<compile_context>
chip_gen: v6e
topology: v6e:2x2x1
jax: 0.10.0
libtpu: 0.0.40
codegen_flags: <defaults>
</compile_context>

<pallas_src>
import math

import jax
import jax.numpy as jnp
from jax.experimental import pallas as pl
from jax.experimental.pallas import tpu as pltpu


# ----------------------------------------------------------------------------
# helpers
# ----------------------------------------------------------------------------
def _round_up(x, m):
    return ((x + m - 1) // m) * m


# ----------------------------------------------------------------------------
# Pallas kernel 1: conv matmul (whole-K tile) + bias + LeakyReLU(0.2)
# ----------------------------------------------------------------------------
def _conv_mm_kernel(a_ref, w_ref, b_ref, o_ref):
    r = jnp.dot(a_ref[...], w_ref[...], preferred_element_type=jnp.float32)
    r = r + b_ref[...]                       # bias broadcast over rows (f32)
    r = jnp.maximum(r, 0.2 * r)              # LeakyReLU(0.2), single VPU op
    o_ref[...] = r.astype(o_ref.dtype)


# ----------------------------------------------------------------------------
# Pallas kernel 2: fused dense head with int8 W1 (w8a16)
#   acc += x_bf16 @ dequant(W1_q) over K steps
#   epilogue: h = leaky_relu(acc * col_scale + b1); out = sigmoid(h @ W2 + b2)
# ----------------------------------------------------------------------------
def _head_kernel(a_ref, w1q_ref, s1_ref, b1_ref, w2_ref, b2_ref, o_ref, acc_ref):
    k = pl.program_id(0)

    @pl.when(k == 0)
    def _():
        acc_ref[...] = jnp.zeros_like(acc_ref)

    w = w1q_ref[...].astype(jnp.bfloat16)    # int8 -> bf16 dequant (scale applied later)
    acc_ref[...] += jnp.dot(a_ref[...], w, preferred_element_type=jnp.float32)

    @pl.when(k == pl.num_programs(0) - 1)
    def _():
        h = acc_ref[...] * s1_ref[...] + b1_ref[...]   # per-column scale + bias
        h = jnp.maximum(h, 0.2 * h)                    # LeakyReLU(0.2)
        r = jnp.dot(h.astype(w2_ref.dtype), w2_ref[...],
                    preferred_element_type=jnp.float32)
        r = r + b2_ref[...]
        o_ref[...] = jax.nn.sigmoid(r)


# ----------------------------------------------------------------------------
# Conv3d (im2col glue + Pallas matmul hot path).  Output stays channel-padded
# to the weight's lane width (128) -- no lane slice, no runtime channel cast.
# ----------------------------------------------------------------------------
def conv3d_leaky(x, wm, bias, *, stride, ks, tm=None):
    """x: (B, D, H, W, Cin) bf16 (NDHWC).  wm: prepared (Kp, Np) bf16 weight matrix
    whose K ordering is (kd, kh, kw, cin_padded) with cin_padded == Cin.
    Returns LeakyReLU(0.2)(conv3d(x)) as (B, Do, Ho, Wo, Np), padding = ks//2."""
    B, D, H, W, Cin = x.shape
    pad = ks // 2
    xp = jnp.pad(x, ((0, 0), (pad, pad), (pad, pad), (pad, pad), (0, 0)))
    Do = (D + 2 * pad - ks) // stride + 1
    Ho = (H + 2 * pad - ks) // stride + 1
    Wo = (W + 2 * pad - ks) // stride + 1

    # im2col: K ordering is (kd, kh, kw, cin) -- matches weight prep.
    patches = []
    for kd in range(ks):
        for kh in range(ks):
            for kw in range(ks):
                patches.append(
                    xp[:,
                       kd:kd + (Do - 1) * stride + 1:stride,
                       kh:kh + (Ho - 1) * stride + 1:stride,
                       kw:kw + (Wo - 1) * stride + 1:stride,
                       :])
    col = jnp.concatenate(patches, axis=-1).reshape(B * Do * Ho * Wo, ks ** 3 * Cin)

    M, K = col.shape
    Kp, Np = wm.shape
    if Kp > K:                                 # zero K-padding contributes nothing
        col = jnp.pad(col, ((0, 0), (0, Kp - K)))

    if tm is not None and M % tm == 0:         # tiled M (grid > 1 feeds both v7x TCs)
        tm_eff, gm = tm, M // tm
    else:                                      # single full-M block (no pad / no slice)
        tm_eff, gm = M, 1

    out = pl.pallas_call(
        _conv_mm_kernel,
        out_shape=jax.ShapeDtypeStruct((M, Np), jnp.bfloat16),
        grid_spec=pltpu.PrefetchScalarGridSpec(
            num_scalar_prefetch=0,
            grid=(gm,),
            in_specs=[
                pl.BlockSpec((tm_eff, Kp), lambda i: (i, 0)),   # A tile, whole K
                pl.BlockSpec((Kp, Np), lambda i: (0, 0)),       # full weight, resident
                pl.BlockSpec((1, Np), lambda i: (0, 0)),        # bias, resident
            ],
            out_specs=pl.BlockSpec((tm_eff, Np), lambda i: (i, 0)),
        ),
        compiler_params=pltpu.CompilerParams(dimension_semantics=("parallel",)),
    )(col, wm, bias)

    return out.reshape(B, Do, Ho, Wo, Np)


# ----------------------------------------------------------------------------
# Fused dense head (Linear -> LeakyReLU -> Linear -> Sigmoid), int8 W1 stream.
# ----------------------------------------------------------------------------
def dense_head(flat, w1q, s1, b1, w2p, b2p):
    M, K = flat.shape
    Kw, N = w1q.shape
    assert K == Kw
    tk = 3200 if K % 3200 == 0 else 128        # 5 K-steps for K=16000, 128-lane aligned
    assert K % tk == 0 and tk % 128 == 0

    Mp = 8                                      # minimal sublane padding
    a = jnp.pad(flat, ((0, Mp - M), (0, 0))).astype(jnp.bfloat16)

    out = pl.pallas_call(
        _head_kernel,
        out_shape=jax.ShapeDtypeStruct((Mp, 128), jnp.float32),
        grid_spec=pltpu.PrefetchScalarGridSpec(
            num_scalar_prefetch=0,
            grid=(K // tk,),
            in_specs=[
                pl.BlockSpec((Mp, tk), lambda k: (0, k)),    # activation K-slices
                pl.BlockSpec((tk, N), lambda k: (k, 0)),     # int8 W1 K-slices (streamed)
                pl.BlockSpec((1, N), lambda k: (0, 0)),      # per-column scale (resident)
                pl.BlockSpec((1, N), lambda k: (0, 0)),      # b1 (resident)
                pl.BlockSpec((N, 128), lambda k: (0, 0)),    # W2 padded (resident)
                pl.BlockSpec((1, 128), lambda k: (0, 0)),    # b2 padded (resident)
            ],
            out_specs=pl.BlockSpec((Mp, 128), lambda k: (0, 0)),
            scratch_shapes=[pltpu.VMEM((Mp, N), jnp.float32)],
        ),
        compiler_params=pltpu.CompilerParams(dimension_semantics=("arbitrary",)),
    )(a, w1q, s1, b1, w2p, b2p)
    return out[:M, :1]


# ----------------------------------------------------------------------------
# Parameter init (deterministic, shapes from the PyTorch module __init__)
# ----------------------------------------------------------------------------
def init_params(key, kernel_size=3, channel_nums=(64, 64, 128), dense_size=512):
    ks = kernel_size
    keys = jax.random.split(key, 10)
    params = {}

    def conv_init(k, cout, cin):
        fan_in = cin * ks ** 3
        scale = 1.0 / math.sqrt(fan_in)
        kw, kb = jax.random.split(k)
        w = jax.random.uniform(kw, (cout, cin, ks, ks, ks), jnp.float32, -scale, scale)
        b = jax.random.uniform(kb, (cout,), jnp.float32, -scale, scale)
        return w, b

    params["conv0_w"], params["conv0_b"] = conv_init(keys[0], channel_nums[0], 4)
    params["conv1_w"], params["conv1_b"] = conv_init(keys[1], channel_nums[1], channel_nums[0])
    params["conv2_w"], params["conv2_b"] = conv_init(keys[2], channel_nums[2], channel_nums[1])

    flat_size = channel_nums[-1] * 5 ** 3

    def xavier(k, fan_in, fan_out):
        bound = math.sqrt(6.0 / (fan_in + fan_out))
        return jax.random.uniform(k, (fan_in, fan_out), jnp.float32, -bound, bound)

    # Stored (in, out).  NOTE: PyTorch nn.Linear stores (out, in) -- transpose if
    # importing a real checkpoint.
    params["lin1_w"] = xavier(keys[3], flat_size, dense_size)
    params["lin1_b"] = jnp.zeros((dense_size,), jnp.float32)
    params["lin2_w"] = xavier(keys[4], dense_size, 1)
    params["lin2_b"] = jnp.zeros((1,), jnp.float32)
    return params


# ----------------------------------------------------------------------------
# One-time weight preparation: matmul layout, channel padding, flatten-order
# permutation, int8 quantization of lin1, bf16 casts.
# ----------------------------------------------------------------------------
def prepare_params(params, kernel_size=3, channel_nums=(64, 64, 128)):
    ks = kernel_size

    def prep_conv(w, b, cin_pad):
        cout, cin = w.shape[0], w.shape[1]
        wt = jnp.transpose(w, (2, 3, 4, 1, 0))            # (kd, kh, kw, cin, cout)
        if cin_pad > cin:                                  # absorb channel-padded input
            wt = jnp.pad(wt, ((0, 0), (0, 0), (0, 0), (0, cin_pad - cin), (0, 0)))
        K = ks ** 3 * cin_pad
        Kp = _round_up(K, 128)
        Np = _round_up(cout, 128)
        wm = wt.reshape(K, cout)
        wm = jnp.pad(wm, ((0, Kp - K), (0, Np - cout))).astype(jnp.bfloat16)
        bp = jnp.pad(b.reshape(1, -1), ((0, 0), (0, Np - cout))).astype(jnp.float32)
        return wm, bp

    p = {}
    p["conv0_w"], p["conv0_b"] = prep_conv(params["conv0_w"], params["conv0_b"], cin_pad=4)
    p["conv1_w"], p["conv1_b"] = prep_conv(params["conv1_w"], params["conv1_b"], cin_pad=128)
    p["conv2_w"], p["conv2_b"] = prep_conv(params["conv2_w"], params["conv2_b"], cin_pad=128)

    # lin1: permute rows from PyTorch NCDHW-flatten order (c, d, h, w) to the natural
    # NDHWC-flatten order (d, h, w, c) so the head takes x.reshape(B, -1) directly.
    C = channel_nums[-1]          # 128 (== lane width, so no extra channel padding)
    S = 5
    w1 = params["lin1_w"]                                             # (16000, 512)
    w1 = w1.reshape(C, S, S, S, -1).transpose(1, 2, 3, 0, 4).reshape(w1.shape)

    # int8 quantization with per-output-column f32 scale (dequant folded into epilogue).
    amax = jnp.max(jnp.abs(w1), axis=0, keepdims=True)
    scale = jnp.maximum(amax, 1e-8) / 127.0
    p["lin1_wq"] = jnp.clip(jnp.round(w1 / scale), -127, 127).astype(jnp.int8)
    p["lin1_s"] = scale.astype(jnp.float32)                           # (1, 512)
    p["lin1_b"] = params["lin1_b"].reshape(1, -1).astype(jnp.float32) # (1, 512)

    w2 = params["lin2_w"]                                             # (512, 1)
    p["lin2_w"] = jnp.pad(w2, ((0, 0), (0, 128 - w2.shape[1]))).astype(jnp.bfloat16)
    b2 = params["lin2_b"].reshape(1, -1)                              # (1, 1)
    p["lin2_b"] = jnp.pad(b2, ((0, 0), (0, 128 - b2.shape[1]))).astype(jnp.float32)
    return p


# ----------------------------------------------------------------------------
# Forward pass (non-conditional)
# ----------------------------------------------------------------------------
def discriminator_forward(prepped, x_ncdhw, *, kernel_size=3):
    # x_ncdhw: (B, 4, D, H, W) -> internal NDHWC, bf16 operands on the MXU.
    x = jnp.transpose(x_ncdhw, (0, 2, 3, 4, 1)).astype(jnp.bfloat16)

    # Channels stay padded to 128 lanes through all three convs (no lane slices).
    x = conv3d_leaky(x, prepped["conv0_w"], prepped["conv0_b"], stride=1, ks=kernel_size,
                     tm=1000)                         # grid=2 "parallel" (v7x: both TCs)
    x = conv3d_leaky(x, prepped["conv1_w"], prepped["conv1_b"], stride=2, ks=kernel_size,
                     tm=None)                         # single full-M block (M=250)
    x = conv3d_leaky(x, prepped["conv2_w"], prepped["conv2_b"], stride=1, ks=kernel_size,
                     tm=None)

    # Dropout(0.5) -> identity at inference; flatten in NDHWC order (lin1 rows were
    # permuted in prepare_params so this matches the PyTorch NCDHW flatten semantics).
    B = x.shape[0]
    flat = x.reshape(B, -1)                           # (B, 16000), bf16

    return dense_head(flat, prepped["lin1_wq"], prepped["lin1_s"], prepped["lin1_b"],
                      prepped["lin2_w"], prepped["lin2_b"])           # (B, 1) f32


if __name__ == "__main__":
    key = jax.random.PRNGKey(0)
    pkey, xkey = jax.random.split(key)

    params = init_params(pkey)
    prepped = prepare_params(params)

    # Input spatial size 10 -> after the stride-2 conv -> 5, matching flat_size = 128*5^3
    x = jax.random.normal(xkey, (2, 4, 10, 10, 10), dtype=jnp.float32)

    fwd = jax.jit(discriminator_forward)
    out = fwd(prepped, x)
    out = jax.block_until_ready(out)

    assert out.shape == (2, 1)
    assert bool(jnp.all(jnp.isfinite(out)))
    assert bool(jnp.all((out >= 0.0) & (out <= 1.0)))
    print("KERNEL_OK")
</pallas_src>

<mosaic_0001>
module attributes {stable_mosaic.version = 11 : i64} {
  func.func @_conv_mm_kernel(%arg0: i32, %arg1: memref<1000x128xbf16, #tpu.memory_space<vmem>>, %arg2: memref<128x128xbf16, #tpu.memory_space<vmem>>, %arg3: memref<1x128xf32, #tpu.memory_space<vmem>>, %arg4: memref<1000x128xbf16, #tpu.memory_space<vmem>>) attributes {dimension_semantics = [#tpu.dimension_semantics<parallel>], iteration_bounds = array<i64: 2>, scalar_prefetch = 0 : i64, scratch_operands = 0 : i64, tpu.core_type = #tpu.core_type<tc>, window_params = [{transform_indices = @transform_0, window_bounds = array<i64: 1000, 128>}, {pipeline_mode = #tpu.pipeline_mode<synchronous>, transform_indices = @transform_1, window_bounds = array<i64: 128, 128>}, {pipeline_mode = #tpu.pipeline_mode<synchronous>, transform_indices = @transform_2, window_bounds = array<i64: 1, 128>}, {transform_indices = @transform_3, window_bounds = array<i64: 1000, 128>}]} {
    %c0 = arith.constant 0 : index
    %c0_0 = arith.constant 0 : index
    %0 = vector.load %arg1[%c0, %c0_0] : memref<1000x128xbf16, #tpu.memory_space<vmem>>, vector<1000x128xbf16>
    %c0_1 = arith.constant 0 : index
    %c0_2 = arith.constant 0 : index
    %1 = vector.load %arg2[%c0_1, %c0_2] : memref<128x128xbf16, #tpu.memory_space<vmem>>, vector<128x128xbf16>
    %cst = arith.constant dense<0.000000e+00> : vector<1000x128xf32>
    %2 = tpu.matmul %0, %1, %cst {dimension_numbers = #tpu.dot_dimension_numbers<[1], [0], [0], [1], [0, 0, 1, 1], [], []>} : vector<1000x128xbf16>, vector<128x128xbf16>, vector<1000x128xf32> -> vector<1000x128xf32>
    %c0_3 = arith.constant 0 : index
    %c0_4 = arith.constant 0 : index
    %3 = vector.load %arg3[%c0_3, %c0_4] : memref<1x128xf32, #tpu.memory_space<vmem>>, vector<1x128xf32>
    %4 = vector.broadcast %3 : vector<1x128xf32> to vector<1000x128xf32>
    %5 = arith.addf %2, %4 : vector<1000x128xf32>
    %cst_5 = arith.constant 2.000000e-01 : f32
    %6 = vector.broadcast %cst_5 : f32 to vector<1000x128xf32>
    %7 = arith.mulf %6, %5 : vector<1000x128xf32>
    %8 = arith.maximumf %5, %7 : vector<1000x128xf32>
    %9 = arith.truncf %8 : vector<1000x128xf32> to vector<1000x128xbf16>
    %c0_6 = arith.constant 0 : index
    %c0_7 = arith.constant 0 : index
    %10 = vector.load %arg4[%c0_6, %c0_7] : memref<1000x128xbf16, #tpu.memory_space<vmem>>, vector<1000x128xbf16>
    tpu.vector_store %arg4[%c0_6, %c0_7], %9 {strides = array<i32>} : memref<1000x128xbf16, #tpu.memory_space<vmem>>, vector<1000x128xbf16>,
    return
  }
  func.func @transform_0(%arg0: i32) -> (i32, i32) {
    %c0_i32 = arith.constant 0 : i32
    %c0_i32_0 = arith.constant 0 : i32
    return %arg0, %c0_i32 : i32, i32
  }
  func.func @transform_1(%arg0: i32) -> (i32, i32) {
    %c0_i32 = arith.constant 0 : i32
    %c0_i32_0 = arith.constant 0 : i32
    %c0_i32_1 = arith.constant 0 : i32
    return %c0_i32, %c0_i32_0 : i32, i32
  }
  func.func @transform_2(%arg0: i32) -> (i32, i32) {
    %c0_i32 = arith.constant 0 : i32
    %c0_i32_0 = arith.constant 0 : i32
    %c0_i32_1 = arith.constant 0 : i32
    return %c0_i32, %c0_i32_0 : i32, i32
  }
  func.func @transform_3(%arg0: i32) -> (i32, i32) {
    %c0_i32 = arith.constant 0 : i32
    %c0_i32_0 = arith.constant 0 : i32
    return %arg0, %c0_i32 : i32, i32
  }
}

module attributes {stable_mosaic.version = 11 : i64} {
  func.func @_conv_mm_kernel(%arg0: i32, %arg1: memref<250x3456xbf16, #tpu.memory_space<vmem>>, %arg2: memref<3456x128xbf16, #tpu.memory_space<vmem>>, %arg3: memref<1x128xf32, #tpu.memory_space<vmem>>, %arg4: memref<250x128xbf16, #tpu.memory_space<vmem>>) attributes {dimension_semantics = [#tpu.dimension_semantics<parallel>], iteration_bounds = array<i64: 1>, scalar_prefetch = 0 : i64, scratch_operands = 0 : i64, tpu.core_type = #tpu.core_type<tc>, window_params = [{transform_indices = @transform_0, window_bounds = array<i64: 250, 3456>}, {pipeline_mode = #tpu.pipeline_mode<synchronous>, transform_indices = @transform_1, window_bounds = array<i64: 3456, 128>}, {pipeline_mode = #tpu.pipeline_mode<synchronous>, transform_indices = @transform_2, window_bounds = array<i64: 1, 128>}, {transform_indices = @transform_3, window_bounds = array<i64: 250, 128>}]} {
    %c0 = arith.constant 0 : index
    %c0_0 = arith.constant 0 : index
    %0 = vector.load %arg1[%c0, %c0_0] : memref<250x3456xbf16, #tpu.memory_space<vmem>>, vector<250x3456xbf16>
    %c0_1 = arith.constant 0 : index
    %c0_2 = arith.constant 0 : index
    %1 = vector.load %arg2[%c0_1, %c0_2] : memref<3456x128xbf16, #tpu.memory_space<vmem>>, vector<3456x128xbf16>
    %cst = arith.constant dense<0.000000e+00> : vector<250x128xf32>
    %2 = tpu.matmul %0, %1, %cst {dimension_numbers = #tpu.dot_dimension_numbers<[1], [0], [0], [1], [0, 0, 1, 1], [], []>} : vector<250x3456xbf16>, vector<3456x128xbf16>, vector<250x128xf32> -> vector<250x128xf32>
    %c0_3 = arith.constant 0 : index
    %c0_4 = arith.constant 0 : index
    %3 = vector.load %arg3[%c0_3, %c0_4] : memref<1x128xf32, #tpu.memory_space<vmem>>, vector<1x128xf32>
    %4 = vector.broadcast %3 : vector<1x128xf32> to vector<250x128xf32>
    %5 = arith.addf %2, %4 : vector<250x128xf32>
    %cst_5 = arith.constant 2.000000e-01 : f32
    %6 = vector.broadcast %cst_5 : f32 to vector<250x128xf32>
    %7 = arith.mulf %6, %5 : vector<250x128xf32>
    %8 = arith.maximumf %5, %7 : vector<250x128xf32>
    %9 = arith.truncf %8 : vector<250x128xf32> to vector<250x128xbf16>
    %c0_6 = arith.constant 0 : index
    %c0_7 = arith.constant 0 : index
    %10 = vector.load %arg4[%c0_6, %c0_7] : memref<250x128xbf16, #tpu.memory_space<vmem>>, vector<250x128xbf16>
    tpu.vector_store %arg4[%c0_6, %c0_7], %9 {strides = array<i32>} : memref<250x128xbf16, #tpu.memory_space<vmem>>, vector<250x128xbf16>,
    return
  }
  func.func @transform_0(%arg0: i32) -> (i32, i32) {
    %c0_i32 = arith.constant 0 : i32
    %c0_i32_0 = arith.constant 0 : i32
    return %arg0, %c0_i32 : i32, i32
  }
  func.func @transform_1(%arg0: i32) -> (i32, i32) {
    %c0_i32 = arith.constant 0 : i32
    %c0_i32_0 = arith.constant 0 : i32
    %c0_i32_1 = arith.constant 0 : i32
    return %c0_i32, %c0_i32_0 : i32, i32
  }
  func.func @transform_2(%arg0: i32) -> (i32, i32) {
    %c0_i32 = arith.constant 0 : i32
    %c0_i32_0 = arith.constant 0 : i32
    %c0_i32_1 = arith.constant 0 : i32
    return %c0_i32, %c0_i32_0 : i32, i32
  }
  func.func @transform_3(%arg0: i32) -> (i32, i32) {
    %c0_i32 = arith.constant 0 : i32
    %c0_i32_0 = arith.constant 0 : i32
    return %arg0, %c0_i32 : i32, i32
  }
}

module attributes {stable_mosaic.version = 11 : i64} {
  func.func @_head_kernel(%arg0: i32, %arg1: memref<8x3200xbf16, #tpu.memory_space<vmem>>, %arg2: memref<3200x512xi8, #tpu.memory_space<vmem>>, %arg3: memref<1x512xf32, #tpu.memory_space<vmem>>, %arg4: memref<1x512xf32, #tpu.memory_space<vmem>>, %arg5: memref<512x128xbf16, #tpu.memory_space<vmem>>, %arg6: memref<1x128xf32, #tpu.memory_space<vmem>>, %arg7: memref<8x128xf32, #tpu.memory_space<vmem>>, %arg8: memref<8x512xf32, #tpu.memory_space<vmem>>) attributes {dimension_semantics = [#tpu.dimension_semantics<arbitrary>], iteration_bounds = array<i64: 5>, scalar_prefetch = 0 : i64, scratch_operands = 1 : i64, tpu.core_type = #tpu.core_type<tc>, window_params = [{transform_indices = @transform_0, window_bounds = array<i64: 8, 3200>}, {transform_indices = @transform_1, window_bounds = array<i64: 3200, 512>}, {pipeline_mode = #tpu.pipeline_mode<synchronous>, transform_indices = @transform_2, window_bounds = array<i64: 1, 512>}, {pipeline_mode = #tpu.pipeline_mode<synchronous>, transform_indices = @transform_3, window_bounds = array<i64: 1, 512>}, {pipeline_mode = #tpu.pipeline_mode<synchronous>, transform_indices = @transform_4, window_bounds = array<i64: 512, 128>}, {pipeline_mode = #tpu.pipeline_mode<synchronous>, transform_indices = @transform_5, window_bounds = array<i64: 1, 128>}, {pipeline_mode = #tpu.pipeline_mode<synchronous>, transform_indices = @transform_6, window_bounds = array<i64: 8, 128>}]} {
    %c0_i32 = arith.constant 0 : i32
    %0 = arith.cmpi eq, %arg0, %c0_i32 : i32
    %1 = arith.extui %0 : i1 to i32
    %c0_i32_0 = arith.constant 0 : i32
    %2 = arith.cmpi ne, %1, %c0_i32_0 : i32
    scf.if %2 {
      %cst_9 = arith.constant 0.000000e+00 : f32
      %13 = vector.broadcast %cst_9 : f32 to vector<8x512xf32>
      %c0_10 = arith.constant 0 : index
      %c0_11 = arith.constant 0 : index
      %14 = vector.load %arg8[%c0_10, %c0_11] : memref<8x512xf32, #tpu.memory_space<vmem>>, vector<8x512xf32>
      tpu.vector_store %arg8[%c0_10, %c0_11], %13 {strides = array<i32>} : memref<8x512xf32, #tpu.memory_space<vmem>>, vector<8x512xf32>,
    } else {
    }
    %c0 = arith.constant 0 : index
    %c0_1 = arith.constant 0 : index
    %3 = vector.load %arg2[%c0, %c0_1] : memref<3200x512xi8, #tpu.memory_space<vmem>>, vector<3200x512xi8>
    %4 = arith.sitofp %3 : vector<3200x512xi8> to vector<3200x512xbf16>
    %c0_2 = arith.constant 0 : index
    %c0_3 = arith.constant 0 : index
    %5 = vector.load %arg8[%c0_2, %c0_3] : memref<8x512xf32, #tpu.memory_space<vmem>>, vector<8x512xf32>
    %c0_4 = arith.constant 0 : index
    %c0_5 = arith.constant 0 : index
    %6 = vector.load %arg1[%c0_4, %c0_5] : memref<8x3200xbf16, #tpu.memory_space<vmem>>, vector<8x3200xbf16>
    %cst = arith.constant dense<0.000000e+00> : vector<8x512xf32>
    %7 = tpu.matmul %6, %4, %cst {dimension_numbers = #tpu.dot_dimension_numbers<[1], [0], [0], [1], [0, 0, 1, 1], [], []>} : vector<8x3200xbf16>, vector<3200x512xbf16>, vector<8x512xf32> -> vector<8x512xf32>
    %8 = arith.addf %5, %7 : vector<8x512xf32>
    %c0_6 = arith.constant 0 : index
    %c0_7 = arith.constant 0 : index
    %9 = vector.load %arg8[%c0_6, %c0_7] : memref<8x512xf32, #tpu.memory_space<vmem>>, vector<8x512xf32>
    tpu.vector_store %arg8[%c0_6, %c0_7], %8 {strides = array<i32>} : memref<8x512xf32, #tpu.memory_space<vmem>>, vector<8x512xf32>,
    %c4_i32 = arith.constant 4 : i32
    %10 = arith.cmpi eq, %arg0, %c4_i32 : i32
    %11 = arith.extui %10 : i1 to i32
    %c0_i32_8 = arith.constant 0 : i32
    %12 = arith.cmpi ne, %11, %c0_i32_8 : i32
    scf.if %12 {
      %c0_9 = arith.constant 0 : index
      %c0_10 = arith.constant 0 : index
      %13 = vector.load %arg8[%c0_9, %c0_10] : memref<8x512xf32, #tpu.memory_space<vmem>>, vector<8x512xf32>
      %c0_11 = arith.constant 0 : index
      %c0_12 = arith.constant 0 : index
      %14 = vector.load %arg3[%c0_11, %c0_12] : memref<1x512xf32, #tpu.memory_space<vmem>>, vector<1x512xf32>
      %15 = vector.broadcast %14 : vector<1x512xf32> to vector<8x512xf32>
      %16 = arith.mulf %13, %15 : vector<8x512xf32>
      %c0_13 = arith.constant 0 : index
      %c0_14 = arith.constant 0 : index
      %17 = vector.load %arg4[%c0_13, %c0_14] : memref<1x512xf32, #tpu.memory_space<vmem>>, vector<1x512xf32>
      %18 = vector.broadcast %17 : vector<1x512xf32> to vector<8x512xf32>
      %19 = arith.addf %16, %18 : vector<8x512xf32>
      %cst_15 = arith.constant 2.000000e-01 : f32
      %20 = vector.broadcast %cst_15 : f32 to vector<8x512xf32>
      %21 = arith.mulf %20, %19 : vector<8x512xf32>
      %22 = arith.maximumf %19, %21 : vector<8x512xf32>
      %23 = arith.truncf %22 : vector<8x512xf32> to vector<8x512xbf16>
      %c0_16 = arith.constant 0 : index
      %c0_17 = arith.constant 0 : index
      %24 = vector.load %arg5[%c0_16, %c0_17] : memref<512x128xbf16, #tpu.memory_space<vmem>>, vector<512x128xbf16>
      %cst_18 = arith.constant dense<0.000000e+00> : vector<8x128xf32>
      %25 = tpu.matmul %23, %24, %cst_18 {dimension_numbers = #tpu.dot_dimension_numbers<[1], [0], [0], [1], [0, 0, 1, 1], [], []>} : vector<8x512xbf16>, vector<512x128xbf16>, vector<8x128xf32> -> vector<8x128xf32>
      %c0_19 = arith.constant 0 : index
      %c0_20 = arith.constant 0 : index
      %26 = vector.load %arg6[%c0_19, %c0_20] : memref<1x128xf32, #tpu.memory_space<vmem>>, vector<1x128xf32>
      %27 = vector.broadcast %26 : vector<1x128xf32> to vector<8x128xf32>
      %28 = arith.addf %25, %27 : vector<8x128xf32>
      %29 = arith.negf %28 : vector<8x128xf32>
      %30 = math.exp %29 : vector<8x128xf32>
      %cst_21 = arith.constant 1.000000e+00 : f32
      %31 = vector.broadcast %cst_21 : f32 to vector<8x128xf32>
      %32 = arith.addf %31, %30 : vector<8x128xf32>
      %33 = arith.divf %31, %32 : vector<8x128xf32>
      %c0_22 = arith.constant 0 : index
      %c0_23 = arith.constant 0 : index
      %34 = vector.load %arg7[%c0_22, %c0_23] : memref<8x128xf32, #tpu.memory_space<vmem>>, vector<8x128xf32>
      tpu.vector_store %arg7[%c0_22, %c0_23], %33 {strides = array<i32>} : memref<8x128xf32, #tpu.memory_space<vmem>>, vector<8x128xf32>,
    } else {
    }
    return
  }
  func.func @transform_0(%arg0: i32) -> (i32, i32) {
    %c0_i32 = arith.constant 0 : i32
    %c0_i32_0 = arith.constant 0 : i32
    return %c0_i32, %arg0 : i32, i32
  }
  func.func @transform_1(%arg0: i32) -> (i32, i32) {
    %c0_i32 = arith.constant 0 : i32
    %c0_i32_0 = arith.constant 0 : i32
    return %arg0, %c0_i32 : i32, i32
  }
  func.func @transform_2(%arg0: i32) -> (i32, i32) {
    %c0_i32 = arith.constant 0 : i32
    %c0_i32_0 = arith.constant 0 : i32
    %c0_i32_1 = arith.constant 0 : i32
    return %c0_i32, %c0_i32_0 : i32, i32
  }
  func.func @transform_3(%arg0: i32) -> (i32, i32) {
    %c0_i32 = arith.constant 0 : i32
    %c0_i32_0 = arith.constant 0 : i32
    %c0_i32_1 = arith.constant 0 : i32
    return %c0_i32, %c0_i32_0 : i32, i32
  }
  func.func @transform_4(%arg0: i32) -> (i32, i32) {
    %c0_i32 = arith.constant 0 : i32
    %c0_i32_0 = arith.constant 0 : i32
    %c0_i32_1 = arith.constant 0 : i32
    return %c0_i32, %c0_i32_0 : i32, i32
  }
  func.func @transform_5(%arg0: i32) -> (i32, i32) {
    %c0_i32 = arith.constant 0 : i32
    %c0_i32_0 = arith.constant 0 : i32
    %c0_i32_1 = arith.constant 0 : i32
    return %c0_i32, %c0_i32_0 : i32, i32
  }
  func.func @transform_6(%arg0: i32) -> (i32, i32) {
    %c0_i32 = arith.constant 0 : i32
    %c0_i32_0 = arith.constant 0 : i32
    %c0_i32_1 = arith.constant 0 : i32
    return %c0_i32, %c0_i32_0 : i32, i32
  }
}

</mosaic_0001>

<bundles_post_ra>
// kernel: discriminator_forward.4
= control target key start
LH: loop header
LB: loop body
LE: loop exit
PB: predicated region body
PF: predicated region fallthrough
CT: control target
= control target key end

     0   :  { %s3384_s12 = smov 0   ;;  %s3839_s0 = inlined_call_operand.vmem [shape: bf16[2000,128], index: 0, kind: input, shape index: {}]   ;;  %s3840_s1 = inlined_call_operand.vmem [shape: bf16[128,128], index: 1, kind: input, shape index: {}]   ;;  %s3841_s2 = inlined_call_operand.vmem [shape: f32[1,128], index: 2, kind: input, shape index: {}]   ;;  %s3842_s3 = inlined_call_operand.vmem [shape: bf16[2000,128], index: 3, kind: output, shape index: {}]  }
   0x1 LB: > { %s2215_s13 = sadd.s32 4294967295, %s3360_s12   ;;  %p2219_p0 = scmp.ge.s32.totalorder %s3360_s12, 1  ;;  %s3360_s12 = sphi %s3384_s12, %s13_s12  }
   0x2   : > { %p138_p1 = scmp.lt.s32.totalorder %s3360_s12, 3 }
   0x4   : > { %p139_p2 = pnand %p2219_p0, %p138_p1 }
   0x5   : > { %s162_s18 = smul.u32 (!%p139_p2), 125, %s2215_s13 }
   0x6   : > { %142 = sbr.rel (%p139_p2) target bundleno = 498 (0x1f2), region = 32 }
   0x7   : > { %p163_p3 = scmp.lt.s32.totalorder (!%p139_p2), %s162_s18, 249 }
   0xb   : > { %v3282_v0 = vld [vmem:[%s3840_s1 + $0x38] sm:$0xff]   ;;  %v3362_v1 = vmov 0.0   ;;  %v3283_v2 = vld [vmem:[%s3840_s1 + $0x30] sm:$0xff]   ;;  %vm3363_vm0 = vmmov 0   ;;  %v3284_v3 = vld [vmem:[%s3840_s1 + $0x28] sm:$0xff]   ;;  %s3844_s18 = smov (!%p163_p3, %s162_s18), 249 }
   0xc   : > { %2988 = vmatprep.subr.bf16.mxu0 %v3362_v1  ;;  %3256 = vmatprep.subr.bf16.mxu1 %v3362_v1  ;;  %s2220_s21 = sshll.u32 %s3844_s18, 2  ;;  %v3285_v4 = vld [vmem:[%s3840_s1 + $0x20] sm:$0xff]   ;;  %v3286_v5 = vld [vmem:[%s3840_s1 + $0x18] sm:$0xff]   ;;  %v3287_v6 = vld [vmem:[%s3840_s1 + $0x10] sm:$0xff]  }
   0xd   : > { %2989 = vmatpush3.bf16.msra.mxu0 %v3282_v0  ;;  %3264 = vmatpush3.bf16.msra.mxu1 %v3282_v0  ;;  %s3419_s24 = scalar_lea.vmem %s3839_s0, %s2220_s21  ;;  %v3288_v7 = vld [vmem:[%s3840_s1 + $0x8] sm:$0xff]   ;;  %v3289_v8 = vld [vmem:[%s3840_s1] sm:$0xff]   ;;  %s3616_s13 = scalar_lea.vmem %s3842_s3, %s2220_s21 }
   0xe   : > { %2990 = vmatprep.subr.bf16.mxu0 %v3362_v1  ;;  %3257 = vmatprep.subr.bf16.mxu1 %v3362_v1  ;;  %v3290_v9 = vld [vmem:[%s3419_s24] sm:$0xff]   ;;  %v3292_v11 = vld [vmem:[%s3419_s24 + $0x8] sm:$0xff]   ;;  %v3294_v13 = vld [vmem:[%s3419_s24 + $0x10] sm:$0xff]  }
   0xf   : > { %3004 = vmatprep.mubr.msk.bf16.mxu0 %vm3363_vm0, %v3362_v1  ;;  %3132 = vmatprep.mubr.msk.bf16.mxu1 %vm3363_vm0, %v3362_v1  ;;  %v3291_v10 = vld [vmem:[%s3419_s24 + $0x100] sm:$0xff]   ;;  %v3293_v12 = vld [vmem:[%s3419_s24 + $0x108] sm:$0xff]   ;;  %v3295_v14 = vld [vmem:[%s3419_s24 + $0x110] sm:$0xff]  }
  0x10   : > { %v3296_v15 = vld [vmem:[%s3419_s24 + $0x18] sm:$0xff]   ;;  %v3298_v17 = vld [vmem:[%s3419_s24 + $0x20] sm:$0xff]   ;;  %v3300_v19 = vld [vmem:[%s3419_s24 + $0x28] sm:$0xff]  }
  0x11   : > { %2991 = vmatpush3.bf16.msra.mxu0 %v3283_v2  ;;  %3265 = vmatpush3.bf16.msra.mxu1 %v3283_v2  ;;  %v3297_v16 = vld [vmem:[%s3419_s24 + $0x118] sm:$0xff]   ;;  %v3299_v18 = vld [vmem:[%s3419_s24 + $0x120] sm:$0xff]   ;;  %v3301_v20 = vld [vmem:[%s3419_s24 + $0x128] sm:$0xff]  }
  0x12   : > { %2992 = vmatprep.subr.bf16.mxu0 %v3362_v1  ;;  %3258 = vmatprep.subr.bf16.mxu1 %v3362_v1  ;;  %v3302_v21 = vld [vmem:[%s3419_s24 + $0x30] sm:$0xff]   ;;  %v3304_v23 = vld [vmem:[%s3419_s24 + $0x38] sm:$0xff]   ;;  %v3306_v25 = vld [vmem:[%s3419_s24 + $0x40] sm:$0xff]  }
  0x13   : > { %v3303_v22 = vld [vmem:[%s3419_s24 + $0x130] sm:$0xff]   ;;  %v3305_v24 = vld [vmem:[%s3419_s24 + $0x138] sm:$0xff]   ;;  %v3307_v26 = vld [vmem:[%s3419_s24 + $0x140] sm:$0xff]  }
  0x14   : > { %v3308_v27 = vld [vmem:[%s3419_s24 + $0x48] sm:$0xff]   ;;  %v3310_v29 = vld [vmem:[%s3419_s24 + $0x50] sm:$0xff]   ;;  %v3312_v31 = vld [vmem:[%s3419_s24 + $0x58] sm:$0xff]  }
  0x15   : > { %2993 = vmatpush3.bf16.msra.mxu0 %v3284_v3  ;;  %3266 = vmatpush3.bf16.msra.mxu1 %v3284_v3  ;;  %v3309_v28 = vld [vmem:[%s3419_s24 + $0x148] sm:$0xff]   ;;  %v3311_v30 = vld [vmem:[%s3419_s24 + $0x150] sm:$0xff]   ;;  %v3313_v32 = vld [vmem:[%s3419_s24 + $0x158] sm:$0xff]  }
  0x16   : > { %2994 = vmatprep.subr.bf16.mxu0 %v3362_v1  ;;  %3259 = vmatprep.subr.bf16.mxu1 %v3362_v1  ;;  %v3314_v33 = vld [vmem:[%s3419_s24 + $0x60] sm:$0xff]   ;;  %v3316_v35 = vld [vmem:[%s3419_s24 + $0x68] sm:$0xff]   ;;  %v3318_v37 = vld [vmem:[%s3419_s24 + $0x70] sm:$0xff]  }
  0x17   : > { %v3315_v34 = vld [vmem:[%s3419_s24 + $0x160] sm:$0xff]   ;;  %v3317_v36 = vld [vmem:[%s3419_s24 + $0x168] sm:$0xff]   ;;  %v3319_v38 = vld [vmem:[%s3419_s24 + $0x170] sm:$0xff]  }
  0x18   : > { %v3320_v39 = vld [vmem:[%s3419_s24 + $0x78] sm:$0xff]   ;;  %v3322_v41 = vld [vmem:[%s3419_s24 + $0x80] sm:$0xff]   ;;  %v3324_v43 = vld [vmem:[%s3419_s24 + $0x88] sm:$0xff]  }
  0x19   : > { %2995 = vmatpush3.bf16.msra.mxu0 %v3285_v4  ;;  %3267 = vmatpush3.bf16.msra.mxu1 %v3285_v4  ;;  %v3321_v40 = vld [vmem:[%s3419_s24 + $0x178] sm:$0xff]   ;;  %v3323_v42 = vld [vmem:[%s3419_s24 + $0x180] sm:$0xff]   ;;  %v3325_v44 = vld [vmem:[%s3419_s24 + $0x188] sm:$0xff]  }
  0x1a   : > { %2996 = vmatprep.subr.bf16.mxu0 %v3362_v1  ;;  %3260 = vmatprep.subr.bf16.mxu1 %v3362_v1  ;;  %v3326_v45 = vld [vmem:[%s3419_s24 + $0x90] sm:$0xff]   ;;  %v3328_v47 = vld [vmem:[%s3419_s24 + $0x98] sm:$0xff]   ;;  %v3330_v49 = vld [vmem:[%s3419_s24 + $0xa0] sm:$0xff]  }
  0x1b   : > { %v3327_v46 = vld [vmem:[%s3419_s24 + $0x190] sm:$0xff]   ;;  %v3329_v48 = vld [vmem:[%s3419_s24 + $0x198] sm:$0xff]   ;;  %v3331_v50 = vld [vmem:[%s3419_s24 + $0x1a0] sm:$0xff]  }
  0x1c   : > { %v3332_v51 = vld [vmem:[%s3419_s24 + $0xa8] sm:$0xff]   ;;  %v3334_v53 = vld [vmem:[%s3419_s24 + $0xb0] sm:$0xff]   ;;  %v3336_v55 = vld [vmem:[%s3419_s24 + $0xb8] sm:$0xff]  }
  0x1d   : > { %2997 = vmatpush3.bf16.msra.mxu0 %v3286_v5  ;;  %3268 = vmatpush3.bf16.msra.mxu1 %v3286_v5  ;;  %v3333_v52 = vld [vmem:[%s3419_s24 + $0x1a8] sm:$0xff]   ;;  %v3335_v54 = vld [vmem:[%s3419_s24 + $0x1b0] sm:$0xff]   ;;  %v3337_v56 = vld [vmem:[%s3419_s24 + $0x1b8] sm:$0xff]  }
  0x1e   : > { %2998 = vmatprep.subr.bf16.mxu0 %v3362_v1  ;;  %3261 = vmatprep.subr.bf16.mxu1 %v3362_v1  ;;  %v3338_v57 = vld [vmem:[%s3419_s24 + $0xc0] sm:$0xff]  }
  0x1f   : > { %v3339_v58 = vld [vmem:[%s3419_s24 + $0x1c0] sm:$0xff]  }
  0x20   : > { %v3595_v59 = vld [vmem:[%s3841_s2] ss:$0 sm:$0xff] }
  0x21   : > { %2999 = vmatpush3.bf16.msra.mxu0 %v3287_v6  ;;  %3269 = vmatpush3.bf16.msra.mxu1 %v3287_v6  ;;  %v3340_v6 = vld [vmem:[%s3419_s24 + $0xc8] sm:$0xff]  }
  0x22   : > { %3000 = vmatprep.subr.bf16.mxu0 %v3362_v1  ;;  %3262 = vmatprep.subr.bf16.mxu1 %v3362_v1 }
  0x25   : > { %3001 = vmatpush3.bf16.msra.mxu0 %v3288_v7  ;;  %3270 = vmatpush3.bf16.msra.mxu1 %v3288_v7 }
  0x26   : > { %3002 = vmatprep.subr.bf16.mxu0 %v3362_v1  ;;  %3263 = vmatprep.subr.bf16.mxu1 %v3362_v1 }
  0x29   : > { %3003 = vmatpush3.bf16.msra.mxu0 %v3289_v8  ;;  %3271 = vmatpush3.bf16.msra.mxu1 %v3289_v8  ;;  %v3341_v8 = vld [vmem:[%s3419_s24 + $0x1c8] sm:$0xff]  }
  0x2c   : > { %3005 = vmatmul.mubr.bf16.vlgmr.msra.gmra.mxu0 %v3290_v9  ;;  %3133 = vmatmul.mubr.bf16.vlgmr.msra.gmra.mxu1 %v3291_v10 }
  0x2d   : > { %3008 = vmatprep.mubr.msk.bf16.mxu0 %vm3363_vm0, %v3362_v1  ;;  %3136 = vmatprep.mubr.msk.bf16.mxu1 %vm3363_vm0, %v3362_v1 }
  0x34   : > { %3009 = vmatmul.mubr.bf16.gmra.mxu0 %v3292_v11  ;;  %3137 = vmatmul.mubr.bf16.gmra.mxu1 %v3293_v12 }
  0x35   : > { %3012 = vmatprep.mubr.msk.bf16.mxu0 %vm3363_vm0, %v3362_v1  ;;  %3140 = vmatprep.mubr.msk.bf16.mxu1 %vm3363_vm0, %v3362_v1 }
  0x3c   : > { %3013 = vmatmul.mubr.bf16.gmra.mxu0 %v3294_v13  ;;  %3141 = vmatmul.mubr.bf16.gmra.mxu1 %v3295_v14 }
  0x3d   : > { %3016 = vmatprep.mubr.msk.bf16.mxu0 %vm3363_vm0, %v3362_v1  ;;  %3144 = vmatprep.mubr.msk.bf16.mxu1 %vm3363_vm0, %v3362_v1 }
  0x44   : > { %3017 = vmatmul.mubr.bf16.gmra.mxu0 %v3296_v15  ;;  %3145 = vmatmul.mubr.bf16.gmra.mxu1 %v3297_v16 }
  0x45   : > { %3020 = vmatprep.mubr.msk.bf16.mxu0 %vm3363_vm0, %v3362_v1  ;;  %3148 = vmatprep.mubr.msk.bf16.mxu1 %vm3363_vm0, %v3362_v1 }
  0x4c   : > { %3021 = vmatmul.mubr.bf16.gmra.mxu0 %v3298_v17  ;;  %3149 = vmatmul.mubr.bf16.gmra.mxu1 %v3299_v18 }
  0x4d   : > { %3024 = vmatprep.mubr.msk.bf16.mxu0 %vm3363_vm0, %v3362_v1  ;;  %3152 = vmatprep.mubr.msk.bf16.mxu1 %vm3363_vm0, %v3362_v1 }
  0x54   : > { %3025 = vmatmul.mubr.bf16.gmra.mxu0 %v3300_v19  ;;  %3153 = vmatmul.mubr.bf16.gmra.mxu1 %v3301_v20 }
  0x55   : > { %3028 = vmatprep.mubr.msk.bf16.mxu0 %vm3363_vm0, %v3362_v1  ;;  %3156 = vmatprep.mubr.msk.bf16.mxu1 %vm3363_vm0, %v3362_v1 }
  0x5c   : > { %3029 = vmatmul.mubr.bf16.gmra.mxu0 %v3302_v21  ;;  %3157 = vmatmul.mubr.bf16.gmra.mxu1 %v3303_v22 }
  0x5d   : > { %3032 = vmatprep.mubr.msk.bf16.mxu0 %vm3363_vm0, %v3362_v1  ;;  %3160 = vmatprep.mubr.msk.bf16.mxu1 %vm3363_vm0, %v3362_v1 }
  0x64   : > { %3033 = vmatmul.mubr.bf16.gmra.mxu0 %v3304_v23  ;;  %3161 = vmatmul.mubr.bf16.gmra.mxu1 %v3305_v24 }
  0x65   : > { %3036 = vmatprep.mubr.msk.bf16.mxu0 %vm3363_vm0, %v3362_v1  ;;  %3164 = vmatprep.mubr.msk.bf16.mxu1 %vm3363_vm0, %v3362_v1 }
  0x6c   : > { %3037 = vmatmul.mubr.bf16.gmra.mxu0 %v3306_v25  ;;  %3165 = vmatmul.mubr.bf16.gmra.mxu1 %v3307_v26 }
  0x6d   : > { %3040 = vmatprep.mubr.msk.bf16.mxu0 %vm3363_vm0, %v3362_v1  ;;  %3168 = vmatprep.mubr.msk.bf16.mxu1 %vm3363_vm0, %v3362_v1 }
  0x74   : > { %3041 = vmatmul.mubr.bf16.gmra.mxu0 %v3308_v27  ;;  %3169 = vmatmul.mubr.bf16.gmra.mxu1 %v3309_v28 }
  0x75   : > { %3044 = vmatprep.mubr.msk.bf16.mxu0 %vm3363_vm0, %v3362_v1  ;;  %3172 = vmatprep.mubr.msk.bf16.mxu1 %vm3363_vm0, %v3362_v1 }
  0x7c   : > { %3045 = vmatmul.mubr.bf16.gmra.mxu0 %v3310_v29  ;;  %3173 = vmatmul.mubr.bf16.gmra.mxu1 %v3311_v30  ;;  %v3342_v30 = vld [vmem:[%s3419_s24 + $0xd0] sm:$0xff]  }
  0x7d   : > { %3048 = vmatprep.mubr.msk.bf16.mxu0 %vm3363_vm0, %v3362_v1  ;;  %3176 = vmatprep.mubr.msk.bf16.mxu1 %vm3363_vm0, %v3362_v1 }
  0x84   : > { %3049 = vmatmul.mubr.bf16.gmra.mxu0 %v3312_v31  ;;  %3177 = vmatmul.mubr.bf16.gmra.mxu1 %v3313_v32  ;;  %v3343_v32 = vld [vmem:[%s3419_s24 + $0x1d0] sm:$0xff]  }
  0x85   : > { %3052 = vmatprep.mubr.msk.bf16.mxu0 %vm3363_vm0, %v3362_v1  ;;  %3180 = vmatprep.mubr.msk.bf16.mxu1 %vm3363_vm0, %v3362_v1 }
  0x8c   : > { %3053 = vmatmul.mubr.bf16.gmra.mxu0 %v3314_v33  ;;  %3181 = vmatmul.mubr.bf16.gmra.mxu1 %v3315_v34 }
  0x8d   : > { %3056 = vmatprep.mubr.msk.bf16.mxu0 %vm3363_vm0, %v3362_v1  ;;  %3184 = vmatprep.mubr.msk.bf16.mxu1 %vm3363_vm0, %v3362_v1 }
  0x94   : > { %3057 = vmatmul.mubr.bf16.gmra.mxu0 %v3316_v35  ;;  %3185 = vmatmul.mubr.bf16.gmra.mxu1 %v3317_v36 }
  0x95   : > { %3060 = vmatprep.mubr.msk.bf16.mxu0 %vm3363_vm0, %v3362_v1  ;;  %3188 = vmatprep.mubr.msk.bf16.mxu1 %vm3363_vm0, %v3362_v1 }
  0x9c   : > { %3061 = vmatmul.mubr.bf16.gmra.mxu0 %v3318_v37  ;;  %3189 = vmatmul.mubr.bf16.gmra.mxu1 %v3319_v38 }
  0x9d   : > { %3064 = vmatprep.mubr.msk.bf16.mxu0 %vm3363_vm0, %v3362_v1  ;;  %3192 = vmatprep.mubr.msk.bf16.mxu1 %vm3363_vm0, %v3362_v1 }
  0xa4   : > { %3065 = vmatmul.mubr.bf16.gmra.mxu0 %v3320_v39  ;;  %3193 = vmatmul.mubr.bf16.gmra.mxu1 %v3321_v40 }
  0xa5   : > { %3068 = vmatprep.mubr.msk.bf16.mxu0 %vm3363_vm0, %v3362_v1  ;;  %3196 = vmatprep.mubr.msk.bf16.mxu1 %vm3363_vm0, %v3362_v1 }
  0xac   : > { %3069 = vmatmul.mubr.bf16.gmra.mxu0 %v3322_v41  ;;  %3197 = vmatmul.mubr.bf16.gmra.mxu1 %v3323_v42 }
  0xad   : > { %3072 = vmatprep.mubr.msk.bf16.mxu0 %vm3363_vm0, %v3362_v1  ;;  %3200 = vmatprep.mubr.msk.bf16.mxu1 %vm3363_vm0, %v3362_v1 }
  0xb4   : > { %3073 = vmatmul.mubr.bf16.gmra.mxu0 %v3324_v43  ;;  %3201 = vmatmul.mubr.bf16.gmra.mxu1 %v3325_v44 }
  0xb5   : > { %3076 = vmatprep.mubr.msk.bf16.mxu0 %vm3363_vm0, %v3362_v1  ;;  %3204 = vmatprep.mubr.msk.bf16.mxu1 %vm3363_vm0, %v3362_v1 }
  0xbc   : > { %3077 = vmatmul.mubr.bf16.gmra.mxu0 %v3326_v45  ;;  %3205 = vmatmul.mubr.bf16.gmra.mxu1 %v3327_v46 }
  0xbd   : > { %3080 = vmatprep.mubr.msk.bf16.mxu0 %vm3363_vm0, %v3362_v1  ;;  %3208 = vmatprep.mubr.msk.bf16.mxu1 %vm3363_vm0, %v3362_v1 }
  0xc4   : > { %3081 = vmatmul.mubr.bf16.gmra.mxu0 %v3328_v47  ;;  %3209 = vmatmul.mubr.bf16.gmra.mxu1 %v3329_v48 }
  0xc5   : > { %3084 = vmatprep.mubr.msk.bf16.mxu0 %vm3363_vm0, %v3362_v1  ;;  %3212 = vmatprep.mubr.msk.bf16.mxu1 %vm3363_vm0, %v3362_v1 }
  0xcc   : > { %3085 = vmatmul.mubr.bf16.gmra.mxu0 %v3330_v49  ;;  %3213 = vmatmul.mubr.bf16.gmra.mxu1 %v3331_v50 }
  0xcd   : > { %3088 = vmatprep.mubr.msk.bf16.mxu0 %vm3363_vm0, %v3362_v1  ;;  %3216 = vmatprep.mubr.msk.bf16.mxu1 %vm3363_vm0, %v3362_v1 }
  0xd4   : > { %3089 = vmatmul.mubr.bf16.gmra.mxu0 %v3332_v51  ;;  %3217 = vmatmul.mubr.bf16.gmra.mxu1 %v3333_v52 }
  0xd5   : > { %3092 = vmatprep.mubr.msk.bf16.mxu0 %vm3363_vm0, %v3362_v1  ;;  %3220 = vmatprep.mubr.msk.bf16.mxu1 %vm3363_vm0, %v3362_v1 }
  0xdc   : > { %3093 = vmatmul.mubr.bf16.gmra.mxu0 %v3334_v53  ;;  %3221 = vmatmul.mubr.bf16.gmra.mxu1 %v3335_v54  ;;  %v3344_v54 = vld [vmem:[%s3419_s24 + $0xd8] sm:$0xff]  }
  0xdd   : > { %3096 = vmatprep.mubr.msk.bf16.mxu0 %vm3363_vm0, %v3362_v1  ;;  %3224 = vmatprep.mubr.msk.bf16.mxu1 %vm3363_vm0, %v3362_v1 }
  0xe4   : > { %3097 = vmatmul.mubr.bf16.gmra.mxu0 %v3336_v55  ;;  %3225 = vmatmul.mubr.bf16.gmra.mxu1 %v3337_v56  ;;  %v3345_v56 = vld [vmem:[%s3419_s24 + $0x1d8] sm:$0xff]  }
  0xe5   : > { %3100 = vmatprep.mubr.msk.bf16.mxu0 %vm3363_vm0, %v3362_v1  ;;  %3228 = vmatprep.mubr.msk.bf16.mxu1 %vm3363_vm0, %v3362_v1 }
  0xec   : > { %v781_v60 = vpop.f32.mrf.mxu0  ;;  %3101 = vmatmul.mubr.bf16.gmra.mxu0 %v3338_v57  ;;  %v1037_v61 = vpop.f32.mrf.mxu1  ;;  %3229 = vmatmul.mubr.bf16.gmra.mxu1 %v3339_v58 }
  0xed   : > { %v782_v62 = vadd.f32 %v3595_v59, %v781_v60  ;;  %v1038_v63 = vadd.f32 %v3595_v59, %v1037_v61  ;;  %3104 = vmatprep.mubr.msk.bf16.mxu0 %vm3363_vm0, %v3362_v1  ;;  %3232 = vmatprep.mubr.msk.bf16.mxu1 %vm3363_vm0, %v3362_v1 }
  0xee   : > { %v3006_v0 = vpop.f32.mrf.mxu0  ;;  %v3134_v2 = vpop.f32.mrf.mxu1 }
  0xef   : > { %v1347_v3 = vmul.f32 0.2, %v1038_v63  ;;  %v1283_v4 = vmul.f32 0.2, %v782_v62 }
  0xf0   : > { %v784_v5 = vpop.f32.mrf.mxu0  ;;  %v1040_v7 = vpop.f32.mrf.mxu1 }
  0xf1   : > { %v785_v9 = vadd.f32 %v3595_v59, %v784_v5  ;;  %v1041_v10 = vadd.f32 %v3595_v59, %v1040_v7  ;;  %v1472_v14 = vmax.f32 %v1038_v63, %v1347_v3  ;;  %v1408_v16 = vmax.f32 %v782_v62, %v1283_v4 }
  0xf2   : > { %v3007_v11 = vpop.f32.mrf.mxu0  ;;  %v3135_v12 = vpop.f32.mrf.mxu1 }
  0xf3   : > { %v1284_v13 = vmul.f32 0.2, %v785_v9  ;;  %v1348_v15 = vmul.f32 0.2, %v1041_v10 }
  0xf4   : > { %v789_v17 = vpop.f32.mrf.mxu0  ;;  %3105 = vmatmul.mubr.bf16.gmra.mxu0 %v3340_v6  ;;  %v1045_v18 = vpop.f32.mrf.mxu1  ;;  %3233 = vmatmul.mubr.bf16.gmra.mxu1 %v3341_v8 }
  0xf5   : > { %v1409_v19 = vmax.f32 %v785_v9, %v1284_v13  ;;  %v790_v20 = vadd.f32 %v3595_v59, %v789_v17  ;;  %v1473_v21 = vmax.f32 %v1041_v10, %v1348_v15  ;;  %v1046_v22 = vadd.f32 %v3595_v59, %v1045_v18  ;;  %3108 = vmatprep.mubr.msk.bf16.mxu0 %vm3363_vm0, %v3362_v1  ;;  %v3347_v18 = vld [vmem:[%s3419_s24 + $0x1e0] sm:$0xff]  }
  0xf6   : > { %v3010_v23 = vpop.f32.mrf.mxu0  ;;  %v3138_v24 = vpop.f32.mrf.mxu1  ;;  %3236 = vmatprep.mubr.msk.bf16.mxu1 %vm3363_vm0, %v3362_v1 }
  0xf7   : > { %v2549_v25 = vpack.c.bf16 %v1409_v19, %v1408_v16  ;;  %v2709_v26 = vpack.c.bf16 %v1473_v21, %v1472_v14  ;;  %v1349_v27 = vmul.f32 0.2, %v1046_v22  ;;  %v1285_v28 = vmul.f32 0.2, %v790_v20  ;;  %v3346_v16 = vld [vmem:[%s3419_s24 + $0xe0] sm:$0xff]  }
  0xf8   : > { %v792_v29 = vpop.f32.mrf.mxu0  ;;  %v1048_v31 = vpop.f32.mrf.mxu1 }
  0xf9   : > { %2550 = vst [vmem:[%s3616_s13] sm:$0xff] %v2549_v25   ;;  %2887 = vst [vmem:[%s3616_s13 + $0x100] sm:$0xff] %v2709_v26   ;;  %v793_v33 = vadd.f32 %v3595_v59, %v792_v29  ;;  %v1049_v34 = vadd.f32 %v3595_v59, %v1048_v31  ;;  %v1474_v38 = vmax.f32 %v1046_v22, %v1349_v27 }
  0xfa   : > { %v3011_v35 = vpop.f32.mrf.mxu0  ;;  %v3139_v36 = vpop.f32.mrf.mxu1  ;;  %v1410_v40 = vmax.f32 %v790_v20, %v1285_v28 }
  0xfb   : > { %v1286_v37 = vmul.f32 0.2, %v793_v33  ;;  %v1350_v39 = vmul.f32 0.2, %v1049_v34 }
  0xfc   : > { %v797_v41 = vpop.f32.mrf.mxu0  ;;  %3109 = vmatmul.mubr.bf16.gmra.mxu0 %v3342_v30  ;;  %v1053_v42 = vpop.f32.mrf.mxu1  ;;  %3237 = vmatmul.mubr.bf16.gmra.mxu1 %v3343_v32 }
  0xfd   : > { %v1411_v43 = vmax.f32 %v793_v33, %v1286_v37  ;;  %v798_v44 = vadd.f32 %v3595_v59, %v797_v41  ;;  %v1475_v45 = vmax.f32 %v1049_v34, %v1350_v39  ;;  %v1054_v46 = vadd.f32 %v3595_v59, %v1053_v42  ;;  %3112 = vmatprep.mubr.msk.bf16.mxu0 %vm3363_vm0, %v3362_v1  ;;  %v3349_v42 = vld [vmem:[%s3419_s24 + $0x1e8] sm:$0xff]  }
  0xfe   : > { %v3014_v47 = vpop.f32.mrf.mxu0  ;;  %v3142_v48 = vpop.f32.mrf.mxu1  ;;  %3240 = vmatprep.mubr.msk.bf16.mxu1 %vm3363_vm0, %v3362_v1 }
  0xff   : > { %v2554_v49 = vpack.c.bf16 %v1411_v43, %v1410_v40  ;;  %v2714_v50 = vpack.c.bf16 %v1475_v45, %v1474_v38  ;;  %v1351_v51 = vmul.f32 0.2, %v1054_v46  ;;  %v1287_v52 = vmul.f32 0.2, %v798_v44  ;;  %v3348_v40 = vld [vmem:[%s3419_s24 + $0xe8] sm:$0xff]  }
 0x100   : > { %v800_v53 = vpop.f32.mrf.mxu0  ;;  %v1056_v55 = vpop.f32.mrf.mxu1 }
 0x101   : > { %2856 = vst [vmem:[%s3616_s13 + $0x8] sm:$0xff] %v2554_v49   ;;  %2888 = vst [vmem:[%s3616_s13 + $0x108] sm:$0xff] %v2714_v50   ;;  %v801_v57 = vadd.f32 %v3595_v59, %v800_v53  ;;  %v1057_v58 = vadd.f32 %v3595_v59, %v1056_v55  ;;  %v1476_v63 = vmax.f32 %v1054_v46, %v1351_v51 }
 0x102   : > { %v3015_v60 = vpop.f32.mrf.mxu0  ;;  %v3143_v61 = vpop.f32.mrf.mxu1  ;;  %v1412_v2 = vmax.f32 %v798_v44, %v1287_v52 }
 0x103   : > { %v1288_v62 = vmul.f32 0.2, %v801_v57  ;;  %v1352_v0 = vmul.f32 0.2, %v1057_v58 }
 0x104   : > { %v805_v3 = vpop.f32.mrf.mxu0  ;;  %3113 = vmatmul.mubr.bf16.gmra.mxu0 %v3344_v54  ;;  %v1061_v4 = vpop.f32.mrf.mxu1  ;;  %3241 = vmatmul.mubr.bf16.gmra.mxu1 %v3345_v56 }
 0x105   : > { %v1413_v5 = vmax.f32 %v801_v57, %v1288_v62  ;;  %v806_v6 = vadd.f32 %v3595_v59, %v805_v3  ;;  %v1477_v7 = vmax.f32 %v1057_v58, %v1352_v0  ;;  %v1062_v8 = vadd.f32 %v3595_v59, %v1061_v4  ;;  %3116 = vmatprep.mubr.msk.bf16.mxu0 %vm3363_vm0, %v3362_v1  ;;  %v3351_v4 = vld [vmem:[%s3419_s24 + $0x1f0] ss:$0 sps:$4 sm:$0xff]  }
 0x106   : > { %v3018_v9 = vpop.f32.mrf.mxu0  ;;  %v3146_v10 = vpop.f32.mrf.mxu1  ;;  %3244 = vmatprep.mubr.msk.bf16.mxu1 %vm3363_vm0, %v3362_v1 }
 0x107   : > { %v2559_v11 = vpack.c.bf16 %v1413_v5, %v1412_v2  ;;  %v2719_v12 = vpack.c.bf16 %v1477_v7, %v1476_v63  ;;  %v1353_v13 = vmul.f32 0.2, %v1062_v8  ;;  %v1289_v14 = vmul.f32 0.2, %v806_v6  ;;  %v3350_v2 = vld [vmem:[%s3419_s24 + $0xf0] sm:$0xff]  }
 0x108   : > { %v808_v15 = vpop.f32.mrf.mxu0  ;;  %v1064_v17 = vpop.f32.mrf.mxu1 }
 0x109   : > { %2857 = vst [vmem:[%s3616_s13 + $0x10] sm:$0xff] %v2559_v11   ;;  %2889 = vst [vmem:[%s3616_s13 + $0x110] sm:$0xff] %v2719_v12   ;;  %v809_v19 = vadd.f32 %v3595_v59, %v808_v15  ;;  %v1065_v20 = vadd.f32 %v3595_v59, %v1064_v17  ;;  %v1478_v24 = vmax.f32 %v1062_v8, %v1353_v13 }
 0x10a   : > { %v3019_v21 = vpop.f32.mrf.mxu0  ;;  %v3147_v22 = vpop.f32.mrf.mxu1  ;;  %v1414_v26 = vmax.f32 %v806_v6, %v1289_v14 }
 0x10b   : > { %v1290_v23 = vmul.f32 0.2, %v809_v19  ;;  %v1354_v25 = vmul.f32 0.2, %v1065_v20 }
 0x10c   : > { %v813_v27 = vpop.f32.mrf.mxu0  ;;  %3117 = vmatmul.mubr.bf16.gmra.mxu0 %v3346_v16  ;;  %v1069_v28 = vpop.f32.mrf.mxu1  ;;  %3245 = vmatmul.mubr.bf16.gmra.mxu1 %v3347_v18 }
 0x10d   : > { %v1415_v29 = vmax.f32 %v809_v19, %v1290_v23  ;;  %v814_v30 = vadd.f32 %v3595_v59, %v813_v27  ;;  %v1479_v31 = vmax.f32 %v1065_v20, %v1354_v25  ;;  %v1070_v32 = vadd.f32 %v3595_v59, %v1069_v28  ;;  %3120 = vmatprep.mubr.msk.bf16.mxu0 %vm3363_vm0, %v3362_v1 }
 0x10e   : > { %v3022_v33 = vpop.f32.mrf.mxu0  ;;  %v3150_v34 = vpop.f32.mrf.mxu1  ;;  %3248 = vmatprep.mubr.msk.bf16.mxu1 %vm3363_vm0, %v3362_v1 }
 0x10f   : > { %v2564_v35 = vpack.c.bf16 %v1415_v29, %v1414_v26  ;;  %v2724_v36 = vpack.c.bf16 %v1479_v31, %v1478_v24  ;;  %v1355_v37 = vmul.f32 0.2, %v1070_v32  ;;  %v1291_v38 = vmul.f32 0.2, %v814_v30  ;;  %v3352_v26 = vld [vmem:[%s3419_s24 + $0xf8] sm:$0xff]  }
 0x110   : > { %v816_v39 = vpop.f32.mrf.mxu0  ;;  %v1072_v41 = vpop.f32.mrf.mxu1 }
 0x111   : > { %2858 = vst [vmem:[%s3616_s13 + $0x18] sm:$0xff] %v2564_v35   ;;  %2890 = vst [vmem:[%s3616_s13 + $0x118] sm:$0xff] %v2724_v36   ;;  %v817_v43 = vadd.f32 %v3595_v59, %v816_v39  ;;  %v1073_v44 = vadd.f32 %v3595_v59, %v1072_v41  ;;  %v1480_v48 = vmax.f32 %v1070_v32, %v1355_v37 }
 0x112   : > { %v3023_v45 = vpop.f32.mrf.mxu0  ;;  %v3151_v46 = vpop.f32.mrf.mxu1  ;;  %v1416_v50 = vmax.f32 %v814_v30, %v1291_v38 }
 0x113   : > { %v1292_v47 = vmul.f32 0.2, %v817_v43  ;;  %v1356_v49 = vmul.f32 0.2, %v1073_v44 }
 0x114   : > { %v821_v51 = vpop.f32.mrf.mxu0  ;;  %3121 = vmatmul.mubr.bf16.gmra.mxu0 %v3348_v40  ;;  %v1077_v52 = vpop.f32.mrf.mxu1  ;;  %3249 = vmatmul.mubr.bf16.gmra.mxu1 %v3349_v42 }
 0x115   : > { %v1417_v53 = vmax.f32 %v817_v43, %v1292_v47  ;;  %v822_v54 = vadd.f32 %v3595_v59, %v821_v51  ;;  %v1481_v55 = vmax.f32 %v1073_v44, %v1356_v49  ;;  %v1078_v56 = vadd.f32 %v3595_v59, %v1077_v52  ;;  %3124 = vmatprep.mubr.msk.bf16.mxu0 %vm3363_vm0, %v3362_v1 }
 0x116   : > { %v3026_v57 = vpop.f32.mrf.mxu0  ;;  %v3154_v58 = vpop.f32.mrf.mxu1  ;;  %3252 = vmatprep.mubr.msk.bf16.mxu1 %vm3363_vm0, %v3362_v1 }
 0x117   : > { %v2569_v60 = vpack.c.bf16 %v1417_v53, %v1416_v50  ;;  %v2729_v61 = vpack.c.bf16 %v1481_v55, %v1480_v48  ;;  %v1357_v62 = vmul.f32 0.2, %v1078_v56  ;;  %v1293_v63 = vmul.f32 0.2, %v822_v54 }
 0x118   : > { %v824_v0 = vpop.f32.mrf.mxu0  ;;  %v1080_v3 = vpop.f32.mrf.mxu1 }
 0x119   : > { %2859 = vst [vmem:[%s3616_s13 + $0x20] sm:$0xff] %v2569_v60   ;;  %2891 = vst [vmem:[%s3616_s13 + $0x120] sm:$0xff] %v2729_v61   ;;  %v825_v5 = vadd.f32 %v3595_v59, %v824_v0  ;;  %v1081_v6 = vadd.f32 %v3595_v59, %v1080_v3  ;;  %v1482_v10 = vmax.f32 %v1078_v56, %v1357_v62 }
 0x11a   : > { %v3027_v7 = vpop.f32.mrf.mxu0  ;;  %v3155_v8 = vpop.f32.mrf.mxu1  ;;  %v1418_v12 = vmax.f32 %v822_v54, %v1293_v63 }
 0x11b   : > { %v1294_v9 = vmul.f32 0.2, %v825_v5  ;;  %v1358_v11 = vmul.f32 0.2, %v1081_v6 }
 0x11c   : > { %v829_v13 = vpop.f32.mrf.mxu0  ;;  %3125 = vmatmul.mubr.bf16.gmra.mxu0 %v3350_v2  ;;  %v1085_v14 = vpop.f32.mrf.mxu1  ;;  %3253 = vmatmul.mubr.bf16.gmra.mxu1 %v3351_v4 }
 0x11d   : > { %v1419_v15 = vmax.f32 %v825_v5, %v1294_v9  ;;  %v830_v16 = vadd.f32 %v3595_v59, %v829_v13  ;;  %v1483_v17 = vmax.f32 %v1081_v6, %v1358_v11  ;;  %v1086_v18 = vadd.f32 %v3595_v59, %v1085_v14  ;;  %3128 = vmatprep.mubr.msk.bf16.mxu0 %vm3363_vm0, %v3362_v1 }
 0x11e   : > { %v3030_v19 = vpop.f32.mrf.mxu0  ;;  %v3158_v20 = vpop.f32.mrf.mxu1 }
 0x11f   : > { %v2574_v21 = vpack.c.bf16 %v1419_v15, %v1418_v12  ;;  %v2734_v22 = vpack.c.bf16 %v1483_v17, %v1482_v10  ;;  %v1359_v23 = vmul.f32 0.2, %v1086_v18  ;;  %v1295_v24 = vmul.f32 0.2, %v830_v16 }
 0x120   : > { %v832_v25 = vpop.f32.mrf.mxu0  ;;  %v1088_v27 = vpop.f32.mrf.mxu1 }
 0x121   : > { %2860 = vst [vmem:[%s3616_s13 + $0x28] sm:$0xff] %v2574_v21   ;;  %2892 = vst [vmem:[%s3616_s13 + $0x128] sm:$0xff] %v2734_v22   ;;  %v833_v28 = vadd.f32 %v3595_v59, %v832_v25  ;;  %v1089_v29 = vadd.f32 %v3595_v59, %v1088_v27  ;;  %v1484_v33 = vmax.f32 %v1086_v18, %v1359_v23 }
 0x122   : > { %v3031_v30 = vpop.f32.mrf.mxu0  ;;  %v3159_v31 = vpop.f32.mrf.mxu1  ;;  %v1420_v34 = vmax.f32 %v830_v16, %v1295_v24 }
 0x123   : > { %v1296_v32 = vmul.f32 0.2, %v833_v28  ;;  %v1360_v1 = vmul.f32 0.2, %v1089_v29 }
 0x124   : > { %v837_v35 = vpop.f32.mrf.mxu0  ;;  %3129 = vmatmul.mubr.bf16.gmra.mxu0 %v3352_v26  ;;  %v1093_v36 = vpop.f32.mrf.mxu1 }
 0x125   : > { %v1421_v37 = vmax.f32 %v833_v28, %v1296_v32  ;;  %v838_v38 = vadd.f32 %v3595_v59, %v837_v35  ;;  %v1485_v39 = vmax.f32 %v1089_v29, %v1360_v1  ;;  %v1094_v40 = vadd.f32 %v3595_v59, %v1093_v36 }
 0x126   : > { %v3034_v41 = vpop.f32.mrf.mxu0  ;;  %v3162_v42 = vpop.f32.mrf.mxu1 }
 0x127   : > { %v2579_v43 = vpack.c.bf16 %v1421_v37, %v1420_v34  ;;  %v2739_v44 = vpack.c.bf16 %v1485_v39, %v1484_v33  ;;  %v1361_v45 = vmul.f32 0.2, %v1094_v40  ;;  %v1297_v46 = vmul.f32 0.2, %v838_v38 }
 0x128   : > { %v840_v47 = vpop.f32.mrf.mxu0  ;;  %v1096_v48 = vpop.f32.mrf.mxu1 }
 0x129   : > { %2861 = vst [vmem:[%s3616_s13 + $0x30] sm:$0xff] %v2579_v43   ;;  %2893 = vst [vmem:[%s3616_s13 + $0x130] sm:$0xff] %v2739_v44   ;;  %v841_v49 = vadd.f32 %v3595_v59, %v840_v47  ;;  %v1097_v50 = vadd.f32 %v3595_v59, %v1096_v48  ;;  %v1486_v54 = vmax.f32 %v1094_v40, %v1361_v45 }
 0x12a   : > { %v3035_v51 = vpop.f32.mrf.mxu0  ;;  %v3163_v52 = vpop.f32.mrf.mxu1  ;;  %v1422_v56 = vmax.f32 %v838_v38, %v1297_v46 }
 0x12b   : > { %v1298_v53 = vmul.f32 0.2, %v841_v49  ;;  %v1362_v55 = vmul.f32 0.2, %v1097_v50 }
 0x12c   : > { %v845_v57 = vpop.f32.mrf.mxu0  ;;  %v1101_v58 = vpop.f32.mrf.mxu1 }
 0x12d   : > { %v1423_v60 = vmax.f32 %v841_v49, %v1298_v53  ;;  %v846_v61 = vadd.f32 %v3595_v59, %v845_v57  ;;  %v1487_v62 = vmax.f32 %v1097_v50, %v1362_v55  ;;  %v1102_v63 = vadd.f32 %v3595_v59, %v1101_v58 }
 0x12e   : > { %v3038_v0 = vpop.f32.mrf.mxu0  ;;  %v3166_v2 = vpop.f32.mrf.mxu1 }
 0x12f   : > { %v2584_v3 = vpack.c.bf16 %v1423_v60, %v1422_v56  ;;  %v2744_v4 = vpack.c.bf16 %v1487_v62, %v1486_v54  ;;  %v1363_v5 = vmul.f32 0.2, %v1102_v63  ;;  %v1299_v6 = vmul.f32 0.2, %v846_v61 }
 0x130   : > { %v848_v7 = vpop.f32.mrf.mxu0  ;;  %v1104_v8 = vpop.f32.mrf.mxu1 }
 0x131   : > { %2862 = vst [vmem:[%s3616_s13 + $0x38] sm:$0xff] %v2584_v3   ;;  %2894 = vst [vmem:[%s3616_s13 + $0x138] sm:$0xff] %v2744_v4   ;;  %v849_v9 = vadd.f32 %v3595_v59, %v848_v7  ;;  %v1105_v10 = vadd.f32 %v3595_v59, %v1104_v8  ;;  %v1488_v14 = vmax.f32 %v1102_v63, %v1363_v5 }
 0x132   : > { %v3039_v11 = vpop.f32.mrf.mxu0  ;;  %v3167_v12 = vpop.f32.mrf.mxu1  ;;  %v1424_v16 = vmax.f32 %v846_v61, %v1299_v6 }
 0x133   : > { %v1300_v13 = vmul.f32 0.2, %v849_v9  ;;  %v1364_v15 = vmul.f32 0.2, %v1105_v10 }
 0x134   : > { %v853_v17 = vpop.f32.mrf.mxu0  ;;  %v1109_v18 = vpop.f32.mrf.mxu1 }
 0x135   : > { %v1425_v19 = vmax.f32 %v849_v9, %v1300_v13  ;;  %v854_v20 = vadd.f32 %v3595_v59, %v853_v17  ;;  %v1489_v21 = vmax.f32 %v1105_v10, %v1364_v15  ;;  %v1110_v22 = vadd.f32 %v3595_v59, %v1109_v18 }
 0x136   : > { %v3042_v23 = vpop.f32.mrf.mxu0  ;;  %v3170_v24 = vpop.f32.mrf.mxu1 }
 0x137   : > { %v2589_v25 = vpack.c.bf16 %v1425_v19, %v1424_v16  ;;  %v2749_v26 = vpack.c.bf16 %v1489_v21, %v1488_v14  ;;  %v1365_v27 = vmul.f32 0.2, %v1110_v22  ;;  %v1301_v28 = vmul.f32 0.2, %v854_v20 }
 0x138   : > { %v856_v29 = vpop.f32.mrf.mxu0  ;;  %v1112_v30 = vpop.f32.mrf.mxu1 }
 0x139   : > { %2863 = vst [vmem:[%s3616_s13 + $0x40] sm:$0xff] %v2589_v25   ;;  %2895 = vst [vmem:[%s3616_s13 + $0x140] sm:$0xff] %v2749_v26   ;;  %v857_v31 = vadd.f32 %v3595_v59, %v856_v29  ;;  %v1113_v32 = vadd.f32 %v3595_v59, %v1112_v30  ;;  %v1490_v35 = vmax.f32 %v1110_v22, %v1365_v27 }
 0x13a   : > { %v3043_v33 = vpop.f32.mrf.mxu0  ;;  %v3171_v1 = vpop.f32.mrf.mxu1  ;;  %v1426_v37 = vmax.f32 %v854_v20, %v1301_v28 }
 0x13b   : > { %v1302_v34 = vmul.f32 0.2, %v857_v31  ;;  %v1366_v36 = vmul.f32 0.2, %v1113_v32 }
 0x13c   : > { %v861_v38 = vpop.f32.mrf.mxu0  ;;  %v1117_v39 = vpop.f32.mrf.mxu1 }
 0x13d   : > { %v1427_v40 = vmax.f32 %v857_v31, %v1302_v34  ;;  %v862_v41 = vadd.f32 %v3595_v59, %v861_v38  ;;  %v1491_v42 = vmax.f32 %v1113_v32, %v1366_v36  ;;  %v1118_v43 = vadd.f32 %v3595_v59, %v1117_v39 }
 0x13e   : > { %v3046_v44 = vpop.f32.mrf.mxu0  ;;  %v3174_v45 = vpop.f32.mrf.mxu1 }
 0x13f   : > { %v2594_v46 = vpack.c.bf16 %v1427_v40, %v1426_v37  ;;  %v2754_v47 = vpack.c.bf16 %v1491_v42, %v1490_v35  ;;  %v1367_v48 = vmul.f32 0.2, %v1118_v43  ;;  %v1303_v49 = vmul.f32 0.2, %v862_v41 }
 0x140   : > { %v864_v50 = vpop.f32.mrf.mxu0  ;;  %v1120_v51 = vpop.f32.mrf.mxu1 }
 0x141   : > { %2864 = vst [vmem:[%s3616_s13 + $0x48] sm:$0xff] %v2594_v46   ;;  %2896 = vst [vmem:[%s3616_s13 + $0x148] sm:$0xff] %v2754_v47   ;;  %v865_v52 = vadd.f32 %v3595_v59, %v864_v50  ;;  %v1121_v53 = vadd.f32 %v3595_v59, %v1120_v51  ;;  %v1492_v57 = vmax.f32 %v1118_v43, %v1367_v48 }
 0x142   : > { %v3047_v54 = vpop.f32.mrf.mxu0  ;;  %v3175_v55 = vpop.f32.mrf.mxu1  ;;  %v1428_v60 = vmax.f32 %v862_v41, %v1303_v49 }
 0x143   : > { %v1304_v56 = vmul.f32 0.2, %v865_v52  ;;  %v1368_v58 = vmul.f32 0.2, %v1121_v53 }
 0x144   : > { %v869_v61 = vpop.f32.mrf.mxu0  ;;  %v1125_v62 = vpop.f32.mrf.mxu1 }
 0x145   : > { %v1429_v63 = vmax.f32 %v865_v52, %v1304_v56  ;;  %v870_v0 = vadd.f32 %v3595_v59, %v869_v61  ;;  %v1493_v2 = vmax.f32 %v1121_v53, %v1368_v58  ;;  %v1126_v3 = vadd.f32 %v3595_v59, %v1125_v62 }
 0x146   : > { %v3050_v4 = vpop.f32.mrf.mxu0  ;;  %v3178_v5 = vpop.f32.mrf.mxu1 }
 0x147   : > { %v2599_v6 = vpack.c.bf16 %v1429_v63, %v1428_v60  ;;  %v2759_v7 = vpack.c.bf16 %v1493_v2, %v1492_v57  ;;  %v1369_v8 = vmul.f32 0.2, %v1126_v3  ;;  %v1305_v9 = vmul.f32 0.2, %v870_v0 }
 0x148   : > { %v872_v10 = vpop.f32.mrf.mxu0  ;;  %v1128_v11 = vpop.f32.mrf.mxu1 }
 0x149   : > { %2865 = vst [vmem:[%s3616_s13 + $0x50] sm:$0xff] %v2599_v6   ;;  %2897 = vst [vmem:[%s3616_s13 + $0x150] sm:$0xff] %v2759_v7   ;;  %v873_v12 = vadd.f32 %v3595_v59, %v872_v10  ;;  %v1129_v13 = vadd.f32 %v3595_v59, %v1128_v11  ;;  %v1494_v17 = vmax.f32 %v1126_v3, %v1369_v8 }
 0x14a   : > { %v3051_v14 = vpop.f32.mrf.mxu0  ;;  %v3179_v15 = vpop.f32.mrf.mxu1  ;;  %v1430_v19 = vmax.f32 %v870_v0, %v1305_v9 }
 0x14b   : > { %v1306_v16 = vmul.f32 0.2, %v873_v12  ;;  %v1370_v18 = vmul.f32 0.2, %v1129_v13 }
 0x14c   : > { %v877_v20 = vpop.f32.mrf.mxu0  ;;  %v1133_v21 = vpop.f32.mrf.mxu1 }
 0x14d   : > { %v1431_v22 = vmax.f32 %v873_v12, %v1306_v16  ;;  %v878_v23 = vadd.f32 %v3595_v59, %v877_v20  ;;  %v1495_v24 = vmax.f32 %v1129_v13, %v1370_v18  ;;  %v1134_v25 = vadd.f32 %v3595_v59, %v1133_v21 }
 0x14e   : > { %v3054_v26 = vpop.f32.mrf.mxu0  ;;  %v3182_v27 = vpop.f32.mrf.mxu1 }
 0x14f   : > { %v2604_v28 = vpack.c.bf16 %v1431_v22, %v1430_v19  ;;  %v2764_v29 = vpack.c.bf16 %v1495_v24, %v1494_v17  ;;  %v1371_v30 = vmul.f32 0.2, %v1134_v25  ;;  %v1307_v31 = vmul.f32 0.2, %v878_v23 }
 0x150   : > { %v880_v32 = vpop.f32.mrf.mxu0  ;;  %v1136_v33 = vpop.f32.mrf.mxu1 }
 0x151   : > { %2866 = vst [vmem:[%s3616_s13 + $0x58] sm:$0xff] %v2604_v28   ;;  %2898 = vst [vmem:[%s3616_s13 + $0x158] sm:$0xff] %v2764_v29   ;;  %v881_v1 = vadd.f32 %v3595_v59, %v880_v32  ;;  %v1137_v34 = vadd.f32 %v3595_v59, %v1136_v33  ;;  %v1496_v38 = vmax.f32 %v1134_v25, %v1371_v30 }
 0x152   : > { %v3055_v35 = vpop.f32.mrf.mxu0  ;;  %v3183_v36 = vpop.f32.mrf.mxu1  ;;  %v1432_v40 = vmax.f32 %v878_v23, %v1307_v31 }
 0x153   : > { %v1308_v37 = vmul.f32 0.2, %v881_v1  ;;  %v1372_v39 = vmul.f32 0.2, %v1137_v34 }
 0x154   : > { %v885_v41 = vpop.f32.mrf.mxu0  ;;  %v1141_v42 = vpop.f32.mrf.mxu1 }
 0x155   : > { %v1433_v43 = vmax.f32 %v881_v1, %v1308_v37  ;;  %v886_v44 = vadd.f32 %v3595_v59, %v885_v41  ;;  %v1497_v45 = vmax.f32 %v1137_v34, %v1372_v39  ;;  %v1142_v46 = vadd.f32 %v3595_v59, %v1141_v42 }
 0x156   : > { %v3058_v47 = vpop.f32.mrf.mxu0  ;;  %v3186_v48 = vpop.f32.mrf.mxu1 }
 0x157   : > { %v2609_v49 = vpack.c.bf16 %v1433_v43, %v1432_v40  ;;  %v2769_v50 = vpack.c.bf16 %v1497_v45, %v1496_v38  ;;  %v1373_v51 = vmul.f32 0.2, %v1142_v46  ;;  %v1309_v52 = vmul.f32 0.2, %v886_v44 }
 0x158   : > { %v888_v53 = vpop.f32.mrf.mxu0  ;;  %v1144_v54 = vpop.f32.mrf.mxu1 }
 0x159   : > { %2867 = vst [vmem:[%s3616_s13 + $0x60] sm:$0xff] %v2609_v49   ;;  %2899 = vst [vmem:[%s3616_s13 + $0x160] sm:$0xff] %v2769_v50   ;;  %v889_v55 = vadd.f32 %v3595_v59, %v888_v53  ;;  %v1145_v56 = vadd.f32 %v3595_v59, %v1144_v54  ;;  %v1498_v61 = vmax.f32 %v1142_v46, %v1373_v51 }
 0x15a   : > { %v3059_v57 = vpop.f32.mrf.mxu0  ;;  %v3187_v58 = vpop.f32.mrf.mxu1  ;;  %v1434_v63 = vmax.f32 %v886_v44, %v1309_v52 }
 0x15b   : > { %v1310_v60 = vmul.f32 0.2, %v889_v55  ;;  %v1374_v62 = vmul.f32 0.2, %v1145_v56 }
 0x15c   : > { %v893_v0 = vpop.f32.mrf.mxu0  ;;  %v1149_v2 = vpop.f32.mrf.mxu1 }
 0x15d   : > { %v1435_v3 = vmax.f32 %v889_v55, %v1310_v60  ;;  %v894_v4 = vadd.f32 %v3595_v59, %v893_v0  ;;  %v1499_v5 = vmax.f32 %v1145_v56, %v1374_v62  ;;  %v1150_v6 = vadd.f32 %v3595_v59, %v1149_v2 }
 0x15e   : > { %v3062_v7 = vpop.f32.mrf.mxu0  ;;  %v3190_v8 = vpop.f32.mrf.mxu1 }
 0x15f   : > { %v2614_v9 = vpack.c.bf16 %v1435_v3, %v1434_v63  ;;  %v2774_v10 = vpack.c.bf16 %v1499_v5, %v1498_v61  ;;  %v1375_v11 = vmul.f32 0.2, %v1150_v6  ;;  %v1311_v12 = vmul.f32 0.2, %v894_v4 }
 0x160   : > { %v896_v13 = vpop.f32.mrf.mxu0  ;;  %v1152_v14 = vpop.f32.mrf.mxu1 }
 0x161   : > { %2868 = vst [vmem:[%s3616_s13 + $0x68] sm:$0xff] %v2614_v9   ;;  %2900 = vst [vmem:[%s3616_s13 + $0x168] sm:$0xff] %v2774_v10   ;;  %v897_v15 = vadd.f32 %v3595_v59, %v896_v13  ;;  %v1153_v16 = vadd.f32 %v3595_v59, %v1152_v14  ;;  %v1500_v20 = vmax.f32 %v1150_v6, %v1375_v11 }
 0x162   : > { %v3063_v17 = vpop.f32.mrf.mxu0  ;;  %v3191_v18 = vpop.f32.mrf.mxu1  ;;  %v1436_v22 = vmax.f32 %v894_v4, %v1311_v12 }
 0x163   : > { %v1312_v19 = vmul.f32 0.2, %v897_v15  ;;  %v1376_v21 = vmul.f32 0.2, %v1153_v16 }
 0x164   : > { %v901_v23 = vpop.f32.mrf.mxu0  ;;  %v1157_v24 = vpop.f32.mrf.mxu1 }
 0x165   : > { %v1437_v25 = vmax.f32 %v897_v15, %v1312_v19  ;;  %v902_v26 = vadd.f32 %v3595_v59, %v901_v23  ;;  %v1501_v27 = vmax.f32 %v1153_v16, %v1376_v21  ;;  %v1158_v28 = vadd.f32 %v3595_v59, %v1157_v24 }
 0x166   : > { %v3066_v29 = vpop.f32.mrf.mxu0  ;;  %v3194_v30 = vpop.f32.mrf.mxu1 }
 0x167   : > { %v2619_v31 = vpack.c.bf16 %v1437_v25, %v1436_v22  ;;  %v2779_v32 = vpack.c.bf16 %v1501_v27, %v1500_v20  ;;  %v1377_v33 = vmul.f32 0.2, %v1158_v28  ;;  %v1313_v1 = vmul.f32 0.2, %v902_v26 }
 0x168   : > { %v904_v34 = vpop.f32.mrf.mxu0  ;;  %v1160_v35 = vpop.f32.mrf.mxu1 }
 0x169   : > { %2869 = vst [vmem:[%s3616_s13 + $0x70] sm:$0xff] %v2619_v31   ;;  %2901 = vst [vmem:[%s3616_s13 + $0x170] sm:$0xff] %v2779_v32   ;;  %v905_v36 = vadd.f32 %v3595_v59, %v904_v34  ;;  %v1161_v37 = vadd.f32 %v3595_v59, %v1160_v35  ;;  %v1502_v41 = vmax.f32 %v1158_v28, %v1377_v33 }
 0x16a   : > { %v3067_v38 = vpop.f32.mrf.mxu0  ;;  %v3195_v39 = vpop.f32.mrf.mxu1  ;;  %v1438_v43 = vmax.f32 %v902_v26, %v1313_v1 }
 0x16b   : > { %v1314_v40 = vmul.f32 0.2, %v905_v36  ;;  %v1378_v42 = vmul.f32 0.2, %v1161_v37 }
 0x16c   : > { %v909_v44 = vpop.f32.mrf.mxu0  ;;  %v1165_v45 = vpop.f32.mrf.mxu1 }
 0x16d   : > { %v1439_v46 = vmax.f32 %v905_v36, %v1314_v40  ;;  %v910_v47 = vadd.f32 %v3595_v59, %v909_v44  ;;  %v1503_v48 = vmax.f32 %v1161_v37, %v1378_v42  ;;  %v1166_v49 = vadd.f32 %v3595_v59, %v1165_v45 }
 0x16e   : > { %v3070_v50 = vpop.f32.mrf.mxu0  ;;  %v3198_v51 = vpop.f32.mrf.mxu1 }
 0x16f   : > { %v2624_v52 = vpack.c.bf16 %v1439_v46, %v1438_v43  ;;  %v2784_v53 = vpack.c.bf16 %v1503_v48, %v1502_v41  ;;  %v1379_v54 = vmul.f32 0.2, %v1166_v49  ;;  %v1315_v55 = vmul.f32 0.2, %v910_v47 }
 0x170   : > { %v912_v56 = vpop.f32.mrf.mxu0  ;;  %v1168_v57 = vpop.f32.mrf.mxu1 }
 0x171   : > { %2870 = vst [vmem:[%s3616_s13 + $0x78] sm:$0xff] %v2624_v52   ;;  %2902 = vst [vmem:[%s3616_s13 + $0x178] sm:$0xff] %v2784_v53   ;;  %v913_v58 = vadd.f32 %v3595_v59, %v912_v56  ;;  %v1169_v60 = vadd.f32 %v3595_v59, %v1168_v57  ;;  %v1504_v0 = vmax.f32 %v1166_v49, %v1379_v54 }
 0x172   : > { %v3071_v61 = vpop.f32.mrf.mxu0  ;;  %v3199_v62 = vpop.f32.mrf.mxu1  ;;  %v1440_v3 = vmax.f32 %v910_v47, %v1315_v55 }
 0x173   : > { %v1316_v63 = vmul.f32 0.2, %v913_v58  ;;  %v1380_v2 = vmul.f32 0.2, %v1169_v60 }
 0x174   : > { %v917_v4 = vpop.f32.mrf.mxu0  ;;  %v1173_v5 = vpop.f32.mrf.mxu1 }
 0x175   : > { %v1441_v6 = vmax.f32 %v913_v58, %v1316_v63  ;;  %v918_v7 = vadd.f32 %v3595_v59, %v917_v4  ;;  %v1505_v8 = vmax.f32 %v1169_v60, %v1380_v2  ;;  %v1174_v9 = vadd.f32 %v3595_v59, %v1173_v5 }
 0x176   : > { %v3074_v10 = vpop.f32.mrf.mxu0  ;;  %v3202_v11 = vpop.f32.mrf.mxu1 }
 0x177   : > { %v2629_v12 = vpack.c.bf16 %v1441_v6, %v1440_v3  ;;  %v2789_v13 = vpack.c.bf16 %v1505_v8, %v1504_v0  ;;  %v1381_v14 = vmul.f32 0.2, %v1174_v9  ;;  %v1317_v15 = vmul.f32 0.2, %v918_v7  ;;  %v3764_v10 = vld [vmem:[%s3841_s2] ss:$0 sm:$0xff] }
 0x178   : > { %v920_v16 = vpop.f32.mrf.mxu0  ;;  %v1176_v17 = vpop.f32.mrf.mxu1 }
 0x179   : > { %2871 = vst [vmem:[%s3616_s13 + $0x80] sm:$0xff] %v2629_v12   ;;  %2903 = vst [vmem:[%s3616_s13 + $0x180] sm:$0xff] %v2789_v13   ;;  %v921_v18 = vadd.f32 %v3595_v59, %v920_v16  ;;  %v1177_v19 = vadd.f32 %v3595_v59, %v1176_v17  ;;  %v1506_v23 = vmax.f32 %v1174_v9, %v1381_v14 }
 0x17a   : > { %v3075_v20 = vpop.f32.mrf.mxu0  ;;  %v3203_v21 = vpop.f32.mrf.mxu1  ;;  %v1442_v25 = vmax.f32 %v918_v7, %v1317_v15 }
 0x17b   : > { %v1318_v22 = vmul.f32 0.2, %v921_v18  ;;  %v1382_v24 = vmul.f32 0.2, %v1177_v19 }
 0x17c   : > { %v925_v26 = vpop.f32.mrf.mxu0  ;;  %v1181_v27 = vpop.f32.mrf.mxu1 }
 0x17d   : > { %v1443_v28 = vmax.f32 %v921_v18, %v1318_v22  ;;  %v926_v29 = vadd.f32 %v3595_v59, %v925_v26  ;;  %v1507_v30 = vmax.f32 %v1177_v19, %v1382_v24  ;;  %v1182_v31 = vadd.f32 %v3595_v59, %v1181_v27 }
 0x17e   : > { %v3078_v32 = vpop.f32.mrf.mxu0  ;;  %v3206_v33 = vpop.f32.mrf.mxu1 }
 0x17f   : > { %v2634_v1 = vpack.c.bf16 %v1443_v28, %v1442_v25  ;;  %v2794_v34 = vpack.c.bf16 %v1507_v30, %v1506_v23  ;;  %v1383_v35 = vmul.f32 0.2, %v1182_v31  ;;  %v1319_v36 = vmul.f32 0.2, %v926_v29 }
 0x180   : > { %v928_v37 = vpop.f32.mrf.mxu0  ;;  %v1184_v38 = vpop.f32.mrf.mxu1 }
 0x181   : > { %2872 = vst [vmem:[%s3616_s13 + $0x88] sm:$0xff] %v2634_v1   ;;  %2904 = vst [vmem:[%s3616_s13 + $0x188] sm:$0xff] %v2794_v34   ;;  %v929_v39 = vadd.f32 %v3595_v59, %v928_v37  ;;  %v1185_v40 = vadd.f32 %v3595_v59, %v1184_v38  ;;  %v1508_v44 = vmax.f32 %v1182_v31, %v1383_v35 }
 0x182   : > { %v3079_v41 = vpop.f32.mrf.mxu0  ;;  %v3207_v42 = vpop.f32.mrf.mxu1  ;;  %v1444_v46 = vmax.f32 %v926_v29, %v1319_v36 }
 0x183   : > { %v1320_v43 = vmul.f32 0.2, %v929_v39  ;;  %v1384_v45 = vmul.f32 0.2, %v1185_v40 }
 0x184   : > { %v933_v47 = vpop.f32.mrf.mxu0  ;;  %v1189_v48 = vpop.f32.mrf.mxu1 }
 0x185   : > { %v1445_v49 = vmax.f32 %v929_v39, %v1320_v43  ;;  %v934_v50 = vadd.f32 %v3595_v59, %v933_v47  ;;  %v1509_v51 = vmax.f32 %v1185_v40, %v1384_v45  ;;  %v1190_v52 = vadd.f32 %v3595_v59, %v1189_v48 }
 0x186   : > { %v3082_v53 = vpop.f32.mrf.mxu0  ;;  %v3210_v54 = vpop.f32.mrf.mxu1 }
 0x187   : > { %v2639_v55 = vpack.c.bf16 %v1445_v49, %v1444_v46  ;;  %v2799_v56 = vpack.c.bf16 %v1509_v51, %v1508_v44  ;;  %v1385_v57 = vmul.f32 0.2, %v1190_v52  ;;  %v1321_v58 = vmul.f32 0.2, %v934_v50 }
 0x188   : > { %v936_v60 = vpop.f32.mrf.mxu0  ;;  %v1192_v61 = vpop.f32.mrf.mxu1 }
 0x189   : > { %2873 = vst [vmem:[%s3616_s13 + $0x90] sm:$0xff] %v2639_v55   ;;  %2905 = vst [vmem:[%s3616_s13 + $0x190] sm:$0xff] %v2799_v56   ;;  %v937_v62 = vadd.f32 %v3595_v59, %v936_v60  ;;  %v1193_v63 = vadd.f32 %v3595_v59, %v1192_v61  ;;  %v1510_v4 = vmax.f32 %v1190_v52, %v1385_v57 }
 0x18a   : > { %v3083_v0 = vpop.f32.mrf.mxu0  ;;  %v3211_v2 = vpop.f32.mrf.mxu1  ;;  %v1446_v6 = vmax.f32 %v934_v50, %v1321_v58 }
 0x18b   : > { %v1322_v3 = vmul.f32 0.2, %v937_v62  ;;  %v1386_v5 = vmul.f32 0.2, %v1193_v63 }
 0x18c   : > { %v941_v7 = vpop.f32.mrf.mxu0  ;;  %v1197_v8 = vpop.f32.mrf.mxu1 }
 0x18d   : > { %v1447_v9 = vmax.f32 %v937_v62, %v1322_v3  ;;  %v942_v11 = vadd.f32 %v3764_v10, %v941_v7  ;;  %v1511_v12 = vmax.f32 %v1193_v63, %v1386_v5  ;;  %v1198_v59 = vadd.f32 %v3764_v10, %v1197_v8 }
 0x18e   : > { %v3086_v13 = vpop.f32.mrf.mxu0  ;;  %v3214_v14 = vpop.f32.mrf.mxu1 }
 0x18f   : > { %v2644_v15 = vpack.c.bf16 %v1447_v9, %v1446_v6  ;;  %v2804_v16 = vpack.c.bf16 %v1511_v12, %v1510_v4  ;;  %v1387_v17 = vmul.f32 0.2, %v1198_v59  ;;  %v1323_v18 = vmul.f32 0.2, %v942_v11 }
 0x190   : > { %v944_v19 = vpop.f32.mrf.mxu0  ;;  %v1200_v20 = vpop.f32.mrf.mxu1 }
 0x191   : > { %2874 = vst [vmem:[%s3616_s13 + $0x98] sm:$0xff] %v2644_v15   ;;  %2906 = vst [vmem:[%s3616_s13 + $0x198] sm:$0xff] %v2804_v16   ;;  %v945_v21 = vadd.f32 %v3764_v10, %v944_v19  ;;  %v1201_v22 = vadd.f32 %v3764_v10, %v1200_v20  ;;  %v1512_v26 = vmax.f32 %v1198_v59, %v1387_v17 }
 0x192   : > { %v3087_v23 = vpop.f32.mrf.mxu0  ;;  %v3215_v24 = vpop.f32.mrf.mxu1  ;;  %v1448_v28 = vmax.f32 %v942_v11, %v1323_v18 }
 0x193   : > { %v1324_v25 = vmul.f32 0.2, %v945_v21  ;;  %v1388_v27 = vmul.f32 0.2, %v1201_v22 }
 0x194   : > { %v949_v29 = vpop.f32.mrf.mxu0  ;;  %v1205_v30 = vpop.f32.mrf.mxu1 }
 0x195   : > { %v1449_v31 = vmax.f32 %v945_v21, %v1324_v25  ;;  %v950_v32 = vadd.f32 %v3764_v10, %v949_v29  ;;  %v1513_v33 = vmax.f32 %v1201_v22, %v1388_v27  ;;  %v1206_v1 = vadd.f32 %v3764_v10, %v1205_v30 }
 0x196   : > { %v3090_v34 = vpop.f32.mrf.mxu0  ;;  %v3218_v35 = vpop.f32.mrf.mxu1 }
 0x197   : > { %v2649_v36 = vpack.c.bf16 %v1449_v31, %v1448_v28  ;;  %v2809_v37 = vpack.c.bf16 %v1513_v33, %v1512_v26  ;;  %v1389_v38 = vmul.f32 0.2, %v1206_v1  ;;  %v1325_v39 = vmul.f32 0.2, %v950_v32 }
 0x198   : > { %v952_v40 = vpop.f32.mrf.mxu0  ;;  %v1208_v41 = vpop.f32.mrf.mxu1 }
 0x199   : > { %2875 = vst [vmem:[%s3616_s13 + $0xa0] sm:$0xff] %v2649_v36   ;;  %2907 = vst [vmem:[%s3616_s13 + $0x1a0] sm:$0xff] %v2809_v37   ;;  %v953_v42 = vadd.f32 %v3764_v10, %v952_v40  ;;  %v1209_v43 = vadd.f32 %v3764_v10, %v1208_v41  ;;  %v1514_v47 = vmax.f32 %v1206_v1, %v1389_v38 }
 0x19a   : > { %v3091_v44 = vpop.f32.mrf.mxu0  ;;  %v3219_v45 = vpop.f32.mrf.mxu1  ;;  %v1450_v49 = vmax.f32 %v950_v32, %v1325_v39 }
 0x19b   : > { %v1326_v46 = vmul.f32 0.2, %v953_v42  ;;  %v1390_v48 = vmul.f32 0.2, %v1209_v43 }
 0x19c   : > { %v957_v50 = vpop.f32.mrf.mxu0  ;;  %v1213_v51 = vpop.f32.mrf.mxu1 }
 0x19d   : > { %v1451_v52 = vmax.f32 %v953_v42, %v1326_v46  ;;  %v958_v53 = vadd.f32 %v3764_v10, %v957_v50  ;;  %v1515_v54 = vmax.f32 %v1209_v43, %v1390_v48  ;;  %v1214_v55 = vadd.f32 %v3764_v10, %v1213_v51 }
 0x19e   : > { %v3094_v56 = vpop.f32.mrf.mxu0  ;;  %v3222_v57 = vpop.f32.mrf.mxu1 }
 0x19f   : > { %v2654_v58 = vpack.c.bf16 %v1451_v52, %v1450_v49  ;;  %v2814_v60 = vpack.c.bf16 %v1515_v54, %v1514_v47  ;;  %v1391_v61 = vmul.f32 0.2, %v1214_v55  ;;  %v1327_v62 = vmul.f32 0.2, %v958_v53 }
 0x1a0   : > { %v960_v63 = vpop.f32.mrf.mxu0  ;;  %v1216_v0 = vpop.f32.mrf.mxu1 }
 0x1a1   : > { %2876 = vst [vmem:[%s3616_s13 + $0xa8] sm:$0xff] %v2654_v58   ;;  %2908 = vst [vmem:[%s3616_s13 + $0x1a8] sm:$0xff] %v2814_v60   ;;  %v961_v2 = vadd.f32 %v3764_v10, %v960_v63  ;;  %v1217_v3 = vadd.f32 %v3764_v10, %v1216_v0  ;;  %v1516_v7 = vmax.f32 %v1214_v55, %v1391_v61 }
 0x1a2   : > { %v3095_v4 = vpop.f32.mrf.mxu0  ;;  %v3223_v5 = vpop.f32.mrf.mxu1  ;;  %v1452_v9 = vmax.f32 %v958_v53, %v1327_v62 }
 0x1a3   : > { %v1328_v6 = vmul.f32 0.2, %v961_v2  ;;  %v1392_v8 = vmul.f32 0.2, %v1217_v3 }
 0x1a4   : > { %v965_v11 = vpop.f32.mrf.mxu0  ;;  %v1221_v12 = vpop.f32.mrf.mxu1 }
 0x1a5   : > { %v1453_v59 = vmax.f32 %v961_v2, %v1328_v6  ;;  %v966_v13 = vadd.f32 %v3764_v10, %v965_v11  ;;  %v1517_v14 = vmax.f32 %v1217_v3, %v1392_v8  ;;  %v1222_v15 = vadd.f32 %v3764_v10, %v1221_v12 }
 0x1a6   : > { %v3098_v16 = vpop.f32.mrf.mxu0  ;;  %v3226_v17 = vpop.f32.mrf.mxu1 }
 0x1a7   : > { %v2659_v18 = vpack.c.bf16 %v1453_v59, %v1452_v9  ;;  %v2819_v19 = vpack.c.bf16 %v1517_v14, %v1516_v7  ;;  %v1393_v20 = vmul.f32 0.2, %v1222_v15  ;;  %v1329_v21 = vmul.f32 0.2, %v966_v13 }
 0x1a8   : > { %v968_v22 = vpop.f32.mrf.mxu0  ;;  %v1224_v23 = vpop.f32.mrf.mxu1 }
 0x1a9   : > { %2877 = vst [vmem:[%s3616_s13 + $0xb0] sm:$0xff] %v2659_v18   ;;  %2909 = vst [vmem:[%s3616_s13 + $0x1b0] sm:$0xff] %v2819_v19   ;;  %v969_v24 = vadd.f32 %v3764_v10, %v968_v22  ;;  %v1225_v25 = vadd.f32 %v3764_v10, %v1224_v23  ;;  %v1518_v29 = vmax.f32 %v1222_v15, %v1393_v20 }
 0x1aa   : > { %v3099_v26 = vpop.f32.mrf.mxu0  ;;  %v3227_v27 = vpop.f32.mrf.mxu1  ;;  %v1454_v31 = vmax.f32 %v966_v13, %v1329_v21 }
 0x1ab   : > { %v1330_v28 = vmul.f32 0.2, %v969_v24  ;;  %v1394_v30 = vmul.f32 0.2, %v1225_v25 }
 0x1ac   : > { %v973_v32 = vpop.f32.mrf.mxu0  ;;  %v1229_v33 = vpop.f32.mrf.mxu1 }
 0x1ad   : > { %v1455_v1 = vmax.f32 %v969_v24, %v1330_v28  ;;  %v974_v34 = vadd.f32 %v3764_v10, %v973_v32  ;;  %v1519_v35 = vmax.f32 %v1225_v25, %v1394_v30  ;;  %v1230_v36 = vadd.f32 %v3764_v10, %v1229_v33 }
 0x1ae   : > { %v3102_v37 = vpop.f32.mrf.mxu0  ;;  %v3230_v38 = vpop.f32.mrf.mxu1 }
 0x1af   : > { %v2664_v39 = vpack.c.bf16 %v1455_v1, %v1454_v31  ;;  %v2824_v40 = vpack.c.bf16 %v1519_v35, %v1518_v29  ;;  %v1395_v41 = vmul.f32 0.2, %v1230_v36  ;;  %v1331_v42 = vmul.f32 0.2, %v974_v34 }
 0x1b0   : > { %v976_v43 = vpop.f32.mrf.mxu0  ;;  %v1232_v44 = vpop.f32.mrf.mxu1 }
 0x1b1   : > { %2878 = vst [vmem:[%s3616_s13 + $0xb8] sm:$0xff] %v2664_v39   ;;  %2910 = vst [vmem:[%s3616_s13 + $0x1b8] sm:$0xff] %v2824_v40   ;;  %v977_v45 = vadd.f32 %v3764_v10, %v976_v43  ;;  %v1233_v46 = vadd.f32 %v3764_v10, %v1232_v44  ;;  %v1520_v50 = vmax.f32 %v1230_v36, %v1395_v41 }
 0x1b2   : > { %v3103_v47 = vpop.f32.mrf.mxu0  ;;  %v3231_v48 = vpop.f32.mrf.mxu1  ;;  %v1456_v52 = vmax.f32 %v974_v34, %v1331_v42 }
 0x1b3   : > { %v1332_v49 = vmul.f32 0.2, %v977_v45  ;;  %v1396_v51 = vmul.f32 0.2, %v1233_v46 }
 0x1b4   : > { %v981_v53 = vpop.f32.mrf.mxu0  ;;  %v1237_v54 = vpop.f32.mrf.mxu1 }
 0x1b5   : > { %v1457_v55 = vmax.f32 %v977_v45, %v1332_v49  ;;  %v982_v56 = vadd.f32 %v3764_v10, %v981_v53  ;;  %v1521_v57 = vmax.f32 %v1233_v46, %v1396_v51  ;;  %v1238_v58 = vadd.f32 %v3764_v10, %v1237_v54 }
 0x1b6   : > { %v3106_v60 = vpop.f32.mrf.mxu0  ;;  %v3234_v61 = vpop.f32.mrf.mxu1 }
 0x1b7   : > { %v2669_v62 = vpack.c.bf16 %v1457_v55, %v1456_v52  ;;  %v2829_v63 = vpack.c.bf16 %v1521_v57, %v1520_v50  ;;  %v1397_v0 = vmul.f32 0.2, %v1238_v58  ;;  %v1333_v2 = vmul.f32 0.2, %v982_v56 }
 0x1b8   : > { %v984_v3 = vpop.f32.mrf.mxu0  ;;  %v1240_v4 = vpop.f32.mrf.mxu1 }
 0x1b9   : > { %2879 = vst [vmem:[%s3616_s13 + $0xc0] sm:$0xff] %v2669_v62   ;;  %2911 = vst [vmem:[%s3616_s13 + $0x1c0] sm:$0xff] %v2829_v63   ;;  %v985_v5 = vadd.f32 %v3764_v10, %v984_v3  ;;  %v1241_v6 = vadd.f32 %v3764_v10, %v1240_v4  ;;  %v1522_v11 = vmax.f32 %v1238_v58, %v1397_v0 }
 0x1ba   : > { %v3107_v7 = vpop.f32.mrf.mxu0  ;;  %v3235_v8 = vpop.f32.mrf.mxu1  ;;  %v1458_v59 = vmax.f32 %v982_v56, %v1333_v2 }
 0x1bb   : > { %v1334_v9 = vmul.f32 0.2, %v985_v5  ;;  %v1398_v12 = vmul.f32 0.2, %v1241_v6 }
 0x1bc   : > { %v989_v13 = vpop.f32.mrf.mxu0  ;;  %v1245_v14 = vpop.f32.mrf.mxu1 }
 0x1bd   : > { %v1459_v15 = vmax.f32 %v985_v5, %v1334_v9  ;;  %v990_v16 = vadd.f32 %v3764_v10, %v989_v13  ;;  %v1523_v17 = vmax.f32 %v1241_v6, %v1398_v12  ;;  %v1246_v18 = vadd.f32 %v3764_v10, %v1245_v14 }
 0x1be   : > { %v3110_v19 = vpop.f32.mrf.mxu0  ;;  %v3238_v20 = vpop.f32.mrf.mxu1 }
 0x1bf   : > { %v2674_v21 = vpack.c.bf16 %v1459_v15, %v1458_v59  ;;  %v2834_v22 = vpack.c.bf16 %v1523_v17, %v1522_v11  ;;  %v1399_v23 = vmul.f32 0.2, %v1246_v18  ;;  %v1335_v24 = vmul.f32 0.2, %v990_v16 }
 0x1c0   : > { %v992_v25 = vpop.f32.mrf.mxu0  ;;  %v1248_v26 = vpop.f32.mrf.mxu1 }
 0x1c1   : > { %2880 = vst [vmem:[%s3616_s13 + $0xc8] sm:$0xff] %v2674_v21   ;;  %2912 = vst [vmem:[%s3616_s13 + $0x1c8] sm:$0xff] %v2834_v22   ;;  %v993_v27 = vadd.f32 %v3764_v10, %v992_v25  ;;  %v1249_v28 = vadd.f32 %v3764_v10, %v1248_v26  ;;  %v1524_v32 = vmax.f32 %v1246_v18, %v1399_v23 }
 0x1c2   : > { %v3111_v29 = vpop.f32.mrf.mxu0  ;;  %v3239_v30 = vpop.f32.mrf.mxu1  ;;  %v1460_v1 = vmax.f32 %v990_v16, %v1335_v24 }
 0x1c3   : > { %v1336_v31 = vmul.f32 0.2, %v993_v27  ;;  %v1400_v33 = vmul.f32 0.2, %v1249_v28 }
 0x1c4   : > { %v997_v34 = vpop.f32.mrf.mxu0  ;;  %v1253_v35 = vpop.f32.mrf.mxu1 }
 0x1c5   : > { %v1461_v36 = vmax.f32 %v993_v27, %v1336_v31  ;;  %v998_v37 = vadd.f32 %v3764_v10, %v997_v34  ;;  %v1525_v38 = vmax.f32 %v1249_v28, %v1400_v33  ;;  %v1254_v39 = vadd.f32 %v3764_v10, %v1253_v35 }
 0x1c6   : > { %v3114_v40 = vpop.f32.mrf.mxu0  ;;  %v3242_v41 = vpop.f32.mrf.mxu1 }
 0x1c7   : > { %v2679_v42 = vpack.c.bf16 %v1461_v36, %v1460_v1  ;;  %v2839_v43 = vpack.c.bf16 %v1525_v38, %v1524_v32  ;;  %v1401_v44 = vmul.f32 0.2, %v1254_v39  ;;  %v1337_v45 = vmul.f32 0.2, %v998_v37 }
 0x1c8   : > { %v1000_v46 = vpop.f32.mrf.mxu0  ;;  %v1256_v47 = vpop.f32.mrf.mxu1 }
 0x1c9   : > { %2881 = vst [vmem:[%s3616_s13 + $0xd0] sm:$0xff] %v2679_v42   ;;  %2913 = vst [vmem:[%s3616_s13 + $0x1d0] sm:$0xff] %v2839_v43   ;;  %v1001_v48 = vadd.f32 %v3764_v10, %v1000_v46  ;;  %v1257_v49 = vadd.f32 %v3764_v10, %v1256_v47  ;;  %v1526_v53 = vmax.f32 %v1254_v39, %v1401_v44 }
 0x1ca   : > { %v3115_v50 = vpop.f32.mrf.mxu0  ;;  %v3243_v51 = vpop.f32.mrf.mxu1  ;;  %v1462_v55 = vmax.f32 %v998_v37, %v1337_v45 }
 0x1cb   : > { %v1338_v52 = vmul.f32 0.2, %v1001_v48  ;;  %v1402_v54 = vmul.f32 0.2, %v1257_v49 }
 0x1cc   : > { %v1005_v56 = vpop.f32.mrf.mxu0  ;;  %v1261_v57 = vpop.f32.mrf.mxu1 }
 0x1cd   : > { %v1463_v58 = vmax.f32 %v1001_v48, %v1338_v52  ;;  %v1006_v60 = vadd.f32 %v3764_v10, %v1005_v56  ;;  %v1527_v61 = vmax.f32 %v1257_v49, %v1402_v54  ;;  %v1262_v62 = vadd.f32 %v3764_v10, %v1261_v57 }
 0x1ce   : > { %v3118_v63 = vpop.f32.mrf.mxu0  ;;  %v3246_v0 = vpop.f32.mrf.mxu1 }
 0x1cf   : > { %v2684_v2 = vpack.c.bf16 %v1463_v58, %v1462_v55  ;;  %v2844_v3 = vpack.c.bf16 %v1527_v61, %v1526_v53  ;;  %v1403_v4 = vmul.f32 0.2, %v1262_v62  ;;  %v1339_v5 = vmul.f32 0.2, %v1006_v60 }
 0x1d0   : > { %v1008_v6 = vpop.f32.mrf.mxu0  ;;  %v1264_v7 = vpop.f32.mrf.mxu1 }
 0x1d1   : > { %2882 = vst [vmem:[%s3616_s13 + $0xd8] sm:$0xff] %v2684_v2   ;;  %2914 = vst [vmem:[%s3616_s13 + $0x1d8] sm:$0xff] %v2844_v3   ;;  %v1009_v8 = vadd.f32 %v3764_v10, %v1008_v6  ;;  %v1265_v9 = vadd.f32 %v3764_v10, %v1264_v7  ;;  %v1528_v13 = vmax.f32 %v1262_v62, %v1403_v4 }
 0x1d2   : > { %v3119_v11 = vpop.f32.mrf.mxu0  ;;  %v3247_v12 = vpop.f32.mrf.mxu1  ;;  %v1464_v15 = vmax.f32 %v1006_v60, %v1339_v5 }
 0x1d3   : > { %v1340_v59 = vmul.f32 0.2, %v1009_v8  ;;  %v1404_v14 = vmul.f32 0.2, %v1265_v9 }
 0x1d4   : > { %v1013_v16 = vpop.f32.mrf.mxu0  ;;  %v1269_v17 = vpop.f32.mrf.mxu1 }
 0x1d5   : > { %v1465_v18 = vmax.f32 %v1009_v8, %v1340_v59  ;;  %v1014_v19 = vadd.f32 %v3764_v10, %v1013_v16  ;;  %v1529_v20 = vmax.f32 %v1265_v9, %v1404_v14  ;;  %v1270_v21 = vadd.f32 %v3764_v10, %v1269_v17 }
 0x1d6   : > { %v3122_v22 = vpop.f32.mrf.mxu0  ;;  %v3250_v23 = vpop.f32.mrf.mxu1 }
 0x1d7   : > { %v2689_v24 = vpack.c.bf16 %v1465_v18, %v1464_v15  ;;  %v2849_v25 = vpack.c.bf16 %v1529_v20, %v1528_v13  ;;  %v1405_v26 = vmul.f32 0.2, %v1270_v21  ;;  %v1341_v27 = vmul.f32 0.2, %v1014_v19 }
 0x1d8   : > { %v1016_v28 = vpop.f32.mrf.mxu0  ;;  %v1272_v29 = vpop.f32.mrf.mxu1 }
 0x1d9   : > { %2883 = vst [vmem:[%s3616_s13 + $0xe0] sm:$0xff] %v2689_v24   ;;  %2915 = vst [vmem:[%s3616_s13 + $0x1e0] sm:$0xff] %v2849_v25   ;;  %v1017_v30 = vadd.f32 %v3764_v10, %v1016_v28  ;;  %v1273_v31 = vadd.f32 %v3764_v10, %v1272_v29  ;;  %v1530_v34 = vmax.f32 %v1270_v21, %v1405_v26 }
 0x1da   : > { %v3123_v32 = vpop.f32.mrf.mxu0  ;;  %v3251_v33 = vpop.f32.mrf.mxu1  ;;  %v1466_v36 = vmax.f32 %v1014_v19, %v1341_v27 }
 0x1db   : > { %v1342_v1 = vmul.f32 0.2, %v1017_v30  ;;  %v1406_v35 = vmul.f32 0.2, %v1273_v31 }
 0x1dc   : > { %v1021_v37 = vpop.f32.mrf.mxu0  ;;  %v1277_v38 = vpop.f32.mrf.mxu1 }
 0x1dd   : > { %v1467_v39 = vmax.f32 %v1017_v30, %v1342_v1  ;;  %v1022_v40 = vadd.f32 %v3764_v10, %v1021_v37  ;;  %v1531_v41 = vmax.f32 %v1273_v31, %v1406_v35  ;;  %v1278_v42 = vadd.f32 %v3764_v10, %v1277_v38 }
 0x1de   : > { %v3126_v43 = vpop.f32.mrf.mxu0  ;;  %v3254_v44 = vpop.f32.mrf.mxu1 }
 0x1df   : > { %v2694_v45 = vpack.c.bf16 %v1467_v39, %v1466_v36  ;;  %v2854_v46 = vpack.c.bf16 %v1531_v41, %v1530_v34  ;;  %v1407_v47 = vmul.f32 0.2, %v1278_v42  ;;  %v1343_v50 = vmul.f32 0.2, %v1022_v40 }
 0x1e0   : > { %v1024_v48 = vpop.f32.mrf.mxu0  ;;  %v1280_v49 = vpop.f32.mrf.mxu1 }
 0x1e1   : > { %2884 = vst [vmem:[%s3616_s13 + $0xe8] sm:$0xff] %v2694_v45   ;;  %2916 = vst [vmem:[%s3616_s13 + $0x1e8] sm:$0xff] %v2854_v46   ;;  %v1025_v51 = vadd.f32 %v3764_v10, %v1024_v48  ;;  %v1532_v52 = vmax.f32 %v1278_v42, %v1407_v47  ;;  %v1468_v58 = vmax.f32 %v1022_v40, %v1343_v50 }
 0x1e2   : > { %v3127_v53 = vpop.f32.mrf.mxu0  ;;  %v3255_v54 = vpop.f32.mrf.mxu1 }
 0x1e3   : > { %v1344_v55 = vmul.f32 0.2, %v1025_v51  ;;  %v2545_v56 = vpack.c.bf16 %v1532_v52, %v1532_v52 }
 0x1e4   : > { %v1029_v57 = vpop.f32.mrf.mxu0 }
 0x1e5   : > { %v1469_v60 = vmax.f32 %v1025_v51, %v1344_v55  ;;  %2158 = vst [vmem:[%s3616_s13 + $0x1f0] sm:$0xf] %v2545_v56  ;;  %v1030_v61 = vadd.f32 %v3764_v10, %v1029_v57 }
 0x1e6   : > { %v3130_v62 = vpop.f32.mrf.mxu0 }
 0x1e7   : > { %v2699_v63 = vpack.c.bf16 %v1469_v60, %v1468_v58  ;;  %v1345_v2 = vmul.f32 0.2, %v1030_v61 }
 0x1e8   : > { %v1032_v0 = vpop.f32.mrf.mxu0 }
 0x1e9   : > { %2885 = vst [vmem:[%s3616_s13 + $0xf0] sm:$0xff] %v2699_v63   ;;  %v1033_v3 = vadd.f32 %v3764_v10, %v1032_v0  ;;  %v1470_v6 = vmax.f32 %v1030_v61, %v1345_v2 }
 0x1ea   : > { %v3131_v4 = vpop.f32.mrf.mxu0 }
 0x1eb   : > { %v1346_v5 = vmul.f32 0.2, %v1033_v3 }
 0x1ed   : > { %v1471_v7 = vmax.f32 %v1033_v3, %v1346_v5 }
 0x1ef   : > { %v2704_v8 = vpack.c.bf16 %v1471_v7, %v1470_v6 }
 0x1f1   : > { %2886 = vst [vmem:[%s3616_s13 + $0xf8] sm:$0xff] %v2704_v8  }
 0x1f2 PF: > { %s13_s12 = sadd.s32 1, %s3360_s12  }
 0x1f3   : > { %p10_p4 = scmp.ge.s32.totalorder %s13_s12, 4  }
 0x1f5   :  { %12 = sbr.rel (!%p10_p4) target bundleno = 1 (0x1), region = 62 }

// kernel: discriminator_forward.5
= control target key start
LH: loop header
LB: loop body
LE: loop exit
PB: predicated region body
PF: predicated region fallthrough
CT: control target
= control target key end

     0   :  { %s13401_s1 = inlined_call_operand.vmem [shape: bf16[3456,128], index: 1, kind: input, shape index: {}]   ;;  %s13402_s0 = inlined_call_operand.vmem [shape: bf16[250,3456], index: 0, kind: input, shape index: {}]   ;;  %s13403_s2 = inlined_call_operand.vmem [shape: f32[1,128], index: 2, kind: input, shape index: {}]   ;;  %s13404_s3 = inlined_call_operand.vmem [shape: bf16[250,128], index: 3, kind: output, shape index: {}]  }
   0x1   :  { %v9202_v0 = vld [vmem:[%s13401_s1 + $0x78] sm:$0xff]   ;;  %v9204_v2 = vld [vmem:[%s13401_s1 + $0x70] sm:$0xff]   ;;  %v9206_v4 = vld [vmem:[%s13401_s1 + $0x68] sm:$0xff]  }
   0x2   :  { %v9203_v1 = vld [vmem:[%s13401_s1 + $0x38] sm:$0xff]   ;;  %7658 = vmatprep.subr.bf16.mxu0 %v9202_v0  ;;  %9186 = vmatprep.subr.bf16.mxu1 %v9202_v0  ;;  %v9205_v3 = vld [vmem:[%s13401_s1 + $0x30] sm:$0xff]   ;;  %v9207_v5 = vld [vmem:[%s13401_s1 + $0x28] sm:$0xff]  }
   0x3   :  { %7659 = vmatpush3.bf16.msra.mxu0 %v9203_v1  ;;  %9194 = vmatpush3.bf16.msra.mxu1 %v9203_v1  ;;  %v9208_v6 = vld [vmem:[%s13401_s1 + $0x60] sm:$0xff]   ;;  %v9210_v8 = vld [vmem:[%s13401_s1 + $0x58] sm:$0xff]   ;;  %v9212_v10 = vld [vmem:[%s13401_s1 + $0x50] sm:$0xff]  }
   0x4   :  { %7660 = vmatprep.subr.bf16.mxu0 %v9204_v2  ;;  %9187 = vmatprep.subr.bf16.mxu1 %v9204_v2  ;;  %v9209_v7 = vld [vmem:[%s13401_s1 + $0x20] sm:$0xff]   ;;  %v9211_v9 = vld [vmem:[%s13401_s1 + $0x18] sm:$0xff]   ;;  %v9213_v13 = vld [vmem:[%s13401_s1 + $0x10] sm:$0xff]  }
   0x5   :  { %v9220_v11 = vld [vmem:[%s13402_s0 + $0x4] ss:$108 sps:$4 sm:$0xff]   ;;  %v9214_v14 = vld [vmem:[%s13401_s1 + $0x48] sm:$0xff]   ;;  %v9224_v18 = vld [vmem:[%s13401_s1 + $0xf8] sm:$0xff]  }
   0x6   :  { %v9223_v12 = vld [vmem:[%s13402_s0 + $0xa24] ss:$108 sps:$4 sm:$0xff]   ;;  %4406 = vmatprep.mubr.bf16.mxu0 %v9220_v11  ;;  %v9215_v15 = vld [vmem:[%s13401_s1 + $0x8] sm:$0xff]   ;;  %v9225_v21 = vld [vmem:[%s13401_s1 + $0x178] sm:$0xff]  }
   0x7   :  { %7661 = vmatpush3.bf16.msra.mxu0 %v9205_v3  ;;  %9195 = vmatpush3.bf16.msra.mxu1 %v9205_v3  ;;  %v9216_v16 = vld [vmem:[%s13401_s1 + $0x40] sm:$0xff]   ;;  %v9226_v22 = vld [vmem:[%s13401_s1 + $0xb8] sm:$0xff]   ;;  %v9228_v24 = vld [vmem:[%s13401_s1 + $0xf0] sm:$0xff]  }
   0x8   :  { %7662 = vmatprep.subr.bf16.mxu0 %v9206_v4  ;;  %9188 = vmatprep.subr.bf16.mxu1 %v9206_v4  ;;  %v9217_v17 = vld [vmem:[%s13401_s1] sm:$0xff]   ;;  %v9227_v23 = vld [vmem:[%s13401_s1 + $0x138] sm:$0xff]   ;;  %v9239_v27 = vld [vmem:[%s13401_s1 + $0x170] sm:$0xff]  }
   0x9   :  { %4502 = vmatprep.mubr.bf16.mxu1 %v9223_v12  ;;  %v9218_v19 = vld [vmem:[%s13402_s0] ss:$108 sps:$4 sm:$0xff]   ;;  %v9230_v25 = vld [vmem:[%s13402_s0 + $0xdc] ss:$108 sps:$4 sm:$0xff]   ;;  %v9229_v28 = vld [vmem:[%s13401_s1 + $0xb0] sm:$0xff]  }
   0xa   :  { %v9221_v20 = vld [vmem:[%s13402_s0 + $0xa20] ss:$108 sps:$4 sm:$0xff]   ;;  %v9232_v26 = vld [vmem:[%s13402_s0 + $0xafc] ss:$108 sps:$4 sm:$0xff]   ;;  %v9241_v29 = vld [vmem:[%s13401_s1 + $0x130] sm:$0xff]  }
   0xb   :  { %7663 = vmatpush3.bf16.msra.mxu0 %v9207_v5  ;;  %9196 = vmatpush3.bf16.msra.mxu1 %v9207_v5  ;;  %v9234_v30 = vld [vmem:[%s13402_s0 + $0xd8] ss:$108 sps:$4 sm:$0xff]   ;;  %v9236_v32 = vld [vmem:[%s13401_s1 + $0xe8] sm:$0xff]   ;;  %v9242_v35 = vld [vmem:[%s13402_s0 + $0x1b4] ss:$108 sps:$4 sm:$0xff]  }
   0xc   :  { %7664 = vmatprep.subr.bf16.mxu0 %v9208_v6  ;;  %9189 = vmatprep.subr.bf16.mxu1 %v9208_v6  ;;  %v9235_v31 = vld [vmem:[%s13402_s0 + $0xaf8] ss:$108 sps:$4 sm:$0xff]   ;;  %v9237_v33 = vld [vmem:[%s13401_s1 + $0xa8] sm:$0xff]   ;;  %v9244_v36 = vld [vmem:[%s13402_s0 + $0xbd4] ss:$108 sps:$4 sm:$0xff]  }
   0xd   :  { %v9238_v34 = vld [vmem:[%s13401_s1 + $0xe0] sm:$0xff]   ;;  %v9248_v38 = vld [vmem:[%s13401_s1 + $0xd8] sm:$0xff]   ;;  %v9259_v41 = vld [vmem:[%s13401_s1 + $0x168] sm:$0xff]  }
   0xe   :  { %v9240_v37 = vld [vmem:[%s13401_s1 + $0xa0] sm:$0xff]   ;;  %v9246_v39 = vld [vmem:[%s13402_s0 + $0x1b0] ss:$108 sps:$4 sm:$0xff]   ;;  %v9261_v44 = vld [vmem:[%s13401_s1 + $0x128] sm:$0xff]  }
   0xf   :  { %7665 = vmatpush3.bf16.msra.mxu0 %v9209_v7  ;;  %9197 = vmatpush3.bf16.msra.mxu1 %v9209_v7  ;;  %v9247_v40 = vld [vmem:[%s13402_s0 + $0xbd0] ss:$108 sps:$4 sm:$0xff]   ;;  %v9252_v45 = vld [vmem:[%s13402_s0 + $0x28c] ss:$108 sps:$4 sm:$0xff]   ;;  %v9256_v49 = vld [vmem:[%s13402_s0 + $0x288] ss:$108 sps:$4 sm:$0xff]  }
  0x10   :  { %7666 = vmatprep.subr.bf16.mxu0 %v9210_v8  ;;  %9190 = vmatprep.subr.bf16.mxu1 %v9210_v8  ;;  %v9249_v42 = vld [vmem:[%s13401_s1 + $0x98] sm:$0xff]   ;;  %v9250_v43 = vld [vmem:[%s13401_s1 + $0xd0] sm:$0xff]   ;;  %v9258_v48 = vld [vmem:[%s13401_s1 + $0xc8] sm:$0xff]  }
  0x11   :  { %v9254_v46 = vld [vmem:[%s13402_s0 + $0xcac] ss:$108 sps:$4 sm:$0x1f]   ;;  %v9251_v47 = vld [vmem:[%s13401_s1 + $0x90] sm:$0xff]   ;;  %v9270_v51 = vld [vmem:[%s13401_s1 + $0x160] sm:$0xff]  }
  0x12   :  { %v9257_v50 = vld [vmem:[%s13402_s0 + $0xca8] ss:$108 sps:$4 sm:$0x1f]   ;;  %v9262_v53 = vld [vmem:[%s13401_s1 + $0xc0] sm:$0xff]   ;;  %v9268_v56 = vld [vmem:[%s13402_s0 + $0xc] ss:$108 sps:$4 sm:$0xff]  }
  0x13   :  { %7667 = vmatpush3.bf16.msra.mxu0 %v9211_v9  ;;  %9198 = vmatpush3.bf16.msra.mxu1 %v9211_v9  ;;  %v9260_v52 = vld [vmem:[%s13401_s1 + $0x88] sm:$0xff]   ;;  %v9272_v54 = vld [vmem:[%s13401_s1 + $0x120] sm:$0xff]   ;;  %v9271_v60 = vld [vmem:[%s13401_s1 + $0x1f8] sm:$0xff]  }
  0x14   :  { %7668 = vmatprep.subr.bf16.mxu0 %v9212_v10  ;;  %9191 = vmatprep.subr.bf16.mxu1 %v9212_v10  ;;  %v9264_v55 = vld [vmem:[%s13402_s0 + $0x364] ss:$108 sps:$4 sm:$0xff]   ;;  %v9266_v58 = vld [vmem:[%s13402_s0 + $0x8] ss:$108 sps:$4 sm:$0xff]   ;;  %v9269_v59 = vld [vmem:[%s13402_s0 + $0x360] ss:$108 sps:$4 sm:$0xff]  }
  0x15   :  { %v9263_v57 = vld [vmem:[%s13401_s1 + $0x80] sm:$0xff]   ;;  %v9273_v61 = vld [vmem:[%s13401_s1 + $0x1b8] sm:$0xff]   ;;  %v9288_v2 = vld [vmem:[%s13401_s1 + $0x1f0] sm:$0xff]  }
  0x16   :  { %v9274_v62 = vld [vmem:[%s13402_s0 + $0x43c] ss:$108 sps:$4 sm:$0xff]   ;;  %v9276_v1 = vld [vmem:[%s13402_s0 + $0xe4] ss:$108 sps:$4 sm:$0xff]   ;;  %v9279_v7 = vld [vmem:[%s13402_s0 + $0xe0] ss:$108 sps:$4 sm:$0xff]  }
  0x17   :  { %7669 = vmatpush3.bf16.msra.mxu0 %v9213_v13  ;;  %9199 = vmatpush3.bf16.msra.mxu1 %v9213_v13  ;;  %v9286_v63 = vld [vmem:[%s13401_s1 + $0x158] sm:$0xff]   ;;  %v9289_v3 = vld [vmem:[%s13401_s1 + $0x1b0] sm:$0xff]   ;;  %v9304_v10 = vld [vmem:[%s13401_s1 + $0x1e8] sm:$0xff]  }
  0x18   :  { %7670 = vmatprep.subr.bf16.mxu0 %v9214_v14  ;;  %9192 = vmatprep.subr.bf16.mxu1 %v9214_v14  ;;  %v9287_v0 = vld [vmem:[%s13401_s1 + $0x118] sm:$0xff]   ;;  %v9296_v5 = vld [vmem:[%s13401_s1 + $0x150] sm:$0xff]   ;;  %v9305_v11 = vld [vmem:[%s13401_s1 + $0x1a8] sm:$0xff]  }
  0x19   :  { %v9278_v4 = vld [vmem:[%s13402_s0 + $0x438] ss:$108 sps:$4 sm:$0xff]   ;;  %v9297_v6 = vld [vmem:[%s13401_s1 + $0x110] sm:$0xff]   ;;  %v9282_v9 = vld [vmem:[%s13402_s0 + $0x1bc] ss:$108 sps:$4 sm:$0xff]  }
  0x1a   :  { %v9280_v8 = vld [vmem:[%s13402_s0 + $0x514] ss:$108 sps:$4 sm:$0xff]   ;;  %v9284_v12 = vld [vmem:[%s13402_s0 + $0x510] ss:$108 sps:$4 sm:$0xff]   ;;  %v9285_v13 = vld [vmem:[%s13402_s0 + $0x1b8] ss:$108 sps:$4 sm:$0xff]  }
  0x1b   :  { %7671 = vmatpush3.bf16.msra.mxu0 %v9215_v15  ;;  %9200 = vmatpush3.bf16.msra.mxu1 %v9215_v15  ;;  %v9290_v14 = vld [vmem:[%s13402_s0 + $0x5ec] ss:$108 sps:$4 sm:$0xff]  }
  0x1c   :  { %7672 = vmatprep.subr.bf16.mxu0 %v9216_v16  ;;  %9193 = vmatprep.subr.bf16.mxu1 %v9216_v16  ;;  %v9312_v15 = vld [vmem:[%s13401_s1 + $0x148] sm:$0xff]  }
  0x1d   :  { %v9313_v16 = vld [vmem:[%s13401_s1 + $0x108] sm:$0xff]  }
  0x1f   :  { %7673 = vmatpush3.bf16.msra.mxu0 %v9217_v17  ;;  %9201 = vmatpush3.bf16.msra.mxu1 %v9217_v17  ;;  %v9292_v17 = vld [vmem:[%s13402_s0 + $0x294] ss:$108 sps:$4 sm:$0xff]  }
  0x20   :  { %7770 = vmatprep.subr.bf16.mxu1 %v9224_v18  ;;  %7882 = vmatprep.subr.bf16.mxu0 %v9225_v21  ;;  %v9320_v18 = vld [vmem:[%s13401_s1 + $0x140] sm:$0xff]  }
  0x21   :  { %v9322_v21 = vld [vmem:[%s13401_s1 + $0x100] sm:$0xff]  }
  0x22   :  { %4407 = vmatmul.mubr.bf16.vlgmr.msra.gmra.mxu0 %v9218_v19  ;;  %4503 = vmatmul.mubr.bf16.vlgmr.msra.gmra.mxu1 %v9221_v20  ;;  %v9321_v19 = vld [vmem:[%s13401_s1 + $0x1e0] sm:$0xff]   ;;  %v9294_v20 = vld [vmem:[%s13402_s0 + $0x5e8] ss:$108 sps:$4 sm:$0xff]  }
  0x23   :  { %7771 = vmatpush3.bf16.msra.mxu1 %v9226_v22  ;;  %7883 = vmatpush3.bf16.msra.mxu0 %v9227_v23  ;;  %v9323_v22 = vld [vmem:[%s13401_s1 + $0x1a0] sm:$0xff]   ;;  %v9295_v23 = vld [vmem:[%s13402_s0 + $0x290] ss:$108 sps:$4 sm:$0xff]  }
  0x24   :  { %7772 = vmatprep.subr.bf16.mxu1 %v9228_v24  ;;  %4414 = vmatprep.mubr.bf16.mxu0 %v9230_v25  ;;  %v9298_v24 = vld [vmem:[%s13402_s0 + $0x6c4] ss:$108 sps:$4 sm:$0xff]   ;;  %v9300_v25 = vld [vmem:[%s13402_s0 + $0x36c] ss:$108 sps:$4 sm:$0xff]  }
  0x25   :  { %4510 = vmatprep.mubr.bf16.mxu1 %v9232_v26  ;;  %7884 = vmatprep.subr.bf16.mxu0 %v9239_v27  ;;  %v9336_v26 = vld [vmem:[%s13401_s1 + $0x278] sm:$0xff]   ;;  %v9302_v27 = vld [vmem:[%s13402_s0 + $0x6c0] ss:$108 sps:$4 sm:$0xff]  }
  0x27   :  { %7773 = vmatpush3.bf16.msra.mxu1 %v9229_v28  ;;  %7885 = vmatpush3.bf16.msra.mxu0 %v9241_v29  ;;  %v9303_v28 = vld [vmem:[%s13402_s0 + $0x368] ss:$108 sps:$4 sm:$0xff]  }
  0x28   :  { %7774 = vmatprep.subr.bf16.mxu1 %v9236_v32  ;;  %7886 = vmatprep.subr.bf16.mxu0 %v9259_v41  ;;  %v9306_v29 = vld [vmem:[%s13402_s0 + $0x79c] ss:$108 sps:$4 sm:$0xff]   ;;  %v9308_v32 = vld [vmem:[%s13402_s0 + $0x444] ss:$108 sps:$4 sm:$0xff]   ;;  %v9324_v41 = vld [vmem:[%s13402_s0 + $0x94c] ss:$108 sps:$4 sm:$0xff]  }
  0x2a   :  { %4415 = vmatmul.mubr.bf16.gmra.mxu0 %v9234_v30  ;;  %4511 = vmatmul.mubr.bf16.gmra.mxu1 %v9235_v31  ;;  %v9338_v30 = vld [vmem:[%s13401_s1 + $0x1d8] sm:$0xff]  }
  0x2b   :  { %7775 = vmatpush3.bf16.msra.mxu1 %v9237_v33  ;;  %4422 = vmatprep.mubr.bf16.mxu0 %v9242_v35  ;;  %v9339_v31 = vld [vmem:[%s13401_s1 + $0x198] sm:$0xff]   ;;  %v9314_v35 = vld [vmem:[%s13402_s0 + $0x874] ss:$108 sps:$4 sm:$0xff]  }
  0x2c   :  { %7776 = vmatprep.subr.bf16.mxu1 %v9238_v34  ;;  %4518 = vmatprep.mubr.bf16.mxu1 %v9244_v36  ;;  %v9310_v33 = vld [vmem:[%s13402_s0 + $0x798] ss:$108 sps:$4 sm:$0xff]   ;;  %v9311_v34 = vld [vmem:[%s13402_s0 + $0x440] ss:$108 sps:$4 sm:$0xff]   ;;  %v9316_v36 = vld [vmem:[%s13402_s0 + $0x51c] ss:$108 sps:$4 sm:$0xff]  }
  0x2d   :  { %7887 = vmatpush3.bf16.msra.mxu0 %v9261_v44  ;;  %v9371_v44 = vld [vmem:[%s13401_s1 + $0x188] sm:$0xff]  }
  0x2e   :  { %7888 = vmatprep.subr.bf16.mxu0 %v9270_v51  ;;  %v9332_v51 = vld [vmem:[%s13402_s0 + $0x10] ss:$108 sps:$4 sm:$0xff]  }
  0x2f   :  { %7777 = vmatpush3.bf16.msra.mxu1 %v9240_v37  ;;  %v9354_v37 = vld [vmem:[%s13401_s1 + $0x1d0] sm:$0xff]  }
  0x30   :  { %7778 = vmatprep.subr.bf16.mxu1 %v9248_v38  ;;  %v9355_v38 = vld [vmem:[%s13401_s1 + $0x190] sm:$0xff]  }
  0x31   :  { %7889 = vmatpush3.bf16.msra.mxu0 %v9272_v54  ;;  %v9340_v54 = vld [vmem:[%s13402_s0 + $0x7a4] ss:$108 sps:$4 sm:$0xff]  }
  0x32   :  { %4423 = vmatmul.mubr.bf16.gmra.mxu0 %v9246_v39  ;;  %4519 = vmatmul.mubr.bf16.gmra.mxu1 %v9247_v40  ;;  %v9318_v39 = vld [vmem:[%s13402_s0 + $0x870] ss:$108 sps:$4 sm:$0xff]   ;;  %v9319_v40 = vld [vmem:[%s13402_s0 + $0x518] ss:$108 sps:$4 sm:$0xff]  }
  0x33   :  { %7779 = vmatpush3.bf16.msra.mxu1 %v9249_v42  ;;  %4430 = vmatprep.mubr.bf16.mxu0 %v9252_v45  ;;  %v9326_v42 = vld [vmem:[%s13402_s0 + $0x5f4] ss:$108 sps:$4 sm:$0xff]  }
  0x34   :  { %7780 = vmatprep.subr.bf16.mxu1 %v9250_v43  ;;  %4526 = vmatprep.mubr.bf16.mxu1 %v9254_v46  ;;  %v9370_v43 = vld [vmem:[%s13401_s1 + $0x1c8] sm:$0xff]   ;;  %v9329_v46 = vld [vmem:[%s13402_s0 + $0x5f0] ss:$108 sps:$4 sm:$0xff]  }
  0x35   :  { %7890 = vmatprep.subr.bf16.mxu0 %v9286_v63  ;;  %v9328_v45 = vld [vmem:[%s13402_s0 + $0x948] ss:$108 sps:$4 sm:$0xff]   ;;  %v9348_v63 = vld [vmem:[%s13402_s0 + $0x1c4] ss:$108 sps:$4 sm:$0xff]  }
  0x36   :  { %7891 = vmatpush3.bf16.msra.mxu0 %v9287_v0  ;;  %v9369_v0 = vld [vmem:[%s13401_s1 + $0x228] sm:$0xff]  }
  0x37   :  { %7781 = vmatpush3.bf16.msra.mxu1 %v9251_v47  ;;  %7892 = vmatprep.subr.bf16.mxu0 %v9296_v5  ;;  %v9330_v47 = vld [vmem:[%s13402_s0 + $0x6cc] ss:$108 sps:$4 sm:$0xff]  }
  0x38   :  { %7782 = vmatprep.subr.bf16.mxu1 %v9258_v48  ;;  %v9334_v48 = vld [vmem:[%s13402_s0 + $0x14] ss:$108 sps:$4 sm:$0xff]  }
  0x39   :  { %v9351_v5 = vld [vmem:[%s13402_s0 + $0x1c0] ss:$108 sps:$4 sm:$0xff]  }
  0x3a   :  { %4431 = vmatmul.mubr.bf16.gmra.mxu0 %v9256_v49  ;;  %4527 = vmatmul.mubr.bf16.gmra.mxu1 %v9257_v50  ;;  %v9386_v49 = vld [vmem:[%s13401_s1 + $0x1c0] sm:$0xff]  }
  0x3b   :  { %7783 = vmatpush3.bf16.msra.mxu1 %v9260_v52  ;;  %4438 = vmatprep.mubr.bf16.mxu0 %v9264_v55  ;;  %v9387_v50 = vld [vmem:[%s13401_s1 + $0x180] sm:$0xff]   ;;  %v9335_v52 = vld [vmem:[%s13402_s0 + $0x6c8] ss:$108 sps:$4 sm:$0xff]   ;;  %v9342_v55 = vld [vmem:[%s13402_s0 + $0xec] ss:$108 sps:$4 sm:$0xff]  }
  0x3c   :  { %7784 = vmatprep.subr.bf16.mxu1 %v9262_v53  ;;  %4567 = vmatprep.mubr.bf16.mxu1 %v9268_v56  ;;  %v9337_v53 = vld [vmem:[%s13401_s1 + $0x238] sm:$0xff]   ;;  %v9352_v56 = vld [vmem:[%s13401_s1 + $0x270] sm:$0xff]  }
  0x3d   :  { %7893 = vmatpush3.bf16.msra.mxu0 %v9297_v6  ;;  %v9356_v6 = vld [vmem:[%s13402_s0 + $0x954] ss:$108 sps:$4 sm:$0xff]  }
  0x3e   :  { %7894 = vmatprep.subr.bf16.mxu0 %v9312_v15  ;;  %v9364_v15 = vld [vmem:[%s13402_s0 + $0x374] ss:$108 sps:$4 sm:$0xff]  }
  0x3f   :  { %7785 = vmatpush3.bf16.msra.mxu1 %v9263_v57  ;;  %v9402_v57 = vld [vmem:[%s13401_s1 + $0x2f8] sm:$0xff]  }
  0x40   :  { %7994 = vmatprep.subr.bf16.mxu1 %v9271_v60  ;;  %v9344_v60 = vld [vmem:[%s13402_s0 + $0x7a0] ss:$108 sps:$4 sm:$0xff]  }
  0x41   :  { %7895 = vmatpush3.bf16.msra.mxu0 %v9313_v16  ;;  %v9433_v16 = vld [vmem:[%s13401_s1 + $0x208] sm:$0xff]  }
  0x42   :  { %4439 = vmatmul.mubr.bf16.gmra.mxu0 %v9269_v59  ;;  %4568 = vmatmul.mubr.bf16.vlgmr.msra.gmra.mxu1 %v9266_v58  ;;  %v9353_v58 = vld [vmem:[%s13401_s1 + $0x230] sm:$0xff]   ;;  %v9368_v59 = vld [vmem:[%s13401_s1 + $0x268] sm:$0xff]  }
  0x43   :  { %7995 = vmatpush3.bf16.msra.mxu1 %v9273_v61  ;;  %4446 = vmatprep.mubr.bf16.mxu0 %v9274_v62  ;;  %v9345_v61 = vld [vmem:[%s13402_s0 + $0xe8] ss:$108 sps:$4 sm:$0xff]  }
  0x44   :  { %4575 = vmatprep.mubr.bf16.mxu1 %v9276_v1  ;;  %7996 = vmatprep.subr.bf16.mxu1 %v9288_v2  ;;  %v9346_v62 = vld [vmem:[%s13402_s0 + $0x87c] ss:$108 sps:$4 sm:$0xff]   ;;  %v9384_v1 = vld [vmem:[%s13401_s1 + $0x260] sm:$0xff]  }
  0x45   :  { %7896 = vmatprep.subr.bf16.mxu0 %v9320_v18  ;;  %v9350_v2 = vld [vmem:[%s13402_s0 + $0x878] ss:$108 sps:$4 sm:$0xff]   ;;  %v9367_v18 = vld [vmem:[%s13402_s0 + $0x370] ss:$108 sps:$4 sm:$0xff]  }
  0x46   :  { %7897 = vmatpush3.bf16.msra.mxu0 %v9322_v21  ;;  %v9449_v21 = vld [vmem:[%s13401_s1 + $0x200] sm:$0xff]  }
  0x47   :  { %7997 = vmatpush3.bf16.msra.mxu1 %v9289_v3  ;;  %8106 = vmatprep.subr.bf16.mxu0 %v9336_v26  ;;  %v9385_v3 = vld [vmem:[%s13401_s1 + $0x220] sm:$0xff]   ;;  %v9464_v26 = vld [vmem:[%s13401_s1 + $0x378] sm:$0xff]  }
  0x48   :  { %7998 = vmatprep.subr.bf16.mxu1 %v9304_v10  ;;  %v9360_v10 = vld [vmem:[%s13402_s0 + $0x950] ss:$108 sps:$4 sm:$0xff]  }
  0x4a   :  { %4447 = vmatmul.mubr.bf16.gmra.mxu0 %v9278_v4  ;;  %4576 = vmatmul.mubr.bf16.gmra.mxu1 %v9279_v7  ;;  %v9400_v4 = vld [vmem:[%s13401_s1 + $0x258] sm:$0xff]  }
  0x4b   :  { %4454 = vmatprep.mubr.bf16.mxu0 %v9280_v8  ;;  %4583 = vmatprep.mubr.bf16.mxu1 %v9282_v9  ;;  %v9358_v7 = vld [vmem:[%s13402_s0 + $0x29c] ss:$108 sps:$4 sm:$0xff]   ;;  %v9416_v9 = vld [vmem:[%s13401_s1 + $0x250] sm:$0xff]  }
  0x4c   :  { %7999 = vmatpush3.bf16.msra.mxu1 %v9305_v11  ;;  %v9401_v8 = vld [vmem:[%s13401_s1 + $0x218] sm:$0xff]  }
  0x4d   :  { %8000 = vmatprep.subr.bf16.mxu1 %v9321_v19  ;;  %v9361_v11 = vld [vmem:[%s13402_s0 + $0x298] ss:$108 sps:$4 sm:$0xff]  }
  0x4e   :  { %v9372_v19 = vld [vmem:[%s13402_s0 + $0xb04] ss:$108 sps:$4 sm:$0xff]  }
  0x50   :  { %8001 = vmatpush3.bf16.msra.mxu1 %v9323_v22  ;;  %v9374_v22 = vld [vmem:[%s13402_s0 + $0x44c] ss:$108 sps:$4 sm:$0xff]  }
  0x51   :  { %8002 = vmatprep.subr.bf16.mxu1 %v9338_v30  ;;  %v9388_v30 = vld [vmem:[%s13402_s0 + $0xcb4] ss:$108 sps:$4 sm:$0x1f]  }
  0x52   :  { %4455 = vmatmul.mubr.bf16.gmra.mxu0 %v9284_v12  ;;  %4584 = vmatmul.mubr.bf16.gmra.mxu1 %v9285_v13  ;;  %v9417_v12 = vld [vmem:[%s13401_s1 + $0x210] sm:$0xff]   ;;  %v9432_v13 = vld [vmem:[%s13401_s1 + $0x248] sm:$0xff]  }
  0x53   :  { %4462 = vmatprep.mubr.bf16.mxu0 %v9290_v14  ;;  %4591 = vmatprep.mubr.bf16.mxu1 %v9292_v17  ;;  %v9362_v14 = vld [vmem:[%s13402_s0 + $0xa2c] ss:$108 sps:$4 sm:$0xff]   ;;  %v9366_v17 = vld [vmem:[%s13402_s0 + $0xa28] ss:$108 sps:$4 sm:$0xff]  }
  0x54   :  { %8003 = vmatpush3.bf16.msra.mxu1 %v9339_v31  ;;  %v9390_v31 = vld [vmem:[%s13402_s0 + $0x5fc] ss:$108 sps:$4 sm:$0xff]  }
  0x55   :  { %8004 = vmatprep.subr.bf16.mxu1 %v9354_v37  ;;  %v9399_v37 = vld [vmem:[%s13402_s0 + $0x6d0] ss:$108 sps:$4 sm:$0xff]  }
  0x58   :  { %8005 = vmatpush3.bf16.msra.mxu1 %v9355_v38  ;;  %v9403_v38 = vld [vmem:[%s13401_s1 + $0x2b8] sm:$0xff]  }
  0x59   :  { %8006 = vmatprep.subr.bf16.mxu1 %v9370_v43  ;;  %v9434_v43 = vld [vmem:[%s13401_s1 + $0x2e8] sm:$0xff]  }
  0x5a   :  { %4463 = vmatmul.mubr.bf16.gmra.mxu0 %v9294_v20  ;;  %4592 = vmatmul.mubr.bf16.gmra.mxu1 %v9295_v23  ;;  %v9448_v20 = vld [vmem:[%s13401_s1 + $0x240] sm:$0xff]  }
  0x5b   :  { %4470 = vmatprep.mubr.bf16.mxu0 %v9298_v24  ;;  %4599 = vmatprep.mubr.bf16.mxu1 %v9300_v25  ;;  %v9376_v23 = vld [vmem:[%s13402_s0 + $0xb00] ss:$108 sps:$4 sm:$0xff]   ;;  %v9377_v24 = vld [vmem:[%s13402_s0 + $0x448] ss:$108 sps:$4 sm:$0xff]  }
  0x5c   :  { %8007 = vmatpush3.bf16.msra.mxu1 %v9371_v44  ;;  %v9378_v25 = vld [vmem:[%s13402_s0 + $0xbdc] ss:$108 sps:$4 sm:$0xff]  }
  0x5d   :  { %8008 = vmatprep.subr.bf16.mxu1 %v9386_v49  ;;  %v9408_v44 = vld [vmem:[%s13402_s0 + $0x7a8] ss:$108 sps:$4 sm:$0xff]   ;;  %v9450_v49 = vld [vmem:[%s13401_s1 + $0x2e0] sm:$0xff]  }
  0x60   :  { %8009 = vmatpush3.bf16.msra.mxu1 %v9387_v50  ;;  %v9414_v50 = vld [vmem:[%s13402_s0 + $0x880] ss:$108 sps:$4 sm:$0xff]  }
  0x61   :  { %8218 = vmatprep.subr.bf16.mxu1 %v9402_v57  ;;  %v9482_v57 = vld [vmem:[%s13401_s1 + $0x2d0] sm:$0xff]  }
  0x62   :  { %4471 = vmatmul.mubr.bf16.gmra.mxu0 %v9302_v27  ;;  %4600 = vmatmul.mubr.bf16.gmra.mxu1 %v9303_v28  ;;  %v9380_v27 = vld [vmem:[%s13402_s0 + $0x524] ss:$108 sps:$4 sm:$0xff]  }
  0x63   :  { %4478 = vmatprep.mubr.bf16.mxu0 %v9306_v29  ;;  %4607 = vmatprep.mubr.bf16.mxu1 %v9308_v32  ;;  %v9382_v28 = vld [vmem:[%s13402_s0 + $0xbd8] ss:$108 sps:$4 sm:$0xff]   ;;  %v9383_v29 = vld [vmem:[%s13402_s0 + $0x520] ss:$108 sps:$4 sm:$0xff]  }
  0x64   :  { %v9392_v32 = vld [vmem:[%s13402_s0 + $0xcb0] ss:$108 sps:$4 sm:$0x1f]  }
  0x6a   :  { %4479 = vmatmul.mubr.bf16.gmra.mxu0 %v9310_v33  ;;  %4608 = vmatmul.mubr.bf16.gmra.mxu1 %v9311_v34  ;;  %v9393_v33 = vld [vmem:[%s13402_s0 + $0x5f8] ss:$108 sps:$4 sm:$0xff]   ;;  %v9394_v34 = vld [vmem:[%s13402_s0 + $0x6d4] ss:$108 sps:$4 sm:$0xff]  }
  0x6b   :  { %4486 = vmatprep.mubr.bf16.mxu0 %v9314_v35  ;;  %4615 = vmatprep.mubr.bf16.mxu1 %v9316_v36  ;;  %v9398_v35 = vld [vmem:[%s13402_s0 + $0x1c] ss:$108 sps:$4 sm:$0xff]   ;;  %v9396_v36 = vld [vmem:[%s13402_s0 + $0x18] ss:$108 sps:$4 sm:$0xff]  }
  0x72   :  { %4487 = vmatmul.mubr.bf16.gmra.mxu0 %v9318_v39  ;;  %4616 = vmatmul.mubr.bf16.gmra.mxu1 %v9319_v40  ;;  %v9404_v39 = vld [vmem:[%s13402_s0 + $0x7ac] ss:$108 sps:$4 sm:$0xff]   ;;  %v9406_v40 = vld [vmem:[%s13402_s0 + $0xf4] ss:$108 sps:$4 sm:$0xff]  }
  0x73   :  { %4494 = vmatprep.mubr.bf16.mxu0 %v9324_v41  ;;  %4623 = vmatprep.mubr.bf16.mxu1 %v9326_v42  ;;  %v9418_v41 = vld [vmem:[%s13401_s1 + $0x2f0] sm:$0xff]  }
  0x74   :  { %v9419_v42 = vld [vmem:[%s13401_s1 + $0x2b0] sm:$0xff]  }
  0x7a   :  { %4495 = vmatmul.mubr.bf16.gmra.mxu0 %v9328_v45  ;;  %4624 = vmatmul.mubr.bf16.gmra.mxu1 %v9329_v46  ;;  %v9409_v45 = vld [vmem:[%s13402_s0 + $0xf0] ss:$108 sps:$4 sm:$0xff]  }
  0x7b   :  { %4631 = vmatprep.mubr.bf16.mxu1 %v9330_v47  ;;  %4728 = vmatprep.mubr.bf16.mxu0 %v9334_v48  ;;  %v9410_v46 = vld [vmem:[%s13402_s0 + $0x884] ss:$108 sps:$4 sm:$0xff]   ;;  %v9412_v47 = vld [vmem:[%s13402_s0 + $0x1cc] ss:$108 sps:$4 sm:$0xff]  }
  0x7c   :  { %v9435_v48 = vld [vmem:[%s13401_s1 + $0x2a8] sm:$0xff]  }
  0x82   :  { %4632 = vmatmul.mubr.bf16.gmra.mxu1 %v9335_v52  ;;  %4729 = vmatmul.mubr.bf16.vlgmr.msra.gmra.mxu0 %v9332_v51  ;;  %v9415_v51 = vld [vmem:[%s13402_s0 + $0x1c8] ss:$108 sps:$4 sm:$0xff]   ;;  %v9451_v52 = vld [vmem:[%s13401_s1 + $0x2a0] sm:$0xff]  }
  0x83   :  { %8107 = vmatpush3.bf16.msra.mxu0 %v9337_v53  ;;  %4639 = vmatprep.mubr.bf16.mxu1 %v9340_v54  ;;  %v9466_v53 = vld [vmem:[%s13401_s1 + $0x2d8] sm:$0xff]  }
  0x84   :  { %4736 = vmatprep.mubr.bf16.mxu0 %v9342_v55  ;;  %8108 = vmatprep.subr.bf16.mxu0 %v9352_v56  ;;  %v9420_v54 = vld [vmem:[%s13402_s0 + $0x95c] ss:$108 sps:$4 sm:$0xff]   ;;  %v9422_v55 = vld [vmem:[%s13402_s0 + $0x2a4] ss:$108 sps:$4 sm:$0xff]  }
  0x85   :  { %v9467_v56 = vld [vmem:[%s13401_s1 + $0x298] sm:$0xff]  }
  0x87   :  { %8109 = vmatpush3.bf16.msra.mxu0 %v9353_v58  ;;  %v9424_v58 = vld [vmem:[%s13402_s0 + $0x958] ss:$108 sps:$4 sm:$0xff]  }
  0x88   :  { %8110 = vmatprep.subr.bf16.mxu0 %v9368_v59  ;;  %v9425_v59 = vld [vmem:[%s13402_s0 + $0x2a0] ss:$108 sps:$4 sm:$0xff]  }
  0x8a   :  { %4640 = vmatmul.mubr.bf16.gmra.mxu1 %v9344_v60  ;;  %4737 = vmatmul.mubr.bf16.gmra.mxu0 %v9345_v61  ;;  %v9483_v60 = vld [vmem:[%s13401_s1 + $0x290] sm:$0xff]   ;;  %v9498_v61 = vld [vmem:[%s13401_s1 + $0x2c8] sm:$0xff]  }
  0x8b   :  { %4647 = vmatprep.mubr.bf16.mxu1 %v9346_v62  ;;  %4744 = vmatprep.mubr.bf16.mxu0 %v9348_v63  ;;  %v9426_v62 = vld [vmem:[%s13402_s0 + $0xa34] ss:$108 sps:$4 sm:$0xff]   ;;  %v9428_v63 = vld [vmem:[%s13402_s0 + $0x37c] ss:$108 sps:$4 sm:$0xff]  }
  0x8c   :  { %8111 = vmatpush3.bf16.msra.mxu0 %v9369_v0  ;;  %v9499_v0 = vld [vmem:[%s13401_s1 + $0x288] sm:$0xff]  }
  0x8d   :  { %8112 = vmatprep.subr.bf16.mxu0 %v9384_v1  ;;  %v9514_v1 = vld [vmem:[%s13401_s1 + $0x2c0] sm:$0xff]  }
  0x90   :  { %8113 = vmatpush3.bf16.msra.mxu0 %v9385_v3  ;;  %v9530_v3 = vld [vmem:[%s13401_s1 + $0x3f8] sm:$0xff]  }
  0x91   :  { %8114 = vmatprep.subr.bf16.mxu0 %v9400_v4  ;;  %v9430_v4 = vld [vmem:[%s13402_s0 + $0xa30] ss:$108 sps:$4 sm:$0xff]  }
  0x92   :  { %4648 = vmatmul.mubr.bf16.gmra.mxu1 %v9350_v2  ;;  %4745 = vmatmul.mubr.bf16.gmra.mxu0 %v9351_v5  ;;  %v9515_v2 = vld [vmem:[%s13401_s1 + $0x280] sm:$0xff]  }
  0x93   :  { %4655 = vmatprep.mubr.bf16.mxu1 %v9356_v6  ;;  %4752 = vmatprep.mubr.bf16.mxu0 %v9358_v7  ;;  %v9431_v5 = vld [vmem:[%s13402_s0 + $0x378] ss:$108 sps:$4 sm:$0xff]   ;;  %v9438_v7 = vld [vmem:[%s13402_s0 + $0x454] ss:$108 sps:$4 sm:$0xff]  }
  0x94   :  { %8115 = vmatpush3.bf16.msra.mxu0 %v9401_v8  ;;  %v9436_v6 = vld [vmem:[%s13402_s0 + $0xb0c] ss:$108 sps:$4 sm:$0xff]  }
  0x95   :  { %8116 = vmatprep.subr.bf16.mxu0 %v9416_v9 }
  0x98   :  { %8117 = vmatpush3.bf16.msra.mxu0 %v9417_v12  ;;  %v9440_v12 = vld [vmem:[%s13402_s0 + $0xb08] ss:$108 sps:$4 sm:$0xff]  }
  0x99   :  { %8118 = vmatprep.subr.bf16.mxu0 %v9432_v13  ;;  %v9441_v13 = vld [vmem:[%s13402_s0 + $0x450] ss:$108 sps:$4 sm:$0xff]  }
  0x9a   :  { %4656 = vmatmul.mubr.bf16.gmra.mxu1 %v9360_v10  ;;  %4753 = vmatmul.mubr.bf16.gmra.mxu0 %v9361_v11 }
  0x9b   :  { %4663 = vmatprep.mubr.bf16.mxu1 %v9362_v14  ;;  %4760 = vmatprep.mubr.bf16.mxu0 %v9364_v15 }
  0x9c   :  { %8119 = vmatpush3.bf16.msra.mxu0 %v9433_v16 }
  0x9d   :  { %8120 = vmatprep.subr.bf16.mxu0 %v9448_v20 }
  0xa0   :  { %8121 = vmatpush3.bf16.msra.mxu0 %v9449_v21 }
  0xa1   :  { %8330 = vmatprep.subr.bf16.mxu0 %v9464_v26 }
  0xa2   :  { %4664 = vmatmul.mubr.bf16.gmra.mxu1 %v9366_v17  ;;  %4761 = vmatmul.mubr.bf16.gmra.mxu0 %v9367_v18  ;;  %v9442_v18 = vld [vmem:[%s13402_s0 + $0xbe4] ss:$108 sps:$4 sm:$0xff]  }
  0xa3   :  { %4671 = vmatprep.mubr.bf16.mxu1 %v9372_v19  ;;  %4768 = vmatprep.mubr.bf16.mxu0 %v9374_v22  ;;  %v9444_v19 = vld [vmem:[%s13402_s0 + $0x52c] ss:$108 sps:$4 sm:$0xff]  }
  0xaa   :  { %4672 = vmatmul.mubr.bf16.gmra.mxu1 %v9376_v23  ;;  %4769 = vmatmul.mubr.bf16.gmra.mxu0 %v9377_v24 }
  0xab   :  { %4679 = vmatprep.mubr.bf16.mxu1 %v9378_v25  ;;  %4776 = vmatprep.mubr.bf16.mxu0 %v9380_v27 }
  0xb2   :  { %4680 = vmatmul.mubr.bf16.gmra.mxu1 %v9382_v28  ;;  %4777 = vmatmul.mubr.bf16.gmra.mxu0 %v9383_v29  ;;  %v9446_v28 = vld [vmem:[%s13402_s0 + $0xbe0] ss:$108 sps:$4 sm:$0xff]   ;;  %v9447_v29 = vld [vmem:[%s13402_s0 + $0x528] ss:$108 sps:$4 sm:$0xff]  }
  0xb3   :  { %4687 = vmatprep.mubr.bf16.mxu1 %v9388_v30  ;;  %4784 = vmatprep.mubr.bf16.mxu0 %v9390_v31 }
  0xba   :  { %4688 = vmatmul.mubr.bf16.gmra.mxu1 %v9392_v32  ;;  %4785 = vmatmul.mubr.bf16.gmra.mxu0 %v9393_v33 }
  0xbb   :  { %4792 = vmatprep.mubr.bf16.mxu0 %v9394_v34  ;;  %4889 = vmatprep.mubr.bf16.mxu1 %v9398_v35  ;;  %v9452_v34 = vld [vmem:[%s13402_s0 + $0xcbc] ss:$108 sps:$4 sm:$0x1f]   ;;  %v9454_v35 = vld [vmem:[%s13402_s0 + $0x604] ss:$108 sps:$4 sm:$0xff]  }
  0xc2   :  { %4793 = vmatmul.mubr.bf16.gmra.mxu0 %v9399_v37  ;;  %4890 = vmatmul.mubr.bf16.vlgmr.msra.gmra.mxu1 %v9396_v36 }
  0xc3   :  { %8219 = vmatpush3.bf16.msra.mxu1 %v9403_v38  ;;  %4800 = vmatprep.mubr.bf16.mxu0 %v9404_v39 }
  0xc4   :  { %4897 = vmatprep.mubr.bf16.mxu1 %v9406_v40  ;;  %8220 = vmatprep.subr.bf16.mxu1 %v9418_v41 }
  0xc7   :  { %8221 = vmatpush3.bf16.msra.mxu1 %v9419_v42 }
  0xc8   :  { %8222 = vmatprep.subr.bf16.mxu1 %v9434_v43 }
  0xca   :  { %4801 = vmatmul.mubr.bf16.gmra.mxu0 %v9408_v44  ;;  %4898 = vmatmul.mubr.bf16.gmra.mxu1 %v9409_v45  ;;  %v9456_v44 = vld [vmem:[%s13402_s0 + $0xcb8] ss:$108 sps:$4 sm:$0x1f]   ;;  %v9457_v45 = vld [vmem:[%s13402_s0 + $0x600] ss:$108 sps:$4 sm:$0xff]  }
  0xcb   :  { %4808 = vmatprep.mubr.bf16.mxu0 %v9410_v46  ;;  %4905 = vmatprep.mubr.bf16.mxu1 %v9412_v47 }
  0xcc   :  { %8223 = vmatpush3.bf16.msra.mxu1 %v9435_v48 }
  0xcd   :  { %8224 = vmatprep.subr.bf16.mxu1 %v9450_v49 }
  0xd0   :  { %8225 = vmatpush3.bf16.msra.mxu1 %v9451_v52 }
  0xd1   :  { %8226 = vmatprep.subr.bf16.mxu1 %v9466_v53 }
  0xd2   :  { %4809 = vmatmul.mubr.bf16.gmra.mxu0 %v9414_v50  ;;  %4906 = vmatmul.mubr.bf16.gmra.mxu1 %v9415_v51  ;;  %v9460_v50 = vld [vmem:[%s13402_s0 + $0x6dc] ss:$108 sps:$4 sm:$0xff]   ;;  %v9463_v51 = vld [vmem:[%s13402_s0 + $0x24] ss:$108 sps:$4 sm:$0xff]  }
  0xd3   :  { %4816 = vmatprep.mubr.bf16.mxu0 %v9420_v54  ;;  %4913 = vmatprep.mubr.bf16.mxu1 %v9422_v55 }
  0xd4   :  { %8227 = vmatpush3.bf16.msra.mxu1 %v9467_v56 }
  0xd5   :  { %8228 = vmatprep.subr.bf16.mxu1 %v9482_v57 }
  0xd8   :  { %8229 = vmatpush3.bf16.msra.mxu1 %v9483_v60  ;;  %v9458_v60 = vld [vmem:[%s13402_s0 + $0x6d8] ss:$108 sps:$4 sm:$0xff]  }
  0xd9   :  { %8230 = vmatprep.subr.bf16.mxu1 %v9498_v61  ;;  %v9461_v61 = vld [vmem:[%s13402_s0 + $0x20] ss:$108 sps:$4 sm:$0xff]  }
  0xda   :  { %4817 = vmatmul.mubr.bf16.gmra.mxu0 %v9424_v58  ;;  %4914 = vmatmul.mubr.bf16.gmra.mxu1 %v9425_v59 }
  0xdb   :  { %4824 = vmatprep.mubr.bf16.mxu0 %v9426_v62  ;;  %4921 = vmatprep.mubr.bf16.mxu1 %v9428_v63 }
  0xdc   :  { %8231 = vmatpush3.bf16.msra.mxu1 %v9499_v0 }
  0xdd   :  { %8232 = vmatprep.subr.bf16.mxu1 %v9514_v1 }
  0xe0   :  { %8233 = vmatpush3.bf16.msra.mxu1 %v9515_v2  ;;  %v9465_v2 = vld [vmem:[%s13401_s1 + $0x338] sm:$0xff]  }
  0xe1   :  { %8442 = vmatprep.subr.bf16.mxu1 %v9530_v3  ;;  %v9470_v3 = vld [vmem:[%s13402_s0 + $0x7b4] ss:$108 sps:$4 sm:$0xff]  }
  0xe2   :  { %v7674_v8 = vpop.f32.mrf.mxu0  ;;  %v7746_v9 = vpop.f32.mrf.mxu1  ;;  %4825 = vmatmul.mubr.bf16.gmra.mxu0 %v9430_v4  ;;  %4922 = vmatmul.mubr.bf16.gmra.mxu1 %v9431_v5  ;;  %v10758_v4 = vld [vmem:[%s13403_s2] ss:$0 sm:$0xff] }
  0xe3   :  { %4832 = vmatprep.mubr.bf16.mxu0 %v9436_v6  ;;  %4929 = vmatprep.mubr.bf16.mxu1 %v9438_v7  ;;  %v9473_v7 = vld [vmem:[%s13402_s0 + $0xfc] ss:$108 sps:$4 sm:$0xff]  }
  0xe4   :  { %v7675_v10 = vpop.f32.mrf.mxu0  ;;  %v7747_v11 = vpop.f32.mrf.mxu1 }
  0xe5   :  { %v10685_v14 = vadd.f32 %v7675_v10, %v7674_v8  ;;  %v10687_v15 = vadd.f32 %v7747_v11, %v7746_v9  ;;  %v9480_v8 = vld [vmem:[%s13401_s1 + $0x370] sm:$0xff]  }
  0xe6   :  { %v7677_v16 = vpop.f32.mrf.mxu0  ;;  %v7749_v17 = vpop.f32.mrf.mxu1 }
  0xe8   :  { %v7678_v20 = vpop.f32.mrf.mxu0  ;;  %v7750_v21 = vpop.f32.mrf.mxu1 }
  0xe9   :  { %v10695_v22 = vadd.f32 %v7678_v20, %v7677_v16  ;;  %v10697_v23 = vadd.f32 %v7750_v21, %v7749_v17  ;;  %v9496_v16 = vld [vmem:[%s13401_s1 + $0x368] sm:$0xff]   ;;  %v9471_v20 = vld [vmem:[%s13402_s0 + $0xf8] ss:$108 sps:$4 sm:$0xff]   ;;  %v4409_v21 = vadd.f32 %v10685_v14, %v10758_v4 }
  0xea   :  { %v7680_v24 = vpop.f32.mrf.mxu0  ;;  %v7752_v25 = vpop.f32.mrf.mxu1  ;;  %4833 = vmatmul.mubr.bf16.gmra.mxu0 %v9440_v12  ;;  %4930 = vmatmul.mubr.bf16.gmra.mxu1 %v9441_v13  ;;  %v9481_v13 = vld [vmem:[%s13401_s1 + $0x330] sm:$0xff]   ;;  %v9497_v14 = vld [vmem:[%s13401_s1 + $0x328] sm:$0xff]  }
  0xeb   :  { %4840 = vmatprep.mubr.bf16.mxu0 %v9442_v18  ;;  %4937 = vmatprep.mubr.bf16.mxu1 %v9444_v19  ;;  %v9468_v19 = vld [vmem:[%s13402_s0 + $0x7b0] ss:$108 sps:$4 sm:$0xff]  }
  0xec   :  { %v7681_v26 = vpop.f32.mrf.mxu0  ;;  %v7753_v27 = vpop.f32.mrf.mxu1 }
  0xed   :  { %v10705_v30 = vadd.f32 %v7681_v26, %v7680_v24  ;;  %v10707_v31 = vadd.f32 %v7753_v27, %v7752_v25 }
  0xee   :  { %v7683_v32 = vpop.f32.mrf.mxu0  ;;  %v7755_v33 = vpop.f32.mrf.mxu1 }
  0xf0   :  { %v7684_v36 = vpop.f32.mrf.mxu0  ;;  %v7756_v37 = vpop.f32.mrf.mxu1 }
  0xf1   :  { %v10715_v38 = vadd.f32 %v7684_v36, %v7683_v32  ;;  %v10717_v39 = vadd.f32 %v7756_v37, %v7755_v33  ;;  %v9479_v32 = vld [vmem:[%s13402_s0 + $0x1d4] ss:$108 sps:$4 sm:$0xff]   ;;  %v4412_v36 = vadd.f32 %v10695_v22, %v10758_v4 }
  0xf2   :  { %v7686_v40 = vpop.f32.mrf.mxu0  ;;  %v7758_v41 = vpop.f32.mrf.mxu1  ;;  %4841 = vmatmul.mubr.bf16.gmra.mxu0 %v9446_v28  ;;  %4938 = vmatmul.mubr.bf16.gmra.mxu1 %v9447_v29  ;;  %v9476_v29 = vld [vmem:[%s13402_s0 + $0x88c] ss:$108 sps:$4 sm:$0xff]  }
  0xf3   :  { %4848 = vmatprep.mubr.bf16.mxu0 %v9452_v34  ;;  %4945 = vmatprep.mubr.bf16.mxu1 %v9454_v35  ;;  %v9512_v35 = vld [vmem:[%s13401_s1 + $0x360] sm:$0xff]  }
  0xf4   :  { %v7687_v42 = vpop.f32.mrf.mxu0  ;;  %v7759_v43 = vpop.f32.mrf.mxu1 }
  0xf5   :  { %v10725_v46 = vadd.f32 %v7687_v42, %v7686_v40  ;;  %v10727_v47 = vadd.f32 %v7759_v43, %v7758_v41  ;;  %v9513_v43 = vld [vmem:[%s13401_s1 + $0x320] sm:$0xff]  }
  0xf6   :  { %v7689_v48 = vpop.f32.mrf.mxu0  ;;  %v7761_v49 = vpop.f32.mrf.mxu1 }
  0xf8   :  { %v7690_v52 = vpop.f32.mrf.mxu0  ;;  %v7762_v53 = vpop.f32.mrf.mxu1 }
  0xf9   :  { %v10735_v54 = vadd.f32 %v7690_v52, %v7689_v48  ;;  %v10737_v55 = vadd.f32 %v7762_v53, %v7761_v49  ;;  %v9474_v49 = vld [vmem:[%s13402_s0 + $0x888] ss:$108 sps:$4 sm:$0xff]  }
  0xfa   :  { %v7692_v56 = vpop.f32.mrf.mxu0  ;;  %v7764_v57 = vpop.f32.mrf.mxu1  ;;  %4849 = vmatmul.mubr.bf16.gmra.mxu0 %v9456_v44  ;;  %4946 = vmatmul.mubr.bf16.gmra.mxu1 %v9457_v45  ;;  %v9528_v45 = vld [vmem:[%s13401_s1 + $0x358] sm:$0xff]  }
  0xfb   :  { %4953 = vmatprep.mubr.bf16.mxu1 %v9460_v50  ;;  %5050 = vmatprep.mubr.bf16.mxu0 %v9463_v51  ;;  %v9477_v50 = vld [vmem:[%s13402_s0 + $0x1d0] ss:$108 sps:$4 sm:$0xff]   ;;  %v4417_v51 = vadd.f32 %v10705_v30, %v10758_v4 }
  0xfc   :  { %v7693_v58 = vpop.f32.mrf.mxu0  ;;  %v7765_v59 = vpop.f32.mrf.mxu1  ;;  %v9529_v30 = vld [vmem:[%s13401_s1 + $0x318] sm:$0xff]  }
  0xfd   :  { %v10745_v62 = vadd.f32 %v7693_v58, %v7692_v56  ;;  %v10747_v63 = vadd.f32 %v7765_v59, %v7764_v57  ;;  %v9486_v59 = vld [vmem:[%s13402_s0 + $0x964] ss:$108 sps:$4 sm:$0xff]  }
  0xfe   :  { %v7695_v0 = vpop.f32.mrf.mxu0  ;;  %v7767_v1 = vpop.f32.mrf.mxu1 }
 0x100   :  { %v7696_v5 = vpop.f32.mrf.mxu0  ;;  %v7768_v6 = vpop.f32.mrf.mxu1 }
 0x101   :  { %v10766_v9 = vadd.f32 %v7696_v5, %v7695_v0  ;;  %v10768_v10 = vadd.f32 %v7768_v6, %v7767_v1  ;;  %v9544_v1 = vld [vmem:[%s13401_s1 + $0x350] sm:$0xff]  }
 0x102   :  { %v7698_v11 = vpop.f32.mrf.mxu0  ;;  %v7786_v12 = vpop.f32.mrf.mxu1  ;;  %4954 = vmatmul.mubr.bf16.gmra.mxu1 %v9458_v60  ;;  %5051 = vmatmul.mubr.bf16.vlgmr.msra.gmra.mxu0 %v9461_v61  ;;  %v9489_v60 = vld [vmem:[%s13402_s0 + $0x2ac] ss:$108 sps:$4 sm:$0xff]  }
 0x103   :  { %8331 = vmatpush3.bf16.msra.mxu0 %v9465_v2  ;;  %4961 = vmatprep.mubr.bf16.mxu1 %v9470_v3  ;;  %v4420_v2 = vadd.f32 %v10715_v38, %v10758_v4  ;;  %v9560_v38 = vld [vmem:[%s13401_s1 + $0x348] sm:$0xff]  }
 0x104   :  { %v7699_v17 = vpop.f32.mrf.mxu0  ;;  %v7787_v18 = vpop.f32.mrf.mxu1  ;;  %5058 = vmatprep.mubr.bf16.mxu0 %v9473_v7  ;;  %8332 = vmatprep.subr.bf16.mxu0 %v9480_v8 }
 0x105   :  { %v10784_v24 = vadd.f32 %v7699_v17, %v7698_v11  ;;  %v7788_v25 = vadd.f32 %v7787_v18, %v7786_v12  ;;  %v9545_v11 = vld [vmem:[%s13401_s1 + $0x310] sm:$0xff]   ;;  %v4425_v18 = vadd.f32 %v10725_v46, %v10758_v4  ;;  %v9561_v46 = vld [vmem:[%s13401_s1 + $0x308] sm:$0xff]  }
 0x106   :  { %v7701_v26 = vpop.f32.mrf.mxu0  ;;  %v7789_v27 = vpop.f32.mrf.mxu1  ;;  %v9487_v17 = vld [vmem:[%s13402_s0 + $0x2a8] ss:$108 sps:$4 sm:$0xff]  }
 0x107   :  { %v10786_v28 = vadd.f32 %v7788_v25, %v4409_v21  ;;  %8333 = vmatpush3.bf16.msra.mxu0 %v9481_v13 }
 0x108   :  { %v7702_v33 = vpop.f32.mrf.mxu0  ;;  %v7790_v34 = vpop.f32.mrf.mxu1  ;;  %8334 = vmatprep.subr.bf16.mxu0 %v9496_v16  ;;  %v9484_v16 = vld [vmem:[%s13402_s0 + $0x960] ss:$108 sps:$4 sm:$0xff]  }
 0x109   :  { %v10802_v37 = vadd.f32 %v7702_v33, %v7701_v26  ;;  %v7791_v40 = vadd.f32 %v7790_v34, %v7789_v27  ;;  %v9492_v27 = vld [vmem:[%s13402_s0 + $0xa3c] ss:$108 sps:$4 sm:$0xff]   ;;  %v9576_v34 = vld [vmem:[%s13401_s1 + $0x340] sm:$0xff]  }
 0x10a   :  { %v7704_v41 = vpop.f32.mrf.mxu0  ;;  %v7792_v42 = vpop.f32.mrf.mxu1  ;;  %4962 = vmatmul.mubr.bf16.gmra.mxu1 %v9468_v19  ;;  %5059 = vmatmul.mubr.bf16.gmra.mxu0 %v9471_v20 }
 0x10b   :  { %v10807_v44 = vadd.f32 %v7791_v40, %v4412_v36  ;;  %4969 = vmatprep.mubr.bf16.mxu1 %v9476_v29  ;;  %5066 = vmatprep.mubr.bf16.mxu0 %v9479_v32  ;;  %v9495_v29 = vld [vmem:[%s13402_s0 + $0x384] ss:$108 sps:$4 sm:$0xff]  }
 0x10c   :  { %v7705_v22 = vpop.f32.mrf.mxu0  ;;  %v7793_v48 = vpop.f32.mrf.mxu1  ;;  %8335 = vmatpush3.bf16.msra.mxu0 %v9497_v14  ;;  %v4428_v14 = vadd.f32 %v10735_v54, %v10758_v4  ;;  %v9592_v54 = vld [vmem:[%s13401_s1 + $0x478] sm:$0xff]  }
 0x10d   :  { %v10820_v52 = vadd.f32 %v7705_v22, %v7704_v41  ;;  %v7794_v53 = vadd.f32 %v7793_v48, %v7792_v42  ;;  %8336 = vmatprep.subr.bf16.mxu0 %v9512_v35  ;;  %v9577_v42 = vld [vmem:[%s13401_s1 + $0x300] sm:$0xff]  }
 0x10e   :  { %v7707_v56 = vpop.f32.mrf.mxu0  ;;  %v7795_v57 = vpop.f32.mrf.mxu1  ;;  %v9490_v48 = vld [vmem:[%s13402_s0 + $0xa38] ss:$108 sps:$4 sm:$0xff]  }
 0x10f   :  { %v10822_v58 = vadd.f32 %v7794_v53, %v4417_v51 }
 0x110   :  { %v7708_v61 = vpop.f32.mrf.mxu0  ;;  %v7796_v0 = vpop.f32.mrf.mxu1  ;;  %8337 = vmatpush3.bf16.msra.mxu0 %v9513_v43 }
 0x111   :  { %v10838_v3 = vadd.f32 %v7708_v61, %v7707_v56  ;;  %v7797_v5 = vadd.f32 %v7796_v0, %v7795_v57  ;;  %8338 = vmatprep.subr.bf16.mxu0 %v9528_v45  ;;  %v9505_v61 = vld [vmem:[%s13402_s0 + $0x45c] ss:$108 sps:$4 sm:$0xff]  }
 0x112   :  { %v7710_v6 = vpop.f32.mrf.mxu0  ;;  %v7798_v7 = vpop.f32.mrf.mxu1  ;;  %4970 = vmatmul.mubr.bf16.gmra.mxu1 %v9474_v49  ;;  %5067 = vmatmul.mubr.bf16.gmra.mxu0 %v9477_v50  ;;  %v9493_v49 = vld [vmem:[%s13402_s0 + $0x380] ss:$108 sps:$4 sm:$0xff]   ;;  %v4433_v50 = vadd.f32 %v10745_v62, %v10758_v4  ;;  %v4436_v62 = vadd.f32 %v10766_v9, %v10758_v4  ;;  %v9503_v9 = vld [vmem:[%s13402_s0 + $0x458] ss:$108 sps:$4 sm:$0xff]  }
 0x113   :  { %v10840_v8 = vadd.f32 %v7797_v5, %v4420_v2  ;;  %4977 = vmatprep.mubr.bf16.mxu1 %v9486_v59  ;;  %5074 = vmatprep.mubr.bf16.mxu0 %v9489_v60  ;;  %v9502_v60 = vld [vmem:[%s13402_s0 + $0xb14] ss:$108 sps:$4 sm:$0xff]  }
 0x114   :  { %v7711_v12 = vpop.f32.mrf.mxu0  ;;  %v7799_v13 = vpop.f32.mrf.mxu1  ;;  %8339 = vmatpush3.bf16.msra.mxu0 %v9529_v30 }
 0x115   :  { %v10856_v19 = vadd.f32 %v7711_v12, %v7710_v6  ;;  %v7800_v20 = vadd.f32 %v7799_v13, %v7798_v7  ;;  %8340 = vmatprep.subr.bf16.mxu0 %v9544_v1  ;;  %v9500_v12 = vld [vmem:[%s13402_s0 + $0xb10] ss:$108 sps:$4 sm:$0xff]   ;;  %v4441_v13 = vadd.f32 %v10784_v24, %v10758_v4  ;;  %v4444_v24 = vadd.f32 %v10802_v37, %v10758_v4 }
 0x116   :  { %v7713_v21 = vpop.f32.mrf.mxu0  ;;  %v7801_v25 = vpop.f32.mrf.mxu1  ;;  %v9509_v37 = vld [vmem:[%s13402_s0 + $0x530] ss:$108 sps:$4 sm:$0xff]  }
 0x117   :  { %v10858_v26 = vadd.f32 %v7800_v20, %v4425_v18 }
 0x118   :  { %v7714_v32 = vpop.f32.mrf.mxu0  ;;  %v7802_v33 = vpop.f32.mrf.mxu1  ;;  %8341 = vmatpush3.bf16.msra.mxu0 %v9545_v11 }
 0x119   :  { %v10874_v35 = vadd.f32 %v7714_v32, %v7713_v21  ;;  %v7803_v36 = vadd.f32 %v7802_v33, %v7801_v25  ;;  %8342 = vmatprep.subr.bf16.mxu0 %v9560_v38  ;;  %v9508_v25 = vld [vmem:[%s13402_s0 + $0xbec] ss:$108 sps:$4 sm:$0xff]  }
 0x11a   :  { %v7716_v40 = vpop.f32.mrf.mxu0  ;;  %v7804_v41 = vpop.f32.mrf.mxu1  ;;  %4978 = vmatmul.mubr.bf16.gmra.mxu1 %v9484_v16  ;;  %5075 = vmatmul.mubr.bf16.gmra.mxu0 %v9487_v17 }
 0x11b   :  { %v10879_v43 = vadd.f32 %v7803_v36, %v4428_v14  ;;  %4985 = vmatprep.mubr.bf16.mxu1 %v9492_v27  ;;  %5082 = vmatprep.mubr.bf16.mxu0 %v9495_v29  ;;  %v9511_v27 = vld [vmem:[%s13402_s0 + $0x534] ss:$108 sps:$4 sm:$0xff]  }
 0x11c   :  { %v7717_v45 = vpop.f32.mrf.mxu0  ;;  %v7805_v22 = vpop.f32.mrf.mxu1  ;;  %8343 = vmatpush3.bf16.msra.mxu0 %v9561_v46 }
 0x11d   :  { %v10892_v51 = vadd.f32 %v7717_v45, %v7716_v40  ;;  %v7806_v53 = vadd.f32 %v7805_v22, %v7804_v41  ;;  %8344 = vmatprep.subr.bf16.mxu0 %v9576_v34 }
 0x11e   :  { %v7719_v56 = vpop.f32.mrf.mxu0  ;;  %v7807_v57 = vpop.f32.mrf.mxu1 }
 0x11f   :  { %v10894_v59 = vadd.f32 %v7806_v53, %v4433_v50  ;;  %v9518_v53 = vld [vmem:[%s13402_s0 + $0xcc4] ss:$108 sps:$4 sm:$0x1f]  }
 0x120   :  { %v7720_v0 = vpop.f32.mrf.mxu0  ;;  %v7808_v30 = vpop.f32.mrf.mxu1  ;;  %8345 = vmatpush3.bf16.msra.mxu0 %v9577_v42  ;;  %v9506_v42 = vld [vmem:[%s13402_s0 + $0xbe8] ss:$108 sps:$4 sm:$0xff]  }
 0x121   :  { %v10904_v1 = vadd.f32 %v7720_v0, %v7719_v56  ;;  %v7809_v2 = vadd.f32 %v7808_v30, %v7807_v57  ;;  %8554 = vmatprep.subr.bf16.mxu0 %v9592_v54  ;;  %v4449_v54 = vadd.f32 %v10820_v52, %v10758_v4  ;;  %v9521_v56 = vld [vmem:[%s13402_s0 + $0x60c] ss:$108 sps:$4 sm:$0xff]   ;;  %v4452_v52 = vadd.f32 %v10838_v3, %v10758_v4  ;;  %v9519_v3 = vld [vmem:[%s13402_s0 + $0x608] ss:$108 sps:$4 sm:$0xff]  }
 0x122   :  { %v7722_v5 = vpop.f32.mrf.mxu0  ;;  %v7810_v6 = vpop.f32.mrf.mxu1  ;;  %4986 = vmatmul.mubr.bf16.gmra.mxu1 %v9490_v48  ;;  %5083 = vmatmul.mubr.bf16.gmra.mxu0 %v9493_v49 }
 0x123   :  { %v10906_v7 = vadd.f32 %v7809_v2, %v4436_v62  ;;  %4993 = vmatprep.mubr.bf16.mxu1 %v9502_v60  ;;  %5090 = vmatprep.mubr.bf16.mxu0 %v9505_v61 }
 0x124   :  { %v7723_v11 = vpop.f32.mrf.mxu0  ;;  %v7811_v38 = vpop.f32.mrf.mxu1 }
 0x125   :  { %v10916_v16 = vadd.f32 %v7723_v11, %v7722_v5  ;;  %v7812_v17 = vadd.f32 %v7811_v38, %v7810_v6  ;;  %v9516_v11 = vld [vmem:[%s13402_s0 + $0xcc0] ss:$108 sps:$4 sm:$0x1f]   ;;  %v4457_v38 = vadd.f32 %v10856_v19, %v10758_v4  ;;  %v4460_v19 = vadd.f32 %v10874_v35, %v10758_v4  ;;  %v9525_v35 = vld [vmem:[%s13402_s0 + $0x28] ss:$108 sps:$4 sm:$0xff]  }
 0x126   :  { %v7725_v18 = vpop.f32.mrf.mxu0  ;;  %v7813_v20 = vpop.f32.mrf.mxu1 }
 0x127   :  { %v10918_v21 = vadd.f32 %v7812_v17, %v4441_v13 }
 0x128   :  { %v7726_v29 = vpop.f32.mrf.mxu0  ;;  %v7814_v32 = vpop.f32.mrf.mxu1 }
 0x129   :  { %v10928_v33 = vadd.f32 %v7726_v29, %v7725_v18  ;;  %v7815_v46 = vadd.f32 %v7814_v32, %v7813_v20  ;;  %v9524_v20 = vld [vmem:[%s13402_s0 + $0x6e4] ss:$108 sps:$4 sm:$0xff]  }
 0x12a   :  { %v7728_v34 = vpop.f32.mrf.mxu0  ;;  %v7816_v14 = vpop.f32.mrf.mxu1  ;;  %4994 = vmatmul.mubr.bf16.gmra.mxu1 %v9500_v12  ;;  %5091 = vmatmul.mubr.bf16.gmra.mxu0 %v9503_v9 }
 0x12b   :  { %v10930_v36 = vadd.f32 %v7815_v46, %v4444_v24  ;;  %5001 = vmatprep.mubr.bf16.mxu1 %v9508_v25  ;;  %5098 = vmatprep.mubr.bf16.mxu0 %v9511_v27  ;;  %v9527_v25 = vld [vmem:[%s13402_s0 + $0x2c] ss:$108 sps:$4 sm:$0xff]  }
 0x12c   :  { %v7729_v40 = vpop.f32.mrf.mxu0  ;;  %v7817_v41 = vpop.f32.mrf.mxu1 }
 0x12d   :  { %v10940_v45 = vadd.f32 %v7729_v40, %v7728_v34  ;;  %v7818_v22 = vadd.f32 %v7817_v41, %v7816_v14 }
 0x12e   :  { %v7731_v48 = vpop.f32.mrf.mxu0  ;;  %v7819_v49 = vpop.f32.mrf.mxu1 }
 0x12f   :  { %v10942_v50 = vadd.f32 %v7818_v22, %v4449_v54 }
 0x130   :  { %v7732_v57 = vpop.f32.mrf.mxu0  ;;  %v7820_v60 = vpop.f32.mrf.mxu1 }
 0x131   :  { %v10952_v61 = vadd.f32 %v7732_v57, %v7731_v48  ;;  %v7821_v0 = vadd.f32 %v7820_v60, %v7819_v49  ;;  %v9534_v57 = vld [vmem:[%s13402_s0 + $0x7bc] ss:$108 sps:$4 sm:$0xff]  }
 0x132   :  { %v7734_v30 = vpop.f32.mrf.mxu0  ;;  %v7822_v62 = vpop.f32.mrf.mxu1  ;;  %5002 = vmatmul.mubr.bf16.gmra.mxu1 %v9506_v42  ;;  %5099 = vmatmul.mubr.bf16.gmra.mxu0 %v9509_v37  ;;  %v9522_v42 = vld [vmem:[%s13402_s0 + $0x6e0] ss:$108 sps:$4 sm:$0xff]   ;;  %v4465_v37 = vadd.f32 %v10892_v51, %v10758_v4  ;;  %v9537_v51 = vld [vmem:[%s13402_s0 + $0x104] ss:$108 sps:$4 sm:$0xff]  }
 0x133   :  { %v10954_v2 = vadd.f32 %v7821_v0, %v4452_v52  ;;  %5009 = vmatprep.mubr.bf16.mxu1 %v9518_v53  ;;  %5106 = vmatprep.mubr.bf16.mxu0 %v9521_v56  ;;  %v9531_v56 = vld [vmem:[%s13401_s1 + $0x3b8] sm:$0xff]   ;;  %v9546_v0 = vld [vmem:[%s13401_s1 + $0x3f0] sm:$0xff]  }
 0x134   :  { %v7735_v5 = vpop.f32.mrf.mxu0  ;;  %v7823_v6 = vpop.f32.mrf.mxu1 }
 0x135   :  { %v10964_v12 = vadd.f32 %v7735_v5, %v7734_v30  ;;  %v7824_v9 = vadd.f32 %v7823_v6, %v7822_v62  ;;  %v4468_v30 = vadd.f32 %v10904_v1, %v10758_v4 }
 0x136   :  { %v7737_v13 = vpop.f32.mrf.mxu0  ;;  %v7825_v17 = vpop.f32.mrf.mxu1 }
 0x137   :  { %v10966_v18 = vadd.f32 %v7824_v9, %v4457_v38  ;;  %v9547_v38 = vld [vmem:[%s13401_s1 + $0x3b0] sm:$0xff]   ;;  %v9562_v9 = vld [vmem:[%s13401_s1 + $0x3e8] sm:$0xff]  }
 0x138   :  { %v7738_v27 = vpop.f32.mrf.mxu0  ;;  %v7826_v29 = vpop.f32.mrf.mxu1 }
 0x139   :  { %v10976_v32 = vadd.f32 %v7738_v27, %v7737_v13  ;;  %v7827_v24 = vadd.f32 %v7826_v29, %v7825_v17  ;;  %v9532_v17 = vld [vmem:[%s13402_s0 + $0x7b8] ss:$108 sps:$4 sm:$0xff]  }
 0x13a   :  { %v7740_v46 = vpop.f32.mrf.mxu0  ;;  %v7828_v34 = vpop.f32.mrf.mxu1  ;;  %5010 = vmatmul.mubr.bf16.gmra.mxu1 %v9516_v11  ;;  %5107 = vmatmul.mubr.bf16.gmra.mxu0 %v9519_v3 }
 0x13b   :  { %v10978_v14 = vadd.f32 %v7827_v24, %v4460_v19  ;;  %5114 = vmatprep.mubr.bf16.mxu0 %v9524_v20  ;;  %5211 = vmatprep.mubr.bf16.mxu1 %v9527_v25  ;;  %v9535_v20 = vld [vmem:[%s13402_s0 + $0x100] ss:$108 sps:$4 sm:$0xff]   ;;  %v4473_v25 = vadd.f32 %v10916_v16, %v10758_v4 }
 0x13c   :  { %v7741_v40 = vpop.f32.mrf.mxu0  ;;  %v7829_v41 = vpop.f32.mrf.mxu1 }
 0x13d   :  { %v10988_v54 = vadd.f32 %v7741_v40, %v7740_v46  ;;  %v7830_v22 = vadd.f32 %v7829_v41, %v7828_v34  ;;  %v9540_v40 = vld [vmem:[%s13402_s0 + $0x894] ss:$108 sps:$4 sm:$0xff]   ;;  %v9543_v41 = vld [vmem:[%s13402_s0 + $0x1dc] ss:$108 sps:$4 sm:$0xff]  }
 0x13e   :  { %v7743_v48 = vpop.f32.mrf.mxu0  ;;  %v7831_v49 = vpop.f32.mrf.mxu1 }
 0x13f   :  { %v10990_v53 = vadd.f32 %v7830_v22, %v4465_v37  ;;  %v4476_v37 = vadd.f32 %v10928_v33, %v10758_v4  ;;  %v9594_v33 = vld [vmem:[%s13401_s1 + $0x3d8] sm:$0xff]  }
 0x140   :  { %v7744_v60 = vpop.f32.mrf.mxu0  ;;  %v7832_v52 = vpop.f32.mrf.mxu1 }
 0x141   :  { %v11006_v62 = vadd.f32 %v7744_v60, %v7743_v48  ;;  %v7833_v5 = vadd.f32 %v7832_v52, %v7831_v49 }
 0x142   :  { %v7834_v6 = vpop.f32.mrf.mxu1  ;;  %v7898_v11 = vpop.f32.mrf.mxu0  ;;  %5115 = vmatmul.mubr.bf16.gmra.mxu0 %v9522_v42  ;;  %5212 = vmatmul.mubr.bf16.vlgmr.msra.gmra.mxu1 %v9525_v35  ;;  %v9563_v35 = vld [vmem:[%s13401_s1 + $0x3a8] sm:$0xff]  }
 0x143   :  { %v11008_v3 = vadd.f32 %v7833_v5, %v4468_v30  ;;  %8443 = vmatpush3.bf16.msra.mxu1 %v9531_v56  ;;  %5122 = vmatprep.mubr.bf16.mxu0 %v9534_v57  ;;  %v9579_v57 = vld [vmem:[%s13401_s1 + $0x3a0] sm:$0xff]   ;;  %v9538_v30 = vld [vmem:[%s13402_s0 + $0x890] ss:$108 sps:$4 sm:$0xff]  }
 0x144   :  { %v7835_v1 = vpop.f32.mrf.mxu1  ;;  %v7899_v13 = vpop.f32.mrf.mxu0  ;;  %5219 = vmatprep.mubr.bf16.mxu1 %v9537_v51  ;;  %8444 = vmatprep.subr.bf16.mxu1 %v9546_v0  ;;  %v9541_v5 = vld [vmem:[%s13402_s0 + $0x1d8] ss:$108 sps:$4 sm:$0xff]  }
 0x145   :  { %v7836_v27 = vadd.f32 %v7835_v1, %v7834_v6  ;;  %v7900_v29 = vadd.f32 %v7899_v13, %v7898_v11 }
 0x146   :  { %v7837_v19 = vpop.f32.mrf.mxu1  ;;  %v7901_v24 = vpop.f32.mrf.mxu0 }
 0x147   :  { %v11024_v46 = vadd.f32 %v7836_v27, %v4473_v25  ;;  %v11027_v34 = vadd.f32 %v7900_v29, %v10786_v28  ;;  %8445 = vmatpush3.bf16.msra.mxu1 %v9547_v38  ;;  %v9578_v28 = vld [vmem:[%s13401_s1 + $0x3e0] sm:$0xff]   ;;  %v9595_v27 = vld [vmem:[%s13401_s1 + $0x398] sm:$0xff]   ;;  %v4484_v29 = vadd.f32 %v10952_v61, %v10758_v4  ;;  %v9626_v61 = vld [vmem:[%s13401_s1 + $0x3c8] sm:$0xff]  }
 0x148   :  { %v7838_v42 = vpop.f32.mrf.mxu1  ;;  %v7902_v16 = vpop.f32.mrf.mxu0  ;;  %8446 = vmatprep.subr.bf16.mxu1 %v9562_v9 }
 0x149   :  { %v7839_v22 = vadd.f32 %v7838_v42, %v7837_v19  ;;  %v7903_v48 = vadd.f32 %v7902_v16, %v7901_v24 }
 0x14a   :  { %v7840_v49 = vpop.f32.mrf.mxu1  ;;  %v7904_v56 = vpop.f32.mrf.mxu0  ;;  %5123 = vmatmul.mubr.bf16.gmra.mxu0 %v9532_v17  ;;  %5220 = vmatmul.mubr.bf16.gmra.mxu1 %v9535_v20  ;;  %v9550_v17 = vld [vmem:[%s13402_s0 + $0x96c] ss:$108 sps:$4 sm:$0xff]   ;;  %v9553_v20 = vld [vmem:[%s13402_s0 + $0x2b4] ss:$108 sps:$4 sm:$0xff]  }
 0x14b   :  { %v11046_v60 = vadd.f32 %v7839_v22, %v4476_v37  ;;  %v11049_v52 = vadd.f32 %v7903_v48, %v10807_v44  ;;  %5130 = vmatprep.mubr.bf16.mxu0 %v9540_v40  ;;  %5227 = vmatprep.mubr.bf16.mxu1 %v9543_v41  ;;  %v4481_v44 = vadd.f32 %v10940_v45, %v10758_v4  ;;  %v9548_v22 = vld [vmem:[%s13402_s0 + $0x968] ss:$108 sps:$4 sm:$0xff]  }
 0x14c   :  { %v7841_v51 = vpop.f32.mrf.mxu1  ;;  %v7905_v0 = vpop.f32.mrf.mxu0  ;;  %8447 = vmatpush3.bf16.msra.mxu1 %v9563_v35  ;;  %v9611_v35 = vld [vmem:[%s13401_s1 + $0x390] sm:$0xff]   ;;  %v4489_v48 = vadd.f32 %v10964_v12, %v10758_v4  ;;  %v9627_v12 = vld [vmem:[%s13401_s1 + $0x388] sm:$0xff]  }
 0x14d   :  { %v7842_v6 = vadd.f32 %v7841_v51, %v7840_v49  ;;  %v7906_v11 = vadd.f32 %v7905_v0, %v7904_v56  ;;  %8448 = vmatprep.subr.bf16.mxu1 %v9578_v28 }
 0x14e   :  { %v7843_v38 = vpop.f32.mrf.mxu1  ;;  %v7907_v9 = vpop.f32.mrf.mxu0 }
 0x14f   :  { %v11062_v1 = vadd.f32 %v7842_v6, %v4481_v44  ;;  %v11065_v13 = vadd.f32 %v7906_v11, %v10822_v58  ;;  %v9610_v58 = vld [vmem:[%s13401_s1 + $0x3d0] sm:$0xff]   ;;  %v11120_v6 = vld [vmem:[%s13403_s2] ss:$0 sm:$0xff] }
 0x150   :  { %v7844_v25 = vpop.f32.mrf.mxu1  ;;  %v7908_v45 = vpop.f32.mrf.mxu0  ;;  %8449 = vmatpush3.bf16.msra.mxu1 %v9579_v57  ;;  %v4492_v11 = vadd.f32 %v11120_v6, %v10976_v32  ;;  %v9658_v32 = vld [vmem:[%s13401_s1 + $0x4f8] sm:$0xff]  }
 0x151   :  { %v7845_v19 = vadd.f32 %v7844_v25, %v7843_v38  ;;  %v7909_v24 = vadd.f32 %v7908_v45, %v7907_v9  ;;  %8450 = vmatprep.subr.bf16.mxu1 %v9594_v33  ;;  %v9643_v25 = vld [vmem:[%s13401_s1 + $0x380] sm:$0xff]  }
 0x152   :  { %v7846_v40 = vpop.f32.mrf.mxu1  ;;  %v7910_v41 = vpop.f32.mrf.mxu0  ;;  %5131 = vmatmul.mubr.bf16.gmra.mxu0 %v9538_v30  ;;  %5228 = vmatmul.mubr.bf16.gmra.mxu1 %v9541_v5  ;;  %v9556_v30 = vld [vmem:[%s13402_s0 + $0xa44] ss:$108 sps:$4 sm:$0xff]   ;;  %v9559_v5 = vld [vmem:[%s13402_s0 + $0x38c] ss:$108 sps:$4 sm:$0xff]  }
 0x153   :  { %v11081_v42 = vadd.f32 %v7845_v19, %v4484_v29  ;;  %v11084_v16 = vadd.f32 %v7909_v24, %v10840_v8  ;;  %5138 = vmatprep.mubr.bf16.mxu0 %v9550_v17  ;;  %5235 = vmatprep.mubr.bf16.mxu1 %v9553_v20  ;;  %v9551_v8 = vld [vmem:[%s13402_s0 + $0x2b0] ss:$108 sps:$4 sm:$0xff]   ;;  %v9554_v19 = vld [vmem:[%s13402_s0 + $0xa40] ss:$108 sps:$4 sm:$0xff]   ;;  %v9557_v24 = vld [vmem:[%s13402_s0 + $0x388] ss:$108 sps:$4 sm:$0xff]  }
 0x154   :  { %v7847_v28 = vpop.f32.mrf.mxu1  ;;  %v7911_v37 = vpop.f32.mrf.mxu0  ;;  %8451 = vmatpush3.bf16.msra.mxu1 %v9595_v27 }
 0x155   :  { %v7848_v49 = vadd.f32 %v7847_v28, %v7846_v40  ;;  %v7912_v56 = vadd.f32 %v7911_v37, %v7910_v41  ;;  %8452 = vmatprep.subr.bf16.mxu1 %v9610_v58 }
 0x156   :  { %v7849_v57 = vpop.f32.mrf.mxu1  ;;  %v7913_v33 = vpop.f32.mrf.mxu0 }
 0x157   :  { %v11100_v51 = vadd.f32 %v7848_v49, %v4489_v48  ;;  %v11103_v0 = vadd.f32 %v7912_v56, %v10858_v26  ;;  %v9642_v26 = vld [vmem:[%s13401_s1 + $0x3c0] sm:$0xff]   ;;  %v4500_v49 = vadd.f32 %v11120_v6, %v11006_v62 }
 0x158   :  { %v7850_v44 = vpop.f32.mrf.mxu1  ;;  %v7914_v4 = vpop.f32.mrf.mxu0  ;;  %8453 = vmatpush3.bf16.msra.mxu1 %v9611_v35  ;;  %v9564_v62 = vld [vmem:[%s13402_s0 + $0xb18] ss:$108 sps:$4 sm:$0xff]  }
 0x159   :  { %v7851_v38 = vadd.f32 %v7850_v44, %v7849_v57  ;;  %v7915_v9 = vadd.f32 %v7914_v4, %v7913_v33  ;;  %8454 = vmatprep.subr.bf16.mxu1 %v9626_v61 }
 0x15a   :  { %v7852_v17 = vpop.f32.mrf.mxu1  ;;  %v7916_v20 = vpop.f32.mrf.mxu0  ;;  %5139 = vmatmul.mubr.bf16.gmra.mxu0 %v9548_v22  ;;  %5236 = vmatmul.mubr.bf16.gmra.mxu1 %v9551_v8  ;;  %v9566_v22 = vld [vmem:[%s13402_s0 + $0xb1c] ss:$108 sps:$4 sm:$0xff]   ;;  %v9569_v8 = vld [vmem:[%s13402_s0 + $0x464] ss:$108 sps:$4 sm:$0xff]  }
 0x15b   :  { %v11127_v45 = vadd.f32 %v7851_v38, %v4492_v11  ;;  %v11130_v27 = vadd.f32 %v7915_v9, %v10879_v43  ;;  %5146 = vmatprep.mubr.bf16.mxu0 %v9556_v30  ;;  %5243 = vmatprep.mubr.bf16.mxu1 %v9559_v5  ;;  %v4497_v43 = vadd.f32 %v11120_v6, %v10988_v54 }
 0x15c   :  { %v7853_v58 = vpop.f32.mrf.mxu1  ;;  %v7917_v29 = vpop.f32.mrf.mxu0  ;;  %8455 = vmatpush3.bf16.msra.mxu1 %v9627_v12  ;;  %v9567_v12 = vld [vmem:[%s13402_s0 + $0x460] ss:$108 sps:$4 sm:$0xff]  }
 0x15d   :  { %v7854_v40 = vadd.f32 %v7853_v58, %v7852_v17  ;;  %v7918_v41 = vadd.f32 %v7917_v29, %v7916_v20  ;;  %8456 = vmatprep.subr.bf16.mxu1 %v9642_v26  ;;  %v4505_v26 = vadd.f32 %v11120_v6, %v10687_v15  ;;  %v4508_v15 = vadd.f32 %v11120_v6, %v10697_v23  ;;  %v9573_v23 = vld [vmem:[%s13402_s0 + $0x538] ss:$108 sps:$4 sm:$0xff]  }
 0x15e   :  { %v7855_v35 = vpop.f32.mrf.mxu1  ;;  %v7919_v61 = vpop.f32.mrf.mxu0 }
 0x15f   :  { %v11143_v28 = vadd.f32 %v7854_v40, %v4497_v43  ;;  %v11146_v37 = vadd.f32 %v7918_v41, %v10894_v59 }
 0x160   :  { %v7856_v48 = vpop.f32.mrf.mxu1  ;;  %v7920_v54 = vpop.f32.mrf.mxu0  ;;  %8457 = vmatpush3.bf16.msra.mxu1 %v9643_v25  ;;  %v9572_v25 = vld [vmem:[%s13402_s0 + $0xbf4] ss:$108 sps:$4 sm:$0xff]  }
 0x161   :  { %v7857_v56 = vadd.f32 %v7856_v48, %v7855_v35  ;;  %v7921_v57 = vadd.f32 %v7920_v54, %v7919_v61  ;;  %8666 = vmatprep.subr.bf16.mxu1 %v9658_v32  ;;  %v9575_v32 = vld [vmem:[%s13402_s0 + $0x53c] ss:$108 sps:$4 sm:$0xff]  }
 0x162   :  { %v7858_v33 = vpop.f32.mrf.mxu1  ;;  %v7922_v59 = vpop.f32.mrf.mxu0  ;;  %5147 = vmatmul.mubr.bf16.gmra.mxu0 %v9554_v19  ;;  %5244 = vmatmul.mubr.bf16.gmra.mxu1 %v9557_v24 }
 0x163   :  { %v11156_v30 = vadd.f32 %v7857_v56, %v4500_v49  ;;  %v11159_v5 = vadd.f32 %v7921_v57, %v10906_v7  ;;  %5154 = vmatprep.mubr.bf16.mxu0 %v9566_v22  ;;  %5251 = vmatprep.mubr.bf16.mxu1 %v9569_v8  ;;  %v9570_v22 = vld [vmem:[%s13402_s0 + $0xbf0] ss:$108 sps:$4 sm:$0xff]   ;;  %v4513_v8 = vadd.f32 %v11120_v6, %v10707_v31 }
 0x164   :  { %v7859_v44 = vpop.f32.mrf.mxu1  ;;  %v7923_v4 = vpop.f32.mrf.mxu0  ;;  %v4516_v31 = vadd.f32 %v11120_v6, %v10717_v39  ;;  %v9583_v39 = vld [vmem:[%s13402_s0 + $0x610] ss:$108 sps:$4 sm:$0xff]  }
 0x165   :  { %v7860_v11 = vadd.f32 %v7859_v44, %v7858_v33  ;;  %v7924_v38 = vadd.f32 %v7923_v4, %v7922_v59  ;;  %v9582_v33 = vld [vmem:[%s13402_s0 + $0xccc] ss:$108 sps:$4 sm:$0x1f]   ;;  %v9585_v59 = vld [vmem:[%s13402_s0 + $0x614] ss:$108 sps:$4 sm:$0xff]  }
 0x166   :  { %v7861_v9 = vpop.f32.mrf.mxu1  ;;  %v7925_v7 = vpop.f32.mrf.mxu0 }
 0x167   :  { %v11169_v17 = vadd.f32 %v7860_v11, %v4505_v26  ;;  %v11172_v20 = vadd.f32 %v7924_v38, %v10918_v21 }
 0x168   :  { %v7862_v58 = vpop.f32.mrf.mxu1  ;;  %v7926_v29 = vpop.f32.mrf.mxu0 }
 0x169   :  { %v7863_v19 = vadd.f32 %v7862_v58, %v7861_v9  ;;  %v7927_v24 = vadd.f32 %v7926_v29, %v7925_v7 }
 0x16a   :  { %v7864_v43 = vpop.f32.mrf.mxu1  ;;  %v7928_v40 = vpop.f32.mrf.mxu0  ;;  %5155 = vmatmul.mubr.bf16.gmra.mxu0 %v9564_v62  ;;  %5252 = vmatmul.mubr.bf16.gmra.mxu1 %v9567_v12 }
 0x16b   :  { %v11182_v21 = vadd.f32 %v7863_v19, %v4508_v15  ;;  %v11185_v41 = vadd.f32 %v7927_v24, %v10930_v36  ;;  %5162 = vmatprep.mubr.bf16.mxu0 %v9572_v25  ;;  %5259 = vmatprep.mubr.bf16.mxu1 %v9575_v32  ;;  %v9580_v25 = vld [vmem:[%s13402_s0 + $0xcc8] ss:$108 sps:$4 sm:$0x1f]   ;;  %v4521_v32 = vadd.f32 %v11120_v6, %v10727_v47 }
 0x16c   :  { %v7865_v35 = vpop.f32.mrf.mxu1  ;;  %v7929_v61 = vpop.f32.mrf.mxu0  ;;  %v4524_v47 = vadd.f32 %v11120_v6, %v10737_v55  ;;  %v9589_v55 = vld [vmem:[%s13402_s0 + $0x30] ss:$108 sps:$4 sm:$0xff]  }
 0x16d   :  { %v7866_v48 = vadd.f32 %v7865_v35, %v7864_v43  ;;  %v7930_v54 = vadd.f32 %v7929_v61, %v7928_v40  ;;  %v9588_v43 = vld [vmem:[%s13402_s0 + $0x6ec] ss:$108 sps:$4 sm:$0xff]   ;;  %v9591_v40 = vld [vmem:[%s13402_s0 + $0x34] ss:$108 sps:$4 sm:$0xff]  }
 0x16e   :  { %v7867_v49 = vpop.f32.mrf.mxu1  ;;  %v7931_v36 = vpop.f32.mrf.mxu0 }
 0x16f   :  { %v11195_v56 = vadd.f32 %v7866_v48, %v4513_v8  ;;  %v11198_v57 = vadd.f32 %v7930_v54, %v10942_v50 }
 0x170   :  { %v7868_v44 = vpop.f32.mrf.mxu1  ;;  %v7932_v4 = vpop.f32.mrf.mxu0 }
 0x171   :  { %v7869_v62 = vadd.f32 %v7868_v44, %v7867_v49  ;;  %v7933_v12 = vadd.f32 %v7932_v4, %v7931_v36 }
 0x172   :  { %v7870_v26 = vpop.f32.mrf.mxu1  ;;  %v7934_v11 = vpop.f32.mrf.mxu0  ;;  %5163 = vmatmul.mubr.bf16.gmra.mxu0 %v9570_v22  ;;  %5260 = vmatmul.mubr.bf16.gmra.mxu1 %v9573_v23 }
 0x173   :  { %v11208_v50 = vadd.f32 %v7869_v62, %v4516_v31  ;;  %v11211_v38 = vadd.f32 %v7933_v12, %v10954_v2  ;;  %5170 = vmatprep.mubr.bf16.mxu0 %v9582_v33  ;;  %5267 = vmatprep.mubr.bf16.mxu1 %v9585_v59  ;;  %v9586_v33 = vld [vmem:[%s13402_s0 + $0x6e8] ss:$108 sps:$4 sm:$0xff]   ;;  %v4529_v59 = vadd.f32 %v11120_v6, %v10747_v63  ;;  %v9601_v63 = vld [vmem:[%s13402_s0 + $0x10c] ss:$108 sps:$4 sm:$0xff]  }
 0x174   :  { %v7871_v9 = vpop.f32.mrf.mxu1  ;;  %v7935_v7 = vpop.f32.mrf.mxu0 }
 0x175   :  { %v7872_v58 = vadd.f32 %v7871_v9, %v7870_v26  ;;  %v7936_v29 = vadd.f32 %v7935_v7, %v7934_v11  ;;  %v9593_v26 = vld [vmem:[%s13401_s1 + $0x438] sm:$0xff]   ;;  %v9598_v11 = vld [vmem:[%s13402_s0 + $0x7c4] ss:$108 sps:$4 sm:$0xff]  }
 0x176   :  { %v7873_v15 = vpop.f32.mrf.mxu1  ;;  %v7937_v2 = vpop.f32.mrf.mxu0 }
 0x177   :  { %v11221_v19 = vadd.f32 %v7872_v58, %v4521_v32  ;;  %v11224_v24 = vadd.f32 %v7936_v29, %v10966_v18 }
 0x178   :  { %v7874_v35 = vpop.f32.mrf.mxu1  ;;  %v7938_v61 = vpop.f32.mrf.mxu0 }
 0x179   :  { %v7875_v22 = vadd.f32 %v7874_v35, %v7873_v15  ;;  %v7939_v23 = vadd.f32 %v7938_v61, %v7937_v2  ;;  %v9596_v35 = vld [vmem:[%s13402_s0 + $0x7c0] ss:$108 sps:$4 sm:$0xff]  }
 0x17a   :  { %v7876_v8 = vpop.f32.mrf.mxu1  ;;  %v7940_v48 = vpop.f32.mrf.mxu0  ;;  %5171 = vmatmul.mubr.bf16.gmra.mxu0 %v9580_v25  ;;  %5268 = vmatmul.mubr.bf16.gmra.mxu1 %v9583_v39  ;;  %v9608_v25 = vld [vmem:[%s13401_s1 + $0x470] sm:$0xff]  }
 0x17b   :  { %v11234_v18 = vadd.f32 %v7875_v22, %v4524_v47  ;;  %v11237_v54 = vadd.f32 %v7939_v23, %v10978_v14  ;;  %5275 = vmatprep.mubr.bf16.mxu1 %v9588_v43  ;;  %5372 = vmatprep.mubr.bf16.mxu0 %v9591_v40  ;;  %v9609_v43 = vld [vmem:[%s13401_s1 + $0x430] sm:$0xff]  }
 0x17c   :  { %v7877_v49 = vpop.f32.mrf.mxu1  ;;  %v7941_v36 = vpop.f32.mrf.mxu0 }
 0x17d   :  { %v7878_v44 = vadd.f32 %v7877_v49, %v7876_v8  ;;  %v7942_v4 = vadd.f32 %v7941_v36, %v7940_v48  ;;  %v9604_v49 = vld [vmem:[%s13402_s0 + $0x89c] ss:$108 sps:$4 sm:$0xff]   ;;  %v9607_v36 = vld [vmem:[%s13402_s0 + $0x1e4] ss:$108 sps:$4 sm:$0xff]  }
 0x17e   :  { %v7879_v31 = vpop.f32.mrf.mxu1  ;;  %v7943_v14 = vpop.f32.mrf.mxu0 }
 0x17f   :  { %v11247_v62 = vadd.f32 %v7878_v44, %v4529_v59  ;;  %v11250_v12 = vadd.f32 %v7942_v4, %v10990_v53  ;;  %v4532_v53 = vadd.f32 %v11120_v6, %v10768_v10  ;;  %v9624_v10 = vld [vmem:[%s13401_s1 + $0x468] sm:$0xff]  }
 0x180   :  { %v7880_v9 = vpop.f32.mrf.mxu1  ;;  %v7944_v7 = vpop.f32.mrf.mxu0 }
 0x181   :  { %v7881_v39 = vadd.f32 %v7880_v9, %v7879_v31  ;;  %v7945_v32 = vadd.f32 %v7944_v7, %v7943_v14  ;;  %v9641_v14 = vld [vmem:[%s13401_s1 + $0x420] sm:$0xff]   ;;  %v9656_v9 = vld [vmem:[%s13401_s1 + $0x458] sm:$0xff]  }
 0x182   :  { %v7946_v58 = vpop.f32.mrf.mxu0  ;;  %v8010_v29 = vpop.f32.mrf.mxu1  ;;  %5276 = vmatmul.mubr.bf16.gmra.mxu1 %v9586_v33  ;;  %5373 = vmatmul.mubr.bf16.vlgmr.msra.gmra.mxu0 %v9589_v55 }
 0x183   :  { %v11266_v15 = vadd.f32 %v7881_v39, %v4532_v53  ;;  %v11269_v2 = vadd.f32 %v7945_v32, %v11008_v3  ;;  %8555 = vmatpush3.bf16.msra.mxu0 %v9593_v26  ;;  %5283 = vmatprep.mubr.bf16.mxu1 %v9598_v11  ;;  %v9599_v3 = vld [vmem:[%s13402_s0 + $0x108] ss:$108 sps:$4 sm:$0xff]  }
 0x184   :  { %v7947_v6 = vpop.f32.mrf.mxu0  ;;  %v8011_v40 = vpop.f32.mrf.mxu1  ;;  %5380 = vmatprep.mubr.bf16.mxu0 %v9601_v63  ;;  %8556 = vmatprep.subr.bf16.mxu0 %v9608_v25  ;;  %v9602_v25 = vld [vmem:[%s13402_s0 + $0x898] ss:$108 sps:$4 sm:$0xff]  }
 0x185   :  { %v7948_v61 = vadd.f32 %v7947_v6, %v7946_v58  ;;  %v8012_v47 = vadd.f32 %v8011_v40, %v8010_v29 }
 0x186   :  { %v7949_v22 = vpop.f32.mrf.mxu0  ;;  %v8013_v23 = vpop.f32.mrf.mxu1 }
 0x187   :  { %v11284_v8 = vadd.f32 %v7948_v61, %v11024_v46  ;;  %v11287_v48 = vadd.f32 %v8012_v47, %v11027_v34  ;;  %8557 = vmatpush3.bf16.msra.mxu0 %v9609_v43  ;;  %v9625_v46 = vld [vmem:[%s13401_s1 + $0x428] sm:$0xff]   ;;  %v9640_v34 = vld [vmem:[%s13401_s1 + $0x460] sm:$0xff]  }
 0x188   :  { %v7950_v33 = vpop.f32.mrf.mxu0  ;;  %v8014_v55 = vpop.f32.mrf.mxu1  ;;  %8558 = vmatprep.subr.bf16.mxu0 %v9624_v10  ;;  %v9614_v43 = vld [vmem:[%s13402_s0 + $0x974] ss:$108 sps:$4 sm:$0xff]   ;;  %v9617_v10 = vld [vmem:[%s13402_s0 + $0x2bc] ss:$108 sps:$4 sm:$0xff]  }
 0x189   :  { %v7951_v59 = vadd.f32 %v7950_v33, %v7949_v22  ;;  %v8015_v44 = vadd.f32 %v8014_v55, %v8013_v23 }
 0x18a   :  { %v7952_v4 = vpop.f32.mrf.mxu0  ;;  %v8016_v31 = vpop.f32.mrf.mxu1  ;;  %5284 = vmatmul.mubr.bf16.gmra.mxu1 %v9596_v35  ;;  %5381 = vmatmul.mubr.bf16.gmra.mxu0 %v9599_v3  ;;  %v9657_v35 = vld [vmem:[%s13401_s1 + $0x418] sm:$0xff]  }
 0x18b   :  { %v11305_v26 = vadd.f32 %v7951_v59, %v11046_v60  ;;  %v11308_v11 = vadd.f32 %v8015_v44, %v11049_v52  ;;  %5291 = vmatprep.mubr.bf16.mxu1 %v9604_v49  ;;  %5388 = vmatprep.mubr.bf16.mxu0 %v9607_v36  ;;  %v9605_v60 = vld [vmem:[%s13402_s0 + $0x1e0] ss:$108 sps:$4 sm:$0xff]   ;;  %v9673_v49 = vld [vmem:[%s13401_s1 + $0x410] sm:$0xff]  }
 0x18c   :  { %v7953_v7 = vpop.f32.mrf.mxu0  ;;  %v8017_v63 = vpop.f32.mrf.mxu1  ;;  %8559 = vmatpush3.bf16.msra.mxu0 %v9625_v46  ;;  %v9688_v36 = vld [vmem:[%s13401_s1 + $0x448] sm:$0xff]  }
 0x18d   :  { %v7954_v53 = vadd.f32 %v7953_v7, %v7952_v4  ;;  %v8018_v52 = vadd.f32 %v8017_v63, %v8016_v31  ;;  %8560 = vmatprep.subr.bf16.mxu0 %v9640_v34 }
 0x18e   :  { %v7955_v39 = vpop.f32.mrf.mxu0  ;;  %v8019_v32 = vpop.f32.mrf.mxu1 }
 0x18f   :  { %v11320_v58 = vadd.f32 %v7954_v53, %v11062_v1  ;;  %v11323_v29 = vadd.f32 %v8018_v52, %v11065_v13  ;;  %v9672_v1 = vld [vmem:[%s13401_s1 + $0x450] sm:$0xff]  }
 0x190   :  { %v7956_v6 = vpop.f32.mrf.mxu0  ;;  %v8020_v40 = vpop.f32.mrf.mxu1  ;;  %8561 = vmatpush3.bf16.msra.mxu0 %v9641_v14  ;;  %v9620_v14 = vld [vmem:[%s13402_s0 + $0xa4c] ss:$108 sps:$4 sm:$0xff]  }
 0x191   :  { %v7957_v13 = vadd.f32 %v7956_v6, %v7955_v39  ;;  %v8021_v3 = vadd.f32 %v8020_v40, %v8019_v32  ;;  %8562 = vmatprep.subr.bf16.mxu0 %v9656_v9  ;;  %v9623_v9 = vld [vmem:[%s13402_s0 + $0x394] ss:$108 sps:$4 sm:$0xff]  }
 0x192   :  { %v7958_v61 = vpop.f32.mrf.mxu0  ;;  %v8022_v47 = vpop.f32.mrf.mxu1  ;;  %5292 = vmatmul.mubr.bf16.gmra.mxu1 %v9602_v25  ;;  %5389 = vmatmul.mubr.bf16.gmra.mxu0 %v9605_v60  ;;  %v9689_v25 = vld [vmem:[%s13401_s1 + $0x408] sm:$0xff]   ;;  %v9705_v39 = vld [vmem:[%s13401_s1 + $0x400] sm:$0xff]  }
 0x193   :  { %v11338_v22 = vadd.f32 %v7957_v13, %v11081_v42  ;;  %v11341_v23 = vadd.f32 %v8021_v3, %v11084_v16  ;;  %5299 = vmatprep.mubr.bf16.mxu1 %v9614_v43  ;;  %5396 = vmatprep.mubr.bf16.mxu0 %v9617_v10  ;;  %v9612_v42 = vld [vmem:[%s13402_s0 + $0x970] ss:$108 sps:$4 sm:$0xff]   ;;  %v9615_v16 = vld [vmem:[%s13402_s0 + $0x2b8] ss:$108 sps:$4 sm:$0xff]  }
 0x194   :  { %v7959_v33 = vpop.f32.mrf.mxu0  ;;  %v8023_v55 = vpop.f32.mrf.mxu1  ;;  %8563 = vmatpush3.bf16.msra.mxu0 %v9657_v35  ;;  %v9720_v10 = vld [vmem:[%s13401_s1 + $0x578] sm:$0xff]   ;;  %v9618_v35 = vld [vmem:[%s13402_s0 + $0xa48] ss:$108 sps:$4 sm:$0xff]  }
 0x195   :  { %v7960_v46 = vadd.f32 %v7959_v33, %v7958_v61  ;;  %v8024_v34 = vadd.f32 %v8023_v55, %v8022_v47  ;;  %8564 = vmatprep.subr.bf16.mxu0 %v9672_v1 }
 0x196   :  { %v7961_v59 = vpop.f32.mrf.mxu0  ;;  %v8025_v44 = vpop.f32.mrf.mxu1 }
 0x197   :  { %v11356_v4 = vadd.f32 %v7960_v46, %v11100_v51  ;;  %v11359_v31 = vadd.f32 %v8024_v34, %v11103_v0  ;;  %v9704_v51 = vld [vmem:[%s13401_s1 + $0x440] sm:$0xff]  }
 0x198   :  { %v7962_v7 = vpop.f32.mrf.mxu0  ;;  %v8026_v63 = vpop.f32.mrf.mxu1  ;;  %8565 = vmatpush3.bf16.msra.mxu0 %v9673_v49  ;;  %v9630_v49 = vld [vmem:[%s13402_s0 + $0xb24] ss:$108 sps:$4 sm:$0xff]  }
 0x199   :  { %v7963_v0 = vadd.f32 %v7962_v7, %v7961_v59  ;;  %v8027_v60 = vadd.f32 %v8026_v63, %v8025_v44  ;;  %8566 = vmatprep.subr.bf16.mxu0 %v9688_v36  ;;  %v9633_v36 = vld [vmem:[%s13402_s0 + $0x46c] ss:$108 sps:$4 sm:$0xff]  }
 0x19a   :  { %v7964_v53 = vpop.f32.mrf.mxu0  ;;  %v8028_v52 = vpop.f32.mrf.mxu1  ;;  %5300 = vmatmul.mubr.bf16.gmra.mxu1 %v9612_v42  ;;  %5397 = vmatmul.mubr.bf16.gmra.mxu0 %v9615_v16 }
 0x19b   :  { %v11377_v32 = vadd.f32 %v7963_v0, %v11127_v45  ;;  %v11380_v43 = vadd.f32 %v8027_v60, %v11130_v27  ;;  %5307 = vmatprep.mubr.bf16.mxu1 %v9620_v14  ;;  %5404 = vmatprep.mubr.bf16.mxu0 %v9623_v9  ;;  %v9621_v45 = vld [vmem:[%s13402_s0 + $0x390] ss:$108 sps:$4 sm:$0xff]   ;;  %v9628_v14 = vld [vmem:[%s13402_s0 + $0xb20] ss:$108 sps:$4 sm:$0xff]   ;;  %v9631_v9 = vld [vmem:[%s13402_s0 + $0x468] ss:$108 sps:$4 sm:$0xff]  }
 0x19c   :  { %v7965_v6 = vpop.f32.mrf.mxu0  ;;  %v8029_v40 = vpop.f32.mrf.mxu1  ;;  %8567 = vmatpush3.bf16.msra.mxu0 %v9689_v25  ;;  %v9636_v0 = vld [vmem:[%s13402_s0 + $0xbfc] ss:$108 sps:$4 sm:$0xff]   ;;  %v9639_v60 = vld [vmem:[%s13402_s0 + $0x544] ss:$108 sps:$4 sm:$0xff]  }
 0x19d   :  { %v7966_v1 = vadd.f32 %v7965_v6, %v7964_v53  ;;  %v8030_v27 = vadd.f32 %v8029_v40, %v8028_v52  ;;  %8568 = vmatprep.subr.bf16.mxu0 %v9704_v51 }
 0x19e   :  { %v7967_v13 = vpop.f32.mrf.mxu0  ;;  %v8031_v3 = vpop.f32.mrf.mxu1 }
 0x19f   :  { %v11392_v61 = vadd.f32 %v7966_v1, %v11143_v28  ;;  %v11395_v47 = vadd.f32 %v8030_v27, %v11146_v37  ;;  %v9634_v1 = vld [vmem:[%s13402_s0 + $0xbf8] ss:$108 sps:$4 sm:$0xff]   ;;  %v9637_v27 = vld [vmem:[%s13402_s0 + $0x540] ss:$108 sps:$4 sm:$0xff]  }
 0x1a0   :  { %v7968_v33 = vpop.f32.mrf.mxu0  ;;  %v8032_v55 = vpop.f32.mrf.mxu1  ;;  %8569 = vmatpush3.bf16.msra.mxu0 %v9705_v39 }
 0x1a1   :  { %v7969_v42 = vadd.f32 %v7968_v33, %v7967_v13  ;;  %v8033_v16 = vadd.f32 %v8032_v55, %v8031_v3  ;;  %8778 = vmatprep.subr.bf16.mxu0 %v9720_v10  ;;  %v9649_v55 = vld [vmem:[%s13402_s0 + $0x61c] ss:$108 sps:$4 sm:$0xff]  }
 0x1a2   :  { %v7970_v46 = vpop.f32.mrf.mxu0  ;;  %v8034_v28 = vpop.f32.mrf.mxu1  ;;  %5308 = vmatmul.mubr.bf16.gmra.mxu1 %v9618_v35  ;;  %5405 = vmatmul.mubr.bf16.gmra.mxu0 %v9621_v45 }
 0x1a3   :  { %v11404_v37 = vadd.f32 %v7969_v42, %v11156_v30  ;;  %v11407_v34 = vadd.f32 %v8033_v16, %v11159_v5  ;;  %5315 = vmatprep.mubr.bf16.mxu1 %v9630_v49  ;;  %5412 = vmatprep.mubr.bf16.mxu0 %v9633_v36 }
 0x1a4   :  { %v7971_v59 = vpop.f32.mrf.mxu0  ;;  %v8035_v44 = vpop.f32.mrf.mxu1 }
 0x1a5   :  { %v7972_v7 = vadd.f32 %v7971_v59, %v7970_v46  ;;  %v8036_v63 = vadd.f32 %v8035_v44, %v8034_v28 }
 0x1a6   :  { %v7973_v25 = vpop.f32.mrf.mxu0  ;;  %v8037_v30 = vpop.f32.mrf.mxu1 }
 0x1a7   :  { %v11416_v51 = vadd.f32 %v7972_v7, %v11169_v17  ;;  %v11419_v5 = vadd.f32 %v8036_v63, %v11172_v20  ;;  %v9644_v7 = vld [vmem:[%s13402_s0 + $0xcd0] ss:$108 sps:$4 sm:$0x1f]  }
 0x1a8   :  { %v7974_v53 = vpop.f32.mrf.mxu0  ;;  %v8038_v52 = vpop.f32.mrf.mxu1 }
 0x1a9   :  { %v7975_v39 = vadd.f32 %v7974_v53, %v7973_v25  ;;  %v8039_v10 = vadd.f32 %v8038_v52, %v8037_v30  ;;  %v9652_v53 = vld [vmem:[%s13402_s0 + $0x6f4] ss:$108 sps:$4 sm:$0xff]   ;;  %v9655_v52 = vld [vmem:[%s13402_s0 + $0x3c] ss:$108 sps:$4 sm:$0xff]  }
 0x1aa   :  { %v7976_v6 = vpop.f32.mrf.mxu0  ;;  %v8040_v40 = vpop.f32.mrf.mxu1  ;;  %5316 = vmatmul.mubr.bf16.gmra.mxu1 %v9628_v14  ;;  %5413 = vmatmul.mubr.bf16.gmra.mxu0 %v9631_v9 }
 0x1ab   :  { %v11428_v17 = vadd.f32 %v7975_v39, %v11182_v21  ;;  %v11431_v20 = vadd.f32 %v8039_v10, %v11185_v41  ;;  %5323 = vmatprep.mubr.bf16.mxu1 %v9636_v0  ;;  %5420 = vmatprep.mubr.bf16.mxu0 %v9639_v60  ;;  %v9646_v21 = vld [vmem:[%s13402_s0 + $0xcd4] ss:$108 sps:$4 sm:$0x1f]  }
 0x1ac   :  { %v7977_v35 = vpop.f32.mrf.mxu0  ;;  %v8041_v45 = vpop.f32.mrf.mxu1 }
 0x1ad   :  { %v7978_v13 = vadd.f32 %v7977_v35, %v7976_v6  ;;  %v8042_v3 = vadd.f32 %v8041_v45, %v8040_v40 }
 0x1ae   :  { %v7979_v41 = vpop.f32.mrf.mxu0  ;;  %v8043_v49 = vpop.f32.mrf.mxu1 }
 0x1af   :  { %v11443_v36 = vadd.f32 %v7978_v13, %v11195_v56  ;;  %v11446_v33 = vadd.f32 %v8042_v3, %v11198_v57 }
 0x1b0   :  { %v7980_v42 = vpop.f32.mrf.mxu0  ;;  %v8044_v16 = vpop.f32.mrf.mxu1 }
 0x1b1   :  { %v7981_v46 = vadd.f32 %v7980_v42, %v7979_v41  ;;  %v8045_v28 = vadd.f32 %v8044_v16, %v8043_v49  ;;  %v9650_v49 = vld [vmem:[%s13402_s0 + $0x6f0] ss:$108 sps:$4 sm:$0xff]   ;;  %v9662_v16 = vld [vmem:[%s13402_s0 + $0x7cc] ss:$108 sps:$4 sm:$0xff]  }
 0x1b2   :  { %v7982_v59 = vpop.f32.mrf.mxu0  ;;  %v8046_v44 = vpop.f32.mrf.mxu1  ;;  %5324 = vmatmul.mubr.bf16.gmra.mxu1 %v9634_v1  ;;  %5421 = vmatmul.mubr.bf16.gmra.mxu0 %v9637_v27  ;;  %v9659_v42 = vld [vmem:[%s13401_s1 + $0x4b8] sm:$0xff]  }
 0x1b3   :  { %v11452_v14 = vadd.f32 %v7981_v46, %v11208_v50  ;;  %v11455_v56 = vadd.f32 %v8045_v28, %v11211_v38  ;;  %5331 = vmatprep.mubr.bf16.mxu1 %v9646_v21  ;;  %5428 = vmatprep.mubr.bf16.mxu0 %v9649_v55  ;;  %v9647_v50 = vld [vmem:[%s13402_s0 + $0x618] ss:$108 sps:$4 sm:$0xff]  }
 0x1b4   :  { %v7983_v57 = vpop.f32.mrf.mxu0  ;;  %v8047_v9 = vpop.f32.mrf.mxu1 }
 0x1b5   :  { %v7984_v63 = vadd.f32 %v7983_v57, %v7982_v59  ;;  %v8048_v25 = vadd.f32 %v8047_v9, %v8046_v44  ;;  %v9665_v59 = vld [vmem:[%s13402_s0 + $0x114] ss:$108 sps:$4 sm:$0xff]  }
 0x1b6   :  { %v7985_v30 = vpop.f32.mrf.mxu0  ;;  %v8049_v0 = vpop.f32.mrf.mxu1 }
 0x1b7   :  { %v11464_v60 = vadd.f32 %v7984_v63, %v11221_v19  ;;  %v11467_v38 = vadd.f32 %v8048_v25, %v11224_v24  ;;  %v9675_v25 = vld [vmem:[%s13401_s1 + $0x4b0] sm:$0xff]  }
 0x1b8   :  { %v7986_v39 = vpop.f32.mrf.mxu0  ;;  %v8050_v10 = vpop.f32.mrf.mxu1 }
 0x1b9   :  { %v7987_v6 = vadd.f32 %v7986_v39, %v7985_v30  ;;  %v8051_v40 = vadd.f32 %v8050_v10, %v8049_v0  ;;  %v9663_v10 = vld [vmem:[%s13402_s0 + $0x110] ss:$108 sps:$4 sm:$0xff]  }
 0x1ba   :  { %v7988_v35 = vpop.f32.mrf.mxu0  ;;  %v8052_v45 = vpop.f32.mrf.mxu1  ;;  %5332 = vmatmul.mubr.bf16.gmra.mxu1 %v9644_v7  ;;  %5429 = vmatmul.mubr.bf16.gmra.mxu0 %v9647_v50  ;;  %v9690_v50 = vld [vmem:[%s13401_s1 + $0x4e8] sm:$0xff]  }
 0x1bb   :  { %v11476_v19 = vadd.f32 %v7987_v6, %v11234_v18  ;;  %v11479_v24 = vadd.f32 %v8051_v40, %v11237_v54  ;;  %5436 = vmatprep.mubr.bf16.mxu0 %v9652_v53  ;;  %5533 = vmatprep.mubr.bf16.mxu1 %v9655_v52  ;;  %v9653_v18 = vld [vmem:[%s13402_s0 + $0x38] ss:$108 sps:$4 sm:$0xff]  }
 0x1bc   :  { %v7989_v1 = vpop.f32.mrf.mxu0  ;;  %v8053_v27 = vpop.f32.mrf.mxu1 }
 0x1bd   :  { %v7990_v13 = vadd.f32 %v7989_v1, %v7988_v35  ;;  %v8054_v3 = vadd.f32 %v8053_v27, %v8052_v45  ;;  %v9668_v35 = vld [vmem:[%s13402_s0 + $0x8a4] ss:$108 sps:$4 sm:$0xff]   ;;  %v9671_v45 = vld [vmem:[%s13402_s0 + $0x1ec] ss:$108 sps:$4 sm:$0xff]  }
 0x1be   :  { %v7991_v21 = vpop.f32.mrf.mxu0  ;;  %v8055_v41 = vpop.f32.mrf.mxu1 }
 0x1bf   :  { %v11488_v55 = vadd.f32 %v7990_v13, %v11247_v62  ;;  %v11491_v54 = vadd.f32 %v8054_v3, %v11250_v12  ;;  %v9674_v62 = vld [vmem:[%s13401_s1 + $0x4f0] sm:$0xff]  }
 0x1c0   :  { %v7992_v46 = vpop.f32.mrf.mxu0  ;;  %v8056_v28 = vpop.f32.mrf.mxu1 }
 0x1c1   :  { %v7993_v12 = vadd.f32 %v7992_v46, %v7991_v21  ;;  %v8057_v44 = vadd.f32 %v8056_v28, %v8055_v41  ;;  %v9707_v46 = vld [vmem:[%s13401_s1 + $0x4a0] sm:$0xff]  }
 0x1c2   :  { %v8058_v57 = vpop.f32.mrf.mxu1  ;;  %v8122_v9 = vpop.f32.mrf.mxu0  ;;  %5437 = vmatmul.mubr.bf16.gmra.mxu0 %v9650_v49  ;;  %5534 = vmatmul.mubr.bf16.vlgmr.msra.gmra.mxu1 %v9653_v18 }
 0x1c3   :  { %v11506_v7 = vadd.f32 %v7993_v12, %v11266_v15  ;;  %v11509_v63 = vadd.f32 %v8057_v44, %v11269_v2  ;;  %8667 = vmatpush3.bf16.msra.mxu1 %v9659_v42  ;;  %5444 = vmatprep.mubr.bf16.mxu0 %v9662_v16  ;;  %v9660_v2 = vld [vmem:[%s13402_s0 + $0x7c8] ss:$108 sps:$4 sm:$0xff]  }
 0x1c4   :  { %v8059_v30 = vpop.f32.mrf.mxu1  ;;  %v8123_v0 = vpop.f32.mrf.mxu0  ;;  %5541 = vmatprep.mubr.bf16.mxu1 %v9665_v59  ;;  %8668 = vmatprep.subr.bf16.mxu1 %v9674_v62  ;;  %v9669_v44 = vld [vmem:[%s13402_s0 + $0x1e8] ss:$108 sps:$4 sm:$0xff]  }
 0x1c5   :  { %v8060_v53 = vadd.f32 %v8059_v30, %v8058_v57  ;;  %v8124_v15 = vadd.f32 %v8123_v0, %v8122_v9  ;;  %v9681_v30 = vld [vmem:[%s13402_s0 + $0x2c4] ss:$108 sps:$4 sm:$0xff]  }
 0x1c6   :  { %v8061_v52 = vpop.f32.mrf.mxu1  ;;  %v8125_v39 = vpop.f32.mrf.mxu0 }
 0x1c7   :  { %v11524_v6 = vadd.f32 %v8060_v53, %v11284_v8  ;;  %v11527_v40 = vadd.f32 %v8124_v15, %v11287_v48  ;;  %8669 = vmatpush3.bf16.msra.mxu1 %v9675_v25  ;;  %v9691_v8 = vld [vmem:[%s13401_s1 + $0x4a8] sm:$0xff]   ;;  %v9706_v48 = vld [vmem:[%s13401_s1 + $0x4e0] sm:$0xff]   ;;  %v9723_v53 = vld [vmem:[%s13401_s1 + $0x498] sm:$0xff]  }
 0x1c8   :  { %v8062_v1 = vpop.f32.mrf.mxu1  ;;  %v8126_v27 = vpop.f32.mrf.mxu0  ;;  %8670 = vmatprep.subr.bf16.mxu1 %v9690_v50  ;;  %v9678_v25 = vld [vmem:[%s13402_s0 + $0x97c] ss:$108 sps:$4 sm:$0xff]  }
 0x1c9   :  { %v8063_v13 = vadd.f32 %v8062_v1, %v8061_v52  ;;  %v8127_v3 = vadd.f32 %v8126_v27, %v8125_v39  ;;  %v9739_v1 = vld [vmem:[%s13401_s1 + $0x490] sm:$0xff]  }
 0x1ca   :  { %v8064_v21 = vpop.f32.mrf.mxu1  ;;  %v8128_v41 = vpop.f32.mrf.mxu0  ;;  %5445 = vmatmul.mubr.bf16.gmra.mxu0 %v9660_v2  ;;  %5542 = vmatmul.mubr.bf16.gmra.mxu1 %v9663_v10 }
 0x1cb   :  { %v11542_v49 = vadd.f32 %v8063_v13, %v11305_v26  ;;  %v11545_v18 = vadd.f32 %v8127_v3, %v11308_v11  ;;  %5452 = vmatprep.mubr.bf16.mxu0 %v9668_v35  ;;  %5549 = vmatprep.mubr.bf16.mxu1 %v9671_v45  ;;  %v9722_v26 = vld [vmem:[%s13401_s1 + $0x4d8] sm:$0xff]   ;;  %v9666_v11 = vld [vmem:[%s13402_s0 + $0x8a0] ss:$108 sps:$4 sm:$0xff]  }
 0x1cc   :  { %v8065_v42 = vpop.f32.mrf.mxu1  ;;  %v8129_v16 = vpop.f32.mrf.mxu0  ;;  %8671 = vmatpush3.bf16.msra.mxu1 %v9691_v8 }
 0x1cd   :  { %v8066_v28 = vadd.f32 %v8065_v42, %v8064_v21  ;;  %v8130_v59 = vadd.f32 %v8129_v16, %v8128_v41  ;;  %8672 = vmatprep.subr.bf16.mxu1 %v9706_v48  ;;  %v9679_v48 = vld [vmem:[%s13402_s0 + $0x2c0] ss:$108 sps:$4 sm:$0xff]   ;;  %v9687_v16 = vld [vmem:[%s13402_s0 + $0x39c] ss:$108 sps:$4 sm:$0xff]  }
 0x1ce   :  { %v8067_v62 = vpop.f32.mrf.mxu1  ;;  %v8131_v12 = vpop.f32.mrf.mxu0  ;;  %v9684_v42 = vld [vmem:[%s13402_s0 + $0xa54] ss:$108 sps:$4 sm:$0xff]  }
 0x1cf   :  { %v11560_v57 = vadd.f32 %v8066_v28, %v11320_v58  ;;  %v11563_v9 = vadd.f32 %v8130_v59, %v11323_v29  ;;  %v9738_v29 = vld [vmem:[%s13401_s1 + $0x4d0] sm:$0xff]   ;;  %v9755_v59 = vld [vmem:[%s13401_s1 + $0x488] sm:$0xff]  }
 0x1d0   :  { %v8068_v0 = vpop.f32.mrf.mxu1  ;;  %v8132_v50 = vpop.f32.mrf.mxu0  ;;  %8673 = vmatpush3.bf16.msra.mxu1 %v9707_v46 }
 0x1d1   :  { %v8069_v58 = vadd.f32 %v8068_v0, %v8067_v62  ;;  %v8133_v15 = vadd.f32 %v8132_v50, %v8131_v12  ;;  %8674 = vmatprep.subr.bf16.mxu1 %v9722_v26  ;;  %v9771_v0 = vld [vmem:[%s13401_s1 + $0x480] sm:$0xff]  }
 0x1d2   :  { %v8070_v52 = vpop.f32.mrf.mxu1  ;;  %v8134_v39 = vpop.f32.mrf.mxu0  ;;  %5453 = vmatmul.mubr.bf16.gmra.mxu0 %v9666_v11  ;;  %5550 = vmatmul.mubr.bf16.gmra.mxu1 %v9669_v44 }
 0x1d3   :  { %v11578_v2 = vadd.f32 %v8069_v58, %v11338_v22  ;;  %v11581_v10 = vadd.f32 %v8133_v15, %v11341_v23  ;;  %5460 = vmatprep.mubr.bf16.mxu0 %v9678_v25  ;;  %5557 = vmatprep.mubr.bf16.mxu1 %v9681_v30  ;;  %v9754_v22 = vld [vmem:[%s13401_s1 + $0x4c8] sm:$0xff]   ;;  %v9676_v23 = vld [vmem:[%s13402_s0 + $0x978] ss:$108 sps:$4 sm:$0xff]  }
 0x1d4   :  { %v8071_v35 = vpop.f32.mrf.mxu1  ;;  %v8135_v45 = vpop.f32.mrf.mxu0  ;;  %8675 = vmatpush3.bf16.msra.mxu1 %v9723_v53 }
 0x1d5   :  { %v8072_v27 = vadd.f32 %v8071_v35, %v8070_v52  ;;  %v8136_v8 = vadd.f32 %v8135_v45, %v8134_v39  ;;  %8676 = vmatprep.subr.bf16.mxu1 %v9738_v29  ;;  %v9685_v29 = vld [vmem:[%s13402_s0 + $0x398] ss:$108 sps:$4 sm:$0xff]   ;;  %v9697_v45 = vld [vmem:[%s13402_s0 + $0x474] ss:$108 sps:$4 sm:$0xff]  }
 0x1d6   :  { %v8073_v13 = vpop.f32.mrf.mxu1  ;;  %v8137_v3 = vpop.f32.mrf.mxu0  ;;  %v9694_v35 = vld [vmem:[%s13402_s0 + $0xb2c] ss:$108 sps:$4 sm:$0xff]  }
 0x1d7   :  { %v11596_v21 = vadd.f32 %v8072_v27, %v11356_v4  ;;  %v11599_v41 = vadd.f32 %v8136_v8, %v11359_v31  ;;  %v9770_v31 = vld [vmem:[%s13401_s1 + $0x4c0] sm:$0xff]  }
 0x1d8   :  { %v8074_v46 = vpop.f32.mrf.mxu1  ;;  %v8138_v28 = vpop.f32.mrf.mxu0  ;;  %8677 = vmatpush3.bf16.msra.mxu1 %v9739_v1 }
 0x1d9   :  { %v8075_v4 = vadd.f32 %v8074_v46, %v8073_v13  ;;  %v8139_v26 = vadd.f32 %v8138_v28, %v8137_v3  ;;  %8678 = vmatprep.subr.bf16.mxu1 %v9754_v22 }
 0x1da   :  { %v8076_v62 = vpop.f32.mrf.mxu1  ;;  %v8140_v12 = vpop.f32.mrf.mxu0  ;;  %5461 = vmatmul.mubr.bf16.gmra.mxu0 %v9676_v23  ;;  %5558 = vmatmul.mubr.bf16.gmra.mxu1 %v9679_v48 }
 0x1db   :  { %v11614_v11 = vadd.f32 %v8075_v4, %v11377_v32  ;;  %v11617_v44 = vadd.f32 %v8139_v26, %v11380_v43  ;;  %5468 = vmatprep.mubr.bf16.mxu0 %v9684_v42  ;;  %5565 = vmatprep.mubr.bf16.mxu1 %v9687_v16  ;;  %v9786_v32 = vld [vmem:[%s13401_s1 + $0x5f8] sm:$0xff]   ;;  %v9700_v26 = vld [vmem:[%s13402_s0 + $0xc04] ss:$108 sps:$4 sm:$0xff]  }
 0x1dc   :  { %v8077_v25 = vpop.f32.mrf.mxu1  ;;  %v8141_v30 = vpop.f32.mrf.mxu0  ;;  %8679 = vmatpush3.bf16.msra.mxu1 %v9755_v59  ;;  %v9682_v43 = vld [vmem:[%s13402_s0 + $0xa50] ss:$108 sps:$4 sm:$0xff]   ;;  %v9692_v59 = vld [vmem:[%s13402_s0 + $0xb28] ss:$108 sps:$4 sm:$0xff]  }
 0x1dd   :  { %v8078_v50 = vadd.f32 %v8077_v25, %v8076_v62  ;;  %v8142_v53 = vadd.f32 %v8141_v30, %v8140_v12  ;;  %8680 = vmatprep.subr.bf16.mxu1 %v9770_v31  ;;  %v9703_v31 = vld [vmem:[%s13402_s0 + $0x54c] ss:$108 sps:$4 sm:$0xff]  }
 0x1de   :  { %v8079_v58 = vpop.f32.mrf.mxu1  ;;  %v8143_v15 = vpop.f32.mrf.mxu0 }
 0x1df   :  { %v11632_v52 = vadd.f32 %v8078_v50, %v11392_v61  ;;  %v11635_v39 = vadd.f32 %v8142_v53, %v11395_v47 }
 0x1e0   :  { %v8080_v1 = vpop.f32.mrf.mxu1  ;;  %v8144_v27 = vpop.f32.mrf.mxu0  ;;  %8681 = vmatpush3.bf16.msra.mxu1 %v9771_v0 }
 0x1e1   :  { %v8081_v8 = vadd.f32 %v8080_v1, %v8079_v58  ;;  %v8145_v22 = vadd.f32 %v8144_v27, %v8143_v15  ;;  %8890 = vmatprep.subr.bf16.mxu1 %v9786_v32  ;;  %v9710_v1 = vld [vmem:[%s13402_s0 + $0xcdc] ss:$108 sps:$4 sm:$0x1f]   ;;  %v9713_v27 = vld [vmem:[%s13402_s0 + $0x624] ss:$108 sps:$4 sm:$0xff]  }
 0x1e2   :  { %v8082_v13 = vpop.f32.mrf.mxu1  ;;  %v8146_v61 = vpop.f32.mrf.mxu0  ;;  %5469 = vmatmul.mubr.bf16.gmra.mxu0 %v9682_v43  ;;  %5566 = vmatmul.mubr.bf16.gmra.mxu1 %v9685_v29 }
 0x1e3   :  { %v11644_v47 = vadd.f32 %v8081_v8, %v11404_v37  ;;  %v11647_v3 = vadd.f32 %v8145_v22, %v11407_v34  ;;  %5476 = vmatprep.mubr.bf16.mxu0 %v9694_v35  ;;  %5573 = vmatprep.mubr.bf16.mxu1 %v9697_v45  ;;  %v9695_v37 = vld [vmem:[%s13402_s0 + $0x470] ss:$108 sps:$4 sm:$0xff]   ;;  %v9698_v35 = vld [vmem:[%s13402_s0 + $0xc00] ss:$108 sps:$4 sm:$0xff]  }
 0x1e4   :  { %v8083_v23 = vpop.f32.mrf.mxu1  ;;  %v8147_v48 = vpop.f32.mrf.mxu0 }
 0x1e5   :  { %v8084_v42 = vadd.f32 %v8083_v23, %v8082_v13  ;;  %v8148_v16 = vadd.f32 %v8147_v48, %v8146_v61 }
 0x1e6   :  { %v8085_v46 = vpop.f32.mrf.mxu1  ;;  %v8149_v28 = vpop.f32.mrf.mxu0 }
 0x1e7   :  { %v11656_v4 = vadd.f32 %v8084_v42, %v11416_v51  ;;  %v11659_v34 = vadd.f32 %v8148_v16, %v11419_v5 }
 0x1e8   :  { %v8086_v62 = vpop.f32.mrf.mxu1  ;;  %v8150_v12 = vpop.f32.mrf.mxu0 }
 0x1e9   :  { %v8087_v25 = vadd.f32 %v8086_v62, %v8085_v46  ;;  %v8151_v30 = vadd.f32 %v8150_v12, %v8149_v28  ;;  %v9716_v62 = vld [vmem:[%s13402_s0 + $0x6fc] ss:$108 sps:$4 sm:$0xff]   ;;  %v9719_v12 = vld [vmem:[%s13402_s0 + $0x44] ss:$108 sps:$4 sm:$0xff]  }
 0x1ea   :  { %v8088_v0 = vpop.f32.mrf.mxu1  ;;  %v8152_v50 = vpop.f32.mrf.mxu0  ;;  %5477 = vmatmul.mubr.bf16.gmra.mxu0 %v9692_v59  ;;  %5574 = vmatmul.mubr.bf16.gmra.mxu1 %v9695_v37 }
 0x1eb   :  { %v11668_v51 = vadd.f32 %v8087_v25, %v11428_v17  ;;  %v11671_v5 = vadd.f32 %v8151_v30, %v11431_v20  ;;  %5484 = vmatprep.mubr.bf16.mxu0 %v9700_v26  ;;  %5581 = vmatprep.mubr.bf16.mxu1 %v9703_v31  ;;  %v9701_v17 = vld [vmem:[%s13402_s0 + $0x548] ss:$108 sps:$4 sm:$0xff]   ;;  %v9708_v26 = vld [vmem:[%s13402_s0 + $0xcd8] ss:$108 sps:$4 sm:$0x1f]  }
 0x1ec   :  { %v8089_v53 = vpop.f32.mrf.mxu1  ;;  %v8153_v32 = vpop.f32.mrf.mxu0 }
 0x1ed   :  { %v8090_v58 = vadd.f32 %v8089_v53, %v8088_v0  ;;  %v8154_v15 = vadd.f32 %v8153_v32, %v8152_v50 }
 0x1ee   :  { %v8091_v43 = vpop.f32.mrf.mxu1  ;;  %v8155_v29 = vpop.f32.mrf.mxu0 }
 0x1ef   :  { %v11680_v45 = vadd.f32 %v8090_v58, %v11443_v36  ;;  %v11683_v20 = vadd.f32 %v8154_v15, %v11446_v33 }
 0x1f0   :  { %v8092_v8 = vpop.f32.mrf.mxu1  ;;  %v8156_v22 = vpop.f32.mrf.mxu0 }
 0x1f1   :  { %v8093_v13 = vadd.f32 %v8092_v8, %v8091_v43  ;;  %v8157_v61 = vadd.f32 %v8156_v22, %v8155_v29  ;;  %v9721_v8 = vld [vmem:[%s13401_s1 + $0x538] sm:$0xff]   ;;  %v9726_v22 = vld [vmem:[%s13402_s0 + $0x7d4] ss:$108 sps:$4 sm:$0xff]  }
 0x1f2   :  { %v8094_v23 = vpop.f32.mrf.mxu1  ;;  %v8158_v48 = vpop.f32.mrf.mxu0  ;;  %5485 = vmatmul.mubr.bf16.gmra.mxu0 %v9698_v35  ;;  %5582 = vmatmul.mubr.bf16.gmra.mxu1 %v9701_v17 }
 0x1f3   :  { %v11692_v36 = vadd.f32 %v8093_v13, %v11452_v14  ;;  %v11695_v33 = vadd.f32 %v8157_v61, %v11455_v56  ;;  %5492 = vmatprep.mubr.bf16.mxu0 %v9710_v1  ;;  %5589 = vmatprep.mubr.bf16.mxu1 %v9713_v27  ;;  %v9711_v14 = vld [vmem:[%s13402_s0 + $0x620] ss:$108 sps:$4 sm:$0xff]   ;;  %v9714_v1 = vld [vmem:[%s13402_s0 + $0x6f8] ss:$108 sps:$4 sm:$0xff]  }
 0x1f4   :  { %v8095_v42 = vpop.f32.mrf.mxu1  ;;  %v8159_v16 = vpop.f32.mrf.mxu0 }
 0x1f5   :  { %v8096_v46 = vadd.f32 %v8095_v42, %v8094_v23  ;;  %v8160_v28 = vadd.f32 %v8159_v16, %v8158_v48  ;;  %v9729_v23 = vld [vmem:[%s13402_s0 + $0x11c] ss:$108 sps:$4 sm:$0xff]  }
 0x1f6   :  { %v8097_v59 = vpop.f32.mrf.mxu1  ;;  %v8161_v37 = vpop.f32.mrf.mxu0 }
 0x1f7   :  { %v11704_v31 = vadd.f32 %v8096_v46, %v11464_v60  ;;  %v11707_v56 = vadd.f32 %v8160_v28, %v11467_v38 }
 0x1f8   :  { %v8098_v25 = vpop.f32.mrf.mxu1  ;;  %v8162_v30 = vpop.f32.mrf.mxu0 }
 0x1f9   :  { %v8099_v0 = vadd.f32 %v8098_v25, %v8097_v59  ;;  %v8163_v50 = vadd.f32 %v8162_v30, %v8161_v37  ;;  %v9737_v59 = vld [vmem:[%s13401_s1 + $0x530] sm:$0xff]   ;;  %v9727_v30 = vld [vmem:[%s13402_s0 + $0x118] ss:$108 sps:$4 sm:$0xff]  }
 0x1fa   :  { %v8100_v53 = vpop.f32.mrf.mxu1  ;;  %v8164_v32 = vpop.f32.mrf.mxu0  ;;  %5493 = vmatmul.mubr.bf16.gmra.mxu0 %v9708_v26  ;;  %5590 = vmatmul.mubr.bf16.gmra.mxu1 %v9711_v14  ;;  %v9752_v14 = vld [vmem:[%s13401_s1 + $0x568] sm:$0xff]  }
 0x1fb   :  { %v11716_v60 = vadd.f32 %v8099_v0, %v11476_v19  ;;  %v11719_v38 = vadd.f32 %v8163_v50, %v11479_v24  ;;  %5597 = vmatprep.mubr.bf16.mxu1 %v9716_v62  ;;  %5694 = vmatprep.mubr.bf16.mxu0 %v9719_v12  ;;  %v9717_v19 = vld [vmem:[%s13402_s0 + $0x40] ss:$108 sps:$4 sm:$0xff]  }
 0x1fc   :  { %v8101_v58 = vpop.f32.mrf.mxu1  ;;  %v8165_v15 = vpop.f32.mrf.mxu0 }
 0x1fd   :  { %v8102_v43 = vadd.f32 %v8101_v58, %v8100_v53  ;;  %v8166_v29 = vadd.f32 %v8165_v15, %v8164_v32  ;;  %v9732_v53 = vld [vmem:[%s13402_s0 + $0x8ac] ss:$108 sps:$4 sm:$0xff]   ;;  %v9735_v32 = vld [vmem:[%s13402_s0 + $0x1f4] ss:$108 sps:$4 sm:$0xff]  }
 0x1fe   :  { %v8103_v35 = vpop.f32.mrf.mxu1  ;;  %v8167_v17 = vpop.f32.mrf.mxu0 }
 0x1ff   :  { %v11728_v27 = vadd.f32 %v8102_v43, %v11488_v55  ;;  %v11731_v24 = vadd.f32 %v8166_v29, %v11491_v54  ;;  %v9736_v55 = vld [vmem:[%s13401_s1 + $0x570] sm:$0xff]  }
 0x200   :  { %v8104_v13 = vpop.f32.mrf.mxu1  ;;  %v8168_v61 = vpop.f32.mrf.mxu0 }
 0x201   :  { %v8105_v54 = vadd.f32 %v8104_v13, %v8103_v35  ;;  %v8169_v48 = vadd.f32 %v8168_v61, %v8167_v17  ;;  %v9769_v13 = vld [vmem:[%s13401_s1 + $0x520] sm:$0xff]  }
 0x202   :  { %v8170_v42 = vpop.f32.mrf.mxu0  ;;  %v8234_v16 = vpop.f32.mrf.mxu1  ;;  %5598 = vmatmul.mubr.bf16.gmra.mxu1 %v9714_v1  ;;  %5695 = vmatmul.mubr.bf16.vlgmr.msra.gmra.mxu0 %v9717_v19 }
 0x203   :  { %v11746_v46 = vadd.f32 %v8105_v54, %v11506_v7  ;;  %v11749_v28 = vadd.f32 %v8169_v48, %v11509_v63  ;;  %8779 = vmatpush3.bf16.msra.mxu0 %v9721_v8  ;;  %5605 = vmatprep.mubr.bf16.mxu1 %v9726_v22  ;;  %v9724_v63 = vld [vmem:[%s13402_s0 + $0x7d0] ss:$108 sps:$4 sm:$0xff]  }
 0x204   :  { %v8171_v37 = vpop.f32.mrf.mxu0  ;;  %v8235_v26 = vpop.f32.mrf.mxu1  ;;  %5702 = vmatprep.mubr.bf16.mxu0 %v9729_v23  ;;  %8780 = vmatprep.subr.bf16.mxu0 %v9736_v55  ;;  %v9733_v48 = vld [vmem:[%s13402_s0 + $0x1f0] ss:$108 sps:$4 sm:$0xff]  }
 0x205   :  { %v8172_v62 = vadd.f32 %v8171_v37, %v8170_v42  ;;  %v8236_v7 = vadd.f32 %v8235_v26, %v8234_v16  ;;  %v9745_v37 = vld [vmem:[%s13402_s0 + $0x2cc] ss:$108 sps:$4 sm:$0xff]  }
 0x206   :  { %v8173_v12 = vpop.f32.mrf.mxu0  ;;  %v8237_v25 = vpop.f32.mrf.mxu1 }
 0x207   :  { %v11764_v0 = vadd.f32 %v8172_v62, %v11524_v6  ;;  %v11767_v50 = vadd.f32 %v8236_v7, %v11527_v40  ;;  %8781 = vmatpush3.bf16.msra.mxu0 %v9737_v59  ;;  %v9753_v6 = vld [vmem:[%s13401_s1 + $0x528] sm:$0xff]   ;;  %v9768_v40 = vld [vmem:[%s13401_s1 + $0x560] sm:$0xff]   ;;  %v9785_v62 = vld [vmem:[%s13401_s1 + $0x518] sm:$0xff]  }
 0x208   :  { %v8174_v58 = vpop.f32.mrf.mxu0  ;;  %v8238_v15 = vpop.f32.mrf.mxu1  ;;  %8782 = vmatprep.subr.bf16.mxu0 %v9752_v14  ;;  %v9742_v59 = vld [vmem:[%s13402_s0 + $0x984] ss:$108 sps:$4 sm:$0xff]  }
 0x209   :  { %v8175_v43 = vadd.f32 %v8174_v58, %v8173_v12  ;;  %v8239_v29 = vadd.f32 %v8238_v15, %v8237_v25  ;;  %v9801_v58 = vld [vmem:[%s13401_s1 + $0x510] sm:$0xff]  }
 0x20a   :  { %v8176_v35 = vpop.f32.mrf.mxu0  ;;  %v8240_v17 = vpop.f32.mrf.mxu1  ;;  %5606 = vmatmul.mubr.bf16.gmra.mxu1 %v9724_v63  ;;  %5703 = vmatmul.mubr.bf16.gmra.mxu0 %v9727_v30 }
 0x20b   :  { %v11782_v1 = vadd.f32 %v8175_v43, %v11542_v49  ;;  %v11785_v19 = vadd.f32 %v8239_v29, %v11545_v18  ;;  %5613 = vmatprep.mubr.bf16.mxu1 %v9732_v53  ;;  %5710 = vmatprep.mubr.bf16.mxu0 %v9735_v32  ;;  %v9784_v49 = vld [vmem:[%s13401_s1 + $0x558] sm:$0xff]   ;;  %v9730_v18 = vld [vmem:[%s13402_s0 + $0x8a8] ss:$108 sps:$4 sm:$0xff]  }
 0x20c   :  { %v8177_v8 = vpop.f32.mrf.mxu0  ;;  %v8241_v22 = vpop.f32.mrf.mxu1  ;;  %8783 = vmatpush3.bf16.msra.mxu0 %v9753_v6 }
 0x20d   :  { %v8178_v61 = vadd.f32 %v8177_v8, %v8176_v35  ;;  %v8242_v23 = vadd.f32 %v8241_v22, %v8240_v17  ;;  %8784 = vmatprep.subr.bf16.mxu0 %v9768_v40  ;;  %v9743_v40 = vld [vmem:[%s13402_s0 + $0x2c8] ss:$108 sps:$4 sm:$0xff]   ;;  %v9751_v22 = vld [vmem:[%s13402_s0 + $0x3a4] ss:$108 sps:$4 sm:$0xff]  }
 0x20e   :  { %v8179_v55 = vpop.f32.mrf.mxu0  ;;  %v8243_v54 = vpop.f32.mrf.mxu1  ;;  %v9748_v8 = vld [vmem:[%s13402_s0 + $0xa5c] ss:$108 sps:$4 sm:$0xff]  }
 0x20f   :  { %v11800_v42 = vadd.f32 %v8178_v61, %v11560_v57  ;;  %v11803_v16 = vadd.f32 %v8242_v23, %v11563_v9  ;;  %v9800_v9 = vld [vmem:[%s13401_s1 + $0x550] sm:$0xff]   ;;  %v9817_v23 = vld [vmem:[%s13401_s1 + $0x508] sm:$0xff]  }
 0x210   :  { %v8180_v26 = vpop.f32.mrf.mxu0  ;;  %v8244_v14 = vpop.f32.mrf.mxu1  ;;  %8785 = vmatpush3.bf16.msra.mxu0 %v9769_v13 }
 0x211   :  { %v8181_v57 = vadd.f32 %v8180_v26, %v8179_v55  ;;  %v8245_v7 = vadd.f32 %v8244_v14, %v8243_v54  ;;  %8786 = vmatprep.subr.bf16.mxu0 %v9784_v49  ;;  %v9833_v26 = vld [vmem:[%s13401_s1 + $0x500] sm:$0xff]  }
 0x212   :  { %v8182_v12 = vpop.f32.mrf.mxu0  ;;  %v8246_v25 = vpop.f32.mrf.mxu1  ;;  %5614 = vmatmul.mubr.bf16.gmra.mxu1 %v9730_v18  ;;  %5711 = vmatmul.mubr.bf16.gmra.mxu0 %v9733_v48 }
 0x213   :  { %v11818_v63 = vadd.f32 %v8181_v57, %v11578_v2  ;;  %v11821_v30 = vadd.f32 %v8245_v7, %v11581_v10  ;;  %5621 = vmatprep.mubr.bf16.mxu1 %v9742_v59  ;;  %5718 = vmatprep.mubr.bf16.mxu0 %v9745_v37  ;;  %v9816_v2 = vld [vmem:[%s13401_s1 + $0x548] sm:$0xff]  }
 0x214   :  { %v8183_v53 = vpop.f32.mrf.mxu0  ;;  %v8247_v32 = vpop.f32.mrf.mxu1  ;;  %8787 = vmatpush3.bf16.msra.mxu0 %v9785_v62  ;;  %v9740_v10 = vld [vmem:[%s13402_s0 + $0x980] ss:$108 sps:$4 sm:$0xff]  }
 0x215   :  { %v8184_v15 = vadd.f32 %v8183_v53, %v8182_v12  ;;  %v8248_v6 = vadd.f32 %v8247_v32, %v8246_v25  ;;  %8788 = vmatprep.subr.bf16.mxu0 %v9800_v9  ;;  %v9749_v9 = vld [vmem:[%s13402_s0 + $0x3a0] ss:$108 sps:$4 sm:$0xff]   ;;  %v9761_v32 = vld [vmem:[%s13402_s0 + $0x47c] ss:$108 sps:$4 sm:$0xff]  }
 0x216   :  { %v8185_v43 = vpop.f32.mrf.mxu0  ;;  %v8249_v29 = vpop.f32.mrf.mxu1  ;;  %v9758_v53 = vld [vmem:[%s13402_s0 + $0xb34] ss:$108 sps:$4 sm:$0xff]  }
 0x217   :  { %v11836_v35 = vadd.f32 %v8184_v15, %v11596_v21  ;;  %v11839_v17 = vadd.f32 %v8248_v6, %v11599_v41  ;;  %v9832_v41 = vld [vmem:[%s13401_s1 + $0x540] sm:$0xff]  }
 0x218   :  { %v8186_v13 = vpop.f32.mrf.mxu0  ;;  %v8250_v61 = vpop.f32.mrf.mxu1  ;;  %8789 = vmatpush3.bf16.msra.mxu0 %v9801_v58 }
 0x219   :  { %v8187_v21 = vadd.f32 %v8186_v13, %v8185_v43  ;;  %v8251_v49 = vadd.f32 %v8250_v61, %v8249_v29  ;;  %8790 = vmatprep.subr.bf16.mxu0 %v9816_v2 }
 0x21a   :  { %v8188_v55 = vpop.f32.mrf.mxu0  ;;  %v8252_v54 = vpop.f32.mrf.mxu1  ;;  %5622 = vmatmul.mubr.bf16.gmra.mxu1 %v9740_v10  ;;  %5719 = vmatmul.mubr.bf16.gmra.mxu0 %v9743_v40 }
 0x21b   :  { %v11854_v18 = vadd.f32 %v8187_v21, %v11614_v11  ;;  %v11857_v48 = vadd.f32 %v8251_v49, %v11617_v44  ;;  %5629 = vmatprep.mubr.bf16.mxu1 %v9748_v8  ;;  %5726 = vmatprep.mubr.bf16.mxu0 %v9751_v22  ;;  %v9848_v11 = vld [vmem:[%s13401_s1 + $0x678] sm:$0xff]  }
 0x21c   :  { %v8189_v59 = vpop.f32.mrf.mxu0  ;;  %v8253_v37 = vpop.f32.mrf.mxu1  ;;  %8791 = vmatpush3.bf16.msra.mxu0 %v9817_v23  ;;  %v9746_v44 = vld [vmem:[%s13402_s0 + $0xa58] ss:$108 sps:$4 sm:$0xff]   ;;  %v9756_v23 = vld [vmem:[%s13402_s0 + $0xb30] ss:$108 sps:$4 sm:$0xff]  }
 0x21d   :  { %v8190_v14 = vadd.f32 %v8189_v59, %v8188_v55  ;;  %v8254_v62 = vadd.f32 %v8253_v37, %v8252_v54  ;;  %8792 = vmatprep.subr.bf16.mxu0 %v9832_v41  ;;  %v9764_v49 = vld [vmem:[%s13402_s0 + $0xc0c] ss:$108 sps:$4 sm:$0xff]   ;;  %v9767_v41 = vld [vmem:[%s13402_s0 + $0x554] ss:$108 sps:$4 sm:$0xff]  }
 0x21e   :  { %v8191_v57 = vpop.f32.mrf.mxu0  ;;  %v8255_v7 = vpop.f32.mrf.mxu1 }
 0x21f   :  { %v11872_v12 = vadd.f32 %v8190_v14, %v11632_v52  ;;  %v11875_v25 = vadd.f32 %v8254_v62, %v11635_v39 }
 0x220   :  { %v8192_v58 = vpop.f32.mrf.mxu0  ;;  %v8256_v15 = vpop.f32.mrf.mxu1  ;;  %8793 = vmatpush3.bf16.msra.mxu0 %v9833_v26 }
 0x221   :  { %v8193_v6 = vadd.f32 %v8192_v58, %v8191_v57  ;;  %v8257_v2 = vadd.f32 %v8256_v15, %v8255_v7  ;;  %9002 = vmatprep.subr.bf16.mxu0 %v9848_v11  ;;  %v9774_v58 = vld [vmem:[%s13402_s0 + $0xce4] ss:$108 sps:$4 sm:$0x1f]   ;;  %v9777_v15 = vld [vmem:[%s13402_s0 + $0x62c] ss:$108 sps:$4 sm:$0xff]  }
 0x222   :  { %v8194_v43 = vpop.f32.mrf.mxu0  ;;  %v8258_v52 = vpop.f32.mrf.mxu1  ;;  %5630 = vmatmul.mubr.bf16.gmra.mxu1 %v9746_v44  ;;  %5727 = vmatmul.mubr.bf16.gmra.mxu0 %v9749_v9 }
 0x223   :  { %v11884_v39 = vadd.f32 %v8193_v6, %v11644_v47  ;;  %v11887_v29 = vadd.f32 %v8257_v2, %v11647_v3  ;;  %5637 = vmatprep.mubr.bf16.mxu1 %v9758_v53  ;;  %5734 = vmatprep.mubr.bf16.mxu0 %v9761_v32  ;;  %v9759_v47 = vld [vmem:[%s13402_s0 + $0x478] ss:$108 sps:$4 sm:$0xff]   ;;  %v9762_v53 = vld [vmem:[%s13402_s0 + $0xc08] ss:$108 sps:$4 sm:$0xff]  }
 0x224   :  { %v8195_v10 = vpop.f32.mrf.mxu0  ;;  %v8259_v40 = vpop.f32.mrf.mxu1 }
 0x225   :  { %v8196_v8 = vadd.f32 %v8195_v10, %v8194_v43  ;;  %v8260_v22 = vadd.f32 %v8259_v40, %v8258_v52 }
 0x226   :  { %v8197_v13 = vpop.f32.mrf.mxu0  ;;  %v8261_v61 = vpop.f32.mrf.mxu1 }
 0x227   :  { %v11896_v21 = vadd.f32 %v8196_v8, %v11656_v4  ;;  %v11899_v3 = vadd.f32 %v8260_v22, %v11659_v34 }
 0x228   :  { %v8198_v55 = vpop.f32.mrf.mxu0  ;;  %v8262_v54 = vpop.f32.mrf.mxu1 }
 0x229   :  { %v8199_v59 = vadd.f32 %v8198_v55, %v8197_v13  ;;  %v8263_v37 = vadd.f32 %v8262_v54, %v8261_v61  ;;  %v9780_v55 = vld [vmem:[%s13402_s0 + $0x704] ss:$108 sps:$4 sm:$0xff]   ;;  %v9783_v54 = vld [vmem:[%s13402_s0 + $0x4c] ss:$108 sps:$4 sm:$0xff]  }
 0x22a   :  { %v8200_v26 = vpop.f32.mrf.mxu0  ;;  %v8264_v14 = vpop.f32.mrf.mxu1  ;;  %5638 = vmatmul.mubr.bf16.gmra.mxu1 %v9756_v23  ;;  %5735 = vmatmul.mubr.bf16.gmra.mxu0 %v9759_v47 }
 0x22b   :  { %v11908_v4 = vadd.f32 %v8199_v59, %v11668_v51  ;;  %v11911_v34 = vadd.f32 %v8263_v37, %v11671_v5  ;;  %5645 = vmatprep.mubr.bf16.mxu1 %v9764_v49  ;;  %5742 = vmatprep.mubr.bf16.mxu0 %v9767_v41  ;;  %v9765_v51 = vld [vmem:[%s13402_s0 + $0x550] ss:$108 sps:$4 sm:$0xff]   ;;  %v9772_v49 = vld [vmem:[%s13402_s0 + $0xce0] ss:$108 sps:$4 sm:$0x1f]  }
 0x22c   :  { %v8201_v62 = vpop.f32.mrf.mxu0  ;;  %v8265_v11 = vpop.f32.mrf.mxu1 }
 0x22d   :  { %v8202_v57 = vadd.f32 %v8201_v62, %v8200_v26  ;;  %v8266_v7 = vadd.f32 %v8265_v11, %v8264_v14 }
 0x22e   :  { %v8203_v44 = vpop.f32.mrf.mxu0  ;;  %v8267_v9 = vpop.f32.mrf.mxu1 }
 0x22f   :  { %v11920_v32 = vadd.f32 %v8202_v57, %v11680_v45  ;;  %v11923_v5 = vadd.f32 %v8266_v7, %v11683_v20 }
 0x230   :  { %v8204_v6 = vpop.f32.mrf.mxu0  ;;  %v8268_v2 = vpop.f32.mrf.mxu1 }
 0x231   :  { %v8205_v43 = vadd.f32 %v8204_v6, %v8203_v44  ;;  %v8269_v52 = vadd.f32 %v8268_v2, %v8267_v9  ;;  %v9787_v6 = vld [vmem:[%s13401_s1 + $0x5b8] sm:$0xff]  }
 0x232   :  { %v8206_v10 = vpop.f32.mrf.mxu0  ;;  %v8270_v40 = vpop.f32.mrf.mxu1  ;;  %5646 = vmatmul.mubr.bf16.gmra.mxu1 %v9762_v53  ;;  %5743 = vmatmul.mubr.bf16.gmra.mxu0 %v9765_v51  ;;  %v9790_v2 = vld [vmem:[%s13402_s0 + $0x7dc] ss:$108 sps:$4 sm:$0xff]  }
 0x233   :  { %v11932_v45 = vadd.f32 %v8205_v43, %v11692_v36  ;;  %v11935_v20 = vadd.f32 %v8269_v52, %v11695_v33  ;;  %5653 = vmatprep.mubr.bf16.mxu1 %v9774_v58  ;;  %5750 = vmatprep.mubr.bf16.mxu0 %v9777_v15  ;;  %v9775_v36 = vld [vmem:[%s13402_s0 + $0x628] ss:$108 sps:$4 sm:$0xff]   ;;  %v9778_v58 = vld [vmem:[%s13402_s0 + $0x700] ss:$108 sps:$4 sm:$0xff]  }
 0x234   :  { %v8207_v8 = vpop.f32.mrf.mxu0  ;;  %v8271_v22 = vpop.f32.mrf.mxu1 }
 0x235   :  { %v8208_v13 = vadd.f32 %v8207_v8, %v8206_v10  ;;  %v8272_v61 = vadd.f32 %v8271_v22, %v8270_v40  ;;  %v9793_v10 = vld [vmem:[%s13402_s0 + $0x124] ss:$108 sps:$4 sm:$0xff]  }
 0x236   :  { %v8209_v23 = vpop.f32.mrf.mxu0  ;;  %v8273_v47 = vpop.f32.mrf.mxu1 }
 0x237   :  { %v11944_v41 = vadd.f32 %v8208_v13, %v11704_v31  ;;  %v11947_v33 = vadd.f32 %v8272_v61, %v11707_v56 }
 0x238   :  { %v8210_v59 = vpop.f32.mrf.mxu0  ;;  %v8274_v37 = vpop.f32.mrf.mxu1 }
 0x239   :  { %v8211_v26 = vadd.f32 %v8210_v59, %v8209_v23  ;;  %v8275_v14 = vadd.f32 %v8274_v37, %v8273_v47  ;;  %v9803_v23 = vld [vmem:[%s13401_s1 + $0x5b0] sm:$0xff]   ;;  %v9791_v37 = vld [vmem:[%s13402_s0 + $0x120] ss:$108 sps:$4 sm:$0xff]  }
 0x23a   :  { %v8212_v62 = vpop.f32.mrf.mxu0  ;;  %v8276_v11 = vpop.f32.mrf.mxu1  ;;  %5654 = vmatmul.mubr.bf16.gmra.mxu1 %v9772_v49  ;;  %5751 = vmatmul.mubr.bf16.gmra.mxu0 %v9775_v36  ;;  %v9818_v36 = vld [vmem:[%s13401_s1 + $0x5e8] sm:$0xff]  }
 0x23b   :  { %v11956_v31 = vadd.f32 %v8211_v26, %v11716_v60  ;;  %v11959_v56 = vadd.f32 %v8275_v14, %v11719_v38  ;;  %5758 = vmatprep.mubr.bf16.mxu0 %v9780_v55  ;;  %5855 = vmatprep.mubr.bf16.mxu1 %v9783_v54  ;;  %v9781_v60 = vld [vmem:[%s13402_s0 + $0x48] ss:$108 sps:$4 sm:$0xff]  }
 0x23c   :  { %v8213_v57 = vpop.f32.mrf.mxu0  ;;  %v8277_v7 = vpop.f32.mrf.mxu1 }
 0x23d   :  { %v8214_v44 = vadd.f32 %v8213_v57, %v8212_v62  ;;  %v8278_v9 = vadd.f32 %v8277_v7, %v8276_v11  ;;  %v9796_v62 = vld [vmem:[%s13402_s0 + $0x8b4] ss:$108 sps:$4 sm:$0xff]   ;;  %v9799_v11 = vld [vmem:[%s13402_s0 + $0x1fc] ss:$108 sps:$4 sm:$0xff]  }
 0x23e   :  { %v8215_v53 = vpop.f32.mrf.mxu0  ;;  %v8279_v51 = vpop.f32.mrf.mxu1 }
 0x23f   :  { %v11968_v15 = vadd.f32 %v8214_v44, %v11728_v27  ;;  %v11971_v38 = vadd.f32 %v8278_v9, %v11731_v24  ;;  %v9802_v27 = vld [vmem:[%s13401_s1 + $0x5f0] sm:$0xff]  }
 0x240   :  { %v8216_v43 = vpop.f32.mrf.mxu0  ;;  %v8280_v52 = vpop.f32.mrf.mxu1 }
 0x241   :  { %v8217_v24 = vadd.f32 %v8216_v43, %v8215_v53  ;;  %v8281_v40 = vadd.f32 %v8280_v52, %v8279_v51  ;;  %v9835_v43 = vld [vmem:[%s13401_s1 + $0x5a0] sm:$0xff]  }
 0x242   :  { %v8282_v8 = vpop.f32.mrf.mxu1  ;;  %v8346_v22 = vpop.f32.mrf.mxu0  ;;  %5759 = vmatmul.mubr.bf16.gmra.mxu0 %v9778_v58  ;;  %5856 = vmatmul.mubr.bf16.vlgmr.msra.gmra.mxu1 %v9781_v60 }
 0x243   :  { %v11986_v13 = vadd.f32 %v8217_v24, %v11746_v46  ;;  %v11989_v61 = vadd.f32 %v8281_v40, %v11749_v28  ;;  %8891 = vmatpush3.bf16.msra.mxu1 %v9787_v6  ;;  %5766 = vmatprep.mubr.bf16.mxu0 %v9790_v2  ;;  %v9788_v28 = vld [vmem:[%s13402_s0 + $0x7d8] ss:$108 sps:$4 sm:$0xff]  }
 0x244   :  { %v8283_v47 = vpop.f32.mrf.mxu1  ;;  %v8347_v49 = vpop.f32.mrf.mxu0  ;;  %5863 = vmatprep.mubr.bf16.mxu1 %v9793_v10  ;;  %8892 = vmatprep.subr.bf16.mxu1 %v9802_v27  ;;  %v9797_v40 = vld [vmem:[%s13402_s0 + $0x1f8] ss:$108 sps:$4 sm:$0xff]  }
 0x245   :  { %v8284_v55 = vadd.f32 %v8283_v47, %v8282_v8  ;;  %v8348_v46 = vadd.f32 %v8347_v49, %v8346_v22  ;;  %v9809_v47 = vld [vmem:[%s13402_s0 + $0x2d4] ss:$108 sps:$4 sm:$0xff]  }
 0x246   :  { %v8285_v54 = vpop.f32.mrf.mxu1  ;;  %v8349_v59 = vpop.f32.mrf.mxu0 }
 0x247   :  { %v12004_v26 = vadd.f32 %v8284_v55, %v11764_v0  ;;  %v12007_v14 = vadd.f32 %v8348_v46, %v11767_v50  ;;  %8893 = vmatpush3.bf16.msra.mxu1 %v9803_v23  ;;  %v9819_v0 = vld [vmem:[%s13401_s1 + $0x5a8] sm:$0xff]   ;;  %v9834_v50 = vld [vmem:[%s13401_s1 + $0x5e0] sm:$0xff]   ;;  %v9851_v55 = vld [vmem:[%s13401_s1 + $0x598] sm:$0xff]  }
 0x248   :  { %v8286_v57 = vpop.f32.mrf.mxu1  ;;  %v8350_v7 = vpop.f32.mrf.mxu0  ;;  %8894 = vmatprep.subr.bf16.mxu1 %v9818_v36  ;;  %v9806_v23 = vld [vmem:[%s13402_s0 + $0x98c] ss:$108 sps:$4 sm:$0xff]  }
 0x249   :  { %v8287_v44 = vadd.f32 %v8286_v57, %v8285_v54  ;;  %v8351_v9 = vadd.f32 %v8350_v7, %v8349_v59  ;;  %v9867_v57 = vld [vmem:[%s13401_s1 + $0x590] sm:$0xff]  }
 0x24a   :  { %v8288_v53 = vpop.f32.mrf.mxu1  ;;  %v8352_v51 = vpop.f32.mrf.mxu0  ;;  %5767 = vmatmul.mubr.bf16.gmra.mxu0 %v9788_v28  ;;  %5864 = vmatmul.mubr.bf16.gmra.mxu1 %v9791_v37 }
 0x24b   :  { %v12022_v58 = vadd.f32 %v8287_v44, %v11782_v1  ;;  %v12025_v60 = vadd.f32 %v8351_v9, %v11785_v19  ;;  %5774 = vmatprep.mubr.bf16.mxu0 %v9796_v62  ;;  %5871 = vmatprep.mubr.bf16.mxu1 %v9799_v11  ;;  %v9850_v1 = vld [vmem:[%s13401_s1 + $0x5d8] sm:$0xff]  }
 0x24c   :  { %v8289_v6 = vpop.f32.mrf.mxu1  ;;  %v8353_v2 = vpop.f32.mrf.mxu0  ;;  %8895 = vmatpush3.bf16.msra.mxu1 %v9819_v0  ;;  %v9794_v19 = vld [vmem:[%s13402_s0 + $0x8b0] ss:$108 sps:$4 sm:$0xff]  }
 0x24d   :  { %v8290_v52 = vadd.f32 %v8289_v6, %v8288_v53  ;;  %v8354_v10 = vadd.f32 %v8353_v2, %v8352_v51  ;;  %8896 = vmatprep.subr.bf16.mxu1 %v9834_v50  ;;  %v9807_v50 = vld [vmem:[%s13402_s0 + $0x2d0] ss:$108 sps:$4 sm:$0xff]   ;;  %v9815_v2 = vld [vmem:[%s13402_s0 + $0x3ac] ss:$108 sps:$4 sm:$0xff]  }
 0x24e   :  { %v8291_v27 = vpop.f32.mrf.mxu1  ;;  %v8355_v24 = vpop.f32.mrf.mxu0  ;;  %v9812_v6 = vld [vmem:[%s13402_s0 + $0xa64] ss:$108 sps:$4 sm:$0xff]  }
 0x24f   :  { %v12040_v8 = vadd.f32 %v8290_v52, %v11800_v42  ;;  %v12043_v22 = vadd.f32 %v8354_v10, %v11803_v16  ;;  %v9866_v16 = vld [vmem:[%s13401_s1 + $0x5d0] sm:$0xff]   ;;  %v9883_v10 = vld [vmem:[%s13401_s1 + $0x588] sm:$0xff]  }
 0x250   :  { %v8292_v49 = vpop.f32.mrf.mxu1  ;;  %v8356_v36 = vpop.f32.mrf.mxu0  ;;  %8897 = vmatpush3.bf16.msra.mxu1 %v9835_v43 }
 0x251   :  { %v8293_v42 = vadd.f32 %v8292_v49, %v8291_v27  ;;  %v8357_v46 = vadd.f32 %v8356_v36, %v8355_v24  ;;  %8898 = vmatprep.subr.bf16.mxu1 %v9850_v1  ;;  %v9899_v49 = vld [vmem:[%s13401_s1 + $0x580] sm:$0xff]  }
 0x252   :  { %v8294_v54 = vpop.f32.mrf.mxu1  ;;  %v8358_v59 = vpop.f32.mrf.mxu0  ;;  %5775 = vmatmul.mubr.bf16.gmra.mxu0 %v9794_v19  ;;  %5872 = vmatmul.mubr.bf16.gmra.mxu1 %v9797_v40 }
 0x253   :  { %v12058_v28 = vadd.f32 %v8293_v42, %v11818_v63  ;;  %v12061_v37 = vadd.f32 %v8357_v46, %v11821_v30  ;;  %5782 = vmatprep.mubr.bf16.mxu0 %v9806_v23  ;;  %5879 = vmatprep.mubr.bf16.mxu1 %v9809_v47  ;;  %v9882_v63 = vld [vmem:[%s13401_s1 + $0x5c8] sm:$0xff]  }
 0x254   :  { %v8295_v62 = vpop.f32.mrf.mxu1  ;;  %v8359_v11 = vpop.f32.mrf.mxu0  ;;  %8899 = vmatpush3.bf16.msra.mxu1 %v9851_v55  ;;  %v9804_v30 = vld [vmem:[%s13402_s0 + $0x988] ss:$108 sps:$4 sm:$0xff]   ;;  %v9810_v46 = vld [vmem:[%s13402_s0 + $0xa60] ss:$108 sps:$4 sm:$0xff]  }
 0x255   :  { %v8296_v7 = vadd.f32 %v8295_v62, %v8294_v54  ;;  %v8360_v0 = vadd.f32 %v8359_v11, %v8358_v59  ;;  %8900 = vmatprep.subr.bf16.mxu1 %v9866_v16  ;;  %v9813_v16 = vld [vmem:[%s13402_s0 + $0x3a8] ss:$108 sps:$4 sm:$0xff]   ;;  %v9825_v11 = vld [vmem:[%s13402_s0 + $0x484] ss:$108 sps:$4 sm:$0xff]  }
 0x256   :  { %v8297_v44 = vpop.f32.mrf.mxu1  ;;  %v8361_v9 = vpop.f32.mrf.mxu0  ;;  %v9822_v62 = vld [vmem:[%s13402_s0 + $0xb3c] ss:$108 sps:$4 sm:$0xff]  }
 0x257   :  { %v12076_v53 = vadd.f32 %v8296_v7, %v11836_v35  ;;  %v12079_v51 = vadd.f32 %v8360_v0, %v11839_v17  ;;  %v9898_v17 = vld [vmem:[%s13401_s1 + $0x5c0] sm:$0xff]  }
 0x258   :  { %v8298_v43 = vpop.f32.mrf.mxu1  ;;  %v8362_v52 = vpop.f32.mrf.mxu0  ;;  %8901 = vmatpush3.bf16.msra.mxu1 %v9867_v57 }
 0x259   :  { %v8299_v35 = vadd.f32 %v8298_v43, %v8297_v44  ;;  %v8363_v1 = vadd.f32 %v8362_v52, %v8361_v9  ;;  %8902 = vmatprep.subr.bf16.mxu1 %v9882_v63 }
 0x25a   :  { %v8300_v27 = vpop.f32.mrf.mxu1  ;;  %v8364_v24 = vpop.f32.mrf.mxu0  ;;  %5783 = vmatmul.mubr.bf16.gmra.mxu0 %v9804_v30  ;;  %5880 = vmatmul.mubr.bf16.gmra.mxu1 %v9807_v50 }
 0x25b   :  { %v12094_v19 = vadd.f32 %v8299_v35, %v11854_v18  ;;  %v12097_v40 = vadd.f32 %v8363_v1, %v11857_v48  ;;  %5790 = vmatprep.mubr.bf16.mxu0 %v9812_v6  ;;  %5887 = vmatprep.mubr.bf16.mxu1 %v9815_v2  ;;  %v12105_v18 = vld [vmem:[%s13401_s1 + $0x6b8] sm:$0xff]   ;;  %v9828_v1 = vld [vmem:[%s13402_s0 + $0xc14] ss:$108 sps:$4 sm:$0xff]  }
 0x25c   :  { %v8301_v23 = vpop.f32.mrf.mxu1  ;;  %v8365_v47 = vpop.f32.mrf.mxu0  ;;  %8903 = vmatpush3.bf16.msra.mxu1 %v9883_v10  ;;  %v9820_v10 = vld [vmem:[%s13402_s0 + $0xb38] ss:$108 sps:$4 sm:$0xff]  }
 0x25d   :  { %v8302_v36 = vadd.f32 %v8301_v23, %v8300_v27  ;;  %v8366_v55 = vadd.f32 %v8365_v47, %v8364_v24  ;;  %8904 = vmatprep.subr.bf16.mxu1 %v9898_v17  ;;  %v9831_v17 = vld [vmem:[%s13402_s0 + $0x55c] ss:$108 sps:$4 sm:$0xff]  }
 0x25e   :  { %v8303_v42 = vpop.f32.mrf.mxu1  ;;  %v8367_v48 = vpop.f32.mrf.mxu0 }
 0x25f   :  { %v12114_v54 = vadd.f32 %v8302_v36, %v11872_v12  ;;  %v12117_v59 = vadd.f32 %v8366_v55, %v11875_v25 }
 0x260   :  { %v8304_v57 = vpop.f32.mrf.mxu1  ;;  %v8368_v7 = vpop.f32.mrf.mxu0  ;;  %8905 = vmatpush3.bf16.msra.mxu1 %v9899_v49 }
 0x261   :  { %v8305_v0 = vadd.f32 %v8304_v57, %v8303_v42  ;;  %v8369_v63 = vadd.f32 %v8368_v7, %v8367_v48  ;;  %9138 = vmatprep.subr.bf16.mxu1 %v12105_v18  ;;  %v9838_v7 = vld [vmem:[%s13402_s0 + $0xcec] ss:$108 sps:$4 sm:$0x1f]  }
 0x262   :  { %v8306_v12 = vpop.f32.mrf.mxu1  ;;  %v8370_v44 = vpop.f32.mrf.mxu0  ;;  %5791 = vmatmul.mubr.bf16.gmra.mxu0 %v9810_v46  ;;  %5888 = vmatmul.mubr.bf16.gmra.mxu1 %v9813_v16 }
 0x263   :  { %v12127_v25 = vadd.f32 %v8305_v0, %v11884_v39  ;;  %v12130_v9 = vadd.f32 %v8369_v63, %v11887_v29  ;;  %5798 = vmatprep.mubr.bf16.mxu0 %v9822_v62  ;;  %5895 = vmatprep.mubr.bf16.mxu1 %v9825_v11  ;;  %v9823_v39 = vld [vmem:[%s13402_s0 + $0x480] ss:$108 sps:$4 sm:$0xff]   ;;  %v9826_v11 = vld [vmem:[%s13402_s0 + $0xc10] ss:$108 sps:$4 sm:$0xff]  }
 0x264   :  { %v8307_v30 = vpop.f32.mrf.mxu1  ;;  %v8371_v50 = vpop.f32.mrf.mxu0  ;;  %v9841_v0 = vld [vmem:[%s13402_s0 + $0x634] ss:$108 sps:$4 sm:$0xff]  }
 0x265   :  { %v8308_v6 = vadd.f32 %v8307_v30, %v8306_v12  ;;  %v8372_v2 = vadd.f32 %v8371_v50, %v8370_v44 }
 0x266   :  { %v8309_v43 = vpop.f32.mrf.mxu1  ;;  %v8373_v52 = vpop.f32.mrf.mxu0 }
 0x267   :  { %v12139_v35 = vadd.f32 %v8308_v6, %v11896_v21  ;;  %v12142_v29 = vadd.f32 %v8372_v2, %v11899_v3 }
 0x268   :  { %v8310_v27 = vpop.f32.mrf.mxu1  ;;  %v8374_v24 = vpop.f32.mrf.mxu0 }
 0x269   :  { %v8311_v23 = vadd.f32 %v8310_v27, %v8309_v43  ;;  %v8375_v47 = vadd.f32 %v8374_v24, %v8373_v52  ;;  %v9844_v24 = vld [vmem:[%s13402_s0 + $0x70c] ss:$108 sps:$4 sm:$0xff]  }
 0x26a   :  { %v8312_v49 = vpop.f32.mrf.mxu1  ;;  %v8376_v36 = vpop.f32.mrf.mxu0  ;;  %5799 = vmatmul.mubr.bf16.gmra.mxu0 %v9820_v10  ;;  %5896 = vmatmul.mubr.bf16.gmra.mxu1 %v9823_v39 }
 0x26b   :  { %v12151_v21 = vadd.f32 %v8311_v23, %v11908_v4  ;;  %v12154_v3 = vadd.f32 %v8375_v47, %v11911_v34  ;;  %5806 = vmatprep.mubr.bf16.mxu0 %v9828_v1  ;;  %5903 = vmatprep.mubr.bf16.mxu1 %v9831_v17  ;;  %v9829_v4 = vld [vmem:[%s13402_s0 + $0x558] ss:$108 sps:$4 sm:$0xff]   ;;  %v9836_v17 = vld [vmem:[%s13402_s0 + $0xce8] ss:$108 sps:$4 sm:$0x1f]  }
 0x26c   :  { %v8313_v55 = vpop.f32.mrf.mxu1  ;;  %v8377_v42 = vpop.f32.mrf.mxu0  ;;  %v9847_v23 = vld [vmem:[%s13402_s0 + $0x54] ss:$108 sps:$4 sm:$0xff]  }
 0x26d   :  { %v8314_v48 = vadd.f32 %v8313_v55, %v8312_v49  ;;  %v8378_v46 = vadd.f32 %v8377_v42, %v8376_v36 }
 0x26e   :  { %v8315_v16 = vpop.f32.mrf.mxu1  ;;  %v8379_v62 = vpop.f32.mrf.mxu0 }
 0x26f   :  { %v12163_v57 = vadd.f32 %v8314_v48, %v11920_v32  ;;  %v12166_v34 = vadd.f32 %v8378_v46, %v11923_v5 }
 0x270   :  { %v8316_v63 = vpop.f32.mrf.mxu1  ;;  %v8380_v12 = vpop.f32.mrf.mxu0 }
 0x271   :  { %v8317_v44 = vadd.f32 %v8316_v63, %v8315_v16  ;;  %v8381_v30 = vadd.f32 %v8380_v12, %v8379_v62  ;;  %v9849_v12 = vld [vmem:[%s13401_s1 + $0x638] sm:$0xff]  }
 0x272   :  { %v8318_v50 = vpop.f32.mrf.mxu1  ;;  %v8382_v6 = vpop.f32.mrf.mxu0  ;;  %5807 = vmatmul.mubr.bf16.gmra.mxu0 %v9826_v11  ;;  %5904 = vmatmul.mubr.bf16.gmra.mxu1 %v9829_v4 }
 0x273   :  { %v12175_v32 = vadd.f32 %v8317_v44, %v11932_v45  ;;  %v12178_v5 = vadd.f32 %v8381_v30, %v11935_v20  ;;  %5814 = vmatprep.mubr.bf16.mxu0 %v9838_v7  ;;  %5911 = vmatprep.mubr.bf16.mxu1 %v9841_v0  ;;  %v9839_v45 = vld [vmem:[%s13402_s0 + $0x630] ss:$108 sps:$4 sm:$0xff]   ;;  %v9842_v0 = vld [vmem:[%s13402_s0 + $0x708] ss:$108 sps:$4 sm:$0xff]  }
 0x274   :  { %v8319_v2 = vpop.f32.mrf.mxu1  ;;  %v8383_v43 = vpop.f32.mrf.mxu0  ;;  %v9854_v44 = vld [vmem:[%s13402_s0 + $0x7e4] ss:$108 sps:$4 sm:$0xff]  }
 0x275   :  { %v8320_v52 = vadd.f32 %v8319_v2, %v8318_v50  ;;  %v8384_v10 = vadd.f32 %v8383_v43, %v8382_v6  ;;  %v9857_v6 = vld [vmem:[%s13402_s0 + $0x12c] ss:$108 sps:$4 sm:$0xff]  }
 0x276   :  { %v8321_v39 = vpop.f32.mrf.mxu1  ;;  %v8385_v1 = vpop.f32.mrf.mxu0 }
 0x277   :  { %v12187_v27 = vadd.f32 %v8320_v52, %v11944_v41  ;;  %v12190_v20 = vadd.f32 %v8384_v10, %v11947_v33 }
 0x278   :  { %v8322_v47 = vpop.f32.mrf.mxu1  ;;  %v8386_v49 = vpop.f32.mrf.mxu0 }
 0x279   :  { %v8323_v36 = vadd.f32 %v8322_v47, %v8321_v39  ;;  %v8387_v55 = vadd.f32 %v8386_v49, %v8385_v1  ;;  %v9865_v1 = vld [vmem:[%s13401_s1 + $0x630] sm:$0xff]  }
 0x27a   :  { %v8324_v42 = vpop.f32.mrf.mxu1  ;;  %v8388_v48 = vpop.f32.mrf.mxu0  ;;  %5815 = vmatmul.mubr.bf16.gmra.mxu0 %v9836_v17  ;;  %5912 = vmatmul.mubr.bf16.gmra.mxu1 %v9839_v45 }
 0x27b   :  { %v12199_v41 = vadd.f32 %v8323_v36, %v11956_v31  ;;  %v12202_v33 = vadd.f32 %v8387_v55, %v11959_v56  ;;  %5919 = vmatprep.mubr.bf16.mxu1 %v9844_v24  ;;  %6016 = vmatprep.mubr.bf16.mxu0 %v9847_v23  ;;  %v9845_v31 = vld [vmem:[%s13402_s0 + $0x50] ss:$108 sps:$4 sm:$0xff]   ;;  %v9880_v24 = vld [vmem:[%s13401_s1 + $0x668] sm:$0xff]  }
 0x27c   :  { %v8325_v46 = vpop.f32.mrf.mxu1  ;;  %v8389_v16 = vpop.f32.mrf.mxu0  ;;  %v9855_v36 = vld [vmem:[%s13402_s0 + $0x128] ss:$108 sps:$4 sm:$0xff]  }
 0x27d   :  { %v8326_v62 = vadd.f32 %v8325_v46, %v8324_v42  ;;  %v8390_v11 = vadd.f32 %v8389_v16, %v8388_v48  ;;  %v9860_v48 = vld [vmem:[%s13402_s0 + $0x8bc] ss:$108 sps:$4 sm:$0xff]   ;;  %v9863_v46 = vld [vmem:[%s13402_s0 + $0x204] ss:$108 sps:$4 sm:$0xff]  }
 0x27e   :  { %v8327_v4 = vpop.f32.mrf.mxu1  ;;  %v8391_v7 = vpop.f32.mrf.mxu0 }
 0x27f   :  { %v12211_v63 = vadd.f32 %v8326_v62, %v11968_v15  ;;  %v12214_v56 = vadd.f32 %v8390_v11, %v11971_v38  ;;  %v9864_v15 = vld [vmem:[%s13401_s1 + $0x670] sm:$0xff]  }
 0x280   :  { %v8328_v30 = vpop.f32.mrf.mxu1  ;;  %v8392_v50 = vpop.f32.mrf.mxu0 }
 0x281   :  { %v8329_v38 = vadd.f32 %v8328_v30, %v8327_v4  ;;  %v8393_v2 = vadd.f32 %v8392_v50, %v8391_v7  ;;  %v9897_v50 = vld [vmem:[%s13401_s1 + $0x620] sm:$0xff]  }
 0x282   :  { %v8394_v43 = vpop.f32.mrf.mxu0  ;;  %v8458_v52 = vpop.f32.mrf.mxu1  ;;  %5920 = vmatmul.mubr.bf16.gmra.mxu1 %v9842_v0  ;;  %6017 = vmatmul.mubr.bf16.vlgmr.msra.gmra.mxu0 %v9845_v31 }
 0x283   :  { %v12229_v10 = vadd.f32 %v8329_v38, %v11986_v13  ;;  %v12232_v39 = vadd.f32 %v8393_v2, %v11989_v61  ;;  %9003 = vmatpush3.bf16.msra.mxu0 %v9849_v12  ;;  %5927 = vmatprep.mubr.bf16.mxu1 %v9854_v44  ;;  %v9852_v61 = vld [vmem:[%s13402_s0 + $0x7e0] ss:$108 sps:$4 sm:$0xff]  }
 0x284   :  { %v8395_v17 = vpop.f32.mrf.mxu0  ;;  %v8459_v45 = vpop.f32.mrf.mxu1  ;;  %6024 = vmatprep.mubr.bf16.mxu0 %v9857_v6  ;;  %9004 = vmatprep.subr.bf16.mxu0 %v9864_v15 }
 0x285   :  { %v8396_v23 = vadd.f32 %v8395_v17, %v8394_v43  ;;  %v8460_v13 = vadd.f32 %v8459_v45, %v8458_v52  ;;  %v9861_v43 = vld [vmem:[%s13402_s0 + $0x200] ss:$108 sps:$4 sm:$0xff]   ;;  %v9873_v45 = vld [vmem:[%s13402_s0 + $0x2dc] ss:$108 sps:$4 sm:$0xff]  }
 0x286   :  { %v8397_v47 = vpop.f32.mrf.mxu0  ;;  %v8461_v49 = vpop.f32.mrf.mxu1  ;;  %v9870_v17 = vld [vmem:[%s13402_s0 + $0x994] ss:$108 sps:$4 sm:$0xff]  }
 0x287   :  { %v12247_v55 = vadd.f32 %v8396_v23, %v12004_v26  ;;  %v12250_v42 = vadd.f32 %v8460_v13, %v12007_v14  ;;  %9005 = vmatpush3.bf16.msra.mxu0 %v9865_v1  ;;  %v9881_v26 = vld [vmem:[%s13401_s1 + $0x628] sm:$0xff]   ;;  %v9896_v14 = vld [vmem:[%s13401_s1 + $0x660] sm:$0xff]   ;;  %v9913_v13 = vld [vmem:[%s13401_s1 + $0x618] sm:$0xff]  }
 0x288   :  { %v8398_v16 = vpop.f32.mrf.mxu0  ;;  %v8462_v62 = vpop.f32.mrf.mxu1  ;;  %9006 = vmatprep.subr.bf16.mxu0 %v9880_v24 }
 0x289   :  { %v8399_v11 = vadd.f32 %v8398_v16, %v8397_v47  ;;  %v8463_v4 = vadd.f32 %v8462_v62, %v8461_v49  ;;  %v9928_v62 = vld [vmem:[%s13401_s1 + $0x610] sm:$0xff]  }
 0x28a   :  { %v8400_v7 = vpop.f32.mrf.mxu0  ;;  %v8464_v0 = vpop.f32.mrf.mxu1  ;;  %5928 = vmatmul.mubr.bf16.gmra.mxu1 %v9852_v61  ;;  %6025 = vmatmul.mubr.bf16.gmra.mxu0 %v9855_v36 }
 0x28b   :  { %v12265_v31 = vadd.f32 %v8399_v11, %v12022_v58  ;;  %v12268_v12 = vadd.f32 %v8463_v4, %v12025_v60  ;;  %5935 = vmatprep.mubr.bf16.mxu1 %v9860_v48  ;;  %6032 = vmatprep.mubr.bf16.mxu0 %v9863_v46  ;;  %v9912_v58 = vld [vmem:[%s13401_s1 + $0x658] sm:$0xff]  }
 0x28c   :  { %v8401_v44 = vpop.f32.mrf.mxu0  ;;  %v8465_v30 = vpop.f32.mrf.mxu1  ;;  %9007 = vmatpush3.bf16.msra.mxu0 %v9881_v26  ;;  %v9858_v60 = vld [vmem:[%s13402_s0 + $0x8b8] ss:$108 sps:$4 sm:$0xff]  }
 0x28d   :  { %v8402_v6 = vadd.f32 %v8401_v44, %v8400_v7  ;;  %v8466_v15 = vadd.f32 %v8465_v30, %v8464_v0  ;;  %9008 = vmatprep.subr.bf16.mxu0 %v9896_v14  ;;  %v9871_v7 = vld [vmem:[%s13402_s0 + $0x2d8] ss:$108 sps:$4 sm:$0xff]  }
 0x28e   :  { %v8403_v38 = vpop.f32.mrf.mxu0  ;;  %v8467_v2 = vpop.f32.mrf.mxu1  ;;  %v9876_v30 = vld [vmem:[%s13402_s0 + $0xa6c] ss:$108 sps:$4 sm:$0xff]  }
 0x28f   :  { %v12283_v52 = vadd.f32 %v8402_v6, %v12040_v8  ;;  %v12286_v1 = vadd.f32 %v8466_v15, %v12043_v22  ;;  %v9927_v22 = vld [vmem:[%s13401_s1 + $0x650] sm:$0xff]  }
 0x290   :  { %v8404_v24 = vpop.f32.mrf.mxu0  ;;  %v8468_v23 = vpop.f32.mrf.mxu1  ;;  %9009 = vmatpush3.bf16.msra.mxu0 %v9897_v50  ;;  %v9879_v50 = vld [vmem:[%s13402_s0 + $0x3b4] ss:$108 sps:$4 sm:$0xff]  }
 0x291   :  { %v8405_v8 = vadd.f32 %v8404_v24, %v8403_v38  ;;  %v8469_v47 = vadd.f32 %v8468_v23, %v8467_v2  ;;  %9010 = vmatprep.subr.bf16.mxu0 %v9912_v58  ;;  %v9943_v58 = vld [vmem:[%s13401_s1 + $0x608] sm:$0xff]   ;;  %v9958_v23 = vld [vmem:[%s13401_s1 + $0x600] sm:$0xff]  }
 0x292   :  { %v8406_v49 = vpop.f32.mrf.mxu0  ;;  %v8470_v61 = vpop.f32.mrf.mxu1  ;;  %5936 = vmatmul.mubr.bf16.gmra.mxu1 %v9858_v60  ;;  %6033 = vmatmul.mubr.bf16.gmra.mxu0 %v9861_v43 }
 0x293   :  { %v12301_v36 = vadd.f32 %v8405_v8, %v12058_v28  ;;  %v12304_v48 = vadd.f32 %v8469_v47, %v12061_v37  ;;  %5943 = vmatprep.mubr.bf16.mxu1 %v9870_v17  ;;  %6040 = vmatprep.mubr.bf16.mxu0 %v9873_v45  ;;  %v9942_v28 = vld [vmem:[%s13401_s1 + $0x648] sm:$0xff]   ;;  %v9868_v37 = vld [vmem:[%s13402_s0 + $0x990] ss:$108 sps:$4 sm:$0xff]  }
 0x294   :  { %v8407_v46 = vpop.f32.mrf.mxu0  ;;  %v8471_v16 = vpop.f32.mrf.mxu1  ;;  %9011 = vmatpush3.bf16.msra.mxu0 %v9913_v13 }
 0x295   :  { %v8408_v26 = vadd.f32 %v8407_v46, %v8406_v49  ;;  %v8472_v11 = vadd.f32 %v8471_v16, %v8470_v61  ;;  %9012 = vmatprep.subr.bf16.mxu0 %v9927_v22  ;;  %v9886_v46 = vld [vmem:[%s13402_s0 + $0xb44] ss:$108 sps:$4 sm:$0xff]   ;;  %v9889_v16 = vld [vmem:[%s13402_s0 + $0x48c] ss:$108 sps:$4 sm:$0xff]  }
 0x296   :  { %v8409_v4 = vpop.f32.mrf.mxu0  ;;  %v8473_v14 = vpop.f32.mrf.mxu1 }
 0x297   :  { %v12319_v0 = vadd.f32 %v8408_v26, %v12076_v53  ;;  %v12322_v44 = vadd.f32 %v8472_v11, %v12079_v51  ;;  %v9957_v51 = vld [vmem:[%s13401_s1 + $0x640] sm:$0xff]  }
 0x298   :  { %v8410_v6 = vpop.f32.mrf.mxu0  ;;  %v8474_v15 = vpop.f32.mrf.mxu1  ;;  %9013 = vmatpush3.bf16.msra.mxu0 %v9928_v62 }
 0x299   :  { %v8411_v53 = vadd.f32 %v8410_v6, %v8409_v4  ;;  %v8475_v38 = vadd.f32 %v8474_v15, %v8473_v14  ;;  %9014 = vmatprep.subr.bf16.mxu0 %v9942_v28 }
 0x29a   :  { %v8412_v2 = vpop.f32.mrf.mxu0  ;;  %v8476_v60 = vpop.f32.mrf.mxu1  ;;  %5944 = vmatmul.mubr.bf16.gmra.mxu1 %v9868_v37  ;;  %6041 = vmatmul.mubr.bf16.gmra.mxu0 %v9871_v7 }
 0x29b   :  { %v12337_v43 = vadd.f32 %v8411_v53, %v12094_v19  ;;  %v12340_v17 = vadd.f32 %v8475_v38, %v12097_v40  ;;  %5951 = vmatprep.mubr.bf16.mxu1 %v9876_v30  ;;  %6048 = vmatprep.mubr.bf16.mxu0 %v9879_v50  ;;  %v9874_v19 = vld [vmem:[%s13402_s0 + $0xa68] ss:$108 sps:$4 sm:$0xff]   ;;  %v9877_v40 = vld [vmem:[%s13402_s0 + $0x3b0] ss:$108 sps:$4 sm:$0xff]  }
 0x29c   :  { %v8413_v45 = vpop.f32.mrf.mxu0  ;;  %v8477_v24 = vpop.f32.mrf.mxu1  ;;  %9015 = vmatpush3.bf16.msra.mxu0 %v9943_v58  ;;  %v9884_v58 = vld [vmem:[%s13402_s0 + $0xb40] ss:$108 sps:$4 sm:$0xff]   ;;  %v9892_v38 = vld [vmem:[%s13402_s0 + $0xc1c] ss:$108 sps:$4 sm:$0xff]  }
 0x29d   :  { %v8414_v13 = vadd.f32 %v8413_v45, %v8412_v2  ;;  %v8478_v8 = vadd.f32 %v8477_v24, %v8476_v60  ;;  %9016 = vmatprep.subr.bf16.mxu0 %v9957_v51  ;;  %v9895_v51 = vld [vmem:[%s13402_s0 + $0x564] ss:$108 sps:$4 sm:$0xff]  }
 0x29e   :  { %v8415_v47 = vpop.f32.mrf.mxu0  ;;  %v8479_v22 = vpop.f32.mrf.mxu1 }
 0x29f   :  { %v12352_v49 = vadd.f32 %v8414_v13, %v12114_v54  ;;  %v12355_v61 = vadd.f32 %v8478_v8, %v12117_v59 }
 0x2a0   :  { %v8416_v62 = vpop.f32.mrf.mxu0  ;;  %v8480_v26 = vpop.f32.mrf.mxu1  ;;  %9017 = vmatpush3.bf16.msra.mxu0 %v9958_v23 }
 0x2a1   :  { %v8417_v11 = vadd.f32 %v8416_v62, %v8415_v47  ;;  %v8481_v28 = vadd.f32 %v8480_v26, %v8479_v22  ;;  %v9902_v26 = vld [vmem:[%s13402_s0 + $0xcf4] ss:$108 sps:$4 sm:$0x1f]  }
 0x2a2   :  { %v8418_v4 = vpop.f32.mrf.mxu0  ;;  %v8482_v14 = vpop.f32.mrf.mxu1  ;;  %5952 = vmatmul.mubr.bf16.gmra.mxu1 %v9874_v19  ;;  %6049 = vmatmul.mubr.bf16.gmra.mxu0 %v9877_v40 }
 0x2a3   :  { %v12364_v54 = vadd.f32 %v8417_v11, %v12127_v25  ;;  %v12367_v59 = vadd.f32 %v8481_v28, %v12130_v9  ;;  %5959 = vmatprep.mubr.bf16.mxu1 %v9886_v46  ;;  %6056 = vmatprep.mubr.bf16.mxu0 %v9889_v16  ;;  %v9887_v25 = vld [vmem:[%s13402_s0 + $0x488] ss:$108 sps:$4 sm:$0xff]   ;;  %v9890_v16 = vld [vmem:[%s13402_s0 + $0xc18] ss:$108 sps:$4 sm:$0xff]  }
 0x2a4   :  { %v8419_v37 = vpop.f32.mrf.mxu0  ;;  %v8483_v7 = vpop.f32.mrf.mxu1  ;;  %v9905_v11 = vld [vmem:[%s13402_s0 + $0x63c] ss:$108 sps:$4 sm:$0xff]  }
 0x2a5   :  { %v8420_v30 = vadd.f32 %v8419_v37, %v8418_v4  ;;  %v8484_v50 = vadd.f32 %v8483_v7, %v8482_v14 }
 0x2a6   :  { %v8421_v6 = vpop.f32.mrf.mxu0  ;;  %v8485_v15 = vpop.f32.mrf.mxu1 }
 0x2a7   :  { %v12376_v53 = vadd.f32 %v8420_v30, %v12139_v35  ;;  %v12379_v9 = vadd.f32 %v8484_v50, %v12142_v29 }
 0x2a8   :  { %v8422_v2 = vpop.f32.mrf.mxu0  ;;  %v8486_v60 = vpop.f32.mrf.mxu1 }
 0x2a9   :  { %v8423_v45 = vadd.f32 %v8422_v2, %v8421_v6  ;;  %v8487_v24 = vadd.f32 %v8486_v60, %v8485_v15  ;;  %v9908_v60 = vld [vmem:[%s13402_s0 + $0x714] ss:$108 sps:$4 sm:$0xff]  }
 0x2aa   :  { %v8424_v23 = vpop.f32.mrf.mxu0  ;;  %v8488_v13 = vpop.f32.mrf.mxu1  ;;  %5960 = vmatmul.mubr.bf16.gmra.mxu1 %v9884_v58  ;;  %6057 = vmatmul.mubr.bf16.gmra.mxu0 %v9887_v25 }
 0x2ab   :  { %v12388_v35 = vadd.f32 %v8423_v45, %v12151_v21  ;;  %v12391_v29 = vadd.f32 %v8487_v24, %v12154_v3  ;;  %5967 = vmatprep.mubr.bf16.mxu1 %v9892_v38  ;;  %6064 = vmatprep.mubr.bf16.mxu0 %v9895_v51  ;;  %v9893_v21 = vld [vmem:[%s13402_s0 + $0x560] ss:$108 sps:$4 sm:$0xff]   ;;  %v9900_v51 = vld [vmem:[%s13402_s0 + $0xcf0] ss:$108 sps:$4 sm:$0x1f]  }
 0x2ac   :  { %v8425_v8 = vpop.f32.mrf.mxu0  ;;  %v8489_v47 = vpop.f32.mrf.mxu1  ;;  %v9911_v45 = vld [vmem:[%s13402_s0 + $0x5c] ss:$108 sps:$4 sm:$0xff]  }
 0x2ad   :  { %v8426_v22 = vadd.f32 %v8425_v8, %v8424_v23  ;;  %v8490_v19 = vadd.f32 %v8489_v47, %v8488_v13 }
 0x2ae   :  { %v8427_v40 = vpop.f32.mrf.mxu0  ;;  %v8491_v46 = vpop.f32.mrf.mxu1 }
 0x2af   :  { %v12400_v62 = vadd.f32 %v8426_v22, %v12163_v57  ;;  %v12403_v3 = vadd.f32 %v8490_v19, %v12166_v34 }
 0x2b0   :  { %v8428_v28 = vpop.f32.mrf.mxu0  ;;  %v8492_v4 = vpop.f32.mrf.mxu1 }
 0x2b1   :  { %v8429_v14 = vadd.f32 %v8428_v28, %v8427_v40  ;;  %v8493_v37 = vadd.f32 %v8492_v4, %v8491_v46  ;;  %v9917_v4 = vld [vmem:[%s13402_s0 + $0x7ec] ss:$108 sps:$4 sm:$0xff]  }
 0x2b2   :  { %v8430_v7 = vpop.f32.mrf.mxu0  ;;  %v8494_v30 = vpop.f32.mrf.mxu1  ;;  %5968 = vmatmul.mubr.bf16.gmra.mxu1 %v9890_v16  ;;  %6065 = vmatmul.mubr.bf16.gmra.mxu0 %v9893_v21 }
 0x2b3   :  { %v12412_v57 = vadd.f32 %v8429_v14, %v12175_v32  ;;  %v12415_v34 = vadd.f32 %v8493_v37, %v12178_v5  ;;  %5975 = vmatprep.mubr.bf16.mxu1 %v9902_v26  ;;  %6072 = vmatprep.mubr.bf16.mxu0 %v9905_v11  ;;  %v9903_v32 = vld [vmem:[%s13402_s0 + $0x638] ss:$108 sps:$4 sm:$0xff]   ;;  %v9906_v11 = vld [vmem:[%s13402_s0 + $0x710] ss:$108 sps:$4 sm:$0xff]  }
 0x2b4   :  { %v8431_v50 = vpop.f32.mrf.mxu0  ;;  %v8495_v6 = vpop.f32.mrf.mxu1 }
 0x2b5   :  { %v8432_v15 = vadd.f32 %v8431_v50, %v8430_v7  ;;  %v8496_v58 = vadd.f32 %v8495_v6, %v8494_v30  ;;  %v9920_v7 = vld [vmem:[%s13402_s0 + $0x134] ss:$108 sps:$4 sm:$0xff]  }
 0x2b6   :  { %v8433_v25 = vpop.f32.mrf.mxu0  ;;  %v8497_v38 = vpop.f32.mrf.mxu1  ;;  %v9929_v30 = vld [vmem:[%s13401_s1 + $0x6b0] sm:$0xff]  }
 0x2b7   :  { %v12424_v2 = vadd.f32 %v8432_v15, %v12187_v27  ;;  %v12427_v5 = vadd.f32 %v8496_v58, %v12190_v20 }
 0x2b8   :  { %v8434_v24 = vpop.f32.mrf.mxu0  ;;  %v8498_v23 = vpop.f32.mrf.mxu1 }
 0x2b9   :  { %v8435_v13 = vadd.f32 %v8434_v24, %v8433_v25  ;;  %v8499_v8 = vadd.f32 %v8498_v23, %v8497_v38 }
 0x2ba   :  { %v8436_v47 = vpop.f32.mrf.mxu0  ;;  %v8500_v22 = vpop.f32.mrf.mxu1  ;;  %5976 = vmatmul.mubr.bf16.gmra.mxu1 %v9900_v51  ;;  %6073 = vmatmul.mubr.bf16.gmra.mxu0 %v9903_v32  ;;  %v9944_v51 = vld [vmem:[%s13401_s1 + $0x6a8] sm:$0xff]  }
 0x2bb   :  { %v12436_v27 = vadd.f32 %v8435_v13, %v12199_v41  ;;  %v12439_v20 = vadd.f32 %v8499_v8, %v12202_v33  ;;  %6080 = vmatprep.mubr.bf16.mxu0 %v9908_v60  ;;  %6177 = vmatprep.mubr.bf16.mxu1 %v9911_v45  ;;  %v9909_v41 = vld [vmem:[%s13402_s0 + $0x58] ss:$108 sps:$4 sm:$0xff]  }
 0x2bc   :  { %v8437_v19 = vpop.f32.mrf.mxu0  ;;  %v8501_v40 = vpop.f32.mrf.mxu1  ;;  %v9923_v13 = vld [vmem:[%s13402_s0 + $0x8c4] ss:$108 sps:$4 sm:$0xff]   ;;  %v9926_v8 = vld [vmem:[%s13402_s0 + $0x20c] ss:$108 sps:$4 sm:$0xff]  }
 0x2bd   :  { %v8438_v46 = vadd.f32 %v8437_v19, %v8436_v47  ;;  %v8502_v16 = vadd.f32 %v8501_v40, %v8500_v22 }
 0x2be   :  { %v8439_v21 = vpop.f32.mrf.mxu0  ;;  %v8503_v26 = vpop.f32.mrf.mxu1 }
 0x2bf   :  { %v12448_v28 = vadd.f32 %v8438_v46, %v12211_v63  ;;  %v12451_v33 = vadd.f32 %v8502_v16, %v12214_v56 }
 0x2c0   :  { %v8440_v14 = vpop.f32.mrf.mxu0  ;;  %v8504_v37 = vpop.f32.mrf.mxu1 }
 0x2c1   :  { %v8441_v50 = vadd.f32 %v8440_v14, %v8439_v21  ;;  %v8505_v63 = vadd.f32 %v8504_v37, %v8503_v26  ;;  %v9972_v14 = vld [vmem:[%s13401_s1 + $0x698] sm:$0xff]  }
 0x2c2   :  { %v8506_v6 = vpop.f32.mrf.mxu1  ;;  %v8570_v15 = vpop.f32.mrf.mxu0  ;;  %6081 = vmatmul.mubr.bf16.gmra.mxu0 %v9906_v11  ;;  %6178 = vmatmul.mubr.bf16.vlgmr.msra.gmra.mxu1 %v9909_v41 }
 0x2c3   :  { %v12463_v56 = vadd.f32 %v8441_v50, %v12229_v10  ;;  %v12466_v58 = vadd.f32 %v8505_v63, %v12232_v39  ;;  %9139 = vmatpush3.bf16.msra.mxu1 %v12105_v18  ;;  %6088 = vmatprep.mubr.bf16.mxu0 %v9917_v4  ;;  %v9915_v10 = vld [vmem:[%s13402_s0 + $0x7e8] ss:$108 sps:$4 sm:$0xff]   ;;  %v9918_v18 = vld [vmem:[%s13402_s0 + $0x130] ss:$108 sps:$4 sm:$0xff]  }
 0x2c4   :  { %v8507_v25 = vpop.f32.mrf.mxu1  ;;  %v8571_v38 = vpop.f32.mrf.mxu0  ;;  %6185 = vmatprep.mubr.bf16.mxu1 %v9920_v7  ;;  %9140 = vmatprep.subr.bf16.mxu1 %v9929_v30  ;;  %v9932_v63 = vld [vmem:[%s13402_s0 + $0x99c] ss:$108 sps:$4 sm:$0xff]  }
 0x2c5   :  { %v8508_v32 = vadd.f32 %v8507_v25, %v8506_v6  ;;  %v8572_v60 = vadd.f32 %v8571_v38, %v8570_v15  ;;  %v9935_v6 = vld [vmem:[%s13402_s0 + $0x2e4] ss:$108 sps:$4 sm:$0xff]  }
 0x2c6   :  { %v8509_v45 = vpop.f32.mrf.mxu1  ;;  %v8573_v24 = vpop.f32.mrf.mxu0 }
 0x2c7   :  { %v12479_v39 = vadd.f32 %v8508_v32, %v12247_v55  ;;  %v12482_v23 = vadd.f32 %v8572_v60, %v12250_v42  ;;  %9141 = vmatpush3.bf16.msra.mxu1 %v9929_v30  ;;  %v9959_v55 = vld [vmem:[%s13401_s1 + $0x6a0] sm:$0xff]  }
 0x2c8   :  { %v8510_v47 = vpop.f32.mrf.mxu1  ;;  %v8574_v22 = vpop.f32.mrf.mxu0  ;;  %9142 = vmatprep.subr.bf16.mxu1 %v9944_v51 }
 0x2c9   :  { %v8511_v19 = vadd.f32 %v8510_v47, %v8509_v45  ;;  %v8575_v40 = vadd.f32 %v8574_v22, %v8573_v24 }
 0x2ca   :  { %v8512_v42 = vpop.f32.mrf.mxu1  ;;  %v8576_v46 = vpop.f32.mrf.mxu0  ;;  %6089 = vmatmul.mubr.bf16.gmra.mxu0 %v9915_v10  ;;  %6186 = vmatmul.mubr.bf16.gmra.mxu1 %v9918_v18 }
 0x2cb   :  { %v12494_v16 = vadd.f32 %v8511_v19, %v12265_v31  ;;  %v12497_v21 = vadd.f32 %v8575_v40, %v12268_v12  ;;  %6096 = vmatprep.mubr.bf16.mxu0 %v9923_v13  ;;  %6193 = vmatprep.mubr.bf16.mxu1 %v9926_v8  ;;  %v9921_v31 = vld [vmem:[%s13402_s0 + $0x8c0] ss:$108 sps:$4 sm:$0xff]   ;;  %v9924_v12 = vld [vmem:[%s13402_s0 + $0x208] ss:$108 sps:$4 sm:$0xff]  }
 0x2cc   :  { %v8513_v26 = vpop.f32.mrf.mxu1  ;;  %v8577_v11 = vpop.f32.mrf.mxu0  ;;  %9143 = vmatpush3.bf16.msra.mxu1 %v9944_v51  ;;  %v9998_v8 = vld [vmem:[%s13401_s1 + $0x688] sm:$0xff]  }
 0x2cd   :  { %v8514_v41 = vadd.f32 %v8513_v26, %v8512_v42  ;;  %v8578_v4 = vadd.f32 %v8577_v11, %v8576_v46  ;;  %9144 = vmatprep.subr.bf16.mxu1 %v9959_v55  ;;  %v9941_v42 = vld [vmem:[%s13402_s0 + $0x3bc] ss:$108 sps:$4 sm:$0xff]  }
 0x2ce   :  { %v8515_v37 = vpop.f32.mrf.mxu1  ;;  %v8579_v7 = vpop.f32.mrf.mxu0 }
 0x2cf   :  { %v12509_v30 = vadd.f32 %v8514_v41, %v12283_v52  ;;  %v12512_v50 = vadd.f32 %v8578_v4, %v12286_v1  ;;  %v9985_v52 = vld [vmem:[%s13401_s1 + $0x690] sm:$0xff]  }
 0x2d0   :  { %v8516_v15 = vpop.f32.mrf.mxu1  ;;  %v8580_v25 = vpop.f32.mrf.mxu0  ;;  %9145 = vmatpush3.bf16.msra.mxu1 %v9959_v55  ;;  %v9938_v55 = vld [vmem:[%s13402_s0 + $0xa74] ss:$108 sps:$4 sm:$0xff]  }
 0x2d1   :  { %v8517_v38 = vadd.f32 %v8516_v15, %v8515_v37  ;;  %v8581_v51 = vadd.f32 %v8580_v25, %v8579_v7  ;;  %9146 = vmatprep.subr.bf16.mxu1 %v9972_v14  ;;  %v9936_v25 = vld [vmem:[%s13402_s0 + $0xa70] ss:$108 sps:$4 sm:$0xff]  }
 0x2d2   :  { %v8518_v1 = vpop.f32.mrf.mxu1  ;;  %v8582_v32 = vpop.f32.mrf.mxu0  ;;  %6097 = vmatmul.mubr.bf16.gmra.mxu0 %v9921_v31  ;;  %6194 = vmatmul.mubr.bf16.gmra.mxu1 %v9924_v12 }
 0x2d3   :  { %v12524_v60 = vadd.f32 %v8517_v38, %v12301_v36  ;;  %v12527_v45 = vadd.f32 %v8581_v51, %v12304_v48  ;;  %6104 = vmatprep.mubr.bf16.mxu0 %v9932_v63  ;;  %6201 = vmatprep.mubr.bf16.mxu1 %v9935_v6  ;;  %v9930_v36 = vld [vmem:[%s13402_s0 + $0x998] ss:$108 sps:$4 sm:$0xff]   ;;  %v9933_v48 = vld [vmem:[%s13402_s0 + $0x2e0] ss:$108 sps:$4 sm:$0xff]  }
 0x2d4   :  { %v8519_v24 = vpop.f32.mrf.mxu1  ;;  %v8583_v10 = vpop.f32.mrf.mxu0  ;;  %9147 = vmatpush3.bf16.msra.mxu1 %v9972_v14  ;;  %v9947_v51 = vld [vmem:[%s13402_s0 + $0xb4c] ss:$108 sps:$4 sm:$0xff]  }
 0x2d5   :  { %v8520_v18 = vadd.f32 %v8519_v24, %v8518_v1  ;;  %v8584_v13 = vadd.f32 %v8583_v10, %v8582_v32  ;;  %9148 = vmatprep.subr.bf16.mxu1 %v9985_v52 }
 0x2d6   :  { %v8521_v47 = vpop.f32.mrf.mxu1  ;;  %v8585_v22 = vpop.f32.mrf.mxu0 }
 0x2d7   :  { %v12539_v19 = vadd.f32 %v8520_v18, %v12319_v0  ;;  %v12542_v40 = vadd.f32 %v8584_v13, %v12322_v44  ;;  %v10011_v0 = vld [vmem:[%s13401_s1 + $0x680] sm:$0xff]  }
 0x2d8   :  { %v8522_v46 = vpop.f32.mrf.mxu1  ;;  %v8586_v26 = vpop.f32.mrf.mxu0  ;;  %9149 = vmatpush3.bf16.msra.mxu1 %v9985_v52  ;;  %v9950_v52 = vld [vmem:[%s13402_s0 + $0x494] ss:$108 sps:$4 sm:$0xff]  }
 0x2d9   :  { %v8523_v11 = vadd.f32 %v8522_v46, %v8521_v47  ;;  %v8587_v41 = vadd.f32 %v8586_v26, %v8585_v22  ;;  %9150 = vmatprep.subr.bf16.mxu1 %v9998_v8  ;;  %v9953_v26 = vld [vmem:[%s13402_s0 + $0xc24] ss:$108 sps:$4 sm:$0xff]  }
 0x2da   :  { %v8524_v44 = vpop.f32.mrf.mxu1  ;;  %v8588_v4 = vpop.f32.mrf.mxu0  ;;  %6105 = vmatmul.mubr.bf16.gmra.mxu0 %v9930_v36  ;;  %6202 = vmatmul.mubr.bf16.gmra.mxu1 %v9933_v48 }
 0x2db   :  { %v12554_v14 = vadd.f32 %v8523_v11, %v12337_v43  ;;  %v12557_v37 = vadd.f32 %v8587_v41, %v12340_v17  ;;  %6112 = vmatprep.mubr.bf16.mxu0 %v9938_v55  ;;  %6209 = vmatprep.mubr.bf16.mxu1 %v9941_v42  ;;  %v9939_v43 = vld [vmem:[%s13402_s0 + $0x3b8] ss:$108 sps:$4 sm:$0xff]   ;;  %v9945_v42 = vld [vmem:[%s13402_s0 + $0xb48] ss:$108 sps:$4 sm:$0xff]  }
 0x2dc   :  { %v8525_v7 = vpop.f32.mrf.mxu1  ;;  %v8589_v31 = vpop.f32.mrf.mxu0  ;;  %9151 = vmatpush3.bf16.msra.mxu1 %v9998_v8  ;;  %v9956_v11 = vld [vmem:[%s13402_s0 + $0x56c] ss:$108 sps:$4 sm:$0xff]  }
 0x2dd   :  { %v8526_v12 = vadd.f32 %v8525_v7, %v8524_v44  ;;  %v8590_v63 = vadd.f32 %v8589_v31, %v8588_v4  ;;  %9152 = vmatprep.subr.bf16.mxu1 %v10011_v0 }
 0x2de   :  { %v8527_v6 = vpop.f32.mrf.mxu1  ;;  %v8591_v15 = vpop.f32.mrf.mxu0 }
 0x2df   :  { %v12566_v17 = vadd.f32 %v8526_v12, %v12352_v49  ;;  %v12569_v38 = vadd.f32 %v8590_v63, %v12355_v61 }
 0x2e0   :  { %v8528_v1 = vpop.f32.mrf.mxu1  ;;  %v8592_v32 = vpop.f32.mrf.mxu0  ;;  %9153 = vmatpush3.bf16.msra.mxu1 %v10011_v0 }
 0x2e1   :  { %v8529_v24 = vadd.f32 %v8528_v1, %v8527_v6  ;;  %v8593_v10 = vadd.f32 %v8592_v32, %v8591_v15  ;;  %v9962_v1 = vld [vmem:[%s13402_s0 + $0xcfc] ss:$108 sps:$4 sm:$0x1f]   ;;  %v9965_v32 = vld [vmem:[%s13402_s0 + $0x644] ss:$108 sps:$4 sm:$0xff]  }
 0x2e2   :  { %v8530_v18 = vpop.f32.mrf.mxu1  ;;  %v8594_v13 = vpop.f32.mrf.mxu0  ;;  %6113 = vmatmul.mubr.bf16.gmra.mxu0 %v9936_v25  ;;  %6210 = vmatmul.mubr.bf16.gmra.mxu1 %v9939_v43 }
 0x2e3   :  { %v12578_v49 = vadd.f32 %v8529_v24, %v12364_v54  ;;  %v12581_v61 = vadd.f32 %v8593_v10, %v12367_v59  ;;  %6120 = vmatprep.mubr.bf16.mxu0 %v9947_v51  ;;  %6217 = vmatprep.mubr.bf16.mxu1 %v9950_v52  ;;  %v9948_v54 = vld [vmem:[%s13402_s0 + $0x490] ss:$108 sps:$4 sm:$0xff]   ;;  %v9951_v51 = vld [vmem:[%s13402_s0 + $0xc20] ss:$108 sps:$4 sm:$0xff]  }
 0x2e4   :  { %v8531_v8 = vpop.f32.mrf.mxu1  ;;  %v8595_v47 = vpop.f32.mrf.mxu0 }
 0x2e5   :  { %v8532_v22 = vadd.f32 %v8531_v8, %v8530_v18  ;;  %v8596_v36 = vadd.f32 %v8595_v47, %v8594_v13 }
 0x2e6   :  { %v8533_v48 = vpop.f32.mrf.mxu1  ;;  %v8597_v55 = vpop.f32.mrf.mxu0 }
 0x2e7   :  { %v12590_v46 = vadd.f32 %v8532_v22, %v12376_v53  ;;  %v12593_v59 = vadd.f32 %v8596_v36, %v12379_v9 }
 0x2e8   :  { %v8534_v41 = vpop.f32.mrf.mxu1  ;;  %v8598_v0 = vpop.f32.mrf.mxu0 }
 0x2e9   :  { %v8535_v44 = vadd.f32 %v8534_v41, %v8533_v48  ;;  %v8599_v4 = vadd.f32 %v8598_v0, %v8597_v55  ;;  %v9968_v41 = vld [vmem:[%s13402_s0 + $0x71c] ss:$108 sps:$4 sm:$0xff]   ;;  %v9971_v0 = vld [vmem:[%s13402_s0 + $0x64] ss:$108 sps:$4 sm:$0xff]  }
 0x2ea   :  { %v8536_v7 = vpop.f32.mrf.mxu1  ;;  %v8600_v31 = vpop.f32.mrf.mxu0  ;;  %6121 = vmatmul.mubr.bf16.gmra.mxu0 %v9945_v42  ;;  %6218 = vmatmul.mubr.bf16.gmra.mxu1 %v9948_v54 }
 0x2eb   :  { %v12602_v53 = vadd.f32 %v8535_v44, %v12388_v35  ;;  %v12605_v9 = vadd.f32 %v8599_v4, %v12391_v29  ;;  %6128 = vmatprep.mubr.bf16.mxu0 %v9953_v26  ;;  %6225 = vmatprep.mubr.bf16.mxu1 %v9956_v11  ;;  %v9954_v35 = vld [vmem:[%s13402_s0 + $0x568] ss:$108 sps:$4 sm:$0xff]   ;;  %v9960_v26 = vld [vmem:[%s13402_s0 + $0xcf8] ss:$108 sps:$4 sm:$0x1f]  }
 0x2ec   :  { %v8537_v12 = vpop.f32.mrf.mxu1  ;;  %v8601_v63 = vpop.f32.mrf.mxu0 }
 0x2ed   :  { %v8538_v6 = vadd.f32 %v8537_v12, %v8536_v7  ;;  %v8602_v15 = vadd.f32 %v8601_v63, %v8600_v31 }
 0x2ee   :  { %v8539_v25 = vpop.f32.mrf.mxu1  ;;  %v8603_v43 = vpop.f32.mrf.mxu0 }
 0x2ef   :  { %v12614_v52 = vadd.f32 %v8538_v6, %v12400_v62  ;;  %v12617_v29 = vadd.f32 %v8602_v15, %v12403_v3 }
 0x2f0   :  { %v8540_v24 = vpop.f32.mrf.mxu1  ;;  %v8604_v10 = vpop.f32.mrf.mxu0 }
 0x2f1   :  { %v8541_v18 = vadd.f32 %v8540_v24, %v8539_v25  ;;  %v8605_v13 = vadd.f32 %v8604_v10, %v8603_v43  ;;  %v9975_v24 = vld [vmem:[%s13402_s0 + $0x7f4] ss:$108 sps:$4 sm:$0xff]   ;;  %v9978_v10 = vld [vmem:[%s13402_s0 + $0x13c] ss:$108 sps:$4 sm:$0xff]  }
 0x2f2   :  { %v8542_v8 = vpop.f32.mrf.mxu1  ;;  %v8606_v47 = vpop.f32.mrf.mxu0  ;;  %6129 = vmatmul.mubr.bf16.gmra.mxu0 %v9951_v51  ;;  %6226 = vmatmul.mubr.bf16.gmra.mxu1 %v9954_v35 }
 0x2f3   :  { %v12626_v62 = vadd.f32 %v8541_v18, %v12412_v57  ;;  %v12629_v3 = vadd.f32 %v8605_v13, %v12415_v34  ;;  %6136 = vmatprep.mubr.bf16.mxu0 %v9962_v1  ;;  %6233 = vmatprep.mubr.bf16.mxu1 %v9965_v32  ;;  %v9963_v57 = vld [vmem:[%s13402_s0 + $0x640] ss:$108 sps:$4 sm:$0xff]   ;;  %v9966_v1 = vld [vmem:[%s13402_s0 + $0x718] ss:$108 sps:$4 sm:$0xff]  }
 0x2f4   :  { %v8543_v22 = vpop.f32.mrf.mxu1  ;;  %v8607_v36 = vpop.f32.mrf.mxu0 }
 0x2f5   :  { %v8544_v48 = vadd.f32 %v8543_v22, %v8542_v8  ;;  %v8608_v55 = vadd.f32 %v8607_v36, %v8606_v47 }
 0x2f6   :  { %v8545_v42 = vpop.f32.mrf.mxu1  ;;  %v8609_v54 = vpop.f32.mrf.mxu0 }
 0x2f7   :  { %v12638_v11 = vadd.f32 %v8544_v48, %v12424_v2  ;;  %v12641_v34 = vadd.f32 %v8608_v55, %v12427_v5 }
 0x2f8   :  { %v8546_v44 = vpop.f32.mrf.mxu1  ;;  %v8610_v4 = vpop.f32.mrf.mxu0 }
 0x2f9   :  { %v8547_v7 = vadd.f32 %v8546_v44, %v8545_v42  ;;  %v8611_v31 = vadd.f32 %v8610_v4, %v8609_v54  ;;  %v9981_v44 = vld [vmem:[%s13402_s0 + $0x8cc] ss:$108 sps:$4 sm:$0xff]   ;;  %v9984_v4 = vld [vmem:[%s13402_s0 + $0x214] ss:$108 sps:$4 sm:$0xff]  }
 0x2fa   :  { %v8548_v12 = vpop.f32.mrf.mxu1  ;;  %v8612_v63 = vpop.f32.mrf.mxu0  ;;  %6137 = vmatmul.mubr.bf16.gmra.mxu0 %v9960_v26  ;;  %6234 = vmatmul.mubr.bf16.gmra.mxu1 %v9963_v57 }
 0x2fb   :  { %v12650_v2 = vadd.f32 %v8547_v7, %v12436_v27  ;;  %v12653_v5 = vadd.f32 %v8611_v31, %v12439_v20  ;;  %6241 = vmatprep.mubr.bf16.mxu1 %v9968_v41  ;;  %6338 = vmatprep.mubr.bf16.mxu0 %v9971_v0  ;;  %v9969_v27 = vld [vmem:[%s13402_s0 + $0x60] ss:$108 sps:$4 sm:$0xff]   ;;  %v9973_v41 = vld [vmem:[%s13402_s0 + $0x7f0] ss:$108 sps:$4 sm:$0xff]  }
 0x2fc   :  { %v8549_v6 = vpop.f32.mrf.mxu1  ;;  %v8613_v15 = vpop.f32.mrf.mxu0 }
 0x2fd   :  { %v8550_v25 = vadd.f32 %v8549_v6, %v8548_v12  ;;  %v8614_v43 = vadd.f32 %v8613_v15, %v8612_v63 }
 0x2fe   :  { %v8551_v51 = vpop.f32.mrf.mxu1  ;;  %v8615_v35 = vpop.f32.mrf.mxu0 }
 0x2ff   :  { %v12662_v32 = vadd.f32 %v8550_v25, %v12448_v28  ;;  %v12665_v20 = vadd.f32 %v8614_v43, %v12451_v33 }
 0x300   :  { %v8552_v18 = vpop.f32.mrf.mxu1  ;;  %v8616_v13 = vpop.f32.mrf.mxu0 }
 0x301   :  { %v8553_v8 = vadd.f32 %v8552_v18, %v8551_v51  ;;  %v8617_v47 = vadd.f32 %v8616_v13, %v8615_v35  ;;  %v9988_v18 = vld [vmem:[%s13402_s0 + $0x9a4] ss:$108 sps:$4 sm:$0xff]   ;;  %v9991_v13 = vld [vmem:[%s13402_s0 + $0x2ec] ss:$108 sps:$4 sm:$0xff]  }
 0x302   :  { %v8618_v22 = vpop.f32.mrf.mxu0  ;;  %v8682_v36 = vpop.f32.mrf.mxu1  ;;  %6242 = vmatmul.mubr.bf16.gmra.mxu1 %v9966_v1  ;;  %6339 = vmatmul.mubr.bf16.vlgmr.msra.gmra.mxu0 %v9969_v27 }
 0x303   :  { %v12674_v28 = vadd.f32 %v8553_v8, %v12463_v56  ;;  %v12677_v33 = vadd.f32 %v8617_v47, %v12466_v58  ;;  %6249 = vmatprep.mubr.bf16.mxu1 %v9975_v24  ;;  %6346 = vmatprep.mubr.bf16.mxu0 %v9978_v10  ;;  %v9976_v56 = vld [vmem:[%s13402_s0 + $0x138] ss:$108 sps:$4 sm:$0xff]   ;;  %v9979_v24 = vld [vmem:[%s13402_s0 + $0x8c8] ss:$108 sps:$4 sm:$0xff]  }
 0x304   :  { %v8619_v48 = vpop.f32.mrf.mxu0  ;;  %v8683_v55 = vpop.f32.mrf.mxu1 }
 0x305   :  { %v8620_v42 = vadd.f32 %v8619_v48, %v8618_v22  ;;  %v8684_v54 = vadd.f32 %v8683_v55, %v8682_v36 }
 0x306   :  { %v8621_v26 = vpop.f32.mrf.mxu0  ;;  %v8685_v57 = vpop.f32.mrf.mxu1 }
 0x307   :  { %v12686_v0 = vadd.f32 %v8620_v42, %v12479_v39  ;;  %v12689_v58 = vadd.f32 %v8684_v54, %v12482_v23 }
 0x308   :  { %v8622_v7 = vpop.f32.mrf.mxu0  ;;  %v8686_v31 = vpop.f32.mrf.mxu1 }
 0x309   :  { %v8623_v12 = vadd.f32 %v8622_v7, %v8621_v26  ;;  %v8687_v63 = vadd.f32 %v8686_v31, %v8685_v57  ;;  %v9994_v7 = vld [vmem:[%s13402_s0 + $0xa7c] ss:$108 sps:$4 sm:$0xff]   ;;  %v9997_v31 = vld [vmem:[%s13402_s0 + $0x3c4] ss:$108 sps:$4 sm:$0xff]  }
 0x30a   :  { %v8624_v6 = vpop.f32.mrf.mxu0  ;;  %v8688_v15 = vpop.f32.mrf.mxu1  ;;  %6250 = vmatmul.mubr.bf16.gmra.mxu1 %v9973_v41  ;;  %6347 = vmatmul.mubr.bf16.gmra.mxu0 %v9976_v56 }
 0x30b   :  { %v12698_v39 = vadd.f32 %v8623_v12, %v12494_v16  ;;  %v12701_v23 = vadd.f32 %v8687_v63, %v12497_v21  ;;  %6257 = vmatprep.mubr.bf16.mxu1 %v9981_v44  ;;  %6354 = vmatprep.mubr.bf16.mxu0 %v9984_v4  ;;  %v9982_v16 = vld [vmem:[%s13402_s0 + $0x210] ss:$108 sps:$4 sm:$0xff]   ;;  %v9986_v44 = vld [vmem:[%s13402_s0 + $0x9a0] ss:$108 sps:$4 sm:$0xff]  }
 0x30c   :  { %v8625_v25 = vpop.f32.mrf.mxu0  ;;  %v8689_v43 = vpop.f32.mrf.mxu1 }
 0x30d   :  { %v8626_v51 = vadd.f32 %v8625_v25, %v8624_v6  ;;  %v8690_v35 = vadd.f32 %v8689_v43, %v8688_v15 }
 0x30e   :  { %v8627_v1 = vpop.f32.mrf.mxu0  ;;  %v8691_v27 = vpop.f32.mrf.mxu1 }
 0x30f   :  { %v12710_v10 = vadd.f32 %v8626_v51, %v12509_v30  ;;  %v12713_v21 = vadd.f32 %v8690_v35, %v12512_v50 }
 0x310   :  { %v8628_v8 = vpop.f32.mrf.mxu0  ;;  %v8692_v47 = vpop.f32.mrf.mxu1 }
 0x311   :  { %v8629_v22 = vadd.f32 %v8628_v8, %v8627_v1  ;;  %v8693_v36 = vadd.f32 %v8692_v47, %v8691_v27  ;;  %v10001_v8 = vld [vmem:[%s13402_s0 + $0xb54] ss:$108 sps:$4 sm:$0xff]   ;;  %v10004_v47 = vld [vmem:[%s13402_s0 + $0x49c] ss:$108 sps:$4 sm:$0xff]  }
 0x312   :  { %v8630_v48 = vpop.f32.mrf.mxu0  ;;  %v8694_v55 = vpop.f32.mrf.mxu1  ;;  %6258 = vmatmul.mubr.bf16.gmra.mxu1 %v9979_v24  ;;  %6355 = vmatmul.mubr.bf16.gmra.mxu0 %v9982_v16 }
 0x313   :  { %v12722_v30 = vadd.f32 %v8629_v22, %v12524_v60  ;;  %v12725_v50 = vadd.f32 %v8693_v36, %v12527_v45  ;;  %6265 = vmatprep.mubr.bf16.mxu1 %v9988_v18  ;;  %6362 = vmatprep.mubr.bf16.mxu0 %v9991_v13  ;;  %v9989_v60 = vld [vmem:[%s13402_s0 + $0x2e8] ss:$108 sps:$4 sm:$0xff]   ;;  %v9992_v18 = vld [vmem:[%s13402_s0 + $0xa78] ss:$108 sps:$4 sm:$0xff]  }
 0x314   :  { %v8631_v42 = vpop.f32.mrf.mxu0  ;;  %v8695_v54 = vpop.f32.mrf.mxu1 }
 0x315   :  { %v8632_v26 = vadd.f32 %v8631_v42, %v8630_v48  ;;  %v8696_v57 = vadd.f32 %v8695_v54, %v8694_v55 }
 0x316   :  { %v8633_v41 = vpop.f32.mrf.mxu0  ;;  %v8697_v56 = vpop.f32.mrf.mxu1 }
 0x317   :  { %v12734_v4 = vadd.f32 %v8632_v26, %v12539_v19  ;;  %v12737_v45 = vadd.f32 %v8696_v57, %v12542_v40 }
 0x318   :  { %v8634_v12 = vpop.f32.mrf.mxu0  ;;  %v8698_v63 = vpop.f32.mrf.mxu1 }
 0x319   :  { %v8635_v6 = vadd.f32 %v8634_v12, %v8633_v41  ;;  %v8699_v15 = vadd.f32 %v8698_v63, %v8697_v56  ;;  %v10007_v12 = vld [vmem:[%s13402_s0 + $0xc2c] ss:$108 sps:$4 sm:$0xff]   ;;  %v10010_v63 = vld [vmem:[%s13402_s0 + $0x574] ss:$108 sps:$4 sm:$0xff]  }
 0x31a   :  { %v8636_v25 = vpop.f32.mrf.mxu0  ;;  %v8700_v43 = vpop.f32.mrf.mxu1  ;;  %6266 = vmatmul.mubr.bf16.gmra.mxu1 %v9986_v44  ;;  %6363 = vmatmul.mubr.bf16.gmra.mxu0 %v9989_v60 }
 0x31b   :  { %v12746_v19 = vadd.f32 %v8635_v6, %v12554_v14  ;;  %v12749_v40 = vadd.f32 %v8699_v15, %v12557_v37  ;;  %6273 = vmatprep.mubr.bf16.mxu1 %v9994_v7  ;;  %6370 = vmatprep.mubr.bf16.mxu0 %v9997_v31  ;;  %v9995_v14 = vld [vmem:[%s13402_s0 + $0x3c0] ss:$108 sps:$4 sm:$0xff]   ;;  %v9999_v7 = vld [vmem:[%s13402_s0 + $0xb50] ss:$108 sps:$4 sm:$0xff]  }
 0x31c   :  { %v8637_v51 = vpop.f32.mrf.mxu0  ;;  %v8701_v35 = vpop.f32.mrf.mxu1 }
 0x31d   :  { %v8638_v1 = vadd.f32 %v8637_v51, %v8636_v25  ;;  %v8702_v27 = vadd.f32 %v8701_v35, %v8700_v43 }
 0x31e   :  { %v8639_v24 = vpop.f32.mrf.mxu0  ;;  %v8703_v16 = vpop.f32.mrf.mxu1 }
 0x31f   :  { %v12758_v13 = vadd.f32 %v8638_v1, %v12566_v17  ;;  %v12761_v37 = vadd.f32 %v8702_v27, %v12569_v38 }
 0x320   :  { %v8640_v22 = vpop.f32.mrf.mxu0  ;;  %v8704_v36 = vpop.f32.mrf.mxu1 }
 0x321   :  { %v8641_v48 = vadd.f32 %v8640_v22, %v8639_v24  ;;  %v8705_v55 = vadd.f32 %v8704_v36, %v8703_v16  ;;  %v10014_v22 = vld [vmem:[%s13402_s0 + $0xd04] ss:$108 sps:$4 sm:$0x1f]   ;;  %v10017_v36 = vld [vmem:[%s13402_s0 + $0x64c] ss:$108 sps:$4 sm:$0xff]  }
 0x322   :  { %v8642_v42 = vpop.f32.mrf.mxu0  ;;  %v8706_v54 = vpop.f32.mrf.mxu1  ;;  %6274 = vmatmul.mubr.bf16.gmra.mxu1 %v9992_v18  ;;  %6371 = vmatmul.mubr.bf16.gmra.mxu0 %v9995_v14 }
 0x323   :  { %v12770_v17 = vadd.f32 %v8641_v48, %v12578_v49  ;;  %v12773_v38 = vadd.f32 %v8705_v55, %v12581_v61  ;;  %6281 = vmatprep.mubr.bf16.mxu1 %v10001_v8  ;;  %6378 = vmatprep.mubr.bf16.mxu0 %v10004_v47  ;;  %v10002_v49 = vld [vmem:[%s13402_s0 + $0x498] ss:$108 sps:$4 sm:$0xff]   ;;  %v10005_v8 = vld [vmem:[%s13402_s0 + $0xc28] ss:$108 sps:$4 sm:$0xff]  }
 0x324   :  { %v8643_v26 = vpop.f32.mrf.mxu0  ;;  %v8707_v57 = vpop.f32.mrf.mxu1 }
 0x325   :  { %v8644_v41 = vadd.f32 %v8643_v26, %v8642_v42  ;;  %v8708_v56 = vadd.f32 %v8707_v57, %v8706_v54 }
 0x326   :  { %v8645_v44 = vpop.f32.mrf.mxu0  ;;  %v8709_v60 = vpop.f32.mrf.mxu1 }
 0x327   :  { %v12782_v31 = vadd.f32 %v8644_v41, %v12590_v46  ;;  %v12785_v61 = vadd.f32 %v8708_v56, %v12593_v59 }
 0x328   :  { %v8646_v6 = vpop.f32.mrf.mxu0  ;;  %v8710_v15 = vpop.f32.mrf.mxu1 }
 0x329   :  { %v8647_v25 = vadd.f32 %v8646_v6, %v8645_v44  ;;  %v8711_v43 = vadd.f32 %v8710_v15, %v8709_v60  ;;  %v10020_v6 = vld [vmem:[%s13402_s0 + $0x724] ss:$108 sps:$4 sm:$0xff]   ;;  %v10021_v15 = vld [vmem:[%s13402_s0 + $0x68] ss:$108 sps:$4 sm:$0xff]  }
 0x32a   :  { %v8648_v51 = vpop.f32.mrf.mxu0  ;;  %v8712_v35 = vpop.f32.mrf.mxu1  ;;  %6282 = vmatmul.mubr.bf16.gmra.mxu1 %v9999_v7  ;;  %6379 = vmatmul.mubr.bf16.gmra.mxu0 %v10002_v49 }
 0x32b   :  { %v12794_v46 = vadd.f32 %v8647_v25, %v12602_v53  ;;  %v12797_v59 = vadd.f32 %v8711_v43, %v12605_v9  ;;  %6289 = vmatprep.mubr.bf16.mxu1 %v10007_v12  ;;  %6386 = vmatprep.mubr.bf16.mxu0 %v10010_v63  ;;  %v10008_v53 = vld [vmem:[%s13402_s0 + $0x570] ss:$108 sps:$4 sm:$0xff]   ;;  %v10012_v12 = vld [vmem:[%s13402_s0 + $0xd00] ss:$108 sps:$4 sm:$0x1f]  }
 0x32c   :  { %v8649_v1 = vpop.f32.mrf.mxu0  ;;  %v8713_v27 = vpop.f32.mrf.mxu1 }
 0x32d   :  { %v8650_v24 = vadd.f32 %v8649_v1, %v8648_v51  ;;  %v8714_v16 = vadd.f32 %v8713_v27, %v8712_v35 }
 0x32e   :  { %v8651_v18 = vpop.f32.mrf.mxu0  ;;  %v8715_v14 = vpop.f32.mrf.mxu1 }
 0x32f   :  { %v12806_v47 = vadd.f32 %v8650_v24, %v12614_v52  ;;  %v12809_v9 = vadd.f32 %v8714_v16, %v12617_v29 }
 0x330   :  { %v8652_v48 = vpop.f32.mrf.mxu0  ;;  %v8716_v55 = vpop.f32.mrf.mxu1 }
 0x331   :  { %v8653_v42 = vadd.f32 %v8652_v48, %v8651_v18  ;;  %v8717_v54 = vadd.f32 %v8716_v55, %v8715_v14  ;;  %v10025_v48 = vld [vmem:[%s13402_s0 + $0x7fc] ss:$108 sps:$4 sm:$0xff]   ;;  %v10026_v55 = vld [vmem:[%s13402_s0 + $0x218] ss:$108 sps:$4 sm:$0xff]  }
 0x332   :  { %v8654_v26 = vpop.f32.mrf.mxu0  ;;  %v8718_v57 = vpop.f32.mrf.mxu1  ;;  %6290 = vmatmul.mubr.bf16.gmra.mxu1 %v10005_v8  ;;  %6387 = vmatmul.mubr.bf16.gmra.mxu0 %v10008_v53 }
 0x333   :  { %v12818_v52 = vadd.f32 %v8653_v42, %v12626_v62  ;;  %v12821_v29 = vadd.f32 %v8717_v54, %v12629_v3  ;;  %6297 = vmatprep.mubr.bf16.mxu1 %v10014_v22  ;;  %6394 = vmatprep.mubr.bf16.mxu0 %v10017_v36  ;;  %v10015_v62 = vld [vmem:[%s13402_s0 + $0x648] ss:$108 sps:$4 sm:$0xff]   ;;  %v10018_v22 = vld [vmem:[%s13402_s0 + $0x720] ss:$108 sps:$4 sm:$0xff]  }
 0x334   :  { %v8655_v41 = vpop.f32.mrf.mxu0  ;;  %v8719_v56 = vpop.f32.mrf.mxu1 }
 0x335   :  { %v8656_v44 = vadd.f32 %v8655_v41, %v8654_v26  ;;  %v8720_v60 = vadd.f32 %v8719_v56, %v8718_v57 }
 0x336   :  { %v8657_v7 = vpop.f32.mrf.mxu0  ;;  %v8721_v49 = vpop.f32.mrf.mxu1 }
 0x337   :  { %v12830_v63 = vadd.f32 %v8656_v44, %v12638_v11  ;;  %v12833_v3 = vadd.f32 %v8720_v60, %v12641_v34 }
 0x338   :  { %v8658_v25 = vpop.f32.mrf.mxu0  ;;  %v8722_v43 = vpop.f32.mrf.mxu1 }
 0x339   :  { %v8659_v51 = vadd.f32 %v8658_v25, %v8657_v7  ;;  %v8723_v35 = vadd.f32 %v8722_v43, %v8721_v49  ;;  %v10030_v25 = vld [vmem:[%s13402_s0 + $0x8d4] ss:$108 sps:$4 sm:$0xff]  }
 0x33a   :  { %v8660_v1 = vpop.f32.mrf.mxu0  ;;  %v8724_v27 = vpop.f32.mrf.mxu1  ;;  %6298 = vmatmul.mubr.bf16.gmra.mxu1 %v10012_v12  ;;  %6395 = vmatmul.mubr.bf16.gmra.mxu0 %v10015_v62  ;;  %v10031_v43 = vld [vmem:[%s13402_s0 + $0x3c8] ss:$108 sps:$4 sm:$0xff]  }
 0x33b   :  { %v12842_v11 = vadd.f32 %v8659_v51, %v12650_v2  ;;  %v12845_v34 = vadd.f32 %v8723_v35, %v12653_v5  ;;  %6402 = vmatprep.mubr.bf16.mxu0 %v10020_v6  ;;  %9154 = vmatprep.mubr.bf16.mxu1 %v10021_v15  ;;  %v10022_v2 = vld [vmem:[%s13402_s0 + $0x140] ss:$108 sps:$4 sm:$0xff]   ;;  %v10023_v6 = vld [vmem:[%s13402_s0 + $0x7f8] ss:$108 sps:$4 sm:$0xff]  }
 0x33c   :  { %v8661_v24 = vpop.f32.mrf.mxu0  ;;  %v8725_v16 = vpop.f32.mrf.mxu1 }
 0x33d   :  { %v8662_v18 = vadd.f32 %v8661_v24, %v8660_v1  ;;  %v8726_v14 = vadd.f32 %v8725_v16, %v8724_v27 }
 0x33e   :  { %v8663_v8 = vpop.f32.mrf.mxu0  ;;  %v8727_v53 = vpop.f32.mrf.mxu1 }
 0x33f   :  { %v12854_v36 = vadd.f32 %v8662_v18, %v12662_v32  ;;  %v12857_v5 = vadd.f32 %v8726_v14, %v12665_v20 }
 0x340   :  { %v8664_v42 = vpop.f32.mrf.mxu0  ;;  %v8728_v54 = vpop.f32.mrf.mxu1 }
 0x341   :  { %v8665_v26 = vadd.f32 %v8664_v42, %v8663_v8  ;;  %v8729_v57 = vadd.f32 %v8728_v54, %v8727_v53  ;;  %v10035_v42 = vld [vmem:[%s13402_s0 + $0x9ac] ss:$108 sps:$4 sm:$0xff]  }
 0x342   :  { %v8730_v41 = vpop.f32.mrf.mxu1  ;;  %v8794_v56 = vpop.f32.mrf.mxu0  ;;  %6403 = vmatmul.mubr.bf16.gmra.mxu0 %v10018_v22  ;;  %9155 = vmatmul.mubr.bf16.vlgmr.msra.gmra.mxu1 %v10022_v2  ;;  %v10036_v54 = vld [vmem:[%s13402_s0 + $0x578] ss:$108 sps:$4 sm:$0xff]  }
 0x343   :  { %v12866_v32 = vadd.f32 %v8665_v26, %v12674_v28  ;;  %v12869_v20 = vadd.f32 %v8729_v57, %v12677_v33  ;;  %6410 = vmatprep.mubr.bf16.mxu0 %v10025_v48  ;;  %9158 = vmatprep.mubr.bf16.mxu1 %v10026_v55  ;;  %v10027_v28 = vld [vmem:[%s13402_s0 + $0x2f0] ss:$108 sps:$4 sm:$0xff]  }
 0x344   :  { %v8731_v44 = vpop.f32.mrf.mxu1  ;;  %v8795_v60 = vpop.f32.mrf.mxu0  ;;  %v10028_v48 = vld [vmem:[%s13402_s0 + $0x8d0] ss:$108 sps:$4 sm:$0xff]  }
 0x345   :  { %v8732_v7 = vadd.f32 %v8731_v44, %v8730_v41  ;;  %v8796_v49 = vadd.f32 %v8795_v60, %v8794_v56 }
 0x346   :  { %v8733_v12 = vpop.f32.mrf.mxu1  ;;  %v8797_v62 = vpop.f32.mrf.mxu0 }
 0x347   :  { %v12878_v15 = vadd.f32 %v8732_v7, %v12686_v0  ;;  %v12881_v33 = vadd.f32 %v8796_v49, %v12689_v58 }
 0x348   :  { %v8734_v51 = vpop.f32.mrf.mxu1  ;;  %v8798_v35 = vpop.f32.mrf.mxu0 }
 0x349   :  { %v8735_v1 = vadd.f32 %v8734_v51, %v8733_v12  ;;  %v8799_v27 = vadd.f32 %v8798_v35, %v8797_v62  ;;  %v10040_v51 = vld [vmem:[%s13402_s0 + $0xa84] ss:$108 sps:$4 sm:$0xff]   ;;  %v10041_v35 = vld [vmem:[%s13402_s0 + $0x728] ss:$108 sps:$4 sm:$0xff]  }
 0x34a   :  { %v8736_v24 = vpop.f32.mrf.mxu1  ;;  %v8800_v16 = vpop.f32.mrf.mxu0  ;;  %6411 = vmatmul.mubr.bf16.gmra.mxu0 %v10023_v6  ;;  %9159 = vmatmul.mubr.bf16.gmra.mxu1 %v10027_v28 }
 0x34b   :  { %v12890_v0 = vadd.f32 %v8735_v1, %v12698_v39  ;;  %v12893_v58 = vadd.f32 %v8799_v27, %v12701_v23  ;;  %6418 = vmatprep.mubr.bf16.mxu0 %v10030_v25  ;;  %9162 = vmatprep.mubr.bf16.mxu1 %v10031_v43  ;;  %v10032_v39 = vld [vmem:[%s13402_s0 + $0x4a0] ss:$108 sps:$4 sm:$0xff]   ;;  %v10033_v25 = vld [vmem:[%s13402_s0 + $0x9a8] ss:$108 sps:$4 sm:$0xff]  }
 0x34c   :  { %v8737_v18 = vpop.f32.mrf.mxu1  ;;  %v8801_v14 = vpop.f32.mrf.mxu0 }
 0x34d   :  { %v8738_v8 = vadd.f32 %v8737_v18, %v8736_v24  ;;  %v8802_v53 = vadd.f32 %v8801_v14, %v8800_v16 }
 0x34e   :  { %v8739_v22 = vpop.f32.mrf.mxu1  ;;  %v8803_v2 = vpop.f32.mrf.mxu0 }
 0x34f   :  { %v12902_v55 = vadd.f32 %v8738_v8, %v12710_v10  ;;  %v12905_v23 = vadd.f32 %v8802_v53, %v12713_v21 }
 0x350   :  { %v8740_v26 = vpop.f32.mrf.mxu1  ;;  %v8804_v57 = vpop.f32.mrf.mxu0 }
 0x351   :  { %v8741_v41 = vadd.f32 %v8740_v26, %v8739_v22  ;;  %v8805_v56 = vadd.f32 %v8804_v57, %v8803_v2  ;;  %v10045_v26 = vld [vmem:[%s13402_s0 + $0xb5c] ss:$108 sps:$4 sm:$0xff]   ;;  %v10046_v57 = vld [vmem:[%s13402_s0 + $0x8d8] ss:$108 sps:$4 sm:$0xff]  }
 0x352   :  { %v8742_v44 = vpop.f32.mrf.mxu1  ;;  %v8806_v60 = vpop.f32.mrf.mxu0  ;;  %6419 = vmatmul.mubr.bf16.gmra.mxu0 %v10028_v48  ;;  %9163 = vmatmul.mubr.bf16.gmra.mxu1 %v10032_v39 }
 0x353   :  { %v12914_v10 = vadd.f32 %v8741_v41, %v12722_v30  ;;  %v12917_v21 = vadd.f32 %v8805_v56, %v12725_v50  ;;  %6426 = vmatprep.mubr.bf16.mxu0 %v10035_v42  ;;  %9166 = vmatprep.mubr.bf16.mxu1 %v10036_v54  ;;  %v10037_v30 = vld [vmem:[%s13402_s0 + $0x650] ss:$108 sps:$4 sm:$0xff]   ;;  %v10038_v42 = vld [vmem:[%s13402_s0 + $0xa80] ss:$108 sps:$4 sm:$0xff]  }
 0x354   :  { %v8743_v7 = vpop.f32.mrf.mxu1  ;;  %v8807_v49 = vpop.f32.mrf.mxu0 }
 0x355   :  { %v8744_v12 = vadd.f32 %v8743_v7, %v8742_v44  ;;  %v8808_v62 = vadd.f32 %v8807_v49, %v8806_v60 }
 0x356   :  { %v8745_v6 = vpop.f32.mrf.mxu1  ;;  %v8809_v28 = vpop.f32.mrf.mxu0 }
 0x357   :  { %v12926_v43 = vadd.f32 %v8744_v12, %v12734_v4  ;;  %v12929_v50 = vadd.f32 %v8808_v62, %v12737_v45 }
 0x358   :  { %v8746_v1 = vpop.f32.mrf.mxu1  ;;  %v8810_v27 = vpop.f32.mrf.mxu0 }
 0x359   :  { %v8747_v24 = vadd.f32 %v8746_v1, %v8745_v6  ;;  %v8811_v16 = vadd.f32 %v8810_v27, %v8809_v28  ;;  %v10050_v1 = vld [vmem:[%s13402_s0 + $0xc34] ss:$108 sps:$4 sm:$0xff]  }
 0x35a   :  { %v8748_v18 = vpop.f32.mrf.mxu1  ;;  %v8812_v14 = vpop.f32.mrf.mxu0  ;;  %6427 = vmatmul.mubr.bf16.gmra.mxu0 %v10033_v25  ;;  %9167 = vmatmul.mubr.bf16.gmra.mxu1 %v10037_v30  ;;  %v10051_v27 = vld [vmem:[%s13402_s0 + $0xa88] ss:$108 sps:$4 sm:$0xff]  }
 0x35b   :  { %v12938_v4 = vadd.f32 %v8747_v24, %v12746_v19  ;;  %v12941_v45 = vadd.f32 %v8811_v16, %v12749_v40  ;;  %6434 = vmatprep.mubr.bf16.mxu0 %v10040_v51  ;;  %9170 = vmatprep.mubr.bf16.mxu1 %v10041_v35  ;;  %v10042_v19 = vld [vmem:[%s13402_s0 + $0x800] ss:$108 sps:$4 sm:$0xff]   ;;  %v10043_v51 = vld [vmem:[%s13402_s0 + $0xb58] ss:$108 sps:$4 sm:$0xff]  }
 0x35c   :  { %v8749_v8 = vpop.f32.mrf.mxu1  ;;  %v8813_v53 = vpop.f32.mrf.mxu0 }
 0x35d   :  { %v8750_v22 = vadd.f32 %v8749_v8, %v8748_v18  ;;  %v8814_v2 = vadd.f32 %v8813_v53, %v8812_v14 }
 0x35e   :  { %v8751_v48 = vpop.f32.mrf.mxu1  ;;  %v8815_v39 = vpop.f32.mrf.mxu0 }
 0x35f   :  { %v12950_v54 = vadd.f32 %v8750_v22, %v12758_v13  ;;  %v12953_v40 = vadd.f32 %v8814_v2, %v12761_v37 }
 0x360   :  { %v8752_v41 = vpop.f32.mrf.mxu1  ;;  %v8816_v56 = vpop.f32.mrf.mxu0 }
 0x361   :  { %v8753_v44 = vadd.f32 %v8752_v41, %v8751_v48  ;;  %v8817_v60 = vadd.f32 %v8816_v56, %v8815_v39  ;;  %v10055_v41 = vld [vmem:[%s13402_s0 + $0xd0c] ss:$108 sps:$4 sm:$0x1f]  }
 0x362   :  { %v8754_v7 = vpop.f32.mrf.mxu1  ;;  %v8818_v49 = vpop.f32.mrf.mxu0  ;;  %6435 = vmatmul.mubr.bf16.gmra.mxu0 %v10038_v42  ;;  %9171 = vmatmul.mubr.bf16.gmra.mxu1 %v10042_v19  ;;  %v10056_v56 = vld [vmem:[%s13402_s0 + $0xc38] ss:$108 sps:$4 sm:$0xff]  }
 0x363   :  { %v12962_v13 = vadd.f32 %v8753_v44, %v12770_v17  ;;  %v12965_v37 = vadd.f32 %v8817_v60, %v12773_v38  ;;  %6442 = vmatprep.mubr.bf16.mxu0 %v10045_v26  ;;  %9174 = vmatprep.mubr.bf16.mxu1 %v10046_v57  ;;  %v10047_v17 = vld [vmem:[%s13402_s0 + $0x9b0] ss:$108 sps:$4 sm:$0xff]  }
 0x364   :  { %v8755_v12 = vpop.f32.mrf.mxu1  ;;  %v8819_v62 = vpop.f32.mrf.mxu0  ;;  %v10048_v26 = vld [vmem:[%s13402_s0 + $0xc30] ss:$108 sps:$4 sm:$0xff]  }
 0x365   :  { %v8756_v6 = vadd.f32 %v8755_v12, %v8754_v7  ;;  %v8820_v28 = vadd.f32 %v8819_v62, %v8818_v49 }
 0x366   :  { %v8757_v25 = vpop.f32.mrf.mxu1  ;;  %v8821_v30 = vpop.f32.mrf.mxu0 }
 0x367   :  { %v12974_v35 = vadd.f32 %v8756_v6, %v12782_v31  ;;  %v12977_v38 = vadd.f32 %v8820_v28, %v12785_v61 }
 0x368   :  { %v8758_v24 = vpop.f32.mrf.mxu1  ;;  %v8822_v16 = vpop.f32.mrf.mxu0 }
 0x369   :  { %v8759_v18 = vadd.f32 %v8758_v24, %v8757_v25  ;;  %v8823_v14 = vadd.f32 %v8822_v16, %v8821_v30 }
 0x36a   :  { %v8760_v8 = vpop.f32.mrf.mxu1  ;;  %v8824_v53 = vpop.f32.mrf.mxu0  ;;  %6443 = vmatmul.mubr.bf16.gmra.mxu0 %v10043_v51  ;;  %9175 = vmatmul.mubr.bf16.gmra.mxu1 %v10047_v17 }
 0x36b   :  { %v12986_v31 = vadd.f32 %v8759_v18, %v12794_v46  ;;  %v12989_v61 = vadd.f32 %v8823_v14, %v12797_v59  ;;  %6450 = vmatprep.mubr.bf16.mxu0 %v10050_v1  ;;  %9178 = vmatprep.mubr.bf16.mxu1 %v10051_v27  ;;  %v10052_v46 = vld [vmem:[%s13402_s0 + $0xb60] ss:$108 sps:$4 sm:$0xff]   ;;  %v10053_v1 = vld [vmem:[%s13402_s0 + $0xd08] ss:$108 sps:$4 sm:$0x1f]  }
 0x36c   :  { %v8761_v22 = vpop.f32.mrf.mxu1  ;;  %v8825_v2 = vpop.f32.mrf.mxu0 }
 0x36d   :  { %v8762_v48 = vadd.f32 %v8761_v22, %v8760_v8  ;;  %v8826_v39 = vadd.f32 %v8825_v2, %v8824_v53 }
 0x36e   :  { %v8763_v42 = vpop.f32.mrf.mxu1  ;;  %v8827_v19 = vpop.f32.mrf.mxu0 }
 0x36f   :  { %v12998_v57 = vadd.f32 %v8762_v48, %v12806_v47  ;;  %v13001_v59 = vadd.f32 %v8826_v39, %v12809_v9 }
 0x370   :  { %v8764_v44 = vpop.f32.mrf.mxu1  ;;  %v8828_v60 = vpop.f32.mrf.mxu0 }
 0x371   :  { %v8765_v7 = vadd.f32 %v8764_v44, %v8763_v42  ;;  %v8829_v49 = vadd.f32 %v8828_v60, %v8827_v19 }
 0x372   :  { %v8766_v12 = vpop.f32.mrf.mxu1  ;;  %v8830_v62 = vpop.f32.mrf.mxu0  ;;  %6451 = vmatmul.mubr.bf16.gmra.mxu0 %v10048_v26  ;;  %9179 = vmatmul.mubr.bf16.gmra.mxu1 %v10052_v46 }
 0x373   :  { %v13010_v47 = vadd.f32 %v8765_v7, %v12818_v52  ;;  %v13013_v9 = vadd.f32 %v8829_v49, %v12821_v29  ;;  %6458 = vmatprep.mubr.bf16.mxu0 %v10055_v41  ;;  %9182 = vmatprep.mubr.bf16.mxu1 %v10056_v56  ;;  %v10057_v52 = vld [vmem:[%s13402_s0 + $0xd10] ss:$108 sps:$4 sm:$0x1f]  }
 0x374   :  { %v8767_v6 = vpop.f32.mrf.mxu1  ;;  %v8831_v28 = vpop.f32.mrf.mxu0 }
 0x375   :  { %v8768_v25 = vadd.f32 %v8767_v6, %v8766_v12  ;;  %v8832_v30 = vadd.f32 %v8831_v28, %v8830_v62 }
 0x376   :  { %v8769_v51 = vpop.f32.mrf.mxu1  ;;  %v8833_v17 = vpop.f32.mrf.mxu0 }
 0x377   :  { %v13022_v27 = vadd.f32 %v8768_v25, %v12830_v63  ;;  %v13025_v29 = vadd.f32 %v8832_v30, %v12833_v3 }
 0x378   :  { %v8770_v24 = vpop.f32.mrf.mxu1  ;;  %v8834_v16 = vpop.f32.mrf.mxu0 }
 0x379   :  { %v8771_v18 = vadd.f32 %v8770_v24, %v8769_v51  ;;  %v8835_v14 = vadd.f32 %v8834_v16, %v8833_v17 }
 0x37a   :  { %v8772_v8 = vpop.f32.mrf.mxu1  ;;  %v8836_v53 = vpop.f32.mrf.mxu0  ;;  %6459 = vmatmul.mubr.bf16.gmra.mxu0 %v10053_v1  ;;  %9183 = vmatmul.mubr.bf16.gmra.mxu1 %v10057_v52 }
 0x37b   :  { %v13028_v22 = vadd.f32 %v8771_v18, %v12842_v11  ;;  %v13031_v2 = vadd.f32 %v8835_v14, %v12845_v34 }
 0x37c   :  { %v8773_v48 = vpop.f32.mrf.mxu1  ;;  %v8837_v63 = vpop.f32.mrf.mxu0 }
 0x37d   :  { %v8774_v39 = vadd.f32 %v8773_v48, %v8772_v8  ;;  %v8838_v42 = vadd.f32 %v8837_v63, %v8836_v53 }
 0x37e   :  { %v8775_v3 = vpop.f32.mrf.mxu1  ;;  %v8839_v19 = vpop.f32.mrf.mxu0 }
 0x37f   :  { %v13034_v26 = vadd.f32 %v8774_v39, %v12854_v36  ;;  %v13037_v46 = vadd.f32 %v8838_v42, %v12857_v5 }
 0x380   :  { %v8776_v41 = vpop.f32.mrf.mxu1  ;;  %v8840_v56 = vpop.f32.mrf.mxu0 }
 0x381   :  { %v8777_v44 = vadd.f32 %v8776_v41, %v8775_v3  ;;  %v8841_v11 = vadd.f32 %v8840_v56, %v8839_v19 }
 0x382   :  { %v8842_v60 = vpop.f32.mrf.mxu0  ;;  %v8906_v7 = vpop.f32.mrf.mxu1 }
 0x383   :  { %v13040_v34 = vadd.f32 %v8777_v44, %v12866_v32  ;;  %v13043_v49 = vadd.f32 %v8841_v11, %v12869_v20 }
 0x384   :  { %v8843_v12 = vpop.f32.mrf.mxu0  ;;  %v8907_v62 = vpop.f32.mrf.mxu1 }
 0x385   :  { %v8844_v6 = vadd.f32 %v8843_v12, %v8842_v60  ;;  %v8908_v36 = vadd.f32 %v8907_v62, %v8906_v7 }
 0x386   :  { %v8845_v28 = vpop.f32.mrf.mxu0  ;;  %v8909_v25 = vpop.f32.mrf.mxu1 }
 0x387   :  { %v13046_v5 = vadd.f32 %v8844_v6, %v12878_v15  ;;  %v13049_v30 = vadd.f32 %v8908_v36, %v12881_v33 }
 0x388   :  { %v8846_v51 = vpop.f32.mrf.mxu0  ;;  %v8910_v17 = vpop.f32.mrf.mxu1 }
 0x389   :  { %v8847_v1 = vadd.f32 %v8846_v51, %v8845_v28  ;;  %v8911_v32 = vadd.f32 %v8910_v17, %v8909_v25 }
 0x38a   :  { %v8848_v52 = vpop.f32.mrf.mxu0  ;;  %v8912_v24 = vpop.f32.mrf.mxu1 }
 0x38b   :  { %v13052_v20 = vadd.f32 %v8847_v1, %v12890_v0  ;;  %v13055_v16 = vadd.f32 %v8911_v32, %v12893_v58 }
 0x38c   :  { %v8849_v18 = vpop.f32.mrf.mxu0  ;;  %v8913_v14 = vpop.f32.mrf.mxu1 }
 0x38d   :  { %v8850_v8 = vadd.f32 %v8849_v18, %v8848_v52  ;;  %v8914_v15 = vadd.f32 %v8913_v14, %v8912_v24 }
 0x38e   :  { %v8851_v53 = vpop.f32.mrf.mxu0  ;;  %v8915_v48 = vpop.f32.mrf.mxu1 }
 0x38f   :  { %v13058_v33 = vadd.f32 %v8850_v8, %v12902_v55  ;;  %v13061_v63 = vadd.f32 %v8914_v15, %v12905_v23 }
 0x390   :  { %v8852_v39 = vpop.f32.mrf.mxu0  ;;  %v8916_v42 = vpop.f32.mrf.mxu1 }
 0x391   :  { %v8853_v3 = vadd.f32 %v8852_v39, %v8851_v53  ;;  %v8917_v0 = vadd.f32 %v8916_v42, %v8915_v48 }
 0x392   :  { %v8854_v19 = vpop.f32.mrf.mxu0  ;;  %v8918_v41 = vpop.f32.mrf.mxu1 }
 0x393   :  { %v13064_v58 = vadd.f32 %v8853_v3, %v12914_v10  ;;  %v13067_v56 = vadd.f32 %v8917_v0, %v12917_v21 }
 0x394   :  { %v8855_v44 = vpop.f32.mrf.mxu0  ;;  %v8919_v11 = vpop.f32.mrf.mxu1 }
 0x395   :  { %v8856_v60 = vadd.f32 %v8855_v44, %v8854_v19  ;;  %v8920_v55 = vadd.f32 %v8919_v11, %v8918_v41 }
 0x396   :  { %v8857_v7 = vpop.f32.mrf.mxu0  ;;  %v8921_v12 = vpop.f32.mrf.mxu1 }
 0x397   :  { %v13070_v23 = vadd.f32 %v8856_v60, %v12926_v43  ;;  %v13073_v62 = vadd.f32 %v8920_v55, %v12929_v50 }
 0x398   :  { %v8858_v6 = vpop.f32.mrf.mxu0  ;;  %v8922_v36 = vpop.f32.mrf.mxu1 }
 0x399   :  { %v8859_v28 = vadd.f32 %v8858_v6, %v8857_v7  ;;  %v8923_v10 = vadd.f32 %v8922_v36, %v8921_v12 }
 0x39a   :  { %v8860_v25 = vpop.f32.mrf.mxu0  ;;  %v8924_v51 = vpop.f32.mrf.mxu1 }
 0x39b   :  { %v13076_v21 = vadd.f32 %v8859_v28, %v12938_v4  ;;  %v13079_v17 = vadd.f32 %v8923_v10, %v12941_v45 }
 0x39c   :  { %v8861_v1 = vpop.f32.mrf.mxu0  ;;  %v8925_v32 = vpop.f32.mrf.mxu1 }
 0x39d   :  { %v8862_v52 = vadd.f32 %v8861_v1, %v8860_v25  ;;  %v8926_v43 = vadd.f32 %v8925_v32, %v8924_v51 }
 0x39e   :  { %v8863_v24 = vpop.f32.mrf.mxu0  ;;  %v8927_v18 = vpop.f32.mrf.mxu1 }
 0x39f   :  { %v13082_v50 = vadd.f32 %v8862_v52, %v12950_v54  ;;  %v13085_v14 = vadd.f32 %v8926_v43, %v12953_v40 }
 0x3a0   :  { %v8864_v8 = vpop.f32.mrf.mxu0  ;;  %v8928_v15 = vpop.f32.mrf.mxu1 }
 0x3a1   :  { %v8865_v53 = vadd.f32 %v8864_v8, %v8863_v24  ;;  %v8929_v4 = vadd.f32 %v8928_v15, %v8927_v18 }
 0x3a2   :  { %v8866_v48 = vpop.f32.mrf.mxu0  ;;  %v8930_v39 = vpop.f32.mrf.mxu1 }
 0x3a3   :  { %v13088_v45 = vadd.f32 %v8865_v53, %v12962_v13  ;;  %v13091_v42 = vadd.f32 %v8929_v4, %v12965_v37 }
 0x3a4   :  { %v8867_v3 = vpop.f32.mrf.mxu0  ;;  %v8931_v0 = vpop.f32.mrf.mxu1 }
 0x3a5   :  { %v8868_v19 = vadd.f32 %v8867_v3, %v8866_v48  ;;  %v8932_v54 = vadd.f32 %v8931_v0, %v8930_v39 }
 0x3a6   :  { %v8869_v41 = vpop.f32.mrf.mxu0  ;;  %v8933_v44 = vpop.f32.mrf.mxu1 }
 0x3a7   :  { %v13094_v40 = vadd.f32 %v8868_v19, %v12974_v35  ;;  %v13097_v11 = vadd.f32 %v8932_v54, %v12977_v38 }
 0x3a8   :  { %v8870_v60 = vpop.f32.mrf.mxu0  ;;  %v8934_v55 = vpop.f32.mrf.mxu1 }
 0x3a9   :  { %v8871_v7 = vadd.f32 %v8870_v60, %v8869_v41  ;;  %v8935_v13 = vadd.f32 %v8934_v55, %v8933_v44 }
 0x3aa   :  { %v8872_v12 = vpop.f32.mrf.mxu0  ;;  %v8936_v6 = vpop.f32.mrf.mxu1 }
 0x3ab   :  { %v13100_v37 = vadd.f32 %v8871_v7, %v12986_v31  ;;  %v13103_v36 = vadd.f32 %v8935_v13, %v12989_v61 }
 0x3ac   :  { %v8873_v28 = vpop.f32.mrf.mxu0  ;;  %v8937_v10 = vpop.f32.mrf.mxu1 }
 0x3ad   :  { %v8874_v25 = vadd.f32 %v8873_v28, %v8872_v12  ;;  %v8938_v35 = vadd.f32 %v8937_v10, %v8936_v6 }
 0x3ae   :  { %v8875_v51 = vpop.f32.mrf.mxu0  ;;  %v8939_v1 = vpop.f32.mrf.mxu1 }
 0x3af   :  { %v13106_v38 = vadd.f32 %v8874_v25, %v12998_v57  ;;  %v13109_v32 = vadd.f32 %v8938_v35, %v13001_v59 }
 0x3b0   :  { %v8876_v52 = vpop.f32.mrf.mxu0  ;;  %v8940_v43 = vpop.f32.mrf.mxu1 }
 0x3b1   :  { %v8877_v24 = vadd.f32 %v8876_v52, %v8875_v51  ;;  %v8941_v31 = vadd.f32 %v8940_v43, %v8939_v1 }
 0x3b2   :  { %v8878_v18 = vpop.f32.mrf.mxu0  ;;  %v8942_v8 = vpop.f32.mrf.mxu1 }
 0x3b3   :  { %v13112_v61 = vadd.f32 %v8877_v24, %v13010_v47  ;;  %v13115_v15 = vadd.f32 %v8941_v31, %v13013_v9 }
 0x3b4   :  { %v8879_v53 = vpop.f32.mrf.mxu0  ;;  %v8943_v4 = vpop.f32.mrf.mxu1 }
 0x3b5   :  { %v8880_v48 = vadd.f32 %v8879_v53, %v8878_v18  ;;  %v8944_v57 = vadd.f32 %v8943_v4, %v8942_v8 }
 0x3b6   :  { %v8881_v39 = vpop.f32.mrf.mxu0  ;;  %v8945_v3 = vpop.f32.mrf.mxu1 }
 0x3b7   :  { %v13118_v59 = vadd.f32 %v8880_v48, %v13022_v27  ;;  %v13121_v0 = vadd.f32 %v8944_v57, %v13025_v29 }
 0x3b8   :  { %v8882_v19 = vpop.f32.mrf.mxu0  ;;  %v8946_v54 = vpop.f32.mrf.mxu1 }
 0x3b9   :  { %v8883_v41 = vadd.f32 %v8882_v19, %v8881_v39  ;;  %v8947_v47 = vadd.f32 %v8946_v54, %v8945_v3 }
 0x3ba   :  { %v8884_v44 = vpop.f32.mrf.mxu0  ;;  %v8948_v60 = vpop.f32.mrf.mxu1 }
 0x3bb   :  { %v13124_v9 = vadd.f32 %v8883_v41, %v13028_v22  ;;  %v13127_v55 = vadd.f32 %v8947_v47, %v13031_v2 }
 0x3bc   :  { %v8885_v7 = vpop.f32.mrf.mxu0  ;;  %v8949_v13 = vpop.f32.mrf.mxu1 }
 0x3bd   :  { %v8886_v12 = vadd.f32 %v8885_v7, %v8884_v44  ;;  %v8950_v27 = vadd.f32 %v8949_v13, %v8948_v60 }
 0x3be   :  { %v8887_v6 = vpop.f32.mrf.mxu0  ;;  %v8951_v28 = vpop.f32.mrf.mxu1 }
 0x3bf   :  { %v13130_v29 = vadd.f32 %v8886_v12, %v13034_v26  ;;  %v13133_v10 = vadd.f32 %v8950_v27, %v13037_v46 }
 0x3c0   :  { %v8888_v25 = vpop.f32.mrf.mxu0  ;;  %v8952_v35 = vpop.f32.mrf.mxu1 }
 0x3c1   :  { %v8889_v51 = vadd.f32 %v8888_v25, %v8887_v6  ;;  %v8953_v22 = vadd.f32 %v8952_v35, %v8951_v28 }
 0x3c2   :  { %v8954_v1 = vpop.f32.mrf.mxu1  ;;  %v9018_v52 = vpop.f32.mrf.mxu0 }
 0x3c3   :  { %v13136_v2 = vadd.f32 %v8889_v51, %v13040_v34  ;;  %v13139_v43 = vadd.f32 %v8953_v22, %v13043_v49 }
 0x3c4   :  { %v8955_v24 = vpop.f32.mrf.mxu1  ;;  %v9019_v31 = vpop.f32.mrf.mxu0 }
 0x3c5   :  { %v8956_v18 = vadd.f32 %v8955_v24, %v8954_v1  ;;  %v9020_v26 = vadd.f32 %v9019_v31, %v9018_v52 }
 0x3c6   :  { %v8957_v8 = vpop.f32.mrf.mxu1  ;;  %v13141_v53 = vpop.f32.mrf.mxu0 }
 0x3c7   :  { %v13144_v46 = vadd.f32 %v8956_v18, %v13046_v5  ;;  %v13147_v4 = vadd.f32 %v9020_v26, %v13049_v30 }
 0x3c8   :  { %v8958_v48 = vpop.f32.mrf.mxu1  ;;  %v13149_v57 = vpop.f32.mrf.mxu0 }
 0x3c9   :  { %v8959_v34 = vadd.f32 %v8958_v48, %v8957_v8 }
 0x3ca   :  { %v8960_v39 = vpop.f32.mrf.mxu1  ;;  %v13151_v49 = vpop.f32.mrf.mxu0 }
 0x3cb   :  { %v13154_v3 = vadd.f32 %v8959_v34, %v13052_v20 }
 0x3cc   :  { %v8961_v19 = vpop.f32.mrf.mxu1  ;;  %v13156_v54 = vpop.f32.mrf.mxu0 }
 0x3cd   :  { %v8962_v41 = vadd.f32 %v8961_v19, %v8960_v39 }
 0x3ce   :  { %v8963_v47 = vpop.f32.mrf.mxu1  ;;  %v13158_v5 = vpop.f32.mrf.mxu0 }
 0x3cf   :  { %v13161_v30 = vadd.f32 %v8962_v41, %v13058_v33 }
 0x3d0   :  { %v8964_v44 = vpop.f32.mrf.mxu1  ;;  %v13163_v60 = vpop.f32.mrf.mxu0 }
 0x3d1   :  { %v8965_v7 = vadd.f32 %v8964_v44, %v8963_v47 }
 0x3d2   :  { %v8966_v13 = vpop.f32.mrf.mxu1  ;;  %v13165_v12 = vpop.f32.mrf.mxu0 }
 0x3d3   :  { %v13168_v20 = vadd.f32 %v8965_v7, %v13064_v58 }
 0x3d4   :  { %v8967_v27 = vpop.f32.mrf.mxu1  ;;  %v13170_v6 = vpop.f32.mrf.mxu0 }
 0x3d5   :  { %v8968_v28 = vadd.f32 %v8967_v27, %v8966_v13 }
 0x3d6   :  { %v8969_v25 = vpop.f32.mrf.mxu1  ;;  %v13172_v35 = vpop.f32.mrf.mxu0 }
 0x3d7   :  { %v13175_v33 = vadd.f32 %v8968_v28, %v13070_v23 }
 0x3d8   :  { %v8970_v51 = vpop.f32.mrf.mxu1  ;;  %v13177_v22 = vpop.f32.mrf.mxu0 }
 0x3d9   :  { %13405 = vst [vmem:[#allocation2_spill] sm:$0xff] %v13175_v33  ;;  %v8971_v1 = vadd.f32 %v8970_v51, %v8969_v25 }
 0x3da   :  { %v8972_v52 = vpop.f32.mrf.mxu1  ;;  %v13179_v24 = vpop.f32.mrf.mxu0 }
 0x3db   :  { %v13182_v58 = vadd.f32 %v8971_v1, %v13076_v21 }
 0x3dc   :  { %v8973_v31 = vpop.f32.mrf.mxu1  ;;  %v13184_v18 = vpop.f32.mrf.mxu0 }
 0x3dd   :  { %13406 = vst [vmem:[#allocation3_spill] sm:$0xff] %v13182_v58  ;;  %v8974_v26 = vadd.f32 %v8973_v31, %v8972_v52 }
 0x3de   :  { %v8975_v8 = vpop.f32.mrf.mxu1  ;;  %v13186_v48 = vpop.f32.mrf.mxu0 }
 0x3df   :  { %v13189_v23 = vadd.f32 %v8974_v26, %v13082_v50 }
 0x3e0   :  { %v8976_v34 = vpop.f32.mrf.mxu1  ;;  %v13191_v39 = vpop.f32.mrf.mxu0 }
 0x3e1   :  { %13407 = vst [vmem:[#allocation4_spill] sm:$0xff] %v13189_v23  ;;  %v8977_v19 = vadd.f32 %v8976_v34, %v8975_v8 }
 0x3e2   :  { %v8978_v41 = vpop.f32.mrf.mxu1  ;;  %v13193_v47 = vpop.f32.mrf.mxu0 }
 0x3e3   :  { %v13196_v21 = vadd.f32 %v8977_v19, %v13088_v45 }
 0x3e4   :  { %v8979_v44 = vpop.f32.mrf.mxu1  ;;  %v13198_v7 = vpop.f32.mrf.mxu0 }
 0x3e5   :  { %13408 = vst [vmem:[#allocation5_spill] sm:$0xff] %v13196_v21  ;;  %v8980_v13 = vadd.f32 %v8979_v44, %v8978_v41 }
 0x3e6   :  { %v8981_v27 = vpop.f32.mrf.mxu1  ;;  %v13200_v28 = vpop.f32.mrf.mxu0 }
 0x3e7   :  { %v13203_v50 = vadd.f32 %v8980_v13, %v13094_v40 }
 0x3e8   :  { %v8982_v25 = vpop.f32.mrf.mxu1  ;;  %v13205_v51 = vpop.f32.mrf.mxu0 }
 0x3e9   :  { %13409 = vst [vmem:[#allocation6_spill] sm:$0xff] %v13203_v50  ;;  %v8983_v1 = vadd.f32 %v8982_v25, %v8981_v27 }
 0x3ea   :  { %v8984_v52 = vpop.f32.mrf.mxu1  ;;  %v13207_v31 = vpop.f32.mrf.mxu0 }
 0x3eb   :  { %v13210_v45 = vadd.f32 %v8983_v1, %v13100_v37 }
 0x3ec   :  { %v8985_v26 = vpop.f32.mrf.mxu1  ;;  %v13212_v8 = vpop.f32.mrf.mxu0 }
 0x3ed   :  { %13410 = vst [vmem:[#allocation7_spill] sm:$0xff] %v13210_v45  ;;  %v8986_v34 = vadd.f32 %v8985_v26, %v8984_v52 }
 0x3ee   :  { %v8987_v19 = vpop.f32.mrf.mxu1  ;;  %v13214_v41 = vpop.f32.mrf.mxu0 }
 0x3ef   :  { %v13217_v40 = vadd.f32 %v8986_v34, %v13106_v38 }
 0x3f0   :  { %v8988_v44 = vpop.f32.mrf.mxu1  ;;  %v13219_v13 = vpop.f32.mrf.mxu0 }
 0x3f1   :  { %13411 = vst [vmem:[#allocation8_spill] sm:$0xff] %v13217_v40  ;;  %v8989_v27 = vadd.f32 %v8988_v44, %v8987_v19 }
 0x3f2   :  { %v8990_v25 = vpop.f32.mrf.mxu1  ;;  %v13221_v50 = vpop.f32.mrf.mxu0 }
 0x3f3   :  { %v13224_v37 = vadd.f32 %v8989_v27, %v13112_v61 }
 0x3f4   :  { %v8991_v1 = vpop.f32.mrf.mxu1  ;;  %v13226_v45 = vpop.f32.mrf.mxu0 }
 0x3f5   :  { %13412 = vst [vmem:[#allocation9_spill] sm:$0xff] %v13224_v37  ;;  %v8992_v52 = vadd.f32 %v8991_v1, %v8990_v25  ;;  %v9026_v25 = vadd.f32 %v13156_v54, %v13151_v49  ;;  %v9023_v49 = vadd.f32 %v13149_v57, %v13141_v53  ;;  %v9041_v57 = vadd.f32 %v13191_v39, %v13186_v48 }
 0x3f6   :  { %v8993_v26 = vpop.f32.mrf.mxu1  ;;  %v13228_v58 = vpop.f32.mrf.mxu0 }
 0x3f7   :  { %v13231_v38 = vadd.f32 %v8992_v52, %v13118_v59  ;;  %v6344_v53 = vadd.f32 %v9023_v49, %v13055_v16 }
 0x3f8   :  { %v8994_v34 = vpop.f32.mrf.mxu1  ;;  %v13233_v40 = vpop.f32.mrf.mxu0 }
 0x3f9   :  { %13413 = vst [vmem:[#allocation10_spill] sm:$0xff] %v13231_v38  ;;  %v8995_v19 = vadd.f32 %v8994_v34, %v8993_v26 }
 0x3fa   :  { %v8996_v44 = vpop.f32.mrf.mxu1  ;;  %v13235_v21 = vpop.f32.mrf.mxu0 }
 0x3fb   :  { %v13238_v61 = vadd.f32 %v8995_v19, %v13124_v9  ;;  %v9029_v9 = vadd.f32 %v13163_v60, %v13158_v5 }
 0x3fc   :  { %v8997_v27 = vpop.f32.mrf.mxu1  ;;  %v13240_v37 = vpop.f32.mrf.mxu0 }
 0x3fd   :  { %13414 = vst [vmem:[#allocation11_spill] sm:$0xff] %v13238_v61  ;;  %v8998_v1 = vadd.f32 %v8997_v27, %v8996_v44  ;;  %v6349_v61 = vadd.f32 %v9026_v25, %v13061_v63  ;;  %v6352_v63 = vadd.f32 %v9029_v9, %v13067_v56  ;;  %v9035_v9 = vadd.f32 %v13177_v22, %v13172_v35 }
 0x3fe   :  { %v8999_v33 = vpop.f32.mrf.mxu1  ;;  %v13244_v59 = vpop.f32.mrf.mxu0 }
 0x3ff   :  { %v13247_v52 = vadd.f32 %v8998_v1, %v13130_v29  ;;  %v9038_v1 = vadd.f32 %v13184_v18, %v13179_v24 }
 0x400   :  { %v9000_v26 = vpop.f32.mrf.mxu1  ;;  %v13249_v34 = vpop.f32.mrf.mxu0 }
 0x401   :  { %v9001_v19 = vadd.f32 %v9000_v26, %v8999_v33  ;;  %v6365_v56 = vadd.f32 %v9038_v1, %v13085_v14  ;;  %v9050_v14 = vadd.f32 %v13212_v8, %v13207_v31  ;;  %v9053_v31 = vadd.f32 %v13219_v13, %v13214_v41 }
 0x402   :  { %v13254_v38 = vpop.f32.mrf.mxu0  ;;  %v9156_v23 = vpop.f32.mrf.mxu1 }
 0x403   :  { %v13259_v54 = vadd.f32 %v9001_v19, %v13136_v2  ;;  %v6510_v29 = vadd.f32 %v9156_v23, %v6349_v61  ;;  %v9032_v2 = vadd.f32 %v13170_v6, %v13165_v12 }
 0x404   :  { %v13261_v44 = vpop.f32.mrf.mxu0  ;;  %v6501_v27 = vpop.f32.mrf.mxu1 }
 0x405   :  { %v6502_v5 = vadd.f32 %v6501_v27, %v13147_v4  ;;  %v6630_v25 = vmul.f32 0.2, %v6510_v29  ;;  %v6357_v48 = vadd.f32 %v9032_v2, %v13073_v62  ;;  %v6360_v2 = vadd.f32 %v9035_v9, %v13079_v17 }
 0x406   :  { %v13267_v60 = vpop.f32.mrf.mxu0  ;;  %v9157_v33 = vpop.f32.mrf.mxu1  ;;  %v9047_v17 = vadd.f32 %v13205_v51, %v13200_v28 }
 0x407   :  { %v6513_v26 = vadd.f32 %v9157_v33, %v6352_v63  ;;  %v6628_v18 = vmul.f32 0.2, %v6502_v5  ;;  %v6662_v49 = vmax.f32 %v6510_v29, %v6630_v25  ;;  %v6368_v33 = vadd.f32 %v9041_v57, %v13091_v42 }
 0x408   :  { %v13274_v23 = vpop.f32.mrf.mxu0  ;;  %v6504_v24 = vpop.f32.mrf.mxu1  ;;  %v9044_v42 = vadd.f32 %v13198_v7, %v13193_v47 }
 0x409   :  { %v6631_v4 = vmul.f32 0.2, %v6513_v26  ;;  %v6505_v61 = vadd.f32 %v6504_v24, %v6344_v53  ;;  %v6660_v1 = vmax.f32 %v6502_v5, %v6628_v18 }
 0x40a   :  { %v13279_v19 = vpop.f32.mrf.mxu0  ;;  %v9160_v16 = vpop.f32.mrf.mxu1 }
 0x40b   :  { %v6663_v27 = vmax.f32 %v6513_v26, %v6631_v4  ;;  %v6629_v12 = vmul.f32 0.2, %v6505_v61  ;;  %v6526_v6 = vadd.f32 %v9160_v16, %v6365_v56 }
 0x40c   :  { %v13281_v63 = vpop.f32.mrf.mxu0  ;;  %v6517_v39 = vpop.f32.mrf.mxu1 }
 0x40d   :  { %v7577_v53 = vpack.c.bf16 %v6663_v27, %v6662_v49  ;;  %v6661_v35 = vmax.f32 %v6505_v61, %v6629_v12  ;;  %v6518_v22 = vadd.f32 %v6517_v39, %v6357_v48  ;;  %v6634_v26 = vmul.f32 0.2, %v6526_v6 }
 0x40e   :  { %v13287_v24 = vpop.f32.mrf.mxu0  ;;  %v9161_v29 = vpop.f32.mrf.mxu1  ;;  %v6381_v61 = vadd.f32 %v9050_v14, %v13109_v32  ;;  %v6373_v49 = vadd.f32 %v9044_v42, %v13097_v11  ;;  %v6384_v12 = vadd.f32 %v9053_v31, %v13115_v15  ;;  %v9062_v32 = vadd.f32 %v13240_v37, %v13235_v21 }
 0x40f   :  { %7644 = vst [vmem:[%s13404_s3 + $0x8] sm:$0xff] %v7577_v53   ;;  %v7572_v25 = vpack.c.bf16 %v6661_v35, %v6660_v1  ;;  %v6529_v62 = vadd.f32 %v9161_v29, %v6368_v33  ;;  %v6632_v57 = vmul.f32 0.2, %v6518_v22  ;;  %v6666_v7 = vmax.f32 %v6526_v6, %v6634_v26 }
 0x410   :  { %v13297_v8 = vpop.f32.mrf.mxu0  ;;  %v6520_v5 = vpop.f32.mrf.mxu1  ;;  %v6376_v53 = vadd.f32 %v9047_v17, %v13103_v36  ;;  %v9056_v15 = vadd.f32 %v13226_v45, %v13221_v50  ;;  %v9065_v21 = vadd.f32 %v13249_v34, %v13244_v59  ;;  %v6397_v26 = vadd.f32 %v9062_v32, %v13133_v10 }
 0x411   :  { %7573 = vst [vmem:[%s13404_s3] sm:$0xff] %v7572_v25   ;;  %v6635_v18 = vmul.f32 0.2, %v6529_v62  ;;  %v6521_v4 = vadd.f32 %v6520_v5, %v6360_v2  ;;  %v6664_v48 = vmax.f32 %v6518_v22, %v6632_v57  ;;  %v9059_v36 = vadd.f32 %v13233_v40, %v13228_v58 }
 0x412   :  { %v13305_v56 = vpop.f32.mrf.mxu0  ;;  %v9164_v47 = vpop.f32.mrf.mxu1  ;;  %v6389_v31 = vadd.f32 %v9056_v15, %v13121_v0  ;;  %v6400_v57 = vadd.f32 %v9065_v21, %v13139_v43  ;;  %v9068_v43 = vadd.f32 %v13261_v44, %v13254_v38 }
 0x413   :  { %v6667_v41 = vmax.f32 %v6529_v62, %v6635_v18  ;;  %v6633_v13 = vmul.f32 0.2, %v6521_v4  ;;  %v6542_v9 = vadd.f32 %v9164_v47, %v6381_v61  ;;  %v9074_v18 = vadd.f32 %v13281_v63, %v13279_v19 }
 0x414   :  { %v13307_v16 = vpop.f32.mrf.mxu0  ;;  %v6533_v27 = vpop.f32.mrf.mxu1  ;;  %v6392_v0 = vadd.f32 %v9059_v36, %v13127_v55  ;;  %v9077_v19 = vadd.f32 %v13297_v8, %v13287_v24  ;;  %v9071_v55 = vadd.f32 %v13274_v23, %v13267_v60 }
 0x415   :  { %v7587_v39 = vpack.c.bf16 %v6667_v41, %v6666_v7  ;;  %v6665_v28 = vmax.f32 %v6521_v4, %v6633_v13  ;;  %v6534_v51 = vadd.f32 %v6533_v27, %v6373_v49  ;;  %v6638_v1 = vmul.f32 0.2, %v6542_v9 }
 0x416   :  { %v13313_v33 = vpop.f32.mrf.mxu0  ;;  %v9165_v6 = vpop.f32.mrf.mxu1 }
 0x417   :  { %7646 = vst [vmem:[%s13404_s3 + $0x18] sm:$0xff] %v7587_v39   ;;  %v7582_v14 = vpack.c.bf16 %v6665_v28, %v6664_v48  ;;  %v6545_v11 = vadd.f32 %v9165_v6, %v6384_v12  ;;  %v6636_v22 = vmul.f32 0.2, %v6534_v51  ;;  %v6670_v45 = vmax.f32 %v6542_v9, %v6638_v1 }
 0x418   :  { %v13323_v37 = vpop.f32.mrf.mxu0  ;;  %v6536_v35 = vpop.f32.mrf.mxu1  ;;  %v6413_v12 = vadd.f32 %v9074_v18, %v13161_v30  ;;  %v6405_v28 = vadd.f32 %v9068_v43, %v13144_v46  ;;  %v6416_v6 = vadd.f32 %v9077_v19, %v13168_v20  ;;  %v9080_v46 = vadd.f32 %v13307_v16, %v13305_v56  ;;  %v13418_v43 = vld [vmem:[#allocation3_spill] sm:$0xff] }
 0x419   :  { %7645 = vst [vmem:[%s13404_s3 + $0x10] sm:$0xff] %v7582_v14   ;;  %v6639_v29 = vmul.f32 0.2, %v6545_v11  ;;  %v6537_v25 = vadd.f32 %v6536_v35, %v6376_v53  ;;  %v6668_v4 = vmax.f32 %v6534_v51, %v6636_v22  ;;  %v6408_v22 = vadd.f32 %v9071_v55, %v13154_v3 }
 0x41a   :  { %v9084_v62 = vpop.f32.mrf.mxu0  ;;  %v9168_v50 = vpop.f32.mrf.mxu1 }
 0x41b   :  { %v6671_v2 = vmax.f32 %v6545_v11, %v6639_v29  ;;  %v6637_v59 = vmul.f32 0.2, %v6537_v25  ;;  %v6558_v34 = vadd.f32 %v9168_v50, %v6397_v26  ;;  %v13415_v50 = vld [vmem:[#allocation4_spill] sm:$0xff] }
 0x41c   :  { %v9085_v42 = vpop.f32.mrf.mxu0  ;;  %v6549_v5 = vpop.f32.mrf.mxu1 }
 0x41d   :  { %v7597_v10 = vpack.c.bf16 %v6671_v2, %v6670_v45  ;;  %v6669_v61 = vmax.f32 %v6537_v25, %v6637_v59  ;;  %v6550_v17 = vadd.f32 %v6549_v5, %v6389_v31  ;;  %v6642_v7 = vmul.f32 0.2, %v6558_v34  ;;  %v13416_v5 = vld [vmem:[#allocation2_spill] sm:$0xff] }
 0x41e   :  { %v9087_v58 = vpop.f32.mrf.mxu0  ;;  %v9169_v40 = vpop.f32.mrf.mxu1  ;;  %v9086_v14 = vadd.f32 %v9085_v42, %v9084_v62  ;;  %v9083_v2 = vadd.f32 %v13323_v37, %v13313_v33 }
 0x41f   :  { %7648 = vst [vmem:[%s13404_s3 + $0x28] sm:$0xff] %v7597_v10   ;;  %v7592_v47 = vpack.c.bf16 %v6669_v61, %v6668_v4  ;;  %v6561_v41 = vadd.f32 %v9169_v40, %v6400_v57  ;;  %v6640_v9 = vmul.f32 0.2, %v6550_v17  ;;  %v6674_v38 = vmax.f32 %v6558_v34, %v6642_v7  ;;  %v13417_v4 = vld [vmem:[#allocation5_spill] sm:$0xff] }
 0x420   :  { %v9088_v63 = vpop.f32.mrf.mxu0  ;;  %v6552_v13 = vpop.f32.mrf.mxu1  ;;  %v6429_v45 = vadd.f32 %v9086_v14, %v13415_v50  ;;  %v6421_v57 = vadd.f32 %v9080_v46, %v13416_v5  ;;  %v6424_v19 = vadd.f32 %v9083_v2, %v13418_v43  ;;  %v13423_v5 = vld [vmem:[#allocation10_spill] sm:$0xff] }
 0x421   :  { %7647 = vst [vmem:[%s13404_s3 + $0x20] sm:$0xff] %v7592_v47   ;;  %v6643_v49 = vmul.f32 0.2, %v6561_v41  ;;  %v6553_v27 = vadd.f32 %v6552_v13, %v6392_v0  ;;  %v6672_v1 = vmax.f32 %v6550_v17, %v6640_v9  ;;  %v9089_v20 = vadd.f32 %v9088_v63, %v9087_v58 }
 0x422   :  { %v9090_v32 = vpop.f32.mrf.mxu0  ;;  %v9172_v48 = vpop.f32.mrf.mxu1 }
 0x423   :  { %v6675_v44 = vmax.f32 %v6561_v41, %v6643_v49  ;;  %v6641_v39 = vmul.f32 0.2, %v6553_v27  ;;  %v6574_v24 = vadd.f32 %v9172_v48, %v6413_v12  ;;  %v6432_v10 = vadd.f32 %v9089_v20, %v13417_v4  ;;  %v13419_v49 = vld [vmem:[#allocation8_spill] sm:$0xff] }
 0x424   :  { %v9091_v8 = vpop.f32.mrf.mxu0  ;;  %v6565_v51 = vpop.f32.mrf.mxu1 }
 0x425   :  { %v7607_v11 = vpack.c.bf16 %v6675_v44, %v6674_v38  ;;  %v6673_v53 = vmax.f32 %v6553_v27, %v6641_v39  ;;  %v6566_v30 = vadd.f32 %v6565_v51, %v6405_v28  ;;  %v6646_v23 = vmul.f32 0.2, %v6574_v24 }
 0x426   :  { %v9093_v15 = vpop.f32.mrf.mxu0  ;;  %v9173_v21 = vpop.f32.mrf.mxu1  ;;  %v9092_v63 = vadd.f32 %v9091_v8, %v9090_v32  ;;  %v13420_v8 = vld [vmem:[#allocation6_spill] sm:$0xff] }
 0x427   :  { %7650 = vst [vmem:[%s13404_s3 + $0x38] sm:$0xff] %v7607_v11   ;;  %v7602_v60 = vpack.c.bf16 %v6673_v53, %v6672_v1  ;;  %v6577_v35 = vadd.f32 %v9173_v21, %v6416_v6  ;;  %v6644_v26 = vmul.f32 0.2, %v6566_v30  ;;  %v6678_v34 = vmax.f32 %v6574_v24, %v6646_v23 }
 0x428   :  { %v9094_v29 = vpop.f32.mrf.mxu0  ;;  %v6568_v25 = vpop.f32.mrf.mxu1  ;;  %v6437_v1 = vadd.f32 %v9092_v63, %v13420_v8 }
 0x429   :  { %7649 = vst [vmem:[%s13404_s3 + $0x30] sm:$0xff] %v7602_v60   ;;  %v6647_v36 = vmul.f32 0.2, %v6577_v35  ;;  %v6569_v62 = vadd.f32 %v6568_v25, %v6408_v22  ;;  %v6676_v61 = vmax.f32 %v6566_v30, %v6644_v26  ;;  %v9095_v44 = vadd.f32 %v9094_v29, %v9093_v15  ;;  %v13421_v60 = vld [vmem:[#allocation9_spill] sm:$0xff]  ;;  %v13422_v26 = vld [vmem:[#allocation7_spill] sm:$0xff] }
 0x42a   :  { %v9096_v59 = vpop.f32.mrf.mxu0  ;;  %v9176_v3 = vpop.f32.mrf.mxu1 }
 0x42b   :  { %v6679_v42 = vmax.f32 %v6577_v35, %v6647_v36  ;;  %v6645_v56 = vmul.f32 0.2, %v6569_v62  ;;  %v6590_v16 = vadd.f32 %v9176_v3, %v6429_v45  ;;  %v6440_v36 = vadd.f32 %v9095_v44, %v13422_v26 }
 0x42c   :  { %v9097_v31 = vpop.f32.mrf.mxu0  ;;  %v6581_v18 = vpop.f32.mrf.mxu1 }
 0x42d   :  { %v7617_v17 = vpack.c.bf16 %v6679_v42, %v6678_v34  ;;  %v6677_v58 = vmax.f32 %v6569_v62, %v6645_v56  ;;  %v9098_v40 = vadd.f32 %v9097_v31, %v9096_v59  ;;  %v6582_v47 = vadd.f32 %v6581_v18, %v6421_v57 }
 0x42e   :  { %v9099_v7 = vpop.f32.mrf.mxu0  ;;  %v9177_v41 = vpop.f32.mrf.mxu1  ;;  %v6650_v37 = vmul.f32 0.2, %v6590_v16 }
 0x42f   :  { %7652 = vst [vmem:[%s13404_s3 + $0x48] sm:$0xff] %v7617_v17   ;;  %v7612_v33 = vpack.c.bf16 %v6677_v58, %v6676_v61  ;;  %v6593_v0 = vadd.f32 %v9177_v41, %v6432_v10  ;;  %v6445_v27 = vadd.f32 %v9098_v40, %v13419_v49  ;;  %v6648_v12 = vmul.f32 0.2, %v6582_v47 }
 0x430   :  { %v9100_v13 = vpop.f32.mrf.mxu0  ;;  %v6584_v9 = vpop.f32.mrf.mxu1  ;;  %v6682_v28 = vmax.f32 %v6590_v16, %v6650_v37  ;;  %v13424_v37 = vld [vmem:[#allocation11_spill] sm:$0xff] }
 0x431   :  { %7651 = vst [vmem:[%s13404_s3 + $0x40] sm:$0xff] %v7612_v33   ;;  %v6651_v55 = vmul.f32 0.2, %v6593_v0  ;;  %v9101_v48 = vadd.f32 %v9100_v13, %v9099_v7  ;;  %v6585_v38 = vadd.f32 %v6584_v9, %v6424_v19  ;;  %v6680_v53 = vmax.f32 %v6582_v47, %v6648_v12 }
 0x432   :  { %v9102_v39 = vpop.f32.mrf.mxu0  ;;  %v9180_v24 = vpop.f32.mrf.mxu1 }
 0x433   :  { %v6683_v51 = vmax.f32 %v6593_v0, %v6651_v55  ;;  %v6649_v6 = vmul.f32 0.2, %v6585_v38  ;;  %v6606_v14 = vadd.f32 %v9180_v24, %v6445_v27  ;;  %v6448_v23 = vadd.f32 %v9101_v48, %v13421_v60 }
 0x434   :  { %v9103_v32 = vpop.f32.mrf.mxu0  ;;  %v6597_v11 = vpop.f32.mrf.mxu1 }
 0x435   :  { %v7627_v30 = vpack.c.bf16 %v6683_v51, %v6682_v28  ;;  %v6681_v21 = vmax.f32 %v6585_v38, %v6649_v6  ;;  %v6654_v35 = vmul.f32 0.2, %v6606_v14  ;;  %v6598_v22 = vadd.f32 %v6597_v11, %v6437_v1 }
 0x436   :  { %v9105_v46 = vpop.f32.mrf.mxu0  ;;  %v9181_v20 = vpop.f32.mrf.mxu1  ;;  %v9104_v29 = vadd.f32 %v9103_v32, %v9102_v39 }
 0x437   :  { %7654 = vst [vmem:[%s13404_s3 + $0x58] sm:$0xff] %v7627_v30   ;;  %v7622_v15 = vpack.c.bf16 %v6681_v21, %v6680_v53  ;;  %v6609_v25 = vadd.f32 %v9181_v20, %v6448_v23  ;;  %v6652_v62 = vmul.f32 0.2, %v6598_v22  ;;  %v6686_v3 = vmax.f32 %v6606_v14, %v6654_v35 }
 0x438   :  { %v9106_v50 = vpop.f32.mrf.mxu0  ;;  %v6600_v45 = vpop.f32.mrf.mxu1  ;;  %v6453_v57 = vadd.f32 %v9104_v29, %v13423_v5 }
 0x439   :  { %7653 = vst [vmem:[%s13404_s3 + $0x50] sm:$0xff] %v7622_v15   ;;  %v6655_v2 = vmul.f32 0.2, %v6609_v25  ;;  %v6601_v59 = vadd.f32 %v6600_v45, %v6440_v36  ;;  %v9107_v16 = vadd.f32 %v9106_v50, %v9105_v46  ;;  %v6684_v18 = vmax.f32 %v6598_v22, %v6652_v62 }
 0x43a   :  { %v9108_v34 = vpop.f32.mrf.mxu0  ;;  %v9184_v42 = vpop.f32.mrf.mxu1 }
 0x43b   :  { %v6687_v56 = vmax.f32 %v6609_v25, %v6655_v2  ;;  %v6653_v31 = vmul.f32 0.2, %v6601_v59  ;;  %v6456_v0 = vadd.f32 %v9107_v16, %v13424_v37 }
 0x43c   :  { %v9109_v4 = vpop.f32.mrf.mxu0  ;;  %v6613_v10 = vpop.f32.mrf.mxu1 }
 0x43d   :  { %v7637_v61 = vpack.c.bf16 %v6687_v56, %v6686_v3  ;;  %v6685_v17 = vmax.f32 %v6601_v59, %v6653_v31  ;;  %v9110_v58 = vadd.f32 %v9109_v4, %v9108_v34  ;;  %v6614_v40 = vadd.f32 %v6613_v10, %v6453_v57 }
 0x43e   :  { %v9111_v47 = vpop.f32.mrf.mxu0  ;;  %v9185_v7 = vpop.f32.mrf.mxu1 }
 0x43f   :  { %7656 = vst [vmem:[%s13404_s3 + $0x68] sm:$0xff] %v7637_v61   ;;  %v7632_v41 = vpack.c.bf16 %v6685_v17, %v6684_v18  ;;  %v6461_v33 = vadd.f32 %v9110_v58, %v13247_v52  ;;  %v6656_v13 = vmul.f32 0.2, %v6614_v40 }
 0x440   :  { %v9112_v43 = vpop.f32.mrf.mxu0  ;;  %v6616_v19 = vpop.f32.mrf.mxu1 }
 0x441   :  { %7655 = vst [vmem:[%s13404_s3 + $0x60] sm:$0xff] %v7632_v41   ;;  %v6622_v63 = vadd.f32 %v9184_v42, %v6461_v33  ;;  %v9113_v9 = vadd.f32 %v9112_v43, %v9111_v47  ;;  %v6617_v49 = vadd.f32 %v6616_v19, %v6456_v0  ;;  %v6688_v38 = vmax.f32 %v6614_v40, %v6656_v13 }
 0x443   :  { %v6658_v27 = vmul.f32 0.2, %v6622_v63  ;;  %v6464_v12 = vadd.f32 %v9113_v9, %v13259_v54  ;;  %v6657_v55 = vmul.f32 0.2, %v6617_v49 }
 0x445   :  { %v6690_v48 = vmax.f32 %v6622_v63, %v6658_v27  ;;  %v6625_v44 = vadd.f32 %v9185_v7, %v6464_v12  ;;  %v6689_v52 = vmax.f32 %v6617_v49, %v6657_v55 }
 0x447   :  { %v7567_v39 = vpack.c.bf16 %v6690_v48, %v6690_v48  ;;  %v6659_v24 = vmul.f32 0.2, %v6625_v44  ;;  %v7642_v28 = vpack.c.bf16 %v6689_v52, %v6688_v38 }
 0x449   :  { %6850 = vst [vmem:[%s13404_s3 + $0x78] sm:$0xf] %v7567_v39  ;;  %v6691_v51 = vmax.f32 %v6625_v44, %v6659_v24  ;;  %7657 = vst [vmem:[%s13404_s3 + $0x70] sm:$0xff] %v7642_v28  }
 0x44b   :  { %v7568_v6 = vpack.c.bf16 %v6691_v51, %v6691_v51 }
 0x44d   :  { %6851 = vst [vmem:[%s13404_s3 + $0x7c] sm:$0x1] %v7568_v6 }

// kernel: discriminator_forward.7
= control target key start
LH: loop header
LB: loop body
LE: loop exit
PB: predicated region body
PF: predicated region fallthrough
CT: control target
= control target key end

     0   :  { %s3346_s21 = smov 0   ;;  %s4137_s0 = inlined_call_operand.vmem [shape: bf16[8,16000], index: 0, kind: input, shape index: {}]   ;;  %s4138_s1 = inlined_call_operand.vmem [shape: s8[16000,512], index: 1, kind: input, shape index: {}]   ;;  %s4139_s2 = inlined_call_operand.vmem [shape: f32[1,512], index: 2, kind: input, shape index: {}]   ;;  %s4140_s3 = inlined_call_operand.vmem [shape: f32[1,512], index: 3, kind: input, shape index: {}]   ;;  %s4141_s4 = inlined_call_operand.vmem [shape: bf16[512,128], index: 4, kind: input, shape index: {}]   ;;  %s4142_s5 = inlined_call_operand.vmem [shape: f32[1,128], index: 5, kind: input, shape index: {}]   ;;  %s4143_s6 = inlined_call_operand.vmem [shape: f32[8,128], index: 6, kind: output, shape index: {}]  }
   0x1 LB: > { %s3352_s22 = sadd.s32 4294967295, %s3307_s21   ;;  %p3117_p0 = scmp.ge.s32.totalorder %s3307_s21, 1  ;;  %s3307_s21 = sphi %s3346_s21, %s16_s21  }
   0x2   : > { %p220_p1 = scmp.lt.s32.totalorder %s3307_s21, 6 }
   0x4   : > { %p221_p2 = pnand %p3117_p0, %p220_p1 }
   0x5   : > { %s251_s23 = smul.u32 (!%p221_p2), 25, %s3352_s22  ;;  %p3121_p5 = scmp.ne.s32.totalorder (!%p221_p2), %s3352_s22, 0 }
   0x6   : > { %224 = sbr.rel (%p221_p2) target bundleno = 1295 (0x50f), region = 44 }
   0x7   : > { %s257_s24 = smul.u32 (!%p221_p2), 100, %s3352_s22  ;;  %p252_p3 = scmp.lt.s32.totalorder (!%p221_p2), %s251_s23, 124 }
   0x9   : > { %p258_p4 = scmp.lt.s32.totalorder (!%p221_p2), %s257_s24, 499 }
   0xb   : > { %s4145_s23 = smov (!%p252_p3, %s251_s23), 124  ;;  %s4147_s24 = smov (!%p258_p4, %s257_s24), 499 }
   0xc   : > { %s3118_s25 = sshll.u32 %s4145_s23, 2  ;;  %s3184_s29 = sshll.u32 %s4147_s24, 5 }
   0xd   : > { %s3361_s28 = scalar_lea.vmem %s4137_s0, %s3118_s25  ;;  %s3366_s8 = scalar_lea.vmem %s4138_s1, %s3184_s29 }
   0xe   : > { %268 = sbr.rel (%p3121_p5) target bundleno = 22 (0x16), region = 48 }
  0x13   : > { %v3309_v0 = vmov 0.0  }
  0x14   : > { %269 = vst [vmem:[#allocation2 + $0x10] sm:$0xff] %v3309_v0  ;;  %270 = vst [vmem:[#allocation2] sm:$0xff] %v3309_v0 }
  0x15   : > { %271 = vst [vmem:[#allocation2 + $0x18] sm:$0xff] %v3309_v0  ;;  %272 = vst [vmem:[#allocation2 + $0x8] sm:$0xff] %v3309_v0 }
  0x16 PF: > { %v286_v1 = vld [vmem:[%s3366_s8 + $0x68] sm:$0xff]  ;;  %v285_v3 = vld [vmem:[%s3366_s8 + $0x60] sm:$0xff]  ;;  %p3147_p6 = scmp.ne.s32.totalorder %s3352_s22, 4 }
  0x17   : > { %v318_v2 = vld [vmem:[%s3366_s8 + $0x168] sm:$0xff]  ;;  %v698_v4 = vunpack.c.l.s8.bf16 %v286_v1  ;;  %v702_v5 = vunpack.c.h.s8.bf16 %v286_v1  ;;  %v317_v8 = vld [vmem:[%s3366_s8 + $0x160] sm:$0xff]  ;;  %v701_v9 = vunpack.c.h.s8.bf16 %v285_v3  ;;  %v697_v13 = vunpack.c.l.s8.bf16 %v285_v3 }
  0x18   : > { %v762_v6 = vunpack.c.l.s8.bf16 %v318_v2  ;;  %v766_v7 = vunpack.c.h.s8.bf16 %v318_v2  ;;  %v765_v10 = vunpack.c.h.s8.bf16 %v317_v8  ;;  %v282_v11 = vld [vmem:[%s3366_s8 + $0x48] sm:$0xff]  ;;  %v761_v14 = vunpack.c.l.s8.bf16 %v317_v8  ;;  %v281_v17 = vld [vmem:[%s3366_s8 + $0x40] sm:$0xff] }
  0x19   : > { %v314_v12 = vld [vmem:[%s3366_s8 + $0x148] sm:$0xff]  ;;  %1578 = vmatprep.subr.bf16.mxu0 %v702_v5  ;;  %v694_v15 = vunpack.c.h.s8.bf16 %v282_v11  ;;  %v313_v18 = vld [vmem:[%s3366_s8 + $0x140] sm:$0xff]  ;;  %v693_v19 = vunpack.c.h.s8.bf16 %v281_v17  ;;  %v690_v21 = vunpack.c.l.s8.bf16 %v282_v11  ;;  %v689_v25 = vunpack.c.l.s8.bf16 %v281_v17 }
  0x1a   : > { %1619 = vmatprep.subr.bf16.mxu1 %v766_v7  ;;  %1579 = vmatpush1.bf16.msra.mxu0 %v701_v9  ;;  %v758_v16 = vunpack.c.h.s8.bf16 %v314_v12  ;;  %v757_v20 = vunpack.c.h.s8.bf16 %v313_v18  ;;  %v754_v22 = vunpack.c.l.s8.bf16 %v314_v12  ;;  %v278_v23 = vld [vmem:[%s3366_s8 + $0x28] sm:$0xff]  ;;  %v753_v26 = vunpack.c.l.s8.bf16 %v313_v18  ;;  %v277_v29 = vld [vmem:[%s3366_s8 + $0x20] sm:$0xff] }
  0x1b   : > { %1620 = vmatpush1.bf16.msra.mxu1 %v765_v10  ;;  %1580 = vmatprep.subr.bf16.mxu0 %v698_v4  ;;  %v310_v24 = vld [vmem:[%s3366_s8 + $0x128] sm:$0xff]  ;;  %v686_v27 = vunpack.c.h.s8.bf16 %v278_v23  ;;  %v309_v30 = vld [vmem:[%s3366_s8 + $0x120] sm:$0xff]  ;;  %v685_v33 = vunpack.c.h.s8.bf16 %v277_v29  ;;  %v682_v35 = vunpack.c.l.s8.bf16 %v278_v23  ;;  %v681_v41 = vunpack.c.l.s8.bf16 %v277_v29 }
  0x1c   : > { %1621 = vmatprep.subr.bf16.mxu1 %v762_v6  ;;  %v750_v28 = vunpack.c.h.s8.bf16 %v310_v24  ;;  %v3382_v31 = vld [vmem:[%s3361_s28] sm:$0xff]  ;;  %v3385_v32 = vld [vmem:[%s3361_s28 + $0x8] sm:$0xff]  ;;  %v749_v34 = vunpack.c.h.s8.bf16 %v309_v30  ;;  %v746_v36 = vunpack.c.l.s8.bf16 %v310_v24  ;;  %v745_v42 = vunpack.c.l.s8.bf16 %v309_v30 }
  0x1d   : > { %v3389_v37 = vcombine.high %v3382_v31, %v3382_v31  ;;  %v274_v38 = vld [vmem:[%s3366_s8 + $0x8] sm:$0xff]  ;;  %v3395_v40 = vcombine.high %v3385_v32, %v3385_v32  ;;  %v273_v45 = vld [vmem:[%s3366_s8] sm:$0xff] }
  0x1e   : > { %1581 = vmatpush1.bf16.msra.mxu0 %v697_v13  ;;  %v306_v39 = vld [vmem:[%s3366_s8 + $0x108] sm:$0xff]  ;;  %v678_v43 = vunpack.c.h.s8.bf16 %v274_v38  ;;  %v305_v46 = vld [vmem:[%s3366_s8 + $0x100] sm:$0xff]  ;;  %v677_v47 = vunpack.c.h.s8.bf16 %v273_v45  ;;  %v674_v49 = vunpack.c.l.s8.bf16 %v274_v38  ;;  %v673_v53 = vunpack.c.l.s8.bf16 %v273_v45 }
  0x1f   : > { %1622 = vmatpush1.bf16.msra.mxu1 %v761_v14  ;;  %1582 = vmatprep.subr.bf16.mxu0 %v694_v15  ;;  %v742_v44 = vunpack.c.h.s8.bf16 %v306_v39  ;;  %v741_v48 = vunpack.c.h.s8.bf16 %v305_v46  ;;  %v738_v50 = vunpack.c.l.s8.bf16 %v306_v39  ;;  %v302_v51 = vld [vmem:[%s3366_s8 + $0xe8] sm:$0xff]  ;;  %v737_v54 = vunpack.c.l.s8.bf16 %v305_v46  ;;  %v301_v57 = vld [vmem:[%s3366_s8 + $0xe0] sm:$0xff] }
  0x20   : > { %1623 = vmatprep.subr.bf16.mxu1 %v758_v16  ;;  %1610 = vmatprep.mubr.bf16.mxu0 %v3389_v37  ;;  %v334_v52 = vld [vmem:[%s3366_s8 + $0x1e8] sm:$0xff]  ;;  %v734_v55 = vunpack.c.h.s8.bf16 %v302_v51  ;;  %v333_v58 = vld [vmem:[%s3366_s8 + $0x1e0] sm:$0xff]  ;;  %v733_v59 = vunpack.c.h.s8.bf16 %v301_v57  ;;  %v730_v61 = vunpack.c.l.s8.bf16 %v302_v51  ;;  %v729_v1 = vunpack.c.l.s8.bf16 %v301_v57 }
  0x21   : > { %1651 = vmatprep.mubr.bf16.mxu1 %v3395_v40  ;;  %v798_v56 = vunpack.c.h.s8.bf16 %v334_v52  ;;  %v797_v60 = vunpack.c.h.s8.bf16 %v333_v58  ;;  %v794_v62 = vunpack.c.l.s8.bf16 %v334_v52  ;;  %v298_v63 = vld [vmem:[%s3366_s8 + $0xc8] sm:$0xff]  ;;  %v793_v2 = vunpack.c.l.s8.bf16 %v333_v58  ;;  %v297_v5 = vld [vmem:[%s3366_s8 + $0xc0] sm:$0xff] }
  0x22   : > { %1583 = vmatpush1.bf16.msra.mxu0 %v693_v19  ;;  %v330_v0 = vld [vmem:[%s3366_s8 + $0x1c8] sm:$0xff]  ;;  %v726_v3 = vunpack.c.h.s8.bf16 %v298_v63  ;;  %v329_v6 = vld [vmem:[%s3366_s8 + $0x1c0] sm:$0xff]  ;;  %v725_v7 = vunpack.c.h.s8.bf16 %v297_v5  ;;  %v722_v9 = vunpack.c.l.s8.bf16 %v298_v63  ;;  %v721_v13 = vunpack.c.l.s8.bf16 %v297_v5 }
  0x23   : > { %1624 = vmatpush1.bf16.msra.mxu1 %v757_v20  ;;  %1584 = vmatprep.subr.bf16.mxu0 %v690_v21  ;;  %v790_v4 = vunpack.c.h.s8.bf16 %v330_v0  ;;  %v789_v8 = vunpack.c.h.s8.bf16 %v329_v6  ;;  %v786_v10 = vunpack.c.l.s8.bf16 %v330_v0  ;;  %v294_v11 = vld [vmem:[%s3366_s8 + $0xa8] sm:$0xff]  ;;  %v785_v14 = vunpack.c.l.s8.bf16 %v329_v6  ;;  %v293_v17 = vld [vmem:[%s3366_s8 + $0xa0] sm:$0xff] }
  0x24   : > { %1625 = vmatprep.subr.bf16.mxu1 %v754_v22  ;;  %v326_v12 = vld [vmem:[%s3366_s8 + $0x1a8] sm:$0xff]  ;;  %v718_v15 = vunpack.c.h.s8.bf16 %v294_v11  ;;  %v325_v18 = vld [vmem:[%s3366_s8 + $0x1a0] sm:$0xff]  ;;  %v717_v19 = vunpack.c.h.s8.bf16 %v293_v17  ;;  %v714_v21 = vunpack.c.l.s8.bf16 %v294_v11 }
  0x25   : > { %v782_v16 = vunpack.c.h.s8.bf16 %v326_v12  ;;  %v781_v20 = vunpack.c.h.s8.bf16 %v325_v18  ;;  %v778_v22 = vunpack.c.l.s8.bf16 %v326_v12  ;;  %v290_v23 = vld [vmem:[%s3366_s8 + $0x88] sm:$0xff]  ;;  %v289_v29 = vld [vmem:[%s3366_s8 + $0x80] sm:$0xff] }
  0x26   : > { %1585 = vmatpush1.bf16.msra.mxu0 %v689_v25  ;;  %v322_v24 = vld [vmem:[%s3366_s8 + $0x188] sm:$0xff]  ;;  %v713_v25 = vunpack.c.l.s8.bf16 %v293_v17  ;;  %v321_v30 = vld [vmem:[%s3366_s8 + $0x180] sm:$0xff] }
  0x27   : > { %1626 = vmatpush1.bf16.msra.mxu1 %v753_v26  ;;  %1586 = vmatprep.subr.bf16.mxu0 %v686_v27  ;;  %v777_v26 = vunpack.c.l.s8.bf16 %v325_v18  ;;  %v710_v27 = vunpack.c.h.s8.bf16 %v290_v23  ;;  %v350_v38 = vld [vmem:[%s3366_s8 + $0x268] sm:$0xff]  ;;  %v349_v45 = vld [vmem:[%s3366_s8 + $0x260] sm:$0xff] }
  0x28   : > { %1627 = vmatprep.subr.bf16.mxu1 %v750_v28  ;;  %v774_v28 = vunpack.c.h.s8.bf16 %v322_v24  ;;  %v382_v39 = vld [vmem:[%s3366_s8 + $0x368] sm:$0xff]  ;;  %v381_v46 = vld [vmem:[%s3366_s8 + $0x360] sm:$0xff]  ;;  %v829_v51 = vunpack.c.h.s8.bf16 %v349_v45  ;;  %v825_v57 = vunpack.c.l.s8.bf16 %v349_v45 }
  0x29   : > { %v893_v52 = vunpack.c.h.s8.bf16 %v381_v46  ;;  %v889_v58 = vunpack.c.l.s8.bf16 %v381_v46 }
  0x2a   : > { %1587 = vmatpush1.bf16.msra.mxu0 %v685_v33  ;;  %v709_v33 = vunpack.c.h.s8.bf16 %v289_v29 }
  0x2b   : > { %1628 = vmatpush1.bf16.msra.mxu1 %v749_v34  ;;  %1588 = vmatprep.subr.bf16.mxu0 %v682_v35  ;;  %v773_v34 = vunpack.c.h.s8.bf16 %v321_v30  ;;  %v706_v35 = vunpack.c.l.s8.bf16 %v290_v23 }
  0x2c   : > { %1629 = vmatprep.subr.bf16.mxu1 %v746_v36  ;;  %v770_v36 = vunpack.c.l.s8.bf16 %v322_v24 }
  0x2e   : > { %1589 = vmatpush1.bf16.msra.mxu0 %v681_v41  ;;  %v705_v41 = vunpack.c.l.s8.bf16 %v289_v29 }
  0x2f   : > { %1630 = vmatpush1.bf16.msra.mxu1 %v745_v42  ;;  %1590 = vmatprep.subr.bf16.mxu0 %v678_v43  ;;  %v769_v42 = vunpack.c.l.s8.bf16 %v321_v30  ;;  %v830_v43 = vunpack.c.h.s8.bf16 %v350_v38 }
  0x30   : > { %1631 = vmatprep.subr.bf16.mxu1 %v742_v44  ;;  %v894_v44 = vunpack.c.h.s8.bf16 %v382_v39 }
  0x32   : > { %1591 = vmatpush1.bf16.msra.mxu0 %v677_v47  ;;  %v3423_v47 = vcombine.low %v3382_v31, %v3382_v31  ;;  %v346_v31 = vld [vmem:[%s3366_s8 + $0x248] sm:$0xff] }
  0x33   : > { %1632 = vmatpush1.bf16.msra.mxu1 %v741_v48  ;;  %1592 = vmatprep.subr.bf16.mxu0 %v674_v49  ;;  %v3427_v48 = vcombine.low %v3385_v32, %v3385_v32  ;;  %v3430_v49 = vld [vmem:[%s3361_s28 + $0x10] sm:$0xff] }
  0x34   : > { %1633 = vmatprep.subr.bf16.mxu1 %v738_v50  ;;  %v3433_v50 = vld [vmem:[%s3361_s28 + $0x18] sm:$0xff]  ;;  %v3439_v32 = vcombine.high %v3430_v49, %v3430_v49 }
  0x36   : > { %1593 = vmatpush1.bf16.msra.mxu0 %v673_v53  ;;  %v826_v53 = vunpack.c.l.s8.bf16 %v350_v38 }
  0x37   : > { %1634 = vmatpush1.bf16.msra.mxu1 %v737_v54  ;;  %1594 = vmatprep.subr.bf16.mxu0 %v734_v55  ;;  %v890_v54 = vunpack.c.l.s8.bf16 %v382_v39  ;;  %v378_v55 = vld [vmem:[%s3366_s8 + $0x348] sm:$0xff] }
  0x38   : > { %1635 = vmatprep.subr.bf16.mxu1 %v798_v56  ;;  %v3443_v56 = vcombine.high %v3433_v50, %v3433_v50 }
  0x3a   : > { %1595 = vmatpush2.bf16.msra.mxu0 %v733_v59  ;;  %v822_v59 = vunpack.c.h.s8.bf16 %v346_v31 }
  0x3b   : > { %1636 = vmatpush2.bf16.msra.mxu1 %v797_v60  ;;  %1596 = vmatprep.subr.bf16.mxu0 %v730_v61  ;;  %v886_v60 = vunpack.c.h.s8.bf16 %v378_v55  ;;  %v345_v61 = vld [vmem:[%s3366_s8 + $0x240] sm:$0xff] }
  0x3c   : > { %1637 = vmatprep.subr.bf16.mxu1 %v794_v62  ;;  %v377_v62 = vld [vmem:[%s3366_s8 + $0x340] sm:$0xff]  ;;  %v821_v63 = vunpack.c.h.s8.bf16 %v345_v61  ;;  %v817_v5 = vunpack.c.l.s8.bf16 %v345_v61 }
  0x3d   : > { %v885_v0 = vunpack.c.h.s8.bf16 %v377_v62  ;;  %v881_v6 = vunpack.c.l.s8.bf16 %v377_v62 }
  0x3e   : > { %1597 = vmatpush2.bf16.msra.mxu0 %v729_v1  ;;  %v818_v1 = vunpack.c.l.s8.bf16 %v346_v31 }
  0x3f   : > { %1638 = vmatpush2.bf16.msra.mxu1 %v793_v2  ;;  %1598 = vmatprep.subr.bf16.mxu0 %v726_v3  ;;  %v882_v2 = vunpack.c.l.s8.bf16 %v378_v55  ;;  %v342_v3 = vld [vmem:[%s3366_s8 + $0x228] sm:$0xff] }
  0x40   : > { %1639 = vmatprep.subr.bf16.mxu1 %v790_v4  ;;  %v374_v4 = vld [vmem:[%s3366_s8 + $0x328] sm:$0xff] }
  0x42   : > { %1599 = vmatpush2.bf16.msra.mxu0 %v725_v7  ;;  %v814_v7 = vunpack.c.h.s8.bf16 %v342_v3 }
  0x43   : > { %1640 = vmatpush2.bf16.msra.mxu1 %v789_v8  ;;  %1600 = vmatprep.subr.bf16.mxu0 %v722_v9  ;;  %v878_v8 = vunpack.c.h.s8.bf16 %v374_v4  ;;  %v341_v9 = vld [vmem:[%s3366_s8 + $0x220] sm:$0xff] }
  0x44   : > { %1641 = vmatprep.subr.bf16.mxu1 %v786_v10  ;;  %v373_v10 = vld [vmem:[%s3366_s8 + $0x320] sm:$0xff]  ;;  %v813_v11 = vunpack.c.h.s8.bf16 %v341_v9  ;;  %v809_v17 = vunpack.c.l.s8.bf16 %v341_v9 }
  0x45   : > { %v877_v12 = vunpack.c.h.s8.bf16 %v373_v10  ;;  %v873_v18 = vunpack.c.l.s8.bf16 %v373_v10 }
  0x46   : > { %1601 = vmatpush2.bf16.msra.mxu0 %v721_v13  ;;  %v810_v13 = vunpack.c.l.s8.bf16 %v342_v3 }
  0x47   : > { %1642 = vmatpush2.bf16.msra.mxu1 %v785_v14  ;;  %1602 = vmatprep.subr.bf16.mxu0 %v718_v15  ;;  %v874_v14 = vunpack.c.l.s8.bf16 %v374_v4  ;;  %v338_v15 = vld [vmem:[%s3366_s8 + $0x208] sm:$0xff] }
  0x48   : > { %1643 = vmatprep.subr.bf16.mxu1 %v782_v16  ;;  %v370_v16 = vld [vmem:[%s3366_s8 + $0x308] sm:$0xff] }
  0x4a   : > { %1603 = vmatpush2.bf16.msra.mxu0 %v717_v19  ;;  %v806_v19 = vunpack.c.h.s8.bf16 %v338_v15 }
  0x4b   : > { %1644 = vmatpush2.bf16.msra.mxu1 %v781_v20  ;;  %1604 = vmatprep.subr.bf16.mxu0 %v714_v21  ;;  %v870_v20 = vunpack.c.h.s8.bf16 %v370_v16  ;;  %v337_v21 = vld [vmem:[%s3366_s8 + $0x200] sm:$0xff] }
  0x4c   : > { %1645 = vmatprep.subr.bf16.mxu1 %v778_v22  ;;  %v369_v22 = vld [vmem:[%s3366_s8 + $0x300] sm:$0xff]  ;;  %v805_v23 = vunpack.c.h.s8.bf16 %v337_v21  ;;  %v801_v29 = vunpack.c.l.s8.bf16 %v337_v21 }
  0x4d   : > { %v869_v24 = vunpack.c.h.s8.bf16 %v369_v22  ;;  %v865_v30 = vunpack.c.l.s8.bf16 %v369_v22 }
  0x4e   : > { %1605 = vmatpush2.bf16.msra.mxu0 %v713_v25  ;;  %v802_v25 = vunpack.c.l.s8.bf16 %v338_v15 }
  0x4f   : > { %1646 = vmatpush2.bf16.msra.mxu1 %v777_v26  ;;  %1606 = vmatprep.subr.bf16.mxu0 %v710_v27  ;;  %v866_v26 = vunpack.c.l.s8.bf16 %v370_v16  ;;  %v366_v27 = vld [vmem:[%s3366_s8 + $0x2e8] sm:$0xff] }
  0x50   : > { %1647 = vmatprep.subr.bf16.mxu1 %v774_v28  ;;  %v398_v28 = vld [vmem:[%s3366_s8 + $0x3e8] sm:$0xff] }
  0x52   : > { %1607 = vmatpush2.bf16.msra.mxu0 %v709_v33  ;;  %v862_v33 = vunpack.c.h.s8.bf16 %v366_v27 }
  0x53   : > { %1648 = vmatpush2.bf16.msra.mxu1 %v773_v34  ;;  %1608 = vmatprep.subr.bf16.mxu0 %v706_v35  ;;  %v926_v34 = vunpack.c.h.s8.bf16 %v398_v28  ;;  %v365_v35 = vld [vmem:[%s3366_s8 + $0x2e0] sm:$0xff] }
  0x54   : > { %1649 = vmatprep.subr.bf16.mxu1 %v770_v36  ;;  %v397_v36 = vld [vmem:[%s3366_s8 + $0x3e0] sm:$0xff]  ;;  %v861_v38 = vunpack.c.h.s8.bf16 %v365_v35  ;;  %v857_v45 = vunpack.c.l.s8.bf16 %v365_v35 }
  0x55   : > { %v925_v39 = vunpack.c.h.s8.bf16 %v397_v36  ;;  %v921_v46 = vunpack.c.l.s8.bf16 %v397_v36 }
  0x56   : > { %1609 = vmatpush2.bf16.msra.mxu0 %v705_v41  ;;  %v858_v41 = vunpack.c.l.s8.bf16 %v366_v27  ;;  %v3481_v27 = vcombine.low %v3430_v49, %v3430_v49  ;;  %v410_v49 = vld [vmem:[%s3366_s8 + $0x448] sm:$0xff] }
  0x57   : > { %1650 = vmatpush2.bf16.msra.mxu1 %v769_v42  ;;  %1660 = vmatprep.subr.bf16.mxu0 %v830_v43  ;;  %v922_v42 = vunpack.c.l.s8.bf16 %v398_v28  ;;  %v362_v43 = vld [vmem:[%s3366_s8 + $0x2c8] sm:$0xff]  ;;  %v3485_v28 = vcombine.low %v3433_v50, %v3433_v50 }
  0x58   : > { %1701 = vmatprep.subr.bf16.mxu1 %v894_v44  ;;  %v394_v44 = vld [vmem:[%s3366_s8 + $0x3c8] sm:$0xff] }
  0x59   : > { %1611 = vmatmul.mubr.bf16.vlgmr.msra.gmra.mxu0 %v3423_v47 }
  0x5a   : > { %1652 = vmatmul.mubr.bf16.vlgmr.msra.gmra.mxu1 %v3427_v48  ;;  %1661 = vmatpush1.bf16.msra.mxu0 %v829_v51  ;;  %v854_v51 = vunpack.c.h.s8.bf16 %v362_v43 }
  0x5b   : > { %1702 = vmatpush1.bf16.msra.mxu1 %v893_v52  ;;  %1662 = vmatprep.subr.bf16.mxu0 %v826_v53  ;;  %v918_v52 = vunpack.c.h.s8.bf16 %v394_v44  ;;  %v361_v53 = vld [vmem:[%s3366_s8 + $0x2c0] sm:$0xff] }
  0x5c   : > { %1703 = vmatprep.subr.bf16.mxu1 %v890_v54  ;;  %1692 = vmatprep.mubr.bf16.mxu0 %v3439_v32  ;;  %v393_v54 = vld [vmem:[%s3366_s8 + $0x3c0] sm:$0xff]  ;;  %v853_v31 = vunpack.c.h.s8.bf16 %v361_v53  ;;  %v849_v61 = vunpack.c.l.s8.bf16 %v361_v53  ;;  %v946_v53 = vunpack.c.l.s8.bf16 %v410_v49 }
  0x5d   : > { %1733 = vmatprep.mubr.bf16.mxu1 %v3443_v56  ;;  %v917_v55 = vunpack.c.h.s8.bf16 %v393_v54  ;;  %v913_v62 = vunpack.c.l.s8.bf16 %v393_v54 }
  0x5e   : > { %1663 = vmatpush1.bf16.msra.mxu0 %v825_v57  ;;  %v850_v57 = vunpack.c.l.s8.bf16 %v362_v43  ;;  %v950_v43 = vunpack.c.h.s8.bf16 %v410_v49 }
  0x5f   : > { %1704 = vmatpush1.bf16.msra.mxu1 %v889_v58  ;;  %1664 = vmatprep.subr.bf16.mxu0 %v822_v59  ;;  %v914_v58 = vunpack.c.l.s8.bf16 %v394_v44  ;;  %v358_v59 = vld [vmem:[%s3366_s8 + $0x2a8] sm:$0xff] }
  0x60   : > { %1705 = vmatprep.subr.bf16.mxu1 %v886_v60  ;;  %v390_v60 = vld [vmem:[%s3366_s8 + $0x3a8] sm:$0xff] }
  0x62   : > { %1665 = vmatpush1.bf16.msra.mxu0 %v821_v63  ;;  %v846_v63 = vunpack.c.h.s8.bf16 %v358_v59 }
  0x63   : > { %1706 = vmatpush1.bf16.msra.mxu1 %v885_v0  ;;  %1666 = vmatprep.subr.bf16.mxu0 %v818_v1  ;;  %v910_v0 = vunpack.c.h.s8.bf16 %v390_v60  ;;  %v357_v1 = vld [vmem:[%s3366_s8 + $0x2a0] sm:$0xff] }
  0x64   : > { %1707 = vmatprep.subr.bf16.mxu1 %v882_v2  ;;  %v389_v2 = vld [vmem:[%s3366_s8 + $0x3a0] sm:$0xff]  ;;  %v845_v3 = vunpack.c.h.s8.bf16 %v357_v1  ;;  %v841_v9 = vunpack.c.l.s8.bf16 %v357_v1 }
  0x65   : > { %v909_v4 = vunpack.c.h.s8.bf16 %v389_v2  ;;  %v905_v10 = vunpack.c.l.s8.bf16 %v389_v2 }
  0x66   : > { %1667 = vmatpush1.bf16.msra.mxu0 %v817_v5  ;;  %v842_v5 = vunpack.c.l.s8.bf16 %v358_v59 }
  0x67   : > { %1708 = vmatpush1.bf16.msra.mxu1 %v881_v6  ;;  %1668 = vmatprep.subr.bf16.mxu0 %v814_v7  ;;  %v906_v6 = vunpack.c.l.s8.bf16 %v390_v60  ;;  %v354_v7 = vld [vmem:[%s3366_s8 + $0x288] sm:$0xff] }
  0x68   : > { %1709 = vmatprep.subr.bf16.mxu1 %v878_v8  ;;  %v386_v8 = vld [vmem:[%s3366_s8 + $0x388] sm:$0xff] }
  0x6a   : > { %1669 = vmatpush1.bf16.msra.mxu0 %v813_v11  ;;  %v838_v11 = vunpack.c.h.s8.bf16 %v354_v7 }
  0x6b   : > { %1710 = vmatpush1.bf16.msra.mxu1 %v877_v12  ;;  %1670 = vmatprep.subr.bf16.mxu0 %v810_v13  ;;  %v902_v12 = vunpack.c.h.s8.bf16 %v386_v8  ;;  %v353_v13 = vld [vmem:[%s3366_s8 + $0x280] sm:$0xff] }
  0x6c   : > { %1711 = vmatprep.subr.bf16.mxu1 %v874_v14  ;;  %v385_v14 = vld [vmem:[%s3366_s8 + $0x380] sm:$0xff]  ;;  %v837_v15 = vunpack.c.h.s8.bf16 %v353_v13  ;;  %v833_v21 = vunpack.c.l.s8.bf16 %v353_v13 }
  0x6d   : > { %v901_v16 = vunpack.c.h.s8.bf16 %v385_v14  ;;  %v897_v22 = vunpack.c.l.s8.bf16 %v385_v14 }
  0x6e   : > { %1671 = vmatpush1.bf16.msra.mxu0 %v809_v17  ;;  %v834_v17 = vunpack.c.l.s8.bf16 %v354_v7 }
  0x6f   : > { %1712 = vmatpush1.bf16.msra.mxu1 %v873_v18  ;;  %1672 = vmatprep.subr.bf16.mxu0 %v806_v19  ;;  %v898_v18 = vunpack.c.l.s8.bf16 %v386_v8  ;;  %v414_v19 = vld [vmem:[%s3366_s8 + $0x468] sm:$0xff] }
  0x70   : > { %1713 = vmatprep.subr.bf16.mxu1 %v870_v20  ;;  %v446_v20 = vld [vmem:[%s3366_s8 + $0x568] sm:$0xff]  ;;  %v954_v35 = vunpack.c.l.s8.bf16 %v414_v19 }
  0x71   : > { %v1018_v36 = vunpack.c.l.s8.bf16 %v446_v20 }
  0x72   : > { %1673 = vmatpush1.bf16.msra.mxu0 %v805_v23  ;;  %v958_v23 = vunpack.c.h.s8.bf16 %v414_v19 }
  0x73   : > { %1714 = vmatpush1.bf16.msra.mxu1 %v869_v24  ;;  %1674 = vmatprep.subr.bf16.mxu0 %v802_v25  ;;  %v1022_v24 = vunpack.c.h.s8.bf16 %v446_v20  ;;  %v413_v25 = vld [vmem:[%s3366_s8 + $0x460] sm:$0xff] }
  0x74   : > { %1715 = vmatprep.subr.bf16.mxu1 %v866_v26  ;;  %v445_v26 = vld [vmem:[%s3366_s8 + $0x560] sm:$0xff] }
  0x76   : > { %1675 = vmatpush1.bf16.msra.mxu0 %v801_v29  ;;  %v3488_v29 = vld [vmem:[%s3361_s28 + $0x20] sm:$0xff] }
  0x77   : > { %1716 = vmatpush1.bf16.msra.mxu1 %v865_v30  ;;  %1676 = vmatprep.subr.bf16.mxu0 %v862_v33  ;;  %v3491_v30 = vld [vmem:[%s3361_s28 + $0x28] sm:$0xff]  ;;  %v957_v33 = vunpack.c.h.s8.bf16 %v413_v25  ;;  %v3497_v50 = vcombine.high %v3488_v29, %v3488_v29 }
  0x78   : > { %1717 = vmatprep.subr.bf16.mxu1 %v926_v34  ;;  %v1021_v34 = vunpack.c.h.s8.bf16 %v445_v26 }
  0x7a   : > { %1677 = vmatpush2.bf16.msra.mxu0 %v861_v38  ;;  %v442_v38 = vld [vmem:[%s3366_s8 + $0x548] sm:$0xff] }
  0x7b   : > { %1718 = vmatpush2.bf16.msra.mxu1 %v925_v39  ;;  %1678 = vmatprep.subr.bf16.mxu0 %v858_v41  ;;  %v3501_v39 = vcombine.high %v3491_v30, %v3491_v30  ;;  %v953_v41 = vunpack.c.l.s8.bf16 %v413_v25  ;;  %v1014_v44 = vunpack.c.h.s8.bf16 %v442_v38  ;;  %v1010_v54 = vunpack.c.l.s8.bf16 %v442_v38 }
  0x7c   : > { %1719 = vmatprep.subr.bf16.mxu1 %v922_v42  ;;  %v1017_v42 = vunpack.c.l.s8.bf16 %v445_v26 }
  0x7e   : > { %1679 = vmatpush2.bf16.msra.mxu0 %v857_v45  ;;  %v409_v45 = vld [vmem:[%s3366_s8 + $0x440] sm:$0xff] }
  0x7f   : > { %1720 = vmatpush2.bf16.msra.mxu1 %v921_v46  ;;  %1680 = vmatprep.subr.bf16.mxu0 %v854_v51  ;;  %v441_v46 = vld [vmem:[%s3366_s8 + $0x540] sm:$0xff]  ;;  %v949_v51 = vunpack.c.h.s8.bf16 %v409_v45 }
  0x80   : > { %1721 = vmatprep.subr.bf16.mxu1 %v918_v52  ;;  %v1013_v52 = vunpack.c.h.s8.bf16 %v441_v46 }
  0x82   : > { %1681 = vmatpush2.bf16.msra.mxu0 %v853_v31  ;;  %v406_v31 = vld [vmem:[%s3366_s8 + $0x428] sm:$0xff] }
  0x83   : > { %1722 = vmatpush2.bf16.msra.mxu1 %v917_v55  ;;  %1682 = vmatprep.subr.bf16.mxu0 %v850_v57  ;;  %v438_v55 = vld [vmem:[%s3366_s8 + $0x528] sm:$0xff]  ;;  %v945_v57 = vunpack.c.l.s8.bf16 %v409_v45  ;;  %v942_v59 = vunpack.c.h.s8.bf16 %v406_v31  ;;  %v938_v1 = vunpack.c.l.s8.bf16 %v406_v31 }
  0x84   : > { %1723 = vmatprep.subr.bf16.mxu1 %v914_v58  ;;  %v1009_v58 = vunpack.c.l.s8.bf16 %v441_v46  ;;  %v1006_v60 = vunpack.c.h.s8.bf16 %v438_v55  ;;  %v1002_v2 = vunpack.c.l.s8.bf16 %v438_v55 }
  0x86   : > { %1683 = vmatpush2.bf16.msra.mxu0 %v849_v61  ;;  %v405_v61 = vld [vmem:[%s3366_s8 + $0x420] sm:$0xff] }
  0x87   : > { %1724 = vmatpush2.bf16.msra.mxu1 %v913_v62  ;;  %1684 = vmatprep.subr.bf16.mxu0 %v846_v63  ;;  %v437_v62 = vld [vmem:[%s3366_s8 + $0x520] sm:$0xff]  ;;  %v941_v63 = vunpack.c.h.s8.bf16 %v405_v61 }
  0x88   : > { %1725 = vmatprep.subr.bf16.mxu1 %v910_v0  ;;  %v1005_v0 = vunpack.c.h.s8.bf16 %v437_v62 }
  0x8a   : > { %1685 = vmatpush2.bf16.msra.mxu0 %v845_v3  ;;  %v402_v3 = vld [vmem:[%s3366_s8 + $0x408] sm:$0xff] }
  0x8b   : > { %1726 = vmatpush2.bf16.msra.mxu1 %v909_v4  ;;  %1686 = vmatprep.subr.bf16.mxu0 %v842_v5  ;;  %v434_v4 = vld [vmem:[%s3366_s8 + $0x508] sm:$0xff]  ;;  %v937_v5 = vunpack.c.l.s8.bf16 %v405_v61  ;;  %v934_v7 = vunpack.c.h.s8.bf16 %v402_v3  ;;  %v930_v13 = vunpack.c.l.s8.bf16 %v402_v3 }
  0x8c   : > { %1727 = vmatprep.subr.bf16.mxu1 %v906_v6  ;;  %v1001_v6 = vunpack.c.l.s8.bf16 %v437_v62  ;;  %v998_v8 = vunpack.c.h.s8.bf16 %v434_v4  ;;  %v994_v14 = vunpack.c.l.s8.bf16 %v434_v4 }
  0x8e   : > { %1687 = vmatpush2.bf16.msra.mxu0 %v841_v9  ;;  %v401_v9 = vld [vmem:[%s3366_s8 + $0x400] sm:$0xff] }
  0x8f   : > { %1728 = vmatpush2.bf16.msra.mxu1 %v905_v10  ;;  %1688 = vmatprep.subr.bf16.mxu0 %v838_v11  ;;  %v433_v10 = vld [vmem:[%s3366_s8 + $0x500] sm:$0xff]  ;;  %v933_v11 = vunpack.c.h.s8.bf16 %v401_v9 }
  0x90   : > { %1729 = vmatprep.subr.bf16.mxu1 %v902_v12  ;;  %v997_v12 = vunpack.c.h.s8.bf16 %v433_v10 }
  0x92   : > { %1689 = vmatpush2.bf16.msra.mxu0 %v837_v15  ;;  %v430_v15 = vld [vmem:[%s3366_s8 + $0x4e8] sm:$0xff] }
  0x93   : > { %1730 = vmatpush2.bf16.msra.mxu1 %v901_v16  ;;  %1690 = vmatprep.subr.bf16.mxu0 %v834_v17  ;;  %v462_v16 = vld [vmem:[%s3366_s8 + $0x5e8] sm:$0xff]  ;;  %v929_v17 = vunpack.c.l.s8.bf16 %v401_v9  ;;  %v990_v19 = vunpack.c.h.s8.bf16 %v430_v15  ;;  %v986_v25 = vunpack.c.l.s8.bf16 %v430_v15 }
  0x94   : > { %1731 = vmatprep.subr.bf16.mxu1 %v898_v18  ;;  %v993_v18 = vunpack.c.l.s8.bf16 %v433_v10  ;;  %v1054_v20 = vunpack.c.h.s8.bf16 %v462_v16  ;;  %v1050_v26 = vunpack.c.l.s8.bf16 %v462_v16 }
  0x96   : > { %1691 = vmatpush2.bf16.msra.mxu0 %v833_v21  ;;  %v429_v21 = vld [vmem:[%s3366_s8 + $0x4e0] sm:$0xff] }
  0x97   : > { %1732 = vmatpush2.bf16.msra.mxu1 %v897_v22  ;;  %1742 = vmatprep.subr.bf16.mxu0 %v958_v23  ;;  %v461_v22 = vld [vmem:[%s3366_s8 + $0x5e0] sm:$0xff]  ;;  %v989_v23 = vunpack.c.h.s8.bf16 %v429_v21 }
  0x98   : > { %1783 = vmatprep.subr.bf16.mxu1 %v1022_v24  ;;  %v1053_v24 = vunpack.c.h.s8.bf16 %v461_v22 }
  0x99   : > { %1693 = vmatmul.mubr.bf16.vlgmr.msra.gmra.mxu0 %v3481_v27 }
  0x9a   : > { %1734 = vmatmul.mubr.bf16.vlgmr.msra.gmra.mxu1 %v3485_v28  ;;  %1743 = vmatpush1.bf16.msra.mxu0 %v957_v33  ;;  %v426_v33 = vld [vmem:[%s3366_s8 + $0x4c8] sm:$0xff] }
  0x9b   : > { %1784 = vmatpush1.bf16.msra.mxu1 %v1021_v34  ;;  %1744 = vmatprep.subr.bf16.mxu0 %v954_v35  ;;  %v458_v34 = vld [vmem:[%s3366_s8 + $0x5c8] sm:$0xff]  ;;  %v985_v35 = vunpack.c.l.s8.bf16 %v429_v21  ;;  %v982_v49 = vunpack.c.h.s8.bf16 %v426_v33  ;;  %v978_v45 = vunpack.c.l.s8.bf16 %v426_v33  ;;  %v3546_v21 = vld [vmem:[%s3361_s28 + $0x30] sm:$0xff] }
  0x9c   : > { %1785 = vmatprep.subr.bf16.mxu1 %v1018_v36  ;;  %1774 = vmatprep.mubr.bf16.mxu0 %v3497_v50  ;;  %v1049_v36 = vunpack.c.l.s8.bf16 %v461_v22  ;;  %v1046_v38 = vunpack.c.h.s8.bf16 %v458_v34  ;;  %v1042_v46 = vunpack.c.l.s8.bf16 %v458_v34  ;;  %v3549_v22 = vld [vmem:[%s3361_s28 + $0x38] sm:$0xff]  ;;  %v506_v33 = vld [vmem:[%s3366_s8 + $0x748] sm:$0xff] }
  0x9d   : > { %1815 = vmatprep.mubr.bf16.mxu1 %v3501_v39  ;;  %v3559_v34 = vcombine.high %v3549_v22, %v3549_v22 }
  0x9e   : > { %1745 = vmatpush1.bf16.msra.mxu0 %v953_v41  ;;  %v425_v41 = vld [vmem:[%s3366_s8 + $0x4c0] sm:$0xff] }
  0x9f   : > { %1786 = vmatpush1.bf16.msra.mxu1 %v1017_v42  ;;  %1746 = vmatprep.subr.bf16.mxu0 %v950_v43  ;;  %v457_v42 = vld [vmem:[%s3366_s8 + $0x5c0] sm:$0xff]  ;;  %v981_v43 = vunpack.c.h.s8.bf16 %v425_v41 }
  0xa0   : > { %1787 = vmatprep.subr.bf16.mxu1 %v1014_v44  ;;  %v1045_v44 = vunpack.c.h.s8.bf16 %v457_v42 }
  0xa2   : > { %1747 = vmatpush1.bf16.msra.mxu0 %v949_v51  ;;  %v422_v51 = vld [vmem:[%s3366_s8 + $0x4a8] sm:$0xff] }
  0xa3   : > { %1788 = vmatpush1.bf16.msra.mxu1 %v1013_v52  ;;  %1748 = vmatprep.subr.bf16.mxu0 %v946_v53  ;;  %v454_v52 = vld [vmem:[%s3366_s8 + $0x5a8] sm:$0xff]  ;;  %v977_v53 = vunpack.c.l.s8.bf16 %v425_v41  ;;  %v974_v31 = vunpack.c.h.s8.bf16 %v422_v51  ;;  %v970_v61 = vunpack.c.l.s8.bf16 %v422_v51  ;;  %v473_v41 = vld [vmem:[%s3366_s8 + $0x640] sm:$0xff] }
  0xa4   : > { %1789 = vmatprep.subr.bf16.mxu1 %v1010_v54  ;;  %v1041_v54 = vunpack.c.l.s8.bf16 %v457_v42  ;;  %v1038_v55 = vunpack.c.h.s8.bf16 %v454_v52  ;;  %v1034_v62 = vunpack.c.l.s8.bf16 %v454_v52  ;;  %v505_v42 = vld [vmem:[%s3366_s8 + $0x740] sm:$0xff]  ;;  %v470_v51 = vld [vmem:[%s3366_s8 + $0x628] sm:$0xff] }
  0xa5   : > { %v502_v52 = vld [vmem:[%s3366_s8 + $0x728] sm:$0xff] }
  0xa6   : > { %1749 = vmatpush1.bf16.msra.mxu0 %v945_v57  ;;  %v421_v57 = vld [vmem:[%s3366_s8 + $0x4a0] sm:$0xff] }
  0xa7   : > { %1790 = vmatpush1.bf16.msra.mxu1 %v1009_v58  ;;  %1750 = vmatprep.subr.bf16.mxu0 %v942_v59  ;;  %v453_v58 = vld [vmem:[%s3366_s8 + $0x5a0] sm:$0xff]  ;;  %v973_v59 = vunpack.c.h.s8.bf16 %v421_v57 }
  0xa8   : > { %1791 = vmatprep.subr.bf16.mxu1 %v1006_v60  ;;  %v1037_v60 = vunpack.c.h.s8.bf16 %v453_v58 }
  0xaa   : > { %1751 = vmatpush1.bf16.msra.mxu0 %v941_v63  ;;  %v418_v63 = vld [vmem:[%s3366_s8 + $0x488] sm:$0xff] }
  0xab   : > { %1792 = vmatpush1.bf16.msra.mxu1 %v1005_v0  ;;  %1752 = vmatprep.subr.bf16.mxu0 %v938_v1  ;;  %v450_v0 = vld [vmem:[%s3366_s8 + $0x588] sm:$0xff]  ;;  %v969_v1 = vunpack.c.l.s8.bf16 %v421_v57  ;;  %v966_v3 = vunpack.c.h.s8.bf16 %v418_v63  ;;  %v962_v9 = vunpack.c.l.s8.bf16 %v418_v63  ;;  %v469_v57 = vld [vmem:[%s3366_s8 + $0x620] sm:$0xff] }
  0xac   : > { %1793 = vmatprep.subr.bf16.mxu1 %v1002_v2  ;;  %v1033_v2 = vunpack.c.l.s8.bf16 %v453_v58  ;;  %v1030_v4 = vunpack.c.h.s8.bf16 %v450_v0  ;;  %v1026_v10 = vunpack.c.l.s8.bf16 %v450_v0  ;;  %v501_v58 = vld [vmem:[%s3366_s8 + $0x720] sm:$0xff]  ;;  %v466_v63 = vld [vmem:[%s3366_s8 + $0x608] sm:$0xff] }
  0xad   : > { %v498_v0 = vld [vmem:[%s3366_s8 + $0x708] sm:$0xff] }
  0xae   : > { %1753 = vmatpush1.bf16.msra.mxu0 %v937_v5  ;;  %v417_v5 = vld [vmem:[%s3366_s8 + $0x480] sm:$0xff] }
  0xaf   : > { %1794 = vmatpush1.bf16.msra.mxu1 %v1001_v6  ;;  %1754 = vmatprep.subr.bf16.mxu0 %v934_v7  ;;  %v449_v6 = vld [vmem:[%s3366_s8 + $0x580] sm:$0xff]  ;;  %v965_v7 = vunpack.c.h.s8.bf16 %v417_v5 }
  0xb0   : > { %1795 = vmatprep.subr.bf16.mxu1 %v998_v8  ;;  %v1029_v8 = vunpack.c.h.s8.bf16 %v449_v6 }
  0xb2   : > { %1755 = vmatpush1.bf16.msra.mxu0 %v933_v11  ;;  %v478_v11 = vld [vmem:[%s3366_s8 + $0x668] sm:$0xff] }
  0xb3   : > { %1796 = vmatpush1.bf16.msra.mxu1 %v997_v12  ;;  %1756 = vmatprep.subr.bf16.mxu0 %v930_v13  ;;  %v510_v12 = vld [vmem:[%s3366_s8 + $0x768] sm:$0xff]  ;;  %v961_v13 = vunpack.c.l.s8.bf16 %v417_v5  ;;  %v1086_v15 = vunpack.c.h.s8.bf16 %v478_v11  ;;  %v465_v5 = vld [vmem:[%s3366_s8 + $0x600] sm:$0xff] }
  0xb4   : > { %1797 = vmatprep.subr.bf16.mxu1 %v994_v14  ;;  %v1025_v14 = vunpack.c.l.s8.bf16 %v449_v6  ;;  %v1150_v16 = vunpack.c.h.s8.bf16 %v510_v12  ;;  %v497_v6 = vld [vmem:[%s3366_s8 + $0x700] sm:$0xff] }
  0xb6   : > { %1757 = vmatpush1.bf16.msra.mxu0 %v929_v17  ;;  %v477_v17 = vld [vmem:[%s3366_s8 + $0x660] sm:$0xff] }
  0xb7   : > { %1798 = vmatpush1.bf16.msra.mxu1 %v993_v18  ;;  %1758 = vmatprep.subr.bf16.mxu0 %v990_v19  ;;  %v509_v18 = vld [vmem:[%s3366_s8 + $0x760] sm:$0xff]  ;;  %v3539_v19 = vcombine.low %v3488_v29, %v3488_v29  ;;  %v474_v29 = vld [vmem:[%s3366_s8 + $0x648] sm:$0xff] }
  0xb8   : > { %1799 = vmatprep.subr.bf16.mxu1 %v1054_v20  ;;  %v3543_v20 = vcombine.low %v3491_v30, %v3491_v30  ;;  %v3555_v30 = vcombine.high %v3546_v21, %v3546_v21 }
  0xba   : > { %1759 = vmatpush2.bf16.msra.mxu0 %v989_v23  ;;  %v1085_v23 = vunpack.c.h.s8.bf16 %v477_v17 }
  0xbb   : > { %1800 = vmatpush2.bf16.msra.mxu1 %v1053_v24  ;;  %1760 = vmatprep.subr.bf16.mxu0 %v986_v25  ;;  %v1149_v24 = vunpack.c.h.s8.bf16 %v509_v18  ;;  %v1082_v25 = vunpack.c.l.s8.bf16 %v478_v11  ;;  %v494_v11 = vld [vmem:[%s3366_s8 + $0x6e8] sm:$0xff] }
  0xbc   : > { %1801 = vmatprep.subr.bf16.mxu1 %v1050_v26  ;;  %v1146_v26 = vunpack.c.l.s8.bf16 %v510_v12  ;;  %v526_v12 = vld [vmem:[%s3366_s8 + $0x7e8] sm:$0xff] }
  0xbe   : > { %1761 = vmatpush2.bf16.msra.mxu0 %v985_v35  ;;  %v1081_v35 = vunpack.c.l.s8.bf16 %v477_v17  ;;  %v493_v17 = vld [vmem:[%s3366_s8 + $0x6e0] sm:$0xff] }
  0xbf   : > { %1802 = vmatpush2.bf16.msra.mxu1 %v1049_v36  ;;  %1762 = vmatprep.subr.bf16.mxu0 %v982_v49  ;;  %v1145_v36 = vunpack.c.l.s8.bf16 %v509_v18  ;;  %v1078_v49 = vunpack.c.h.s8.bf16 %v474_v29  ;;  %v525_v18 = vld [vmem:[%s3366_s8 + $0x7e0] sm:$0xff] }
  0xc0   : > { %1803 = vmatprep.subr.bf16.mxu1 %v1046_v38  ;;  %v1142_v38 = vunpack.c.h.s8.bf16 %v506_v33 }
  0xc2   : > { %1763 = vmatpush2.bf16.msra.mxu0 %v981_v43  ;;  %v1077_v43 = vunpack.c.h.s8.bf16 %v473_v41 }
  0xc3   : > { %1804 = vmatpush2.bf16.msra.mxu1 %v1045_v44  ;;  %1764 = vmatprep.subr.bf16.mxu0 %v978_v45  ;;  %v1141_v44 = vunpack.c.h.s8.bf16 %v505_v42  ;;  %v1074_v45 = vunpack.c.l.s8.bf16 %v474_v29  ;;  %v490_v29 = vld [vmem:[%s3366_s8 + $0x6c8] sm:$0xff] }
  0xc4   : > { %1805 = vmatprep.subr.bf16.mxu1 %v1042_v46  ;;  %v1138_v46 = vunpack.c.l.s8.bf16 %v506_v33  ;;  %v522_v33 = vld [vmem:[%s3366_s8 + $0x7c8] sm:$0xff] }
  0xc6   : > { %1765 = vmatpush2.bf16.msra.mxu0 %v977_v53  ;;  %v1073_v53 = vunpack.c.l.s8.bf16 %v473_v41  ;;  %v489_v41 = vld [vmem:[%s3366_s8 + $0x6c0] sm:$0xff] }
  0xc7   : > { %1806 = vmatpush2.bf16.msra.mxu1 %v1041_v54  ;;  %1766 = vmatprep.subr.bf16.mxu0 %v974_v31  ;;  %v1137_v54 = vunpack.c.l.s8.bf16 %v505_v42  ;;  %v1070_v31 = vunpack.c.h.s8.bf16 %v470_v51  ;;  %v521_v42 = vld [vmem:[%s3366_s8 + $0x7c0] sm:$0xff] }
  0xc8   : > { %1807 = vmatprep.subr.bf16.mxu1 %v1038_v55  ;;  %v1134_v55 = vunpack.c.h.s8.bf16 %v502_v52 }
  0xca   : > { %1767 = vmatpush2.bf16.msra.mxu0 %v973_v59  ;;  %v1069_v59 = vunpack.c.h.s8.bf16 %v469_v57 }
  0xcb   : > { %1808 = vmatpush2.bf16.msra.mxu1 %v1037_v60  ;;  %1768 = vmatprep.subr.bf16.mxu0 %v970_v61  ;;  %v1133_v60 = vunpack.c.h.s8.bf16 %v501_v58  ;;  %v1066_v61 = vunpack.c.l.s8.bf16 %v470_v51  ;;  %v486_v51 = vld [vmem:[%s3366_s8 + $0x6a8] sm:$0xff] }
  0xcc   : > { %1809 = vmatprep.subr.bf16.mxu1 %v1034_v62  ;;  %v1130_v62 = vunpack.c.l.s8.bf16 %v502_v52  ;;  %v518_v52 = vld [vmem:[%s3366_s8 + $0x7a8] sm:$0xff] }
  0xce   : > { %1769 = vmatpush2.bf16.msra.mxu0 %v969_v1  ;;  %v1065_v1 = vunpack.c.l.s8.bf16 %v469_v57  ;;  %v485_v57 = vld [vmem:[%s3366_s8 + $0x6a0] sm:$0xff] }
  0xcf   : > { %1810 = vmatpush2.bf16.msra.mxu1 %v1033_v2  ;;  %1770 = vmatprep.subr.bf16.mxu0 %v966_v3  ;;  %v1129_v2 = vunpack.c.l.s8.bf16 %v501_v58  ;;  %v1062_v3 = vunpack.c.h.s8.bf16 %v466_v63  ;;  %v517_v58 = vld [vmem:[%s3366_s8 + $0x7a0] sm:$0xff] }
  0xd0   : > { %1811 = vmatprep.subr.bf16.mxu1 %v1030_v4  ;;  %v1126_v4 = vunpack.c.h.s8.bf16 %v498_v0 }
  0xd2   : > { %1771 = vmatpush2.bf16.msra.mxu0 %v965_v7  ;;  %v1061_v7 = vunpack.c.h.s8.bf16 %v465_v5 }
  0xd3   : > { %1812 = vmatpush2.bf16.msra.mxu1 %v1029_v8  ;;  %1772 = vmatprep.subr.bf16.mxu0 %v962_v9  ;;  %v1125_v8 = vunpack.c.h.s8.bf16 %v497_v6  ;;  %v1058_v9 = vunpack.c.l.s8.bf16 %v466_v63  ;;  %v482_v63 = vld [vmem:[%s3366_s8 + $0x688] sm:$0xff] }
  0xd4   : > { %1813 = vmatprep.subr.bf16.mxu1 %v1026_v10  ;;  %v1122_v10 = vunpack.c.l.s8.bf16 %v498_v0  ;;  %v514_v0 = vld [vmem:[%s3366_s8 + $0x788] sm:$0xff] }
  0xd6   : > { %1773 = vmatpush2.bf16.msra.mxu0 %v961_v13  ;;  %v1057_v13 = vunpack.c.l.s8.bf16 %v465_v5  ;;  %v481_v5 = vld [vmem:[%s3366_s8 + $0x680] sm:$0xff] }
  0xd7   : > { %1814 = vmatpush2.bf16.msra.mxu1 %v1025_v14  ;;  %1824 = vmatprep.subr.bf16.mxu0 %v1086_v15  ;;  %v1121_v14 = vunpack.c.l.s8.bf16 %v497_v6  ;;  %v1118_v15 = vunpack.c.h.s8.bf16 %v494_v11  ;;  %v513_v6 = vld [vmem:[%s3366_s8 + $0x780] sm:$0xff] }
  0xd8   : > { %1865 = vmatprep.subr.bf16.mxu1 %v1150_v16  ;;  %v1182_v16 = vunpack.c.h.s8.bf16 %v526_v12 }
  0xd9   : > { %1775 = vmatmul.mubr.bf16.vlgmr.msra.gmra.mxu0 %v3539_v19 }
  0xda   : > { %1816 = vmatmul.mubr.bf16.vlgmr.msra.gmra.mxu1 %v3543_v20  ;;  %1825 = vmatpush1.bf16.msra.mxu0 %v1085_v23  ;;  %v1117_v23 = vunpack.c.h.s8.bf16 %v493_v17 }
  0xdb   : > { %1866 = vmatpush1.bf16.msra.mxu1 %v1149_v24  ;;  %1826 = vmatprep.subr.bf16.mxu0 %v1082_v25  ;;  %v1181_v24 = vunpack.c.h.s8.bf16 %v525_v18  ;;  %v1114_v25 = vunpack.c.l.s8.bf16 %v494_v11  ;;  %v542_v11 = vld [vmem:[%s3366_s8 + $0x868] sm:$0xff] }
  0xdc   : > { %1867 = vmatprep.subr.bf16.mxu1 %v1146_v26  ;;  %1856 = vmatprep.mubr.bf16.mxu0 %v3555_v30  ;;  %v1178_v26 = vunpack.c.l.s8.bf16 %v526_v12  ;;  %v574_v12 = vld [vmem:[%s3366_s8 + $0x968] sm:$0xff] }
  0xdd   : > { %1897 = vmatprep.mubr.bf16.mxu1 %v3559_v34 }
  0xde   : > { %1827 = vmatpush1.bf16.msra.mxu0 %v1081_v35  ;;  %v1113_v35 = vunpack.c.l.s8.bf16 %v493_v17  ;;  %v541_v17 = vld [vmem:[%s3366_s8 + $0x860] sm:$0xff] }
  0xdf   : > { %1868 = vmatpush1.bf16.msra.mxu1 %v1145_v36  ;;  %1828 = vmatprep.subr.bf16.mxu0 %v1078_v49  ;;  %v1177_v36 = vunpack.c.l.s8.bf16 %v525_v18  ;;  %v1110_v49 = vunpack.c.h.s8.bf16 %v490_v29  ;;  %v573_v18 = vld [vmem:[%s3366_s8 + $0x960] sm:$0xff] }
  0xe0   : > { %1869 = vmatprep.subr.bf16.mxu1 %v1142_v38  ;;  %v1174_v38 = vunpack.c.h.s8.bf16 %v522_v33 }
  0xe2   : > { %1829 = vmatpush1.bf16.msra.mxu0 %v1077_v43  ;;  %v1109_v43 = vunpack.c.h.s8.bf16 %v489_v41 }
  0xe3   : > { %1870 = vmatpush1.bf16.msra.mxu1 %v1141_v44  ;;  %1830 = vmatprep.subr.bf16.mxu0 %v1074_v45  ;;  %v1173_v44 = vunpack.c.h.s8.bf16 %v521_v42  ;;  %v1106_v45 = vunpack.c.l.s8.bf16 %v490_v29  ;;  %v1213_v29 = vunpack.c.h.s8.bf16 %v541_v17 }
  0xe4   : > { %1871 = vmatprep.subr.bf16.mxu1 %v1138_v46  ;;  %v1170_v46 = vunpack.c.l.s8.bf16 %v522_v33  ;;  %v1277_v33 = vunpack.c.h.s8.bf16 %v573_v18 }
  0xe6   : > { %1831 = vmatpush1.bf16.msra.mxu0 %v1073_v53  ;;  %v1105_v53 = vunpack.c.l.s8.bf16 %v489_v41 }
  0xe7   : > { %1872 = vmatpush1.bf16.msra.mxu1 %v1137_v54  ;;  %1832 = vmatprep.subr.bf16.mxu0 %v1070_v31  ;;  %v1169_v54 = vunpack.c.l.s8.bf16 %v521_v42  ;;  %v1102_v31 = vunpack.c.h.s8.bf16 %v486_v51 }
  0xe8   : > { %1873 = vmatprep.subr.bf16.mxu1 %v1134_v55  ;;  %v1166_v55 = vunpack.c.h.s8.bf16 %v518_v52 }
  0xea   : > { %1833 = vmatpush1.bf16.msra.mxu0 %v1069_v59  ;;  %v1101_v59 = vunpack.c.h.s8.bf16 %v485_v57 }
  0xeb   : > { %1874 = vmatpush1.bf16.msra.mxu1 %v1133_v60  ;;  %1834 = vmatprep.subr.bf16.mxu0 %v1066_v61  ;;  %v1165_v60 = vunpack.c.h.s8.bf16 %v517_v58  ;;  %v1098_v61 = vunpack.c.l.s8.bf16 %v486_v51 }
  0xec   : > { %1875 = vmatprep.subr.bf16.mxu1 %v1130_v62  ;;  %v1162_v62 = vunpack.c.l.s8.bf16 %v518_v52 }
  0xee   : > { %1835 = vmatpush1.bf16.msra.mxu0 %v1065_v1  ;;  %v1097_v1 = vunpack.c.l.s8.bf16 %v485_v57 }
  0xef   : > { %1876 = vmatpush1.bf16.msra.mxu1 %v1129_v2  ;;  %1836 = vmatprep.subr.bf16.mxu0 %v1062_v3  ;;  %v1161_v2 = vunpack.c.l.s8.bf16 %v517_v58  ;;  %v1094_v3 = vunpack.c.h.s8.bf16 %v482_v63 }
  0xf0   : > { %1877 = vmatprep.subr.bf16.mxu1 %v1126_v4  ;;  %v1158_v4 = vunpack.c.h.s8.bf16 %v514_v0 }
  0xf2   : > { %1837 = vmatpush1.bf16.msra.mxu0 %v1061_v7  ;;  %v1093_v7 = vunpack.c.h.s8.bf16 %v481_v5 }
  0xf3   : > { %1878 = vmatpush1.bf16.msra.mxu1 %v1125_v8  ;;  %1838 = vmatprep.subr.bf16.mxu0 %v1058_v9  ;;  %v1157_v8 = vunpack.c.h.s8.bf16 %v513_v6  ;;  %v1090_v9 = vunpack.c.l.s8.bf16 %v482_v63 }
  0xf4   : > { %1879 = vmatprep.subr.bf16.mxu1 %v1122_v10  ;;  %v1154_v10 = vunpack.c.l.s8.bf16 %v514_v0 }
  0xf6   : > { %1839 = vmatpush1.bf16.msra.mxu0 %v1057_v13  ;;  %v1089_v13 = vunpack.c.l.s8.bf16 %v481_v5 }
  0xf7   : > { %1880 = vmatpush1.bf16.msra.mxu1 %v1121_v14  ;;  %1840 = vmatprep.subr.bf16.mxu0 %v1118_v15  ;;  %v1153_v14 = vunpack.c.l.s8.bf16 %v513_v6  ;;  %v1214_v15 = vunpack.c.h.s8.bf16 %v542_v11 }
  0xf8   : > { %1881 = vmatprep.subr.bf16.mxu1 %v1182_v16  ;;  %v1278_v16 = vunpack.c.h.s8.bf16 %v574_v12 }
  0xfa   : > { %1841 = vmatpush2.bf16.msra.mxu0 %v1117_v23  ;;  %v3597_v23 = vcombine.low %v3546_v21, %v3546_v21 }
  0xfb   : > { %1882 = vmatpush2.bf16.msra.mxu1 %v1181_v24  ;;  %1842 = vmatprep.subr.bf16.mxu0 %v1114_v25  ;;  %v3601_v24 = vcombine.low %v3549_v22, %v3549_v22  ;;  %v3604_v25 = vld [vmem:[%s3361_s28 + $0x40] sm:$0xff] }
  0xfc   : > { %1883 = vmatprep.subr.bf16.mxu1 %v1178_v26  ;;  %v3607_v26 = vld [vmem:[%s3361_s28 + $0x48] sm:$0xff]  ;;  %v3613_v21 = vcombine.high %v3604_v25, %v3604_v25 }
  0xfd   : > { %v3617_v22 = vcombine.high %v3607_v26, %v3607_v26 }
  0xfe   : > { %1843 = vmatpush2.bf16.msra.mxu0 %v1113_v35  ;;  %v1210_v35 = vunpack.c.l.s8.bf16 %v542_v11 }
  0xff   : > { %1884 = vmatpush2.bf16.msra.mxu1 %v1177_v36  ;;  %1844 = vmatprep.subr.bf16.mxu0 %v1110_v49  ;;  %v1274_v36 = vunpack.c.l.s8.bf16 %v574_v12  ;;  %v538_v49 = vld [vmem:[%s3366_s8 + $0x848] sm:$0xff] }
 0x100   : > { %1885 = vmatprep.subr.bf16.mxu1 %v1174_v38  ;;  %v570_v38 = vld [vmem:[%s3366_s8 + $0x948] sm:$0xff]  ;;  %v1206_v52 = vunpack.c.h.s8.bf16 %v538_v49  ;;  %v1202_v63 = vunpack.c.l.s8.bf16 %v538_v49 }
 0x101   : > { %v1266_v0 = vunpack.c.l.s8.bf16 %v570_v38 }
 0x102   : > { %1845 = vmatpush2.bf16.msra.mxu0 %v1109_v43 }
 0x103   : > { %1886 = vmatpush2.bf16.msra.mxu1 %v1173_v44  ;;  %1846 = vmatprep.subr.bf16.mxu0 %v1106_v45  ;;  %v1209_v44 = vunpack.c.l.s8.bf16 %v541_v17  ;;  %v1273_v45 = vunpack.c.l.s8.bf16 %v573_v18 }
 0x104   : > { %1887 = vmatprep.subr.bf16.mxu1 %v1170_v46 }
 0x106   : > { %1847 = vmatpush2.bf16.msra.mxu0 %v1105_v53  ;;  %v1270_v53 = vunpack.c.h.s8.bf16 %v570_v38 }
 0x107   : > { %1888 = vmatpush2.bf16.msra.mxu1 %v1169_v54  ;;  %1848 = vmatprep.subr.bf16.mxu0 %v1102_v31  ;;  %v537_v54 = vld [vmem:[%s3366_s8 + $0x840] sm:$0xff] }
 0x108   : > { %1889 = vmatprep.subr.bf16.mxu1 %v1166_v55  ;;  %v569_v31 = vld [vmem:[%s3366_s8 + $0x940] sm:$0xff] }
 0x10a   : > { %1849 = vmatpush2.bf16.msra.mxu0 %v1101_v59  ;;  %v1205_v59 = vunpack.c.h.s8.bf16 %v537_v54 }
 0x10b   : > { %1890 = vmatpush2.bf16.msra.mxu1 %v1165_v60  ;;  %1850 = vmatprep.subr.bf16.mxu0 %v1098_v61  ;;  %v1269_v60 = vunpack.c.h.s8.bf16 %v569_v31 }
 0x10c   : > { %1891 = vmatprep.subr.bf16.mxu1 %v1162_v62 }
 0x10e   : > { %1851 = vmatpush2.bf16.msra.mxu0 %v1097_v1  ;;  %v534_v1 = vld [vmem:[%s3366_s8 + $0x828] sm:$0xff] }
 0x10f   : > { %1892 = vmatpush2.bf16.msra.mxu1 %v1161_v2  ;;  %1852 = vmatprep.subr.bf16.mxu0 %v1094_v3  ;;  %v566_v2 = vld [vmem:[%s3366_s8 + $0x928] sm:$0xff]  ;;  %v1201_v3 = vunpack.c.l.s8.bf16 %v537_v54  ;;  %v1198_v5 = vunpack.c.h.s8.bf16 %v534_v1  ;;  %v1194_v11 = vunpack.c.l.s8.bf16 %v534_v1  ;;  %v553_v1 = vld [vmem:[%s3366_s8 + $0x8c0] sm:$0xff] }
 0x110   : > { %1893 = vmatprep.subr.bf16.mxu1 %v1158_v4  ;;  %v1265_v4 = vunpack.c.l.s8.bf16 %v569_v31  ;;  %v1262_v6 = vunpack.c.h.s8.bf16 %v566_v2  ;;  %v1258_v12 = vunpack.c.l.s8.bf16 %v566_v2  ;;  %v585_v2 = vld [vmem:[%s3366_s8 + $0x9c0] sm:$0xff] }
 0x112   : > { %1853 = vmatpush2.bf16.msra.mxu0 %v1093_v7  ;;  %v533_v7 = vld [vmem:[%s3366_s8 + $0x820] sm:$0xff] }
 0x113   : > { %1894 = vmatpush2.bf16.msra.mxu1 %v1157_v8  ;;  %1854 = vmatprep.subr.bf16.mxu0 %v1090_v9  ;;  %v565_v8 = vld [vmem:[%s3366_s8 + $0x920] sm:$0xff]  ;;  %v1197_v9 = vunpack.c.h.s8.bf16 %v533_v7 }
 0x114   : > { %1895 = vmatprep.subr.bf16.mxu1 %v1154_v10  ;;  %v1261_v10 = vunpack.c.h.s8.bf16 %v565_v8 }
 0x116   : > { %1855 = vmatpush2.bf16.msra.mxu0 %v1089_v13  ;;  %v530_v13 = vld [vmem:[%s3366_s8 + $0x808] sm:$0xff] }
 0x117   : > { %1896 = vmatpush2.bf16.msra.mxu1 %v1153_v14  ;;  %1906 = vmatprep.subr.bf16.mxu0 %v1214_v15  ;;  %v562_v14 = vld [vmem:[%s3366_s8 + $0x908] sm:$0xff]  ;;  %v1193_v15 = vunpack.c.l.s8.bf16 %v533_v7  ;;  %v1190_v17 = vunpack.c.h.s8.bf16 %v530_v13  ;;  %v1186_v49 = vunpack.c.l.s8.bf16 %v530_v13  ;;  %v549_v13 = vld [vmem:[%s3366_s8 + $0x8a0] sm:$0xff] }
 0x118   : > { %1947 = vmatprep.subr.bf16.mxu1 %v1278_v16  ;;  %v1257_v16 = vunpack.c.l.s8.bf16 %v565_v8  ;;  %v1254_v18 = vunpack.c.h.s8.bf16 %v562_v14  ;;  %v1250_v38 = vunpack.c.l.s8.bf16 %v562_v14  ;;  %v550_v7 = vld [vmem:[%s3366_s8 + $0x8a8] sm:$0xff]  ;;  %v581_v14 = vld [vmem:[%s3366_s8 + $0x9a0] sm:$0xff] }
 0x119   : > { %v1612_v41 = vpop.f32.mrf.mxu0  ;;  %1857 = vmatmul.mubr.bf16.vlgmr.msra.gmra.mxu0 %v3597_v23  ;;  %v582_v8 = vld [vmem:[%s3366_s8 + $0x9a8] sm:$0xff] }
 0x11a   : > { %v1653_v42 = vpop.f32.mrf.mxu1  ;;  %1898 = vmatmul.mubr.bf16.vlgmr.msra.gmra.mxu1 %v3601_v24  ;;  %1907 = vmatpush1.bf16.msra.mxu0 %v1213_v29  ;;  %v529_v29 = vld [vmem:[%s3366_s8 + $0x800] sm:$0xff] }
 0x11b   : > { %v3621_v43 = vadd.f32 %v1653_v42, %v1612_v41  ;;  %1948 = vmatpush1.bf16.msra.mxu1 %v1277_v33  ;;  %v1614_v46 = vpop.f32.mrf.mxu0  ;;  %1908 = vmatprep.subr.bf16.mxu0 %v1210_v35  ;;  %v561_v33 = vld [vmem:[%s3366_s8 + $0x900] sm:$0xff]  ;;  %v1189_v35 = vunpack.c.h.s8.bf16 %v529_v29  ;;  %v558_v41 = vld [vmem:[%s3366_s8 + $0x8e8] sm:$0xff] }
 0x11c   : > { %v1655_v51 = vpop.f32.mrf.mxu1  ;;  %1949 = vmatprep.subr.bf16.mxu1 %v1274_v36  ;;  %1938 = vmatprep.mubr.bf16.mxu0 %v3613_v21  ;;  %v1253_v36 = vunpack.c.h.s8.bf16 %v561_v33  ;;  %v590_v42 = vld [vmem:[%s3366_s8 + $0x9e8] sm:$0xff] }
 0x11d   : > { %v3625_v55 = vadd.f32 %v1655_v51, %v1614_v46  ;;  %1979 = vmatprep.mubr.bf16.mxu1 %v3617_v22  ;;  %v1616_v57 = vpop.f32.mrf.mxu0  ;;  %v1246_v46 = vunpack.c.h.s8.bf16 %v558_v41  ;;  %v1310_v51 = vunpack.c.h.s8.bf16 %v590_v42 }
 0x11e   : > { %v1657_v58 = vpop.f32.mrf.mxu1  ;;  %1909 = vmatpush1.bf16.msra.mxu0 %v1209_v44  ;;  %v1185_v44 = vunpack.c.l.s8.bf16 %v529_v29  ;;  %v1242_v57 = vunpack.c.l.s8.bf16 %v558_v41  ;;  %v546_v29 = vld [vmem:[%s3366_s8 + $0x888] sm:$0xff]  ;;  %v545_v41 = vld [vmem:[%s3366_s8 + $0x880] sm:$0xff] }
 0x11f   : > { %1950 = vmatpush1.bf16.msra.mxu1 %v1273_v45  ;;  %v1617_v61 = vpop.f32.mrf.mxu0  ;;  %1910 = vmatprep.subr.bf16.mxu0 %v1206_v52  ;;  %v1249_v45 = vunpack.c.l.s8.bf16 %v561_v33  ;;  %v557_v52 = vld [vmem:[%s3366_s8 + $0x8e0] sm:$0xff]  ;;  %v1306_v58 = vunpack.c.l.s8.bf16 %v590_v42  ;;  %v578_v33 = vld [vmem:[%s3366_s8 + $0x988] sm:$0xff] }
 0x120   : > { %v1658_v62 = vpop.f32.mrf.mxu1  ;;  %1951 = vmatprep.subr.bf16.mxu1 %v1270_v53  ;;  %v589_v53 = vld [vmem:[%s3366_s8 + $0x9e0] sm:$0xff]  ;;  %v1245_v54 = vunpack.c.h.s8.bf16 %v557_v52  ;;  %v1241_v61 = vunpack.c.l.s8.bf16 %v557_v52  ;;  %v606_v52 = vld [vmem:[%s3366_s8 + $0xa68] sm:$0xff] }
 0x121   : > { %v1309_v31 = vunpack.c.h.s8.bf16 %v589_v53  ;;  %v1305_v62 = vunpack.c.l.s8.bf16 %v589_v53  ;;  %v577_v42 = vld [vmem:[%s3366_s8 + $0x980] sm:$0xff]  ;;  %v638_v53 = vld [vmem:[%s3366_s8 + $0xb68] sm:$0xff] }
 0x122   : > { %1911 = vmatpush1.bf16.msra.mxu0 %v1205_v59  ;;  %v554_v59 = vld [vmem:[%s3366_s8 + $0x8c8] sm:$0xff] }
 0x123   : > { %1952 = vmatpush1.bf16.msra.mxu1 %v1269_v60  ;;  %1912 = vmatprep.subr.bf16.mxu0 %v1202_v63  ;;  %v586_v60 = vld [vmem:[%s3366_s8 + $0x9c8] sm:$0xff]  ;;  %v1238_v63 = vunpack.c.h.s8.bf16 %v554_v59 }
 0x124   : > { %1953 = vmatprep.subr.bf16.mxu1 %v1266_v0  ;;  %v1302_v0 = vunpack.c.h.s8.bf16 %v586_v60 }
 0x126   : > { %1913 = vmatpush1.bf16.msra.mxu0 %v1201_v3  ;;  %v1237_v3 = vunpack.c.h.s8.bf16 %v553_v1 }
 0x127   : > { %1954 = vmatpush1.bf16.msra.mxu1 %v1265_v4  ;;  %1914 = vmatprep.subr.bf16.mxu0 %v1198_v5  ;;  %v1301_v4 = vunpack.c.h.s8.bf16 %v585_v2  ;;  %v1234_v5 = vunpack.c.l.s8.bf16 %v554_v59  ;;  %v605_v59 = vld [vmem:[%s3366_s8 + $0xa60] sm:$0xff] }
 0x128   : > { %1955 = vmatprep.subr.bf16.mxu1 %v1262_v6  ;;  %v1298_v6 = vunpack.c.l.s8.bf16 %v586_v60  ;;  %v637_v60 = vld [vmem:[%s3366_s8 + $0xb60] sm:$0xff] }
 0x12a   : > { %1915 = vmatpush1.bf16.msra.mxu0 %v1197_v9  ;;  %v1233_v9 = vunpack.c.l.s8.bf16 %v553_v1  ;;  %v1341_v1 = vunpack.c.h.s8.bf16 %v605_v59 }
 0x12b   : > { %1956 = vmatpush1.bf16.msra.mxu1 %v1261_v10  ;;  %1916 = vmatprep.subr.bf16.mxu0 %v1194_v11  ;;  %v1297_v10 = vunpack.c.l.s8.bf16 %v585_v2  ;;  %v1230_v11 = vunpack.c.h.s8.bf16 %v550_v7  ;;  %v1405_v2 = vunpack.c.h.s8.bf16 %v637_v60 }
 0x12c   : > { %1957 = vmatprep.subr.bf16.mxu1 %v1258_v12  ;;  %v1294_v12 = vunpack.c.h.s8.bf16 %v582_v8 }
 0x12e   : > { %1917 = vmatpush1.bf16.msra.mxu0 %v1193_v15  ;;  %v1229_v15 = vunpack.c.h.s8.bf16 %v549_v13 }
 0x12f   : > { %1958 = vmatpush1.bf16.msra.mxu1 %v1257_v16  ;;  %1918 = vmatprep.subr.bf16.mxu0 %v1190_v17  ;;  %v1293_v16 = vunpack.c.h.s8.bf16 %v581_v14  ;;  %v1226_v17 = vunpack.c.l.s8.bf16 %v550_v7 }
 0x130   : > { %1959 = vmatprep.subr.bf16.mxu1 %v1254_v18  ;;  %v1290_v18 = vunpack.c.l.s8.bf16 %v582_v8 }
 0x132   : > { %1919 = vmatpush1.bf16.msra.mxu0 %v1189_v35  ;;  %v1225_v35 = vunpack.c.l.s8.bf16 %v549_v13 }
 0x133   : > { %1960 = vmatpush1.bf16.msra.mxu1 %v1253_v36  ;;  %1920 = vmatprep.subr.bf16.mxu0 %v1186_v49  ;;  %v1289_v36 = vunpack.c.l.s8.bf16 %v581_v14  ;;  %v1222_v49 = vunpack.c.h.s8.bf16 %v546_v29 }
 0x134   : > { %1961 = vmatprep.subr.bf16.mxu1 %v1250_v38  ;;  %v1286_v38 = vunpack.c.h.s8.bf16 %v578_v33 }
 0x136   : > { %1921 = vmatpush1.bf16.msra.mxu0 %v1185_v44  ;;  %v1221_v44 = vunpack.c.h.s8.bf16 %v545_v41 }
 0x137   : > { %1962 = vmatpush1.bf16.msra.mxu1 %v1249_v45  ;;  %1922 = vmatprep.subr.bf16.mxu0 %v1246_v46  ;;  %v1285_v45 = vunpack.c.h.s8.bf16 %v577_v42  ;;  %v1218_v46 = vunpack.c.l.s8.bf16 %v546_v29 }
 0x138   : > { %1963 = vmatprep.subr.bf16.mxu1 %v1310_v51  ;;  %v1282_v51 = vunpack.c.l.s8.bf16 %v578_v33 }
 0x13a   : > { %1923 = vmatpush2.bf16.msra.mxu0 %v1245_v54  ;;  %v1217_v54 = vunpack.c.l.s8.bf16 %v545_v41 }
 0x13b   : > { %1964 = vmatpush2.bf16.msra.mxu1 %v1309_v31  ;;  %1924 = vmatprep.subr.bf16.mxu0 %v1242_v57  ;;  %v1281_v31 = vunpack.c.l.s8.bf16 %v577_v42  ;;  %v1342_v57 = vunpack.c.h.s8.bf16 %v606_v52 }
 0x13c   : > { %1965 = vmatprep.subr.bf16.mxu1 %v1306_v58  ;;  %v1406_v58 = vunpack.c.h.s8.bf16 %v638_v53 }
 0x13e   : > { %1925 = vmatpush2.bf16.msra.mxu0 %v1241_v61  ;;  %v3659_v61 = vcombine.low %v3604_v25, %v3604_v25 }
 0x13f   : > { %1966 = vmatpush2.bf16.msra.mxu1 %v1305_v62  ;;  %1926 = vmatprep.subr.bf16.mxu0 %v1238_v63  ;;  %v3663_v62 = vcombine.low %v3607_v26, %v3607_v26  ;;  %v3666_v63 = vld [vmem:[%s3361_s28 + $0x50] sm:$0xff] }
 0x140   : > { %1967 = vmatprep.subr.bf16.mxu1 %v1302_v0  ;;  %v3669_v0 = vld [vmem:[%s3361_s28 + $0x58] sm:$0xff]  ;;  %v3675_v25 = vcombine.high %v3666_v63, %v3666_v63 }
 0x141   : > { %v3679_v26 = vcombine.high %v3669_v0, %v3669_v0 }
 0x142   : > { %1927 = vmatpush2.bf16.msra.mxu0 %v1237_v3  ;;  %v1338_v3 = vunpack.c.l.s8.bf16 %v606_v52 }
 0x143   : > { %1968 = vmatpush2.bf16.msra.mxu1 %v1301_v4  ;;  %1928 = vmatprep.subr.bf16.mxu0 %v1234_v5  ;;  %v1402_v4 = vunpack.c.l.s8.bf16 %v638_v53  ;;  %v602_v5 = vld [vmem:[%s3366_s8 + $0xa48] sm:$0xff] }
 0x144   : > { %1969 = vmatprep.subr.bf16.mxu1 %v1298_v6  ;;  %v634_v6 = vld [vmem:[%s3366_s8 + $0xb48] sm:$0xff]  ;;  %v1334_v14 = vunpack.c.h.s8.bf16 %v602_v5 }
 0x145   : > { %v1394_v42 = vunpack.c.l.s8.bf16 %v634_v6 }
 0x146   : > { %1929 = vmatpush2.bf16.msra.mxu0 %v1233_v9 }
 0x147   : > { %1970 = vmatpush2.bf16.msra.mxu1 %v1297_v10  ;;  %1930 = vmatprep.subr.bf16.mxu0 %v1230_v11  ;;  %v1337_v10 = vunpack.c.l.s8.bf16 %v605_v59  ;;  %v1401_v11 = vunpack.c.l.s8.bf16 %v637_v60 }
 0x148   : > { %1971 = vmatprep.subr.bf16.mxu1 %v1294_v12 }
 0x14a   : > { %1931 = vmatpush2.bf16.msra.mxu0 %v1229_v15  ;;  %v1398_v15 = vunpack.c.h.s8.bf16 %v634_v6 }
 0x14b   : > { %1972 = vmatpush2.bf16.msra.mxu1 %v1293_v16  ;;  %1932 = vmatprep.subr.bf16.mxu0 %v1226_v17  ;;  %v601_v16 = vld [vmem:[%s3366_s8 + $0xa40] sm:$0xff] }
 0x14c   : > { %1973 = vmatprep.subr.bf16.mxu1 %v1290_v18  ;;  %v633_v17 = vld [vmem:[%s3366_s8 + $0xb40] sm:$0xff] }
 0x14e   : > { %1933 = vmatpush2.bf16.msra.mxu0 %v1225_v35 }
 0x14f   : > { %1974 = vmatpush2.bf16.msra.mxu1 %v1289_v36  ;;  %1934 = vmatprep.subr.bf16.mxu0 %v1222_v49  ;;  %v1333_v36 = vunpack.c.h.s8.bf16 %v601_v16  ;;  %v1397_v49 = vunpack.c.h.s8.bf16 %v633_v17 }
 0x150   : > { %1975 = vmatprep.subr.bf16.mxu1 %v1286_v38 }
 0x152   : > { %1935 = vmatpush2.bf16.msra.mxu0 %v1221_v44  ;;  %v598_v44 = vld [vmem:[%s3366_s8 + $0xa28] sm:$0xff] }
 0x153   : > { %1976 = vmatpush2.bf16.msra.mxu1 %v1285_v45  ;;  %1936 = vmatprep.subr.bf16.mxu0 %v1218_v46  ;;  %v630_v45 = vld [vmem:[%s3366_s8 + $0xb28] sm:$0xff]  ;;  %v1329_v46 = vunpack.c.l.s8.bf16 %v601_v16  ;;  %v1326_v52 = vunpack.c.h.s8.bf16 %v598_v44  ;;  %v1322_v59 = vunpack.c.l.s8.bf16 %v598_v44 }
 0x154   : > { %1977 = vmatprep.subr.bf16.mxu1 %v1282_v51  ;;  %v1393_v51 = vunpack.c.l.s8.bf16 %v633_v17  ;;  %v1390_v53 = vunpack.c.h.s8.bf16 %v630_v45  ;;  %v1386_v60 = vunpack.c.l.s8.bf16 %v630_v45 }
 0x156   : > { %1937 = vmatpush2.bf16.msra.mxu0 %v1217_v54  ;;  %v597_v54 = vld [vmem:[%s3366_s8 + $0xa20] sm:$0xff] }
 0x157   : > { %1978 = vmatpush2.bf16.msra.mxu1 %v1281_v31  ;;  %1988 = vmatprep.subr.bf16.mxu0 %v1342_v57  ;;  %v629_v31 = vld [vmem:[%s3366_s8 + $0xb20] sm:$0xff]  ;;  %v1325_v57 = vunpack.c.h.s8.bf16 %v597_v54 }
 0x158   : > { %2029 = vmatprep.subr.bf16.mxu1 %v1406_v58  ;;  %v1389_v58 = vunpack.c.h.s8.bf16 %v629_v31 }
 0x159   : > { %v1694_v7 = vpop.f32.mrf.mxu0  ;;  %1939 = vmatmul.mubr.bf16.vlgmr.msra.gmra.mxu0 %v3659_v61 }
 0x15a   : > { %v1735_v8 = vpop.f32.mrf.mxu1  ;;  %1980 = vmatmul.mubr.bf16.vlgmr.msra.gmra.mxu1 %v3663_v62  ;;  %v1695_v9 = vadd.f32 %v1694_v7, %v3621_v43  ;;  %1989 = vmatpush1.bf16.msra.mxu0 %v1341_v1  ;;  %v594_v1 = vld [vmem:[%s3366_s8 + $0xa08] sm:$0xff]  ;;  %v593_v7 = vld [vmem:[%s3366_s8 + $0xa00] sm:$0xff] }
 0x15b   : > { %2030 = vmatpush1.bf16.msra.mxu1 %v1405_v2  ;;  %v1696_v12 = vpop.f32.mrf.mxu0  ;;  %1990 = vmatprep.subr.bf16.mxu0 %v1338_v3  ;;  %v626_v2 = vld [vmem:[%s3366_s8 + $0xb08] sm:$0xff]  ;;  %v1321_v3 = vunpack.c.l.s8.bf16 %v597_v54 }
 0x15c   : > { %v1737_v13 = vpop.f32.mrf.mxu1  ;;  %2031 = vmatprep.subr.bf16.mxu1 %v1402_v4  ;;  %v3686_v18 = vadd.f32 %v1735_v8, %v1695_v9  ;;  %v1697_v29 = vadd.f32 %v1696_v12, %v3625_v55  ;;  %2020 = vmatprep.mubr.bf16.mxu0 %v3675_v25  ;;  %v1330_v55 = vunpack.c.l.s8.bf16 %v602_v5  ;;  %v1385_v4 = vunpack.c.l.s8.bf16 %v629_v31  ;;  %v625_v8 = vld [vmem:[%s3366_s8 + $0xb00] sm:$0xff] }
 0x15d   : > { %2061 = vmatprep.mubr.bf16.mxu1 %v3679_v26  ;;  %v1698_v43 = vpop.f32.mrf.mxu0  ;;  %v1318_v5 = vunpack.c.h.s8.bf16 %v594_v1  ;;  %v1382_v6 = vunpack.c.h.s8.bf16 %v626_v2  ;;  %v1317_v9 = vunpack.c.h.s8.bf16 %v593_v7  ;;  %v1378_v12 = vunpack.c.l.s8.bf16 %v626_v2 }
 0x15e   : > { %v1739_v33 = vpop.f32.mrf.mxu1  ;;  %v3691_v35 = vadd.f32 %v1737_v13, %v1697_v29  ;;  %1991 = vmatpush1.bf16.msra.mxu0 %v1337_v10  ;;  %v1381_v10 = vunpack.c.h.s8.bf16 %v625_v8  ;;  %v622_v13 = vld [vmem:[%s3366_s8 + $0xae8] sm:$0xff]  ;;  %v1377_v16 = vunpack.c.l.s8.bf16 %v625_v8  ;;  %v621_v43 = vld [vmem:[%s3366_s8 + $0xae0] sm:$0xff] }
 0x15f   : > { %2032 = vmatpush1.bf16.msra.mxu1 %v1401_v11  ;;  %v1699_v38 = vpop.f32.mrf.mxu0  ;;  %1992 = vmatprep.subr.bf16.mxu0 %v1334_v14  ;;  %v1314_v11 = vunpack.c.l.s8.bf16 %v594_v1  ;;  %v654_v14 = vld [vmem:[%s3366_s8 + $0xbe8] sm:$0xff]  ;;  %v1374_v17 = vunpack.c.h.s8.bf16 %v622_v13  ;;  %v653_v33 = vld [vmem:[%s3366_s8 + $0xbe0] sm:$0xff]  ;;  %v1369_v44 = vunpack.c.l.s8.bf16 %v621_v43 }
 0x160   : > { %v1740_v41 = vpop.f32.mrf.mxu1  ;;  %2033 = vmatprep.subr.bf16.mxu1 %v1398_v15  ;;  %v1313_v15 = vunpack.c.l.s8.bf16 %v593_v7  ;;  %v1438_v29 = vunpack.c.h.s8.bf16 %v654_v14  ;;  %v1370_v38 = vunpack.c.l.s8.bf16 %v622_v13  ;;  %v1433_v45 = vunpack.c.l.s8.bf16 %v653_v33 }
 0x161   : > { %v1434_v41 = vunpack.c.l.s8.bf16 %v654_v14 }
 0x162   : > { %1993 = vmatpush1.bf16.msra.mxu0 %v1333_v36  ;;  %v1373_v36 = vunpack.c.h.s8.bf16 %v621_v43 }
 0x163   : > { %2034 = vmatpush1.bf16.msra.mxu1 %v1397_v49  ;;  %1994 = vmatprep.subr.bf16.mxu0 %v1330_v55  ;;  %v1437_v49 = vunpack.c.h.s8.bf16 %v653_v33  ;;  %v618_v55 = vld [vmem:[%s3366_s8 + $0xac8] sm:$0xff] }
 0x164   : > { %2035 = vmatprep.subr.bf16.mxu1 %v1394_v42  ;;  %v650_v42 = vld [vmem:[%s3366_s8 + $0xbc8] sm:$0xff] }
 0x166   : > { %1995 = vmatpush1.bf16.msra.mxu0 %v1329_v46  ;;  %v1366_v46 = vunpack.c.h.s8.bf16 %v618_v55 }
 0x167   : > { %2036 = vmatpush1.bf16.msra.mxu1 %v1393_v51  ;;  %1996 = vmatprep.subr.bf16.mxu0 %v1326_v52  ;;  %v1430_v51 = vunpack.c.h.s8.bf16 %v650_v42  ;;  %v617_v52 = vld [vmem:[%s3366_s8 + $0xac0] sm:$0xff] }
 0x168   : > { %2037 = vmatprep.subr.bf16.mxu1 %v1390_v53  ;;  %v649_v53 = vld [vmem:[%s3366_s8 + $0xbc0] sm:$0xff]  ;;  %v1365_v54 = vunpack.c.h.s8.bf16 %v617_v52  ;;  %v1361_v1 = vunpack.c.l.s8.bf16 %v617_v52  ;;  %v3723_v52 = vcombine.low %v3666_v63, %v3666_v63 }
 0x169   : > { %v1429_v31 = vunpack.c.h.s8.bf16 %v649_v53  ;;  %v1425_v2 = vunpack.c.l.s8.bf16 %v649_v53  ;;  %v3727_v53 = vcombine.low %v3669_v0, %v3669_v0 }
 0x16a   : > { %1997 = vmatpush1.bf16.msra.mxu0 %v1325_v57  ;;  %v1362_v57 = vunpack.c.l.s8.bf16 %v618_v55 }
 0x16b   : > { %2038 = vmatpush1.bf16.msra.mxu1 %v1389_v58  ;;  %1998 = vmatprep.subr.bf16.mxu0 %v1322_v59  ;;  %v1426_v58 = vunpack.c.l.s8.bf16 %v650_v42  ;;  %v614_v59 = vld [vmem:[%s3366_s8 + $0xaa8] sm:$0xff] }
 0x16c   : > { %2039 = vmatprep.subr.bf16.mxu1 %v1386_v60  ;;  %v646_v60 = vld [vmem:[%s3366_s8 + $0xba8] sm:$0xff] }
 0x16e   : > { %1999 = vmatpush1.bf16.msra.mxu0 %v1321_v3  ;;  %v1358_v3 = vunpack.c.h.s8.bf16 %v614_v59 }
 0x16f   : > { %2040 = vmatpush1.bf16.msra.mxu1 %v1385_v4  ;;  %2000 = vmatprep.subr.bf16.mxu0 %v1318_v5  ;;  %v1422_v4 = vunpack.c.h.s8.bf16 %v646_v60  ;;  %v613_v5 = vld [vmem:[%s3366_s8 + $0xaa0] sm:$0xff] }
 0x170   : > { %2041 = vmatprep.subr.bf16.mxu1 %v1382_v6  ;;  %v645_v6 = vld [vmem:[%s3366_s8 + $0xba0] sm:$0xff]  ;;  %v1357_v7 = vunpack.c.h.s8.bf16 %v613_v5  ;;  %v1353_v13 = vunpack.c.l.s8.bf16 %v613_v5 }
 0x171   : > { %v1421_v8 = vunpack.c.h.s8.bf16 %v645_v6  ;;  %v1417_v14 = vunpack.c.l.s8.bf16 %v645_v6 }
 0x172   : > { %2001 = vmatpush1.bf16.msra.mxu0 %v1317_v9  ;;  %v1354_v9 = vunpack.c.l.s8.bf16 %v614_v59  ;;  %v666_v59 = vld [vmem:[%s3366_s8 + $0xc48] sm:$0xff] }
 0x173   : > { %2042 = vmatpush1.bf16.msra.mxu1 %v1381_v10  ;;  %2002 = vmatprep.subr.bf16.mxu0 %v1314_v11  ;;  %v1418_v10 = vunpack.c.l.s8.bf16 %v646_v60  ;;  %v610_v11 = vld [vmem:[%s3366_s8 + $0xa88] sm:$0xff]  ;;  %v284_v60 = vld [vmem:[%s3366_s8 + $0x58] sm:$0xff]  ;;  %v1462_v6 = vunpack.c.h.s8.bf16 %v666_v59 }
 0x174   : > { %2043 = vmatprep.subr.bf16.mxu1 %v1378_v12  ;;  %v642_v12 = vld [vmem:[%s3366_s8 + $0xb88] sm:$0xff] }
 0x176   : > { %2003 = vmatpush1.bf16.msra.mxu0 %v1313_v15  ;;  %v1350_v15 = vunpack.c.h.s8.bf16 %v610_v11 }
 0x177   : > { %2044 = vmatpush1.bf16.msra.mxu1 %v1377_v16  ;;  %2004 = vmatprep.subr.bf16.mxu0 %v1374_v17  ;;  %v1414_v16 = vunpack.c.h.s8.bf16 %v642_v12  ;;  %v609_v17 = vld [vmem:[%s3366_s8 + $0xa80] sm:$0xff] }
 0x178   : > { %2045 = vmatprep.subr.bf16.mxu1 %v1438_v29  ;;  %v641_v29 = vld [vmem:[%s3366_s8 + $0xb80] sm:$0xff]  ;;  %v1349_v43 = vunpack.c.h.s8.bf16 %v609_v17  ;;  %v1345_v55 = vunpack.c.l.s8.bf16 %v609_v17 }
 0x179   : > { %v1413_v33 = vunpack.c.h.s8.bf16 %v641_v29  ;;  %v1409_v42 = vunpack.c.l.s8.bf16 %v641_v29 }
 0x17a   : > { %2005 = vmatpush2.bf16.msra.mxu0 %v1373_v36  ;;  %v1346_v36 = vunpack.c.l.s8.bf16 %v610_v11 }
 0x17b   : > { %2046 = vmatpush2.bf16.msra.mxu1 %v1437_v49  ;;  %2006 = vmatprep.subr.bf16.mxu0 %v1370_v38  ;;  %v1410_v49 = vunpack.c.l.s8.bf16 %v642_v12  ;;  %v670_v38 = vld [vmem:[%s3366_s8 + $0xc68] sm:$0xff]  ;;  %v3310_v12 = vmov 0  }
 0x17c   : > { %2047 = vmatprep.subr.bf16.mxu1 %v1434_v41  ;;  %v288_v41 = vld [vmem:[%s3366_s8 + $0x78] sm:$0xff] }
 0x17e   : > { %2007 = vmatpush2.bf16.msra.mxu0 %v1369_v44  ;;  %v1470_v44 = vunpack.c.h.s8.bf16 %v670_v38 }
 0x17f   : > { %2048 = vmatpush2.bf16.msra.mxu1 %v1433_v45  ;;  %2008 = vmatprep.subr.bf16.mxu0 %v1366_v46  ;;  %v704_v45 = vunpack.c.h.s8.bf16 %v288_v41  ;;  %v669_v46 = vld [vmem:[%s3366_s8 + $0xc60] sm:$0xff] }
 0x180   : > { %2049 = vmatprep.subr.bf16.mxu1 %v1430_v51  ;;  %v287_v51 = vld [vmem:[%s3366_s8 + $0x70] sm:$0xff]  ;;  %v1465_v0 = vunpack.c.l.s8.bf16 %v669_v46 }
 0x182   : > { %2009 = vmatpush2.bf16.msra.mxu0 %v1365_v54  ;;  %v1469_v54 = vunpack.c.h.s8.bf16 %v669_v46 }
 0x183   : > { %2050 = vmatpush2.bf16.msra.mxu1 %v1429_v31  ;;  %2010 = vmatprep.subr.bf16.mxu0 %v1362_v57  ;;  %v703_v31 = vunpack.c.h.s8.bf16 %v287_v51  ;;  %v1466_v57 = vunpack.c.l.s8.bf16 %v670_v38 }
 0x184   : > { %2051 = vmatprep.subr.bf16.mxu1 %v1426_v58  ;;  %v700_v58 = vunpack.c.l.s8.bf16 %v288_v41 }
 0x186   : > { %2011 = vmatpush2.bf16.msra.mxu0 %v1361_v1 }
 0x187   : > { %2052 = vmatpush2.bf16.msra.mxu1 %v1425_v2  ;;  %2012 = vmatprep.subr.bf16.mxu0 %v1358_v3  ;;  %v699_v3 = vunpack.c.l.s8.bf16 %v287_v51 }
 0x188   : > { %2053 = vmatprep.subr.bf16.mxu1 %v1422_v4 }
 0x18a   : > { %2013 = vmatpush2.bf16.msra.mxu0 %v1357_v7  ;;  %v696_v7 = vunpack.c.h.s8.bf16 %v284_v60 }
 0x18b   : > { %2054 = vmatpush2.bf16.msra.mxu1 %v1421_v8  ;;  %2014 = vmatprep.subr.bf16.mxu0 %v1354_v9  ;;  %v665_v8 = vld [vmem:[%s3366_s8 + $0xc40] sm:$0xff]  ;;  %v283_v9 = vld [vmem:[%s3366_s8 + $0x50] sm:$0xff] }
 0x18c   : > { %2055 = vmatprep.subr.bf16.mxu1 %v1418_v10 }
 0x18e   : > { %2015 = vmatpush2.bf16.msra.mxu0 %v1353_v13 }
 0x18f   : > { %2056 = vmatpush2.bf16.msra.mxu1 %v1417_v14  ;;  %2016 = vmatprep.subr.bf16.mxu0 %v1350_v15  ;;  %v1461_v15 = vunpack.c.h.s8.bf16 %v665_v8 }
 0x190   : > { %2057 = vmatprep.subr.bf16.mxu1 %v1414_v16  ;;  %v695_v16 = vunpack.c.h.s8.bf16 %v283_v9 }
 0x192   : > { %2017 = vmatpush2.bf16.msra.mxu0 %v1349_v43  ;;  %v692_v43 = vunpack.c.l.s8.bf16 %v284_v60 }
 0x193   : > { %2058 = vmatpush2.bf16.msra.mxu1 %v1413_v33  ;;  %2018 = vmatprep.subr.bf16.mxu0 %v1346_v36  ;;  %v662_v33 = vld [vmem:[%s3366_s8 + $0xc28] sm:$0xff]  ;;  %v280_v36 = vld [vmem:[%s3366_s8 + $0x38] sm:$0xff] }
 0x194   : > { %2059 = vmatprep.subr.bf16.mxu1 %v1410_v49  ;;  %v691_v49 = vunpack.c.l.s8.bf16 %v283_v9  ;;  %v1454_v38 = vunpack.c.h.s8.bf16 %v662_v33  ;;  %v688_v41 = vunpack.c.h.s8.bf16 %v280_v36  ;;  %v1450_v46 = vunpack.c.l.s8.bf16 %v662_v33  ;;  %v316_v33 = vld [vmem:[%s3366_s8 + $0x158] sm:$0xff] }
 0x195   : > { %v684_v51 = vunpack.c.l.s8.bf16 %v280_v36 }
 0x196   : > { %2019 = vmatpush2.bf16.msra.mxu0 %v1345_v55  ;;  %v661_v55 = vld [vmem:[%s3366_s8 + $0xc20] sm:$0xff] }
 0x197   : > { %2060 = vmatpush2.bf16.msra.mxu1 %v1409_v42  ;;  %2070 = vmatprep.subr.bf16.mxu0 %v1470_v44  ;;  %v279_v42 = vld [vmem:[%s3366_s8 + $0x30] sm:$0xff]  ;;  %v1453_v44 = vunpack.c.h.s8.bf16 %v661_v55 }
 0x198   : > { %2111 = vmatprep.subr.bf16.mxu1 %v704_v45  ;;  %v687_v45 = vunpack.c.h.s8.bf16 %v279_v42 }
 0x199   : > { %v1776_v1 = vpop.f32.mrf.mxu0  ;;  %2021 = vmatmul.mubr.bf16.vlgmr.msra.gmra.mxu0 %v3723_v52 }
 0x19a   : > { %v1817_v2 = vpop.f32.mrf.mxu1  ;;  %2062 = vmatmul.mubr.bf16.vlgmr.msra.gmra.mxu1 %v3727_v53  ;;  %v1777_v63 = vadd.f32 %v1776_v1, %v3686_v18  ;;  %2071 = vmatpush1.bf16.msra.mxu0 %v1469_v54  ;;  %v658_v54 = vld [vmem:[%s3366_s8 + $0xc08] sm:$0xff]  ;;  %v657_v1 = vld [vmem:[%s3366_s8 + $0xc00] sm:$0xff] }
 0x19b   : > { %2112 = vmatpush1.bf16.msra.mxu1 %v703_v31  ;;  %v1778_v4 = vpop.f32.mrf.mxu0  ;;  %2072 = vmatprep.subr.bf16.mxu0 %v1466_v57  ;;  %v276_v31 = vld [vmem:[%s3366_s8 + $0x18] sm:$0xff]  ;;  %v1449_v57 = vunpack.c.l.s8.bf16 %v661_v55  ;;  %v315_v55 = vld [vmem:[%s3366_s8 + $0x150] sm:$0xff] }
 0x19c   : > { %v1819_v5 = vpop.f32.mrf.mxu1  ;;  %2113 = vmatprep.subr.bf16.mxu1 %v700_v58  ;;  %v3736_v10 = vadd.f32 %v1817_v2, %v1777_v63  ;;  %v1779_v11 = vadd.f32 %v1778_v4, %v3691_v35  ;;  %2102 = vmatprep.mubr.bf16.mxu0 %v3310_v12  ;;  %v1458_v35 = vunpack.c.l.s8.bf16 %v666_v59  ;;  %v683_v58 = vunpack.c.l.s8.bf16 %v279_v42  ;;  %v275_v2 = vld [vmem:[%s3366_s8 + $0x10] sm:$0xff] }
 0x19d   : > { %2143 = vmatprep.mubr.bf16.mxu1 %v3389_v37  ;;  %v1780_v18 = vpop.f32.mrf.mxu0  ;;  %v1457_v37 = vunpack.c.l.s8.bf16 %v665_v8  ;;  %v1446_v59 = vunpack.c.h.s8.bf16 %v658_v54  ;;  %v680_v60 = vunpack.c.h.s8.bf16 %v276_v31  ;;  %v1445_v63 = vunpack.c.h.s8.bf16 %v657_v1 }
 0x19e   : > { %v1821_v13 = vpop.f32.mrf.mxu1  ;;  %v3741_v14 = vadd.f32 %v1819_v5, %v1779_v11  ;;  %2073 = vmatpush1.bf16.msra.mxu0 %v1465_v0  ;;  %v679_v0 = vunpack.c.h.s8.bf16 %v275_v2  ;;  %v676_v4 = vunpack.c.l.s8.bf16 %v276_v31  ;;  %v304_v5 = vld [vmem:[%s3366_s8 + $0xf8] sm:$0xff]  ;;  %v675_v8 = vunpack.c.l.s8.bf16 %v275_v2  ;;  %v303_v18 = vld [vmem:[%s3366_s8 + $0xf0] sm:$0xff] }
 0x19f   : > { %2114 = vmatpush1.bf16.msra.mxu1 %v699_v3  ;;  %v1781_v17 = vpop.f32.mrf.mxu0  ;;  %2074 = vmatprep.subr.bf16.mxu0 %v1462_v6  ;;  %v1442_v3 = vunpack.c.l.s8.bf16 %v658_v54  ;;  %v320_v6 = vld [vmem:[%s3366_s8 + $0x178] sm:$0xff]  ;;  %v736_v9 = vunpack.c.h.s8.bf16 %v304_v5  ;;  %v319_v13 = vld [vmem:[%s3366_s8 + $0x170] sm:$0xff]  ;;  %v731_v36 = vunpack.c.l.s8.bf16 %v303_v18 }
 0x1a0   : > { %v1822_v29 = vpop.f32.mrf.mxu1  ;;  %2115 = vmatprep.subr.bf16.mxu1 %v696_v7  ;;  %v1441_v7 = vunpack.c.l.s8.bf16 %v657_v1  ;;  %v768_v11 = vunpack.c.h.s8.bf16 %v320_v6  ;;  %v767_v17 = vunpack.c.h.s8.bf16 %v319_v13  ;;  %v312_v54 = vld [vmem:[%s3366_s8 + $0x138] sm:$0xff] }
 0x1a1   : > { %v732_v29 = vunpack.c.l.s8.bf16 %v304_v5 }
 0x1a2   : > { %2075 = vmatpush1.bf16.msra.mxu0 %v1461_v15  ;;  %v3263_v15 = vld [vmem:[%s3361_s28 + $0x60] ss:$0 sps:$4 sm:$0xff]  }
 0x1a3   : > { %2116 = vmatpush1.bf16.msra.mxu1 %v695_v16  ;;  %2076 = vmatprep.subr.bf16.mxu0 %v1458_v35  ;;  %v735_v16 = vunpack.c.h.s8.bf16 %v303_v18  ;;  %v764_v35 = vunpack.c.l.s8.bf16 %v320_v6 }
 0x1a4   : > { %2117 = vmatprep.subr.bf16.mxu1 %v692_v43  ;;  %v300_v43 = vld [vmem:[%s3366_s8 + $0xd8] sm:$0xff] }
 0x1a6   : > { %2077 = vmatpush1.bf16.msra.mxu0 %v1457_v37  ;;  %v763_v37 = vunpack.c.l.s8.bf16 %v319_v13 }
 0x1a7   : > { %2118 = vmatpush1.bf16.msra.mxu1 %v691_v49  ;;  %2078 = vmatprep.subr.bf16.mxu0 %v1454_v38  ;;  %v728_v49 = vunpack.c.h.s8.bf16 %v300_v43  ;;  %v760_v38 = vunpack.c.h.s8.bf16 %v316_v33 }
 0x1a8   : > { %2119 = vmatprep.subr.bf16.mxu1 %v688_v41  ;;  %v299_v41 = vld [vmem:[%s3366_s8 + $0xd0] sm:$0xff] }
 0x1a9   : > { %v727_v42 = vunpack.c.h.s8.bf16 %v299_v41  ;;  %v723_v31 = vunpack.c.l.s8.bf16 %v299_v41 }
 0x1aa   : > { %2079 = vmatpush1.bf16.msra.mxu0 %v1453_v44  ;;  %v759_v44 = vunpack.c.h.s8.bf16 %v315_v55 }
 0x1ab   : > { %2120 = vmatpush1.bf16.msra.mxu1 %v687_v45  ;;  %2080 = vmatprep.subr.bf16.mxu0 %v1450_v46  ;;  %v724_v45 = vunpack.c.l.s8.bf16 %v300_v43  ;;  %v756_v46 = vunpack.c.l.s8.bf16 %v316_v33 }
 0x1ac   : > { %2121 = vmatprep.subr.bf16.mxu1 %v684_v51  ;;  %v296_v51 = vld [vmem:[%s3366_s8 + $0xb8] sm:$0xff] }
 0x1ae   : > { %2081 = vmatpush1.bf16.msra.mxu0 %v1449_v57  ;;  %v755_v57 = vunpack.c.l.s8.bf16 %v315_v55 }
 0x1af   : > { %2122 = vmatpush1.bf16.msra.mxu1 %v683_v58  ;;  %2082 = vmatprep.subr.bf16.mxu0 %v1446_v59  ;;  %v752_v58 = vunpack.c.h.s8.bf16 %v312_v54  ;;  %v295_v59 = vld [vmem:[%s3366_s8 + $0xb0] sm:$0xff] }
 0x1b0   : > { %2123 = vmatprep.subr.bf16.mxu1 %v680_v60  ;;  %v311_v60 = vld [vmem:[%s3366_s8 + $0x130] sm:$0xff]  ;;  %v719_v1 = vunpack.c.h.s8.bf16 %v295_v59  ;;  %v715_v5 = vunpack.c.l.s8.bf16 %v295_v59 }
 0x1b1   : > { %v751_v2 = vunpack.c.h.s8.bf16 %v311_v60  ;;  %v747_v6 = vunpack.c.l.s8.bf16 %v311_v60 }
 0x1b2   : > { %2083 = vmatpush1.bf16.msra.mxu0 %v1445_v63  ;;  %v716_v63 = vunpack.c.l.s8.bf16 %v296_v51 }
 0x1b3   : > { %2124 = vmatpush1.bf16.msra.mxu1 %v679_v0  ;;  %2084 = vmatprep.subr.bf16.mxu0 %v1442_v3  ;;  %v748_v0 = vunpack.c.l.s8.bf16 %v312_v54  ;;  %v292_v3 = vld [vmem:[%s3366_s8 + $0x98] sm:$0xff] }
 0x1b4   : > { %2125 = vmatprep.subr.bf16.mxu1 %v676_v4  ;;  %v308_v4 = vld [vmem:[%s3366_s8 + $0x118] sm:$0xff] }
 0x1b6   : > { %2085 = vmatpush1.bf16.msra.mxu0 %v1441_v7  ;;  %v712_v7 = vunpack.c.h.s8.bf16 %v292_v3 }
 0x1b7   : > { %2126 = vmatpush1.bf16.msra.mxu1 %v675_v8  ;;  %2152 = vmatprep.subr.bf16.mxu0 %v768_v11  ;;  %v744_v8 = vunpack.c.h.s8.bf16 %v308_v4  ;;  %v307_v11 = vld [vmem:[%s3366_s8 + $0x110] sm:$0xff] }
 0x1b8   : > { %2127 = vmatprep.subr.bf16.mxu1 %v736_v9  ;;  %v291_v9 = vld [vmem:[%s3366_s8 + $0x90] sm:$0xff]  ;;  %v743_v13 = vunpack.c.h.s8.bf16 %v307_v11  ;;  %v739_v43 = vunpack.c.l.s8.bf16 %v307_v11  ;;  %v344_v11 = vld [vmem:[%s3366_s8 + $0x238] sm:$0xff] }
 0x1b9   : > { %2103 = vmatmul.mubr.bf16.vlgmr.msra.gmra.mxu0 %v3263_v15  ;;  %v711_v18 = vunpack.c.h.s8.bf16 %v291_v9  ;;  %v708_v15 = vunpack.c.l.s8.bf16 %v292_v3 }
 0x1ba   : > { %2153 = vmatpush1.bf16.msra.mxu0 %v767_v17  ;;  %2184 = vmatprep.mubr.bf16.mxu0 %v3395_v40  ;;  %v720_v40 = vunpack.c.h.s8.bf16 %v296_v51  ;;  %v336_v17 = vld [vmem:[%s3366_s8 + $0x1f8] sm:$0xff] }
 0x1bb   : > { %2128 = vmatpush2.bf16.msra.mxu1 %v735_v16  ;;  %2154 = vmatprep.subr.bf16.mxu0 %v764_v35  ;;  %v740_v16 = vunpack.c.l.s8.bf16 %v308_v4  ;;  %v707_v35 = vunpack.c.l.s8.bf16 %v291_v9  ;;  %v800_v33 = vunpack.c.h.s8.bf16 %v336_v17  ;;  %v796_v55 = vunpack.c.l.s8.bf16 %v336_v17  ;;  %v343_v17 = vld [vmem:[%s3366_s8 + $0x230] sm:$0xff] }
 0x1bc   : > { %2129 = vmatprep.subr.bf16.mxu1 %v732_v29  ;;  %v352_v29 = vld [vmem:[%s3366_s8 + $0x278] sm:$0xff] }
 0x1be   : > { %2155 = vmatpush1.bf16.msra.mxu0 %v763_v37  ;;  %v335_v37 = vld [vmem:[%s3366_s8 + $0x1f0] sm:$0xff] }
 0x1bf   : > { %2130 = vmatpush2.bf16.msra.mxu1 %v731_v36  ;;  %2156 = vmatprep.subr.bf16.mxu0 %v760_v38  ;;  %v832_v36 = vunpack.c.h.s8.bf16 %v352_v29  ;;  %v799_v38 = vunpack.c.h.s8.bf16 %v335_v37 }
 0x1c0   : > { %2131 = vmatprep.subr.bf16.mxu1 %v728_v49  ;;  %v351_v49 = vld [vmem:[%s3366_s8 + $0x270] sm:$0xff] }
 0x1c1   : > { %v831_v41 = vunpack.c.h.s8.bf16 %v351_v49 }
 0x1c2   : > { %2157 = vmatpush1.bf16.msra.mxu0 %v759_v44  ;;  %v332_v44 = vld [vmem:[%s3366_s8 + $0x1d8] sm:$0xff] }
 0x1c3   : > { %2132 = vmatpush2.bf16.msra.mxu1 %v727_v42  ;;  %2158 = vmatprep.subr.bf16.mxu0 %v756_v46  ;;  %v828_v42 = vunpack.c.l.s8.bf16 %v352_v29  ;;  %v792_v59 = vunpack.c.h.s8.bf16 %v332_v44 }
 0x1c4   : > { %2133 = vmatprep.subr.bf16.mxu1 %v724_v45  ;;  %v348_v45 = vld [vmem:[%s3366_s8 + $0x258] sm:$0xff] }
 0x1c5   : > { %v824_v60 = vunpack.c.h.s8.bf16 %v348_v45  ;;  %v820_v9 = vunpack.c.l.s8.bf16 %v348_v45 }
 0x1c6   : > { %2159 = vmatpush1.bf16.msra.mxu0 %v755_v57  ;;  %v827_v57 = vunpack.c.l.s8.bf16 %v351_v49 }
 0x1c7   : > { %2134 = vmatpush2.bf16.msra.mxu1 %v723_v31  ;;  %2160 = vmatprep.subr.bf16.mxu0 %v752_v58  ;;  %v795_v31 = vunpack.c.l.s8.bf16 %v335_v37  ;;  %v340_v37 = vld [vmem:[%s3366_s8 + $0x218] sm:$0xff] }
 0x1c8   : > { %2135 = vmatprep.subr.bf16.mxu1 %v720_v40 }
 0x1ca   : > { %2161 = vmatpush1.bf16.msra.mxu0 %v751_v2  ;;  %v347_v2 = vld [vmem:[%s3366_s8 + $0x250] sm:$0xff] }
 0x1cb   : > { %2136 = vmatpush2.bf16.msra.mxu1 %v719_v1  ;;  %2162 = vmatprep.subr.bf16.mxu0 %v748_v0  ;;  %v331_v1 = vld [vmem:[%s3366_s8 + $0x1d0] sm:$0xff] }
 0x1cc   : > { %2137 = vmatprep.subr.bf16.mxu1 %v716_v63  ;;  %v791_v4 = vunpack.c.h.s8.bf16 %v331_v1 }
 0x1ce   : > { %2163 = vmatpush1.bf16.msra.mxu0 %v747_v6 }
 0x1cf   : > { %2138 = vmatpush2.bf16.msra.mxu1 %v715_v5  ;;  %2164 = vmatprep.subr.bf16.mxu0 %v744_v8  ;;  %v823_v5 = vunpack.c.h.s8.bf16 %v347_v2  ;;  %v788_v8 = vunpack.c.l.s8.bf16 %v332_v44  ;;  %v339_v44 = vld [vmem:[%s3366_s8 + $0x210] sm:$0xff] }
 0x1d0   : > { %2139 = vmatprep.subr.bf16.mxu1 %v712_v7 }
 0x1d2   : > { %2165 = vmatpush1.bf16.msra.mxu0 %v743_v13 }
 0x1d3   : > { %2140 = vmatpush2.bf16.msra.mxu1 %v711_v18  ;;  %2166 = vmatprep.subr.bf16.mxu0 %v740_v16  ;;  %v819_v18 = vunpack.c.l.s8.bf16 %v347_v2  ;;  %v327_v16 = vld [vmem:[%s3366_s8 + $0x1b0] sm:$0xff] }
 0x1d4   : > { %2141 = vmatprep.subr.bf16.mxu1 %v708_v15  ;;  %v816_v15 = vunpack.c.h.s8.bf16 %v344_v11  ;;  %v783_v29 = vunpack.c.h.s8.bf16 %v327_v16  ;;  %v779_v49 = vunpack.c.l.s8.bf16 %v327_v16  ;;  %v383_v2 = vld [vmem:[%s3366_s8 + $0x370] sm:$0xff]  ;;  %v360_v16 = vld [vmem:[%s3366_s8 + $0x2b8] sm:$0xff] }
 0x1d6   : > { %2167 = vmatpush1.bf16.msra.mxu0 %v739_v43 }
 0x1d7   : > { %2142 = vmatpush2.bf16.msra.mxu1 %v707_v35  ;;  %2168 = vmatprep.subr.bf16.mxu0 %v800_v33  ;;  %v815_v35 = vunpack.c.h.s8.bf16 %v343_v17  ;;  %v812_v33 = vunpack.c.l.s8.bf16 %v344_v11  ;;  %v363_v11 = vld [vmem:[%s3366_s8 + $0x2d0] sm:$0xff] }
 0x1d8   : > { %2193 = vmatprep.subr.bf16.mxu1 %v832_v36  ;;  %v324_v36 = vld [vmem:[%s3366_s8 + $0x198] sm:$0xff] }
 0x1d9   : > { %v1858_v46 = vpop.f32.mrf.mxu0 }
 0x1da   : > { %v1899_v51 = vpop.f32.mrf.mxu1  ;;  %2144 = vmatmul.mubr.bf16.vlgmr.msra.gmra.mxu1 %v3423_v47  ;;  %v1859_v54 = vadd.f32 %v1858_v46, %v3736_v10  ;;  %2169 = vmatpush2.bf16.msra.mxu0 %v799_v38  ;;  %v811_v38 = vunpack.c.l.s8.bf16 %v343_v17  ;;  %v807_v46 = vunpack.c.h.s8.bf16 %v339_v44  ;;  %v376_v17 = vld [vmem:[%s3366_s8 + $0x338] sm:$0xff] }
 0x1db   : > { %2194 = vmatpush1.bf16.msra.mxu1 %v831_v41  ;;  %v1860_v40 = vpop.f32.mrf.mxu0  ;;  %2170 = vmatprep.subr.bf16.mxu0 %v796_v55  ;;  %v776_v41 = vunpack.c.h.s8.bf16 %v324_v36  ;;  %v808_v55 = vunpack.c.h.s8.bf16 %v340_v37 }
 0x1dc   : > { %v1901_v58 = vpop.f32.mrf.mxu1  ;;  %2195 = vmatprep.subr.bf16.mxu1 %v828_v42  ;;  %v3779_v63 = vadd.f32 %v1899_v51, %v1859_v54  ;;  %v1861_v0 = vadd.f32 %v1860_v40, %v3741_v14  ;;  %2225 = vmatprep.mubr.bf16.mxu1 %v3439_v32  ;;  %v328_v14 = vld [vmem:[%s3366_s8 + $0x1b8] sm:$0xff]  ;;  %v787_v32 = vunpack.c.l.s8.bf16 %v331_v1  ;;  %v323_v42 = vld [vmem:[%s3366_s8 + $0x190] sm:$0xff]  ;;  %v772_v51 = vunpack.c.l.s8.bf16 %v324_v36 }
 0x1dd   : > { %v1862_v47 = vpop.f32.mrf.mxu0  ;;  %v784_v13 = vunpack.c.h.s8.bf16 %v328_v14  ;;  %v780_v43 = vunpack.c.l.s8.bf16 %v328_v14  ;;  %v775_v45 = vunpack.c.h.s8.bf16 %v323_v42  ;;  %v804_v54 = vunpack.c.l.s8.bf16 %v340_v37  ;;  %v367_v1 = vld [vmem:[%s3366_s8 + $0x2f0] sm:$0xff] }
 0x1de   : > { %v1903_v10 = vpop.f32.mrf.mxu1  ;;  %v3783_v3 = vadd.f32 %v1901_v58, %v1861_v0  ;;  %2171 = vmatpush2.bf16.msra.mxu0 %v795_v31  ;;  %v368_v31 = vld [vmem:[%s3366_s8 + $0x2f8] sm:$0xff]  ;;  %v771_v40 = vunpack.c.l.s8.bf16 %v323_v42  ;;  %v803_v58 = vunpack.c.l.s8.bf16 %v339_v44  ;;  %v863_v0 = vunpack.c.h.s8.bf16 %v367_v1  ;;  %v375_v36 = vld [vmem:[%s3366_s8 + $0x330] sm:$0xff] }
 0x1df   : > { %2196 = vmatpush1.bf16.msra.mxu1 %v827_v57  ;;  %v1863_v6 = vpop.f32.mrf.mxu0  ;;  %2172 = vmatprep.subr.bf16.mxu0 %v792_v59  ;;  %v384_v57 = vld [vmem:[%s3366_s8 + $0x378] sm:$0xff]  ;;  %v864_v59 = vunpack.c.h.s8.bf16 %v368_v31  ;;  %v895_v47 = vunpack.c.h.s8.bf16 %v383_v2  ;;  %v860_v10 = vunpack.c.l.s8.bf16 %v368_v31  ;;  %v371_v31 = vld [vmem:[%s3366_s8 + $0x310] sm:$0xff] }
 0x1e0   : > { %v1904_v7 = vpop.f32.mrf.mxu1  ;;  %2197 = vmatprep.subr.bf16.mxu1 %v824_v60  ;;  %v896_v60 = vunpack.c.h.s8.bf16 %v384_v57  ;;  %v380_v6 = vld [vmem:[%s3366_s8 + $0x358] sm:$0xff] }
 0x1e1   : > { %v859_v7 = vunpack.c.l.s8.bf16 %v367_v1  ;;  %v888_v14 = vunpack.c.h.s8.bf16 %v380_v6  ;;  %v372_v42 = vld [vmem:[%s3366_s8 + $0x318] sm:$0xff] }
 0x1e2   : > { %2173 = vmatpush2.bf16.msra.mxu0 %v791_v4  ;;  %v892_v4 = vunpack.c.l.s8.bf16 %v384_v57  ;;  %v416_v1 = vld [vmem:[%s3366_s8 + $0x478] sm:$0xff] }
 0x1e3   : > { %2198 = vmatpush1.bf16.msra.mxu1 %v823_v5  ;;  %2174 = vmatprep.subr.bf16.mxu0 %v788_v8  ;;  %v364_v5 = vld [vmem:[%s3366_s8 + $0x2d8] sm:$0xff]  ;;  %v891_v8 = vunpack.c.l.s8.bf16 %v383_v2 }
 0x1e4   : > { %2199 = vmatprep.subr.bf16.mxu1 %v820_v9  ;;  %v856_v9 = vunpack.c.h.s8.bf16 %v364_v5 }
 0x1e6   : > { %2175 = vmatpush2.bf16.msra.mxu0 %v787_v32  ;;  %v379_v32 = vld [vmem:[%s3366_s8 + $0x350] sm:$0xff] }
 0x1e7   : > { %2200 = vmatpush1.bf16.msra.mxu1 %v819_v18  ;;  %2176 = vmatprep.subr.bf16.mxu0 %v784_v13  ;;  %v855_v18 = vunpack.c.h.s8.bf16 %v363_v11  ;;  %v887_v13 = vunpack.c.h.s8.bf16 %v379_v32 }
 0x1e8   : > { %2201 = vmatprep.subr.bf16.mxu1 %v816_v15  ;;  %v884_v15 = vunpack.c.l.s8.bf16 %v380_v6 }
 0x1ea   : > { %2177 = vmatpush2.bf16.msra.mxu0 %v783_v29  ;;  %v851_v29 = vunpack.c.l.s8.bf16 %v363_v11  ;;  %v412_v11 = vld [vmem:[%s3366_s8 + $0x458] sm:$0xff] }
 0x1eb   : > { %2202 = vmatpush1.bf16.msra.mxu1 %v815_v35  ;;  %2178 = vmatprep.subr.bf16.mxu0 %v780_v43  ;;  %v883_v35 = vunpack.c.l.s8.bf16 %v379_v32  ;;  %v880_v43 = vunpack.c.h.s8.bf16 %v376_v17 }
 0x1ec   : > { %2203 = vmatprep.subr.bf16.mxu1 %v812_v33  ;;  %v359_v33 = vld [vmem:[%s3366_s8 + $0x2b0] sm:$0xff] }
 0x1ed   : > { %v847_v37 = vunpack.c.h.s8.bf16 %v359_v33  ;;  %v843_v44 = vunpack.c.l.s8.bf16 %v359_v33 }
 0x1ee   : > { %2179 = vmatpush2.bf16.msra.mxu0 %v779_v49  ;;  %v879_v49 = vunpack.c.h.s8.bf16 %v375_v36 }
 0x1ef   : > { %2204 = vmatpush1.bf16.msra.mxu1 %v811_v38  ;;  %2180 = vmatprep.subr.bf16.mxu0 %v776_v41  ;;  %v844_v38 = vunpack.c.l.s8.bf16 %v360_v16  ;;  %v876_v41 = vunpack.c.l.s8.bf16 %v376_v17 }
 0x1f0   : > { %2205 = vmatprep.subr.bf16.mxu1 %v808_v55  ;;  %v356_v55 = vld [vmem:[%s3366_s8 + $0x298] sm:$0xff] }
 0x1f2   : > { %2181 = vmatpush2.bf16.msra.mxu0 %v775_v45  ;;  %v875_v45 = vunpack.c.l.s8.bf16 %v375_v36 }
 0x1f3   : > { %2206 = vmatpush1.bf16.msra.mxu1 %v807_v46  ;;  %2182 = vmatprep.subr.bf16.mxu0 %v772_v51  ;;  %v840_v46 = vunpack.c.h.s8.bf16 %v356_v55  ;;  %v872_v51 = vunpack.c.h.s8.bf16 %v372_v42 }
 0x1f4   : > { %2207 = vmatprep.subr.bf16.mxu1 %v804_v54  ;;  %v355_v54 = vld [vmem:[%s3366_s8 + $0x290] sm:$0xff] }
 0x1f5   : > { %v839_v57 = vunpack.c.h.s8.bf16 %v355_v54  ;;  %v835_v2 = vunpack.c.l.s8.bf16 %v355_v54 }
 0x1f6   : > { %2183 = vmatpush2.bf16.msra.mxu0 %v771_v40  ;;  %v871_v40 = vunpack.c.h.s8.bf16 %v371_v31 }
 0x1f7   : > { %2208 = vmatpush1.bf16.msra.mxu1 %v803_v58  ;;  %2234 = vmatprep.subr.bf16.mxu0 %v896_v60  ;;  %v836_v58 = vunpack.c.l.s8.bf16 %v356_v55  ;;  %v400_v60 = vld [vmem:[%s3366_s8 + $0x3f8] sm:$0xff] }
 0x1f8   : > { %2209 = vmatprep.subr.bf16.mxu1 %v864_v59  ;;  %v868_v59 = vunpack.c.l.s8.bf16 %v372_v42 }
 0x1f9   : > { %2185 = vmatmul.mubr.bf16.vlgmr.msra.gmra.mxu0 %v3427_v48  ;;  %v852_v48 = vunpack.c.l.s8.bf16 %v364_v5  ;;  %v415_v5 = vld [vmem:[%s3366_s8 + $0x470] sm:$0xff] }
 0x1fa   : > { %2235 = vmatpush1.bf16.msra.mxu0 %v895_v47  ;;  %2266 = vmatprep.mubr.bf16.mxu0 %v3443_v56  ;;  %v848_v56 = vunpack.c.h.s8.bf16 %v360_v16  ;;  %v928_v47 = vunpack.c.h.s8.bf16 %v400_v60 }
 0x1fb   : > { %2210 = vmatpush2.bf16.msra.mxu1 %v863_v0  ;;  %2236 = vmatprep.subr.bf16.mxu0 %v892_v4  ;;  %v867_v0 = vunpack.c.l.s8.bf16 %v371_v31  ;;  %v399_v4 = vld [vmem:[%s3366_s8 + $0x3f0] sm:$0xff] }
 0x1fc   : > { %2211 = vmatprep.subr.bf16.mxu1 %v860_v10  ;;  %v960_v10 = vunpack.c.h.s8.bf16 %v416_v1  ;;  %v927_v6 = vunpack.c.h.s8.bf16 %v399_v4  ;;  %v391_v31 = vld [vmem:[%s3366_s8 + $0x3b0] sm:$0xff] }
 0x1fe   : > { %2237 = vmatpush1.bf16.msra.mxu0 %v891_v8  ;;  %v924_v8 = vunpack.c.l.s8.bf16 %v400_v60 }
 0x1ff   : > { %2212 = vmatpush2.bf16.msra.mxu1 %v859_v7  ;;  %2238 = vmatprep.subr.bf16.mxu0 %v888_v14  ;;  %v959_v7 = vunpack.c.h.s8.bf16 %v415_v5  ;;  %v396_v14 = vld [vmem:[%s3366_s8 + $0x3d8] sm:$0xff] }
 0x200   : > { %2213 = vmatprep.subr.bf16.mxu1 %v856_v9  ;;  %v956_v9 = vunpack.c.l.s8.bf16 %v416_v1  ;;  %v916_v42 = vunpack.c.l.s8.bf16 %v396_v14  ;;  %v388_v1 = vld [vmem:[%s3366_s8 + $0x398] sm:$0xff] }
 0x202   : > { %2239 = vmatpush1.bf16.msra.mxu0 %v887_v13 }
 0x203   : > { %2214 = vmatpush2.bf16.msra.mxu1 %v855_v18  ;;  %2240 = vmatprep.subr.bf16.mxu0 %v884_v15  ;;  %v955_v15 = vunpack.c.l.s8.bf16 %v415_v5  ;;  %v387_v5 = vld [vmem:[%s3366_s8 + $0x390] sm:$0xff] }
 0x204   : > { %2215 = vmatprep.subr.bf16.mxu1 %v852_v48  ;;  %v923_v48 = vunpack.c.l.s8.bf16 %v399_v4 }
 0x206   : > { %2241 = vmatpush1.bf16.msra.mxu0 %v883_v35  ;;  %v952_v35 = vunpack.c.h.s8.bf16 %v412_v11 }
 0x207   : > { %2216 = vmatpush2.bf16.msra.mxu1 %v851_v29  ;;  %2242 = vmatprep.subr.bf16.mxu0 %v880_v43  ;;  %v920_v29 = vunpack.c.h.s8.bf16 %v396_v14  ;;  %v411_v43 = vld [vmem:[%s3366_s8 + $0x450] sm:$0xff] }
 0x208   : > { %2217 = vmatprep.subr.bf16.mxu1 %v848_v56  ;;  %v395_v56 = vld [vmem:[%s3366_s8 + $0x3d0] sm:$0xff] }
 0x20a   : > { %2243 = vmatpush1.bf16.msra.mxu0 %v879_v49  ;;  %v919_v49 = vunpack.c.h.s8.bf16 %v395_v56 }
 0x20b   : > { %2218 = vmatpush2.bf16.msra.mxu1 %v847_v37  ;;  %2244 = vmatprep.subr.bf16.mxu0 %v876_v41 }
 0x20c   : > { %2219 = vmatprep.subr.bf16.mxu1 %v844_v38  ;;  %v951_v38 = vunpack.c.h.s8.bf16 %v411_v43 }
 0x20e   : > { %2245 = vmatpush1.bf16.msra.mxu0 %v875_v45  ;;  %v408_v45 = vld [vmem:[%s3366_s8 + $0x438] sm:$0xff] }
 0x20f   : > { %2220 = vmatpush2.bf16.msra.mxu1 %v843_v44  ;;  %2246 = vmatprep.subr.bf16.mxu0 %v872_v51  ;;  %v948_v44 = vunpack.c.l.s8.bf16 %v412_v11  ;;  %v944_v54 = vunpack.c.h.s8.bf16 %v408_v45  ;;  %v940_v60 = vunpack.c.l.s8.bf16 %v408_v45  ;;  %v432_v11 = vld [vmem:[%s3366_s8 + $0x4f8] sm:$0xff] }
 0x210   : > { %2221 = vmatprep.subr.bf16.mxu1 %v840_v46  ;;  %v947_v46 = vunpack.c.l.s8.bf16 %v411_v43 }
 0x212   : > { %2247 = vmatpush1.bf16.msra.mxu0 %v871_v40  ;;  %v911_v40 = vunpack.c.h.s8.bf16 %v391_v31 }
 0x213   : > { %2222 = vmatpush2.bf16.msra.mxu1 %v839_v57  ;;  %2248 = vmatprep.subr.bf16.mxu0 %v868_v59  ;;  %v407_v57 = vld [vmem:[%s3366_s8 + $0x430] sm:$0xff] }
 0x214   : > { %2223 = vmatprep.subr.bf16.mxu1 %v836_v58  ;;  %v943_v58 = vunpack.c.h.s8.bf16 %v407_v57 }
 0x216   : > { %2249 = vmatpush1.bf16.msra.mxu0 %v867_v0  ;;  %v907_v0 = vunpack.c.l.s8.bf16 %v391_v31 }
 0x217   : > { %2224 = vmatpush2.bf16.msra.mxu1 %v835_v2  ;;  %2250 = vmatprep.subr.bf16.mxu0 %v928_v47  ;;  %v404_v2 = vld [vmem:[%s3366_s8 + $0x418] sm:$0xff]  ;;  %v939_v47 = vunpack.c.l.s8.bf16 %v407_v57  ;;  %v423_v57 = vld [vmem:[%s3366_s8 + $0x4b0] sm:$0xff] }
 0x218   : > { %2275 = vmatprep.subr.bf16.mxu1 %v960_v10  ;;  %v904_v10 = vunpack.c.h.s8.bf16 %v388_v1  ;;  %v936_v4 = vunpack.c.h.s8.bf16 %v404_v2  ;;  %v932_v14 = vunpack.c.l.s8.bf16 %v404_v2  ;;  %v420_v2 = vld [vmem:[%s3366_s8 + $0x498] sm:$0xff] }
 0x219   : > { %v1940_v32 = vpop.f32.mrf.mxu0 }
 0x21a   : > { %v1981_v18 = vpop.f32.mrf.mxu1  ;;  %2226 = vmatmul.mubr.bf16.vlgmr.msra.gmra.mxu1 %v3481_v27  ;;  %v1941_v13 = vadd.f32 %v1940_v32, %v3779_v63  ;;  %2251 = vmatpush2.bf16.msra.mxu0 %v927_v6  ;;  %v403_v6 = vld [vmem:[%s3366_s8 + $0x410] sm:$0xff]  ;;  %v448_v32 = vld [vmem:[%s3366_s8 + $0x578] sm:$0xff] }
 0x21b   : > { %2276 = vmatpush1.bf16.msra.mxu1 %v959_v7  ;;  %v1942_v16 = vpop.f32.mrf.mxu0  ;;  %2252 = vmatprep.subr.bf16.mxu0 %v924_v8  ;;  %v903_v7 = vunpack.c.h.s8.bf16 %v387_v5  ;;  %v935_v8 = vunpack.c.h.s8.bf16 %v403_v6  ;;  %v1020_v43 = vunpack.c.l.s8.bf16 %v448_v32 }
 0x21c   : > { %v1983_v17 = vpop.f32.mrf.mxu1  ;;  %2277 = vmatprep.subr.bf16.mxu1 %v956_v9  ;;  %v3821_v33 = vadd.f32 %v1981_v18, %v1941_v13  ;;  %v1943_v36 = vadd.f32 %v1942_v16, %v3783_v3  ;;  %2307 = vmatprep.mubr.bf16.mxu1 %v3497_v50  ;;  %v392_v3 = vld [vmem:[%s3366_s8 + $0x3b8] sm:$0xff]  ;;  %v915_v50 = vunpack.c.l.s8.bf16 %v395_v56  ;;  %v900_v9 = vunpack.c.l.s8.bf16 %v388_v1  ;;  %v431_v16 = vld [vmem:[%s3366_s8 + $0x4f0] sm:$0xff] }
 0x21d   : > { %v1944_v27 = vpop.f32.mrf.mxu0  ;;  %v912_v51 = vunpack.c.h.s8.bf16 %v392_v3  ;;  %v908_v59 = vunpack.c.l.s8.bf16 %v392_v3  ;;  %v899_v18 = vunpack.c.l.s8.bf16 %v387_v5  ;;  %v931_v13 = vunpack.c.l.s8.bf16 %v403_v6  ;;  %v419_v6 = vld [vmem:[%s3366_s8 + $0x490] sm:$0xff] }
 0x21e   : > { %v1985_v63 = vpop.f32.mrf.mxu1  ;;  %v3825_v37 = vadd.f32 %v1983_v17, %v1943_v36  ;;  %2253 = vmatpush2.bf16.msra.mxu0 %v923_v48  ;;  %v992_v48 = vunpack.c.h.s8.bf16 %v432_v11  ;;  %v447_v17 = vld [vmem:[%s3366_s8 + $0x570] sm:$0xff]  ;;  %v988_v56 = vunpack.c.l.s8.bf16 %v432_v11  ;;  %v428_v36 = vld [vmem:[%s3366_s8 + $0x4d8] sm:$0xff] }
 0x21f   : > { %2278 = vmatpush1.bf16.msra.mxu1 %v955_v15  ;;  %v1945_v41 = vpop.f32.mrf.mxu0  ;;  %2254 = vmatprep.subr.bf16.mxu0 %v920_v29  ;;  %v1024_v15 = vunpack.c.h.s8.bf16 %v448_v32  ;;  %v991_v29 = vunpack.c.h.s8.bf16 %v431_v16  ;;  %v444_v27 = vld [vmem:[%s3366_s8 + $0x558] sm:$0xff]  ;;  %v987_v63 = vunpack.c.l.s8.bf16 %v431_v16 }
 0x220   : > { %v1986_v55 = vpop.f32.mrf.mxu1  ;;  %2279 = vmatprep.subr.bf16.mxu1 %v952_v35  ;;  %v1023_v35 = vunpack.c.h.s8.bf16 %v447_v17  ;;  %v1016_v41 = vunpack.c.h.s8.bf16 %v444_v27  ;;  %v1012_v45 = vunpack.c.l.s8.bf16 %v444_v27  ;;  %v464_v32 = vld [vmem:[%s3366_s8 + $0x5f8] sm:$0xff] }
 0x221   : > { %v427_v55 = vld [vmem:[%s3366_s8 + $0x4d0] sm:$0xff]  ;;  %v460_v27 = vld [vmem:[%s3366_s8 + $0x5d8] sm:$0xff] }
 0x222   : > { %2255 = vmatpush2.bf16.msra.mxu0 %v919_v49  ;;  %v1019_v49 = vunpack.c.l.s8.bf16 %v447_v17  ;;  %v463_v17 = vld [vmem:[%s3366_s8 + $0x5f0] sm:$0xff] }
 0x223   : > { %2280 = vmatpush1.bf16.msra.mxu1 %v951_v38  ;;  %2256 = vmatprep.subr.bf16.mxu0 %v916_v42  ;;  %v984_v38 = vunpack.c.h.s8.bf16 %v428_v36  ;;  %v443_v42 = vld [vmem:[%s3366_s8 + $0x550] sm:$0xff] }
 0x224   : > { %2281 = vmatprep.subr.bf16.mxu1 %v948_v44  ;;  %v983_v44 = vunpack.c.h.s8.bf16 %v427_v55  ;;  %v1015_v3 = vunpack.c.h.s8.bf16 %v443_v42 }
 0x226   : > { %2257 = vmatpush2.bf16.msra.mxu0 %v915_v50  ;;  %v424_v50 = vld [vmem:[%s3366_s8 + $0x4b8] sm:$0xff] }
 0x227   : > { %2282 = vmatpush1.bf16.msra.mxu1 %v947_v46  ;;  %2258 = vmatprep.subr.bf16.mxu0 %v912_v51  ;;  %v440_v46 = vld [vmem:[%s3366_s8 + $0x538] sm:$0xff]  ;;  %v979_v51 = vunpack.c.l.s8.bf16 %v427_v55 }
 0x228   : > { %2283 = vmatprep.subr.bf16.mxu1 %v944_v54  ;;  %v1011_v54 = vunpack.c.l.s8.bf16 %v443_v42  ;;  %v1008_v31 = vunpack.c.h.s8.bf16 %v440_v46  ;;  %v1004_v1 = vunpack.c.l.s8.bf16 %v440_v46 }
 0x22a   : > { %2259 = vmatpush2.bf16.msra.mxu0 %v911_v40  ;;  %v439_v40 = vld [vmem:[%s3366_s8 + $0x530] sm:$0xff] }
 0x22b   : > { %2284 = vmatpush1.bf16.msra.mxu1 %v943_v58  ;;  %2260 = vmatprep.subr.bf16.mxu0 %v908_v59  ;;  %v975_v58 = vunpack.c.h.s8.bf16 %v423_v57  ;;  %v1007_v59 = vunpack.c.h.s8.bf16 %v439_v40 }
 0x22c   : > { %2285 = vmatprep.subr.bf16.mxu1 %v940_v60  ;;  %v972_v60 = vunpack.c.l.s8.bf16 %v424_v50 }
 0x22e   : > { %2261 = vmatpush2.bf16.msra.mxu0 %v907_v0  ;;  %v436_v0 = vld [vmem:[%s3366_s8 + $0x518] sm:$0xff] }
 0x22f   : > { %2286 = vmatpush1.bf16.msra.mxu1 %v939_v47  ;;  %2262 = vmatprep.subr.bf16.mxu0 %v904_v10  ;;  %v971_v47 = vunpack.c.l.s8.bf16 %v423_v57  ;;  %v1003_v10 = vunpack.c.l.s8.bf16 %v439_v40  ;;  %v1000_v5 = vunpack.c.h.s8.bf16 %v436_v0  ;;  %v996_v11 = vunpack.c.l.s8.bf16 %v436_v0  ;;  %v455_v0 = vld [vmem:[%s3366_s8 + $0x5b0] sm:$0xff] }
 0x230   : > { %2287 = vmatprep.subr.bf16.mxu1 %v936_v4  ;;  %v968_v4 = vunpack.c.h.s8.bf16 %v420_v2  ;;  %v1044_v57 = vunpack.c.l.s8.bf16 %v460_v27 }
 0x232   : > { %2263 = vmatpush2.bf16.msra.mxu0 %v903_v7  ;;  %v435_v7 = vld [vmem:[%s3366_s8 + $0x510] sm:$0xff] }
 0x233   : > { %2288 = vmatpush1.bf16.msra.mxu1 %v935_v8  ;;  %2264 = vmatprep.subr.bf16.mxu0 %v900_v9  ;;  %v967_v8 = vunpack.c.h.s8.bf16 %v419_v6  ;;  %v999_v9 = vunpack.c.h.s8.bf16 %v435_v7 }
 0x234   : > { %2289 = vmatprep.subr.bf16.mxu1 %v932_v14  ;;  %v964_v14 = vunpack.c.l.s8.bf16 %v420_v2 }
 0x236   : > { %2265 = vmatpush2.bf16.msra.mxu0 %v899_v18  ;;  %v480_v18 = vld [vmem:[%s3366_s8 + $0x678] sm:$0xff] }
 0x237   : > { %2290 = vmatpush1.bf16.msra.mxu1 %v931_v13  ;;  %2316 = vmatprep.subr.bf16.mxu0 %v1024_v15  ;;  %v963_v13 = vunpack.c.l.s8.bf16 %v419_v6  ;;  %v1056_v15 = vunpack.c.h.s8.bf16 %v464_v32  ;;  %v1088_v16 = vunpack.c.h.s8.bf16 %v480_v18 }
 0x238   : > { %2291 = vmatprep.subr.bf16.mxu1 %v992_v48  ;;  %v995_v48 = vunpack.c.l.s8.bf16 %v435_v7  ;;  %v452_v7 = vld [vmem:[%s3366_s8 + $0x598] sm:$0xff] }
 0x239   : > { %2267 = vmatmul.mubr.bf16.vlgmr.msra.gmra.mxu0 %v3485_v28  ;;  %v980_v28 = vunpack.c.l.s8.bf16 %v428_v36  ;;  %v1084_v36 = vunpack.c.l.s8.bf16 %v480_v18  ;;  %v451_v18 = vld [vmem:[%s3366_s8 + $0x590] sm:$0xff] }
 0x23a   : > { %2317 = vmatpush1.bf16.msra.mxu0 %v1023_v35  ;;  %2348 = vmatprep.mubr.bf16.mxu0 %v3501_v39  ;;  %v976_v39 = vunpack.c.h.s8.bf16 %v424_v50  ;;  %v1055_v35 = vunpack.c.h.s8.bf16 %v463_v17  ;;  %v475_v50 = vld [vmem:[%s3366_s8 + $0x650] sm:$0xff] }
 0x23b   : > { %2292 = vmatpush2.bf16.msra.mxu1 %v991_v29  ;;  %2318 = vmatprep.subr.bf16.mxu0 %v1020_v43  ;;  %v479_v29 = vld [vmem:[%s3366_s8 + $0x670] sm:$0xff]  ;;  %v1052_v43 = vunpack.c.l.s8.bf16 %v464_v32 }
 0x23c   : > { %2293 = vmatprep.subr.bf16.mxu1 %v988_v56  ;;  %v1087_v56 = vunpack.c.h.s8.bf16 %v479_v29  ;;  %v1083_v55 = vunpack.c.l.s8.bf16 %v479_v29  ;;  %v496_v29 = vld [vmem:[%s3366_s8 + $0x6f8] sm:$0xff] }
 0x23e   : > { %2319 = vmatpush1.bf16.msra.mxu0 %v1019_v49 }
 0x23f   : > { %2294 = vmatpush2.bf16.msra.mxu1 %v987_v63  ;;  %2320 = vmatprep.subr.bf16.mxu0 %v1016_v41  ;;  %v476_v63 = vld [vmem:[%s3366_s8 + $0x658] sm:$0xff]  ;;  %v1051_v41 = vunpack.c.l.s8.bf16 %v463_v17 }
 0x240   : > { %2295 = vmatprep.subr.bf16.mxu1 %v984_v38  ;;  %v1076_v40 = vunpack.c.l.s8.bf16 %v476_v63 }
 0x242   : > { %2321 = vmatpush1.bf16.msra.mxu0 %v1015_v3  ;;  %v1048_v3 = vunpack.c.h.s8.bf16 %v460_v27 }
 0x243   : > { %2296 = vmatpush2.bf16.msra.mxu1 %v983_v44  ;;  %2322 = vmatprep.subr.bf16.mxu0 %v1012_v45  ;;  %v459_v45 = vld [vmem:[%s3366_s8 + $0x5d0] sm:$0xff] }
 0x244   : > { %2297 = vmatprep.subr.bf16.mxu1 %v980_v28  ;;  %v1080_v28 = vunpack.c.h.s8.bf16 %v476_v63  ;;  %v495_v63 = vld [vmem:[%s3366_s8 + $0x6f0] sm:$0xff] }
 0x246   : > { %2323 = vmatpush1.bf16.msra.mxu0 %v1011_v54  ;;  %v1079_v54 = vunpack.c.h.s8.bf16 %v475_v50 }
 0x247   : > { %2298 = vmatpush2.bf16.msra.mxu1 %v979_v51  ;;  %2324 = vmatprep.subr.bf16.mxu0 %v1008_v31  ;;  %v1047_v51 = vunpack.c.h.s8.bf16 %v459_v45 }
 0x248   : > { %2299 = vmatprep.subr.bf16.mxu1 %v976_v39 }
 0x24a   : > { %2325 = vmatpush1.bf16.msra.mxu0 %v1007_v59  ;;  %v472_v59 = vld [vmem:[%s3366_s8 + $0x638] sm:$0xff] }
 0x24b   : > { %2300 = vmatpush2.bf16.msra.mxu1 %v975_v58  ;;  %2326 = vmatprep.subr.bf16.mxu0 %v1004_v1  ;;  %v456_v58 = vld [vmem:[%s3366_s8 + $0x5b8] sm:$0xff]  ;;  %v1072_v2 = vunpack.c.h.s8.bf16 %v472_v59  ;;  %v1068_v6 = vunpack.c.l.s8.bf16 %v472_v59  ;;  %v491_v59 = vld [vmem:[%s3366_s8 + $0x6d0] sm:$0xff] }
 0x24c   : > { %2301 = vmatprep.subr.bf16.mxu1 %v972_v60  ;;  %v1043_v60 = vunpack.c.l.s8.bf16 %v459_v45  ;;  %v1040_v1 = vunpack.c.h.s8.bf16 %v456_v58 }
 0x24e   : > { %2327 = vmatpush1.bf16.msra.mxu0 %v1003_v10  ;;  %v1039_v10 = vunpack.c.h.s8.bf16 %v455_v0 }
 0x24f   : > { %2302 = vmatpush2.bf16.msra.mxu1 %v971_v47  ;;  %2328 = vmatprep.subr.bf16.mxu0 %v1000_v5  ;;  %v471_v47 = vld [vmem:[%s3366_s8 + $0x630] sm:$0xff]  ;;  %v1036_v5 = vunpack.c.l.s8.bf16 %v456_v58 }
 0x250   : > { %2303 = vmatprep.subr.bf16.mxu1 %v968_v4  ;;  %v1071_v4 = vunpack.c.h.s8.bf16 %v471_v47 }
 0x252   : > { %2329 = vmatpush1.bf16.msra.mxu0 %v999_v9  ;;  %v1035_v9 = vunpack.c.l.s8.bf16 %v455_v0 }
 0x253   : > { %2304 = vmatpush2.bf16.msra.mxu1 %v967_v8  ;;  %2330 = vmatprep.subr.bf16.mxu0 %v996_v11  ;;  %v468_v8 = vld [vmem:[%s3366_s8 + $0x618] sm:$0xff]  ;;  %v1032_v11 = vunpack.c.h.s8.bf16 %v452_v7 }
 0x254   : > { %2305 = vmatprep.subr.bf16.mxu1 %v964_v14  ;;  %v1067_v14 = vunpack.c.l.s8.bf16 %v471_v47  ;;  %v1064_v32 = vunpack.c.h.s8.bf16 %v468_v8  ;;  %v1060_v17 = vunpack.c.l.s8.bf16 %v468_v8 }
 0x256   : > { %2331 = vmatpush1.bf16.msra.mxu0 %v995_v48  ;;  %v1031_v48 = vunpack.c.h.s8.bf16 %v451_v18 }
 0x257   : > { %2306 = vmatpush2.bf16.msra.mxu1 %v963_v13  ;;  %2332 = vmatprep.subr.bf16.mxu0 %v1056_v15  ;;  %v467_v13 = vld [vmem:[%s3366_s8 + $0x610] sm:$0xff] }
 0x258   : > { %2357 = vmatprep.subr.bf16.mxu1 %v1088_v16  ;;  %v1063_v15 = vunpack.c.h.s8.bf16 %v467_v13  ;;  %v1028_v16 = vunpack.c.l.s8.bf16 %v452_v7 }
 0x259   : > { %v3859_v49 = vpop.f32.mrf.mxu0 }
 0x25a   : > { %v3861_v38 = vpop.f32.mrf.mxu1  ;;  %2308 = vmatmul.mubr.bf16.vlgmr.msra.gmra.mxu1 %v3539_v19  ;;  %2333 = vmatpush2.bf16.msra.mxu0 %v1055_v35  ;;  %v512_v35 = vld [vmem:[%s3366_s8 + $0x778] sm:$0xff] }
 0x25b   : > { %2358 = vmatpush1.bf16.msra.mxu1 %v1087_v56  ;;  %v3864_v42 = vpop.f32.mrf.mxu0  ;;  %2334 = vmatprep.subr.bf16.mxu0 %v1052_v43  ;;  %v1027_v56 = vunpack.c.l.s8.bf16 %v451_v18  ;;  %v1059_v43 = vunpack.c.l.s8.bf16 %v467_v13  ;;  %v1152_v27 = vunpack.c.h.s8.bf16 %v512_v35 }
 0x25c   : > { %v3866_v44 = vpop.f32.mrf.mxu1  ;;  %2359 = vmatprep.subr.bf16.mxu1 %v1084_v36  ;;  %2389 = vmatprep.mubr.bf16.mxu1 %v3555_v30  ;;  %v1075_v30 = vunpack.c.l.s8.bf16 %v475_v50  ;;  %v1120_v36 = vunpack.c.h.s8.bf16 %v496_v29  ;;  %v1116_v50 = vunpack.c.l.s8.bf16 %v496_v29 }
 0x25d   : > { %v2026_v46 = vpop.f32.mrf.mxu0 }
 0x25e   : > { %v2067_v19 = vpop.f32.mrf.mxu1  ;;  %2335 = vmatpush2.bf16.msra.mxu0 %v1051_v41  ;;  %v511_v41 = vld [vmem:[%s3366_s8 + $0x770] sm:$0xff]  ;;  %v1148_v46 = vunpack.c.l.s8.bf16 %v512_v35 }
 0x25f   : > { %2360 = vmatpush1.bf16.msra.mxu1 %v1083_v55  ;;  %v2027_v39 = vpop.f32.mrf.mxu0  ;;  %2336 = vmatprep.subr.bf16.mxu0 %v1048_v3  ;;  %v2023_v55 = vadd.f32 %v3859_v49, %v3821_v33  ;;  %v2025_v3 = vadd.f32 %v3864_v42, %v3825_v37  ;;  %v1151_v45 = vunpack.c.h.s8.bf16 %v511_v41  ;;  %v1115_v49 = vunpack.c.l.s8.bf16 %v495_v63 }
 0x260   : > { %v2068_v31 = vpop.f32.mrf.mxu1  ;;  %2361 = vmatprep.subr.bf16.mxu1 %v1080_v28  ;;  %v1119_v28 = vunpack.c.h.s8.bf16 %v495_v63  ;;  %v1473_v39 = vld [vmem:[#allocation2 + $0x10] sm:$0xff]  ;;  %v1147_v42 = vunpack.c.l.s8.bf16 %v511_v41 }
 0x261   : > { %v2064_v19 = vadd.f32 %v3861_v38, %v2023_v55  ;;  %v2066_v33 = vadd.f32 %v3866_v44, %v2025_v3  ;;  %v528_v3 = vld [vmem:[%s3366_s8 + $0x7f8] sm:$0xff] }
 0x262   : > { %2337 = vmatpush2.bf16.msra.mxu0 %v1047_v51  ;;  %v492_v51 = vld [vmem:[%s3366_s8 + $0x6d8] sm:$0xff] }
 0x263   : > { %2362 = vmatpush1.bf16.msra.mxu1 %v1079_v54  ;;  %2338 = vmatprep.subr.bf16.mxu0 %v1044_v57  ;;  %v508_v54 = vld [vmem:[%s3366_s8 + $0x758] sm:$0xff]  ;;  %v1474_v57 = vld [vmem:[#allocation2] sm:$0xff]  ;;  %v1112_v38 = vunpack.c.h.s8.bf16 %v492_v51 }
 0x264   : > { %2363 = vmatprep.subr.bf16.mxu1 %v1076_v40  ;;  %v1144_v58 = vunpack.c.h.s8.bf16 %v508_v54 }
 0x266   : > { %2339 = vmatpush2.bf16.msra.mxu0 %v1043_v60  ;;  %v507_v60 = vld [vmem:[%s3366_s8 + $0x750] sm:$0xff] }
 0x267   : > { %2364 = vmatpush1.bf16.msra.mxu1 %v1075_v30  ;;  %2340 = vmatprep.subr.bf16.mxu0 %v1040_v1  ;;  %v1143_v0 = vunpack.c.h.s8.bf16 %v507_v60  ;;  %v1139_v7 = vunpack.c.l.s8.bf16 %v507_v60 }
 0x268   : > { %2365 = vmatprep.subr.bf16.mxu1 %v1072_v2  ;;  %v1111_v2 = vunpack.c.h.s8.bf16 %v491_v59 }
 0x26a   : > { %2341 = vmatpush2.bf16.msra.mxu0 %v1039_v10  ;;  %v1108_v10 = vunpack.c.l.s8.bf16 %v492_v51  ;;  %v527_v51 = vld [vmem:[%s3366_s8 + $0x7f0] sm:$0xff] }
 0x26b   : > { %2366 = vmatpush1.bf16.msra.mxu1 %v1071_v4  ;;  %2342 = vmatprep.subr.bf16.mxu0 %v1036_v5  ;;  %v1140_v4 = vunpack.c.l.s8.bf16 %v508_v54  ;;  %v488_v5 = vld [vmem:[%s3366_s8 + $0x6b8] sm:$0xff]  ;;  %v543_v54 = vld [vmem:[%s3366_s8 + $0x870] sm:$0xff] }
 0x26c   : > { %2367 = vmatprep.subr.bf16.mxu1 %v1068_v6  ;;  %v504_v6 = vld [vmem:[%s3366_s8 + $0x738] sm:$0xff]  ;;  %v1104_v8 = vunpack.c.h.s8.bf16 %v488_v5  ;;  %v1100_v13 = vunpack.c.l.s8.bf16 %v488_v5 }
 0x26e   : > { %2343 = vmatpush2.bf16.msra.mxu0 %v1035_v9  ;;  %v1136_v9 = vunpack.c.h.s8.bf16 %v504_v6 }
 0x26f   : > { %2368 = vmatpush1.bf16.msra.mxu1 %v1067_v14  ;;  %2344 = vmatprep.subr.bf16.mxu0 %v1032_v11  ;;  %v487_v14 = vld [vmem:[%s3366_s8 + $0x6b0] sm:$0xff] }
 0x270   : > { %2369 = vmatprep.subr.bf16.mxu1 %v1064_v32  ;;  %v503_v11 = vld [vmem:[%s3366_s8 + $0x730] sm:$0xff]  ;;  %v1103_v32 = vunpack.c.h.s8.bf16 %v487_v14 }
 0x271   : > { %v1135_v18 = vunpack.c.h.s8.bf16 %v503_v11  ;;  %v1131_v29 = vunpack.c.l.s8.bf16 %v503_v11 }
 0x272   : > { %2345 = vmatpush2.bf16.msra.mxu0 %v1031_v48  ;;  %v1132_v48 = vunpack.c.l.s8.bf16 %v504_v6 }
 0x273   : > { %2370 = vmatpush1.bf16.msra.mxu1 %v1063_v15  ;;  %2346 = vmatprep.subr.bf16.mxu0 %v1028_v16  ;;  %v484_v15 = vld [vmem:[%s3366_s8 + $0x698] sm:$0xff] }
 0x274   : > { %2371 = vmatprep.subr.bf16.mxu1 %v1060_v17  ;;  %v500_v16 = vld [vmem:[%s3366_s8 + $0x718] sm:$0xff]  ;;  %v1099_v17 = vunpack.c.l.s8.bf16 %v487_v14  ;;  %v1096_v35 = vunpack.c.h.s8.bf16 %v484_v15  ;;  %v1092_v41 = vunpack.c.l.s8.bf16 %v484_v15 }
 0x275   : > { %v1124_v55 = vunpack.c.l.s8.bf16 %v500_v16 }
 0x276   : > { %2347 = vmatpush2.bf16.msra.mxu0 %v1027_v56  ;;  %v1128_v56 = vunpack.c.h.s8.bf16 %v500_v16 }
 0x277   : > { %2372 = vmatpush1.bf16.msra.mxu1 %v1059_v43  ;;  %2398 = vmatprep.subr.bf16.mxu0 %v1152_v27  ;;  %v483_v43 = vld [vmem:[%s3366_s8 + $0x690] sm:$0xff] }
 0x278   : > { %2373 = vmatprep.subr.bf16.mxu1 %v1120_v36  ;;  %v499_v36 = vld [vmem:[%s3366_s8 + $0x710] sm:$0xff]  ;;  %v1095_v27 = vunpack.c.h.s8.bf16 %v483_v43 }
 0x279   : > { %v2104_v31 = vpop.f32.mrf.mxu0  ;;  %2349 = vmatmul.mubr.bf16.vlgmr.msra.gmra.mxu0 %v3543_v20  ;;  %v1127_v63 = vunpack.c.h.s8.bf16 %v499_v36 }
 0x27a   : > { %v2105_v37 = vadd.f32 %v2104_v31, %v2064_v19  ;;  %2399 = vmatpush1.bf16.msra.mxu0 %v1151_v45  ;;  %2430 = vmatprep.mubr.bf16.mxu0 %v3559_v34  ;;  %v1107_v34 = vunpack.c.l.s8.bf16 %v491_v59  ;;  %v1091_v45 = vunpack.c.l.s8.bf16 %v483_v43  ;;  %v1215_v31 = vunpack.c.h.s8.bf16 %v543_v54 }
 0x27b   : > { %2374 = vmatpush2.bf16.msra.mxu1 %v1119_v28  ;;  %v2106_v40 = vpop.f32.mrf.mxu0  ;;  %2400 = vmatprep.subr.bf16.mxu0 %v1148_v46  ;;  %v544_v28 = vld [vmem:[%s3366_s8 + $0x878] sm:$0xff]  ;;  %v1184_v46 = vunpack.c.h.s8.bf16 %v528_v3 }
 0x27c   : > { %2375 = vmatprep.subr.bf16.mxu1 %v1116_v50  ;;  %v2644_v30 = vadd.f32 %v2105_v37, %v1473_v39  ;;  %v2107_v1 = vadd.f32 %v2106_v40, %v2066_v33  ;;  %v1123_v50 = vunpack.c.l.s8.bf16 %v499_v36  ;;  %v1216_v19 = vunpack.c.h.s8.bf16 %v544_v28 }
 0x27d   : > { %v2108_v20 = vpop.f32.mrf.mxu0  ;;  %v1183_v39 = vunpack.c.h.s8.bf16 %v527_v51  ;;  %v1180_v33 = vunpack.c.l.s8.bf16 %v528_v3  ;;  %v1212_v37 = vunpack.c.l.s8.bf16 %v544_v28  ;;  %v1179_v40 = vunpack.c.l.s8.bf16 %v527_v51 }
 0x27e   : > { %2648 = vst [vmem:[#allocation2 + $0x10] sm:$0xff] %v2644_v30  ;;  %v2645_v44 = vadd.f32 %v2107_v1, %v1474_v57  ;;  %2401 = vmatpush1.bf16.msra.mxu0 %v1147_v42  ;;  %v540_v42 = vld [vmem:[%s3366_s8 + $0x858] sm:$0xff]  ;;  %v523_v30 = vld [vmem:[%s3366_s8 + $0x7d0] sm:$0xff] }
 0x27f   : > { %2376 = vmatpush2.bf16.msra.mxu1 %v1115_v49  ;;  %v2109_v47 = vpop.f32.mrf.mxu0  ;;  %2402 = vmatprep.subr.bf16.mxu0 %v1144_v58  ;;  %v524_v49 = vld [vmem:[%s3366_s8 + $0x7d8] sm:$0xff]  ;;  %v1208_v60 = vunpack.c.h.s8.bf16 %v540_v42  ;;  %v539_v1 = vld [vmem:[%s3366_s8 + $0x850] sm:$0xff]  ;;  %v1171_v5 = vunpack.c.l.s8.bf16 %v523_v30 }
 0x280   : > { %2377 = vmatprep.subr.bf16.mxu1 %v1112_v38  ;;  %2649 = vst [vmem:[#allocation2] sm:$0xff] %v2645_v44  ;;  %v1211_v38 = vunpack.c.l.s8.bf16 %v543_v54  ;;  %v1176_v59 = vunpack.c.h.s8.bf16 %v524_v49  ;;  %v1207_v44 = vunpack.c.h.s8.bf16 %v539_v1  ;;  %v1204_v47 = vunpack.c.l.s8.bf16 %v540_v42 }
 0x281   : > { %v1203_v6 = vunpack.c.l.s8.bf16 %v539_v1  ;;  %v571_v1 = vld [vmem:[%s3366_s8 + $0x950] sm:$0xff] }
 0x282   : > { %2403 = vmatpush1.bf16.msra.mxu0 %v1143_v0  ;;  %v1172_v0 = vunpack.c.l.s8.bf16 %v524_v49 }
 0x283   : > { %2378 = vmatpush2.bf16.msra.mxu1 %v1111_v2  ;;  %2404 = vmatprep.subr.bf16.mxu0 %v1140_v4  ;;  %v536_v4 = vld [vmem:[%s3366_s8 + $0x838] sm:$0xff] }
 0x284   : > { %2379 = vmatprep.subr.bf16.mxu1 %v1108_v10  ;;  %v520_v10 = vld [vmem:[%s3366_s8 + $0x7b8] sm:$0xff] }
 0x285   : > { %v1164_v11 = vunpack.c.l.s8.bf16 %v520_v10 }
 0x286   : > { %2405 = vmatpush1.bf16.msra.mxu0 %v1139_v7  ;;  %v519_v7 = vld [vmem:[%s3366_s8 + $0x7b0] sm:$0xff] }
 0x287   : > { %2380 = vmatpush2.bf16.msra.mxu1 %v1107_v34  ;;  %2406 = vmatprep.subr.bf16.mxu0 %v1136_v9  ;;  %v1200_v34 = vunpack.c.h.s8.bf16 %v536_v4  ;;  %v1167_v9 = vunpack.c.h.s8.bf16 %v519_v7 }
 0x288   : > { %2381 = vmatprep.subr.bf16.mxu1 %v1104_v8  ;;  %v535_v8 = vld [vmem:[%s3366_s8 + $0x830] sm:$0xff] }
 0x289   : > { %v1199_v14 = vunpack.c.h.s8.bf16 %v535_v8  ;;  %v1195_v15 = vunpack.c.l.s8.bf16 %v535_v8 }
 0x28a   : > { %2407 = vmatpush1.bf16.msra.mxu0 %v1135_v18  ;;  %v516_v18 = vld [vmem:[%s3366_s8 + $0x798] sm:$0xff] }
 0x28b   : > { %2382 = vmatpush2.bf16.msra.mxu1 %v1103_v32  ;;  %2408 = vmatprep.subr.bf16.mxu0 %v1132_v48  ;;  %v1196_v32 = vunpack.c.l.s8.bf16 %v536_v4  ;;  %v1163_v48 = vunpack.c.l.s8.bf16 %v519_v7  ;;  %v1160_v16 = vunpack.c.h.s8.bf16 %v516_v18  ;;  %v1156_v36 = vunpack.c.l.s8.bf16 %v516_v18 }
 0x28c   : > { %2383 = vmatprep.subr.bf16.mxu1 %v1100_v13  ;;  %v532_v13 = vld [vmem:[%s3366_s8 + $0x818] sm:$0xff]  ;;  %v1267_v4 = vunpack.c.l.s8.bf16 %v571_v1 }
 0x28e   : > { %2409 = vmatpush1.bf16.msra.mxu0 %v1131_v29  ;;  %v515_v29 = vld [vmem:[%s3366_s8 + $0x790] sm:$0xff] }
 0x28f   : > { %2384 = vmatpush2.bf16.msra.mxu1 %v1099_v17  ;;  %2410 = vmatprep.subr.bf16.mxu0 %v1128_v56  ;;  %v1192_v17 = vunpack.c.h.s8.bf16 %v532_v13  ;;  %v1159_v56 = vunpack.c.h.s8.bf16 %v515_v29 }
 0x290   : > { %2385 = vmatprep.subr.bf16.mxu1 %v1096_v35  ;;  %v531_v35 = vld [vmem:[%s3366_s8 + $0x810] sm:$0xff] }
 0x291   : > { %v1191_v43 = vunpack.c.h.s8.bf16 %v531_v35  ;;  %v1187_v3 = vunpack.c.l.s8.bf16 %v531_v35 }
 0x292   : > { %2411 = vmatpush1.bf16.msra.mxu0 %v1127_v63  ;;  %v560_v63 = vld [vmem:[%s3366_s8 + $0x8f8] sm:$0xff] }
 0x293   : > { %2386 = vmatpush2.bf16.msra.mxu1 %v1095_v27  ;;  %2412 = vmatprep.subr.bf16.mxu0 %v1124_v55  ;;  %v1188_v27 = vunpack.c.l.s8.bf16 %v532_v13  ;;  %v1155_v55 = vunpack.c.l.s8.bf16 %v515_v29  ;;  %v1248_v28 = vunpack.c.h.s8.bf16 %v560_v63  ;;  %v1244_v54 = vunpack.c.l.s8.bf16 %v560_v63 }
 0x294   : > { %2387 = vmatprep.subr.bf16.mxu1 %v1092_v41  ;;  %v576_v41 = vld [vmem:[%s3366_s8 + $0x978] sm:$0xff] }
 0x296   : > { %2413 = vmatpush1.bf16.msra.mxu0 %v1123_v50  ;;  %v559_v50 = vld [vmem:[%s3366_s8 + $0x8f0] sm:$0xff] }
 0x297   : > { %2388 = vmatpush2.bf16.msra.mxu1 %v1091_v45  ;;  %2414 = vmatprep.subr.bf16.mxu0 %v1184_v46  ;;  %v1280_v45 = vunpack.c.h.s8.bf16 %v576_v41  ;;  %v575_v46 = vld [vmem:[%s3366_s8 + $0x970] sm:$0xff]  ;;  %v1243_v42 = vunpack.c.l.s8.bf16 %v559_v50 }
 0x298   : > { %2439 = vmatprep.subr.bf16.mxu1 %v1216_v19  ;;  %v1247_v19 = vunpack.c.h.s8.bf16 %v559_v50  ;;  %v1279_v51 = vunpack.c.h.s8.bf16 %v575_v46 }
 0x29a   : > { %v3909_v57 = vpop.f32.mrf.mxu1  ;;  %2390 = vmatmul.mubr.bf16.vlgmr.msra.gmra.mxu1 %v3597_v23  ;;  %2415 = vmatpush2.bf16.msra.mxu0 %v1183_v39  ;;  %v1175_v23 = vunpack.c.h.s8.bf16 %v523_v30  ;;  %v1276_v39 = vunpack.c.l.s8.bf16 %v576_v41  ;;  %v555_v30 = vld [vmem:[%s3366_s8 + $0x8d0] sm:$0xff] }
 0x29b   : > { %2440 = vmatpush1.bf16.msra.mxu1 %v1215_v31  ;;  %2416 = vmatprep.subr.bf16.mxu0 %v1180_v33  ;;  %v556_v31 = vld [vmem:[%s3366_s8 + $0x8d8] sm:$0xff] }
 0x29c   : > { %v3912_v58 = vpop.f32.mrf.mxu1  ;;  %2441 = vmatprep.subr.bf16.mxu1 %v1212_v37  ;;  %2471 = vmatprep.mubr.bf16.mxu1 %v3613_v21  ;;  %v1168_v21 = vunpack.c.h.s8.bf16 %v520_v10  ;;  %v572_v33 = vld [vmem:[%s3366_s8 + $0x958] sm:$0xff] }
 0x29d   : > { %v568_v10 = vld [vmem:[%s3366_s8 + $0x938] sm:$0xff] }
 0x29e   : > { %v2149_v20 = vpop.f32.mrf.mxu1  ;;  %2417 = vmatpush2.bf16.msra.mxu0 %v1179_v40  ;;  %v1275_v40 = vunpack.c.l.s8.bf16 %v575_v46 }
 0x29f   : > { %2442 = vmatpush1.bf16.msra.mxu1 %v1211_v38  ;;  %2418 = vmatprep.subr.bf16.mxu0 %v1176_v59  ;;  %v1240_v59 = vunpack.c.h.s8.bf16 %v556_v31 }
 0x2a0   : > { %v2150_v2 = vpop.f32.mrf.mxu1  ;;  %2443 = vmatprep.subr.bf16.mxu1 %v1208_v60  ;;  %v1272_v60 = vunpack.c.h.s8.bf16 %v572_v33 }
 0x2a1   : > { %v1236_v2 = vunpack.c.l.s8.bf16 %v556_v31 }
 0x2a2   : > { %2419 = vmatpush2.bf16.msra.mxu0 %v1175_v23  ;;  %v1271_v23 = vunpack.c.h.s8.bf16 %v571_v1 }
 0x2a3   : > { %2444 = vmatpush1.bf16.msra.mxu1 %v1207_v44  ;;  %2420 = vmatprep.subr.bf16.mxu0 %v1172_v0  ;;  %v1268_v0 = vunpack.c.l.s8.bf16 %v572_v33 }
 0x2a4   : > { %2445 = vmatprep.subr.bf16.mxu1 %v1204_v47  ;;  %v552_v47 = vld [vmem:[%s3366_s8 + $0x8b8] sm:$0xff] }
 0x2a5   : > { %v1228_v8 = vunpack.c.l.s8.bf16 %v552_v47 }
 0x2a6   : > { %2421 = vmatpush2.bf16.msra.mxu0 %v1171_v5  ;;  %v1264_v5 = vunpack.c.h.s8.bf16 %v568_v10 }
 0x2a7   : > { %2446 = vmatpush1.bf16.msra.mxu1 %v1203_v6  ;;  %2422 = vmatprep.subr.bf16.mxu0 %v1168_v21  ;;  %v551_v6 = vld [vmem:[%s3366_s8 + $0x8b0] sm:$0xff] }
 0x2a8   : > { %2447 = vmatprep.subr.bf16.mxu1 %v1200_v34  ;;  %v567_v21 = vld [vmem:[%s3366_s8 + $0x930] sm:$0xff]  ;;  %v1231_v34 = vunpack.c.h.s8.bf16 %v551_v6 }
 0x2a9   : > { %v1263_v7 = vunpack.c.h.s8.bf16 %v567_v21  ;;  %v1259_v18 = vunpack.c.l.s8.bf16 %v567_v21  ;;  %v580_v21 = vld [vmem:[%s3366_s8 + $0x998] sm:$0xff] }
 0x2aa   : > { %2423 = vmatpush2.bf16.msra.mxu0 %v1167_v9  ;;  %v1260_v9 = vunpack.c.l.s8.bf16 %v568_v10  ;;  %v583_v10 = vld [vmem:[%s3366_s8 + $0x9b0] sm:$0xff] }
 0x2ab   : > { %2448 = vmatpush1.bf16.msra.mxu1 %v1199_v14  ;;  %2424 = vmatprep.subr.bf16.mxu0 %v1164_v11  ;;  %v548_v14 = vld [vmem:[%s3366_s8 + $0x898] sm:$0xff] }
 0x2ac   : > { %2449 = vmatprep.subr.bf16.mxu1 %v1196_v32  ;;  %v564_v11 = vld [vmem:[%s3366_s8 + $0x918] sm:$0xff]  ;;  %v1227_v32 = vunpack.c.l.s8.bf16 %v551_v6  ;;  %v1224_v13 = vunpack.c.h.s8.bf16 %v548_v14  ;;  %v1220_v35 = vunpack.c.l.s8.bf16 %v548_v14 }
 0x2ae   : > { %2425 = vmatpush2.bf16.msra.mxu0 %v1163_v48  ;;  %v1256_v48 = vunpack.c.h.s8.bf16 %v564_v11 }
 0x2af   : > { %2450 = vmatpush1.bf16.msra.mxu1 %v1195_v15  ;;  %2426 = vmatprep.subr.bf16.mxu0 %v1160_v16  ;;  %v547_v15 = vld [vmem:[%s3366_s8 + $0x890] sm:$0xff] }
 0x2b0   : > { %2451 = vmatprep.subr.bf16.mxu1 %v1192_v17  ;;  %v563_v16 = vld [vmem:[%s3366_s8 + $0x910] sm:$0xff]  ;;  %v1223_v17 = vunpack.c.h.s8.bf16 %v547_v15 }
 0x2b1   : > { %v1255_v29 = vunpack.c.h.s8.bf16 %v563_v16  ;;  %v1251_v63 = vunpack.c.l.s8.bf16 %v563_v16  ;;  %v624_v16 = vld [vmem:[%s3366_s8 + $0xaf8] sm:$0xff] }
 0x2b2   : > { %2427 = vmatpush2.bf16.msra.mxu0 %v1159_v56  ;;  %v1252_v56 = vunpack.c.l.s8.bf16 %v564_v11  ;;  %v579_v11 = vld [vmem:[%s3366_s8 + $0x990] sm:$0xff] }
 0x2b3   : > { %2452 = vmatpush1.bf16.msra.mxu1 %v1191_v43  ;;  %2428 = vmatprep.subr.bf16.mxu0 %v1156_v36  ;;  %v592_v43 = vld [vmem:[%s3366_s8 + $0x9f8] sm:$0xff] }
 0x2b4   : > { %2453 = vmatprep.subr.bf16.mxu1 %v1188_v27  ;;  %v608_v36 = vld [vmem:[%s3366_s8 + $0xa78] sm:$0xff]  ;;  %v1219_v27 = vunpack.c.l.s8.bf16 %v547_v15  ;;  %v1312_v41 = vunpack.c.h.s8.bf16 %v592_v43  ;;  %v1308_v46 = vunpack.c.l.s8.bf16 %v592_v43 }
 0x2b6   : > { %2429 = vmatpush2.bf16.msra.mxu0 %v1155_v55  ;;  %v1344_v55 = vunpack.c.h.s8.bf16 %v608_v36 }
 0x2b7   : > { %2454 = vmatpush1.bf16.msra.mxu1 %v1187_v3  ;;  %2480 = vmatprep.subr.bf16.mxu0 %v1280_v45  ;;  %v591_v3 = vld [vmem:[%s3366_s8 + $0x9f0] sm:$0xff] }
 0x2b8   : > { %2455 = vmatprep.subr.bf16.mxu1 %v1248_v28  ;;  %v607_v28 = vld [vmem:[%s3366_s8 + $0xa70] sm:$0xff]  ;;  %v1311_v45 = vunpack.c.h.s8.bf16 %v591_v3  ;;  %v1307_v33 = vunpack.c.l.s8.bf16 %v591_v3 }
 0x2b9   : > { %v2186_v37 = vpop.f32.mrf.mxu0  ;;  %2431 = vmatmul.mubr.bf16.vlgmr.msra.gmra.mxu0 %v3601_v24  ;;  %v1343_v50 = vunpack.c.h.s8.bf16 %v607_v28 }
 0x2ba   : > { %v3933_v49 = vadd.f32 %v2186_v37, %v3909_v57  ;;  %2481 = vmatpush1.bf16.msra.mxu0 %v1279_v51  ;;  %2512 = vmatprep.mubr.bf16.mxu0 %v3617_v22  ;;  %v1239_v57 = vunpack.c.h.s8.bf16 %v555_v30  ;;  %v1232_v22 = vunpack.c.h.s8.bf16 %v552_v47  ;;  %v588_v51 = vld [vmem:[%s3366_s8 + $0x9d8] sm:$0xff]  ;;  %v1339_v37 = vunpack.c.l.s8.bf16 %v607_v28 }
 0x2bb   : > { %2456 = vmatpush2.bf16.msra.mxu1 %v1247_v19  ;;  %v2188_v38 = vpop.f32.mrf.mxu0  ;;  %2482 = vmatprep.subr.bf16.mxu0 %v1276_v39  ;;  %v1340_v19 = vunpack.c.l.s8.bf16 %v608_v36  ;;  %v623_v36 = vld [vmem:[%s3366_s8 + $0xaf0] sm:$0xff]  ;;  %v620_v28 = vld [vmem:[%s3366_s8 + $0xad8] sm:$0xff] }
 0x2bc   : > { %2457 = vmatprep.subr.bf16.mxu1 %v1244_v54  ;;  %v3938_v20 = vadd.f32 %v2188_v38, %v3912_v58  ;;  %v1235_v58 = vunpack.c.l.s8.bf16 %v555_v30  ;;  %v604_v54 = vld [vmem:[%s3366_s8 + $0xa58] sm:$0xff] }
 0x2bd   : > { %v2190_v24 = vpop.f32.mrf.mxu0  ;;  %v1336_v38 = vunpack.c.h.s8.bf16 %v604_v54 }
 0x2be   : > { %2483 = vmatpush1.bf16.msra.mxu0 %v1275_v40  ;;  %v1304_v40 = vunpack.c.h.s8.bf16 %v588_v51 }
 0x2bf   : > { %2458 = vmatpush2.bf16.msra.mxu1 %v1243_v42  ;;  %v2191_v44 = vpop.f32.mrf.mxu0  ;;  %2484 = vmatprep.subr.bf16.mxu0 %v1272_v60  ;;  %v603_v60 = vld [vmem:[%s3366_s8 + $0xa50] sm:$0xff] }
 0x2c0   : > { %2459 = vmatprep.subr.bf16.mxu1 %v1240_v59  ;;  %v587_v59 = vld [vmem:[%s3366_s8 + $0x9d0] sm:$0xff]  ;;  %v1335_v1 = vunpack.c.h.s8.bf16 %v603_v60  ;;  %v584_v44 = vld [vmem:[%s3366_s8 + $0x9b8] sm:$0xff] }
 0x2c2   : > { %2485 = vmatpush1.bf16.msra.mxu0 %v1271_v23  ;;  %v1332_v23 = vunpack.c.l.s8.bf16 %v604_v54 }
 0x2c3   : > { %2460 = vmatpush2.bf16.msra.mxu1 %v1239_v57  ;;  %2486 = vmatprep.subr.bf16.mxu0 %v1268_v0  ;;  %v1300_v57 = vunpack.c.l.s8.bf16 %v588_v51  ;;  %v1331_v0 = vunpack.c.l.s8.bf16 %v603_v60  ;;  %v1364_v60 = vunpack.c.l.s8.bf16 %v620_v28 }
 0x2c4   : > { %2461 = vmatprep.subr.bf16.mxu1 %v1236_v2  ;;  %v600_v2 = vld [vmem:[%s3366_s8 + $0xa38] sm:$0xff] }
 0x2c5   : > { %v1328_v47 = vunpack.c.h.s8.bf16 %v600_v2  ;;  %v1324_v6 = vunpack.c.l.s8.bf16 %v600_v2 }
 0x2c6   : > { %2487 = vmatpush1.bf16.msra.mxu0 %v1267_v4  ;;  %v1295_v4 = vunpack.c.h.s8.bf16 %v583_v10 }
 0x2c7   : > { %2462 = vmatpush2.bf16.msra.mxu1 %v1235_v58  ;;  %2488 = vmatprep.subr.bf16.mxu0 %v1264_v5  ;;  %v599_v58 = vld [vmem:[%s3366_s8 + $0xa30] sm:$0xff]  ;;  %v1292_v5 = vunpack.c.l.s8.bf16 %v584_v44 }
 0x2c8   : > { %2463 = vmatprep.subr.bf16.mxu1 %v1232_v22  ;;  %v1327_v22 = vunpack.c.h.s8.bf16 %v599_v58 }
 0x2ca   : > { %2489 = vmatpush1.bf16.msra.mxu0 %v1263_v7  ;;  %v1291_v7 = vunpack.c.l.s8.bf16 %v583_v10  ;;  %v628_v10 = vld [vmem:[%s3366_s8 + $0xb18] sm:$0xff] }
 0x2cb   : > { %2464 = vmatpush2.bf16.msra.mxu1 %v1231_v34  ;;  %2490 = vmatprep.subr.bf16.mxu0 %v1260_v9  ;;  %v596_v34 = vld [vmem:[%s3366_s8 + $0xa18] sm:$0xff]  ;;  %v1288_v9 = vunpack.c.h.s8.bf16 %v580_v21 }
 0x2cc   : > { %2465 = vmatprep.subr.bf16.mxu1 %v1228_v8  ;;  %v1323_v8 = vunpack.c.l.s8.bf16 %v599_v58  ;;  %v1320_v14 = vunpack.c.h.s8.bf16 %v596_v34  ;;  %v1316_v15 = vunpack.c.l.s8.bf16 %v596_v34 }
 0x2ce   : > { %2491 = vmatpush1.bf16.msra.mxu0 %v1259_v18  ;;  %v1287_v18 = vunpack.c.h.s8.bf16 %v579_v11 }
 0x2cf   : > { %2466 = vmatpush2.bf16.msra.mxu1 %v1227_v32  ;;  %2492 = vmatprep.subr.bf16.mxu0 %v1256_v48  ;;  %v595_v32 = vld [vmem:[%s3366_s8 + $0xa10] sm:$0xff]  ;;  %v1284_v48 = vunpack.c.l.s8.bf16 %v580_v21 }
 0x2d0   : > { %2467 = vmatprep.subr.bf16.mxu1 %v1224_v13  ;;  %v1319_v13 = vunpack.c.h.s8.bf16 %v595_v32  ;;  %v627_v21 = vld [vmem:[%s3366_s8 + $0xb10] sm:$0xff] }
 0x2d2   : > { %2493 = vmatpush1.bf16.msra.mxu0 %v1255_v29  ;;  %v1283_v29 = vunpack.c.l.s8.bf16 %v579_v11  ;;  %v672_v11 = vld [vmem:[%s3366_s8 + $0xc78] sm:$0xff] }
 0x2d3   : > { %2468 = vmatpush2.bf16.msra.mxu1 %v1223_v17  ;;  %2494 = vmatprep.subr.bf16.mxu0 %v1252_v56  ;;  %v640_v17 = vld [vmem:[%s3366_s8 + $0xb78] sm:$0xff]  ;;  %v1376_v56 = vunpack.c.h.s8.bf16 %v624_v16 }
 0x2d4   : > { %2469 = vmatprep.subr.bf16.mxu1 %v1220_v35  ;;  %v1315_v35 = vunpack.c.l.s8.bf16 %v595_v32  ;;  %v1408_v43 = vunpack.c.h.s8.bf16 %v640_v17  ;;  %v1404_v3 = vunpack.c.l.s8.bf16 %v640_v17 }
 0x2d6   : > { %2495 = vmatpush1.bf16.msra.mxu0 %v1251_v63  ;;  %v1375_v63 = vunpack.c.h.s8.bf16 %v623_v36 }
 0x2d7   : > { %2470 = vmatpush2.bf16.msra.mxu1 %v1219_v27  ;;  %2496 = vmatprep.subr.bf16.mxu0 %v1312_v41  ;;  %v639_v27 = vld [vmem:[%s3366_s8 + $0xb70] sm:$0xff] }
 0x2d8   : > { %2521 = vmatprep.subr.bf16.mxu1 %v1344_v55  ;;  %v1407_v41 = vunpack.c.h.s8.bf16 %v639_v27  ;;  %v1372_v55 = vunpack.c.l.s8.bf16 %v624_v16  ;;  %v1403_v51 = vunpack.c.l.s8.bf16 %v639_v27  ;;  %v671_v16 = vld [vmem:[%s3366_s8 + $0xc70] sm:$0xff] }
 0x2da   : > { %v2227_v39 = vpop.f32.mrf.mxu1  ;;  %2472 = vmatmul.mubr.bf16.vlgmr.msra.gmra.mxu1 %v3659_v61  ;;  %2497 = vmatpush2.bf16.msra.mxu0 %v1311_v45  ;;  %v636_v45 = vld [vmem:[%s3366_s8 + $0xb58] sm:$0xff] }
 0x2db   : > { %v3957_v31 = vadd.f32 %v2227_v39, %v3933_v49  ;;  %2522 = vmatpush1.bf16.msra.mxu1 %v1343_v50  ;;  %2498 = vmatprep.subr.bf16.mxu0 %v1308_v46  ;;  %v1303_v49 = vunpack.c.h.s8.bf16 %v587_v59  ;;  %v1368_v39 = vunpack.c.h.s8.bf16 %v620_v28 }
 0x2dc   : > { %v2229_v42 = vpop.f32.mrf.mxu1  ;;  %2523 = vmatprep.subr.bf16.mxu1 %v1340_v19  ;;  %2553 = vmatprep.mubr.bf16.mxu1 %v3675_v25  ;;  %v1296_v25 = vunpack.c.h.s8.bf16 %v584_v44  ;;  %v1371_v19 = vunpack.c.l.s8.bf16 %v623_v36  ;;  %v631_v44 = vld [vmem:[%s3366_s8 + $0xb30] sm:$0xff]  ;;  %v668_v36 = vld [vmem:[%s3366_s8 + $0xc58] sm:$0xff] }
 0x2dd   : > { %v3962_v30 = vadd.f32 %v2229_v42, %v3938_v20  ;;  %v1299_v20 = vunpack.c.l.s8.bf16 %v587_v59  ;;  %v635_v42 = vld [vmem:[%s3366_s8 + $0xb50] sm:$0xff] }
 0x2de   : > { %v2231_v61 = vpop.f32.mrf.mxu1  ;;  %2499 = vmatpush2.bf16.msra.mxu0 %v1307_v33  ;;  %v1400_v33 = vunpack.c.h.s8.bf16 %v636_v45 }
 0x2df   : > { %2524 = vmatpush1.bf16.msra.mxu1 %v1339_v37  ;;  %2500 = vmatprep.subr.bf16.mxu0 %v1304_v40  ;;  %v619_v37 = vld [vmem:[%s3366_s8 + $0xad0] sm:$0xff]  ;;  %v1396_v61 = vunpack.c.l.s8.bf16 %v636_v45  ;;  %v1464_v45 = vunpack.c.h.s8.bf16 %v668_v36 }
 0x2e0   : > { %v2232_v24 = vpop.f32.mrf.mxu1  ;;  %2525 = vmatprep.subr.bf16.mxu1 %v1336_v38  ;;  %v1399_v38 = vunpack.c.h.s8.bf16 %v635_v42 }
 0x2e1   : > { %v1395_v24 = vunpack.c.l.s8.bf16 %v635_v42  ;;  %v648_v42 = vld [vmem:[%s3366_s8 + $0xbb8] sm:$0xff] }
 0x2e2   : > { %2501 = vmatpush2.bf16.msra.mxu0 %v1303_v49  ;;  %v616_v49 = vld [vmem:[%s3366_s8 + $0xab8] sm:$0xff] }
 0x2e3   : > { %2526 = vmatpush1.bf16.msra.mxu1 %v1335_v1  ;;  %2502 = vmatprep.subr.bf16.mxu0 %v1300_v57  ;;  %v632_v1 = vld [vmem:[%s3366_s8 + $0xb38] sm:$0xff] }
 0x2e4   : > { %2527 = vmatprep.subr.bf16.mxu1 %v1332_v23  ;;  %v1392_v57 = vunpack.c.h.s8.bf16 %v632_v1  ;;  %v615_v23 = vld [vmem:[%s3366_s8 + $0xab0] sm:$0xff] }
 0x2e5   : > { %v1359_v2 = vunpack.c.h.s8.bf16 %v615_v23  ;;  %v1355_v58 = vunpack.c.l.s8.bf16 %v615_v23 }
 0x2e6   : > { %2503 = vmatpush2.bf16.msra.mxu0 %v1299_v20  ;;  %v1391_v20 = vunpack.c.h.s8.bf16 %v631_v44 }
 0x2e7   : > { %2528 = vmatpush1.bf16.msra.mxu1 %v1331_v0  ;;  %2504 = vmatprep.subr.bf16.mxu0 %v1296_v25  ;;  %v1356_v0 = vunpack.c.l.s8.bf16 %v616_v49  ;;  %v1388_v25 = vunpack.c.l.s8.bf16 %v632_v1  ;;  %v1420_v1 = vunpack.c.l.s8.bf16 %v648_v42 }
 0x2e8   : > { %2529 = vmatprep.subr.bf16.mxu1 %v1328_v47  ;;  %v612_v47 = vld [vmem:[%s3366_s8 + $0xa98] sm:$0xff] }
 0x2ea   : > { %2505 = vmatpush2.bf16.msra.mxu0 %v1295_v4  ;;  %v1387_v4 = vunpack.c.l.s8.bf16 %v631_v44 }
 0x2eb   : > { %2530 = vmatpush1.bf16.msra.mxu1 %v1327_v22  ;;  %2506 = vmatprep.subr.bf16.mxu0 %v1292_v5  ;;  %v1352_v22 = vunpack.c.h.s8.bf16 %v612_v47  ;;  %v1384_v5 = vunpack.c.h.s8.bf16 %v628_v10 }
 0x2ec   : > { %2531 = vmatprep.subr.bf16.mxu1 %v1324_v6  ;;  %v611_v6 = vld [vmem:[%s3366_s8 + $0xa90] sm:$0xff] }
 0x2ed   : > { %v1351_v34 = vunpack.c.h.s8.bf16 %v611_v6  ;;  %v1347_v32 = vunpack.c.l.s8.bf16 %v611_v6  ;;  %v3264_v6 = vld [vmem:[%s3361_s28 + $0x60] ss:$0 sps:$4 sm:$0xff]  }
 0x2ee   : > { %2507 = vmatpush2.bf16.msra.mxu0 %v1291_v7  ;;  %v1383_v7 = vunpack.c.h.s8.bf16 %v627_v21 }
 0x2ef   : > { %2532 = vmatpush1.bf16.msra.mxu1 %v1323_v8  ;;  %2508 = vmatprep.subr.bf16.mxu0 %v1288_v9  ;;  %v1348_v8 = vunpack.c.l.s8.bf16 %v612_v47  ;;  %v1380_v9 = vunpack.c.l.s8.bf16 %v628_v10 }
 0x2f0   : > { %2533 = vmatprep.subr.bf16.mxu1 %v1320_v14  ;;  %v656_v14 = vld [vmem:[%s3366_s8 + $0xbf8] sm:$0xff] }
 0x2f2   : > { %2509 = vmatpush2.bf16.msra.mxu0 %v1287_v18  ;;  %v1379_v18 = vunpack.c.l.s8.bf16 %v627_v21 }
 0x2f3   : > { %2534 = vmatpush1.bf16.msra.mxu1 %v1319_v13  ;;  %2510 = vmatprep.subr.bf16.mxu0 %v1284_v48  ;;  %v1440_v13 = vunpack.c.h.s8.bf16 %v656_v14  ;;  %v1472_v48 = vunpack.c.h.s8.bf16 %v672_v11 }
 0x2f4   : > { %2535 = vmatprep.subr.bf16.mxu1 %v1316_v15  ;;  %v655_v15 = vld [vmem:[%s3366_s8 + $0xbf0] sm:$0xff] }
 0x2f5   : > { %v1439_v17 = vunpack.c.h.s8.bf16 %v655_v15 }
 0x2f6   : > { %2511 = vmatpush2.bf16.msra.mxu0 %v1283_v29  ;;  %v1471_v29 = vunpack.c.h.s8.bf16 %v671_v16 }
 0x2f7   : > { %2536 = vmatpush1.bf16.msra.mxu1 %v1315_v35  ;;  %2562 = vmatprep.subr.bf16.mxu0 %v1408_v43  ;;  %v1436_v35 = vunpack.c.l.s8.bf16 %v656_v14  ;;  %v652_v43 = vld [vmem:[%s3366_s8 + $0xbd8] sm:$0xff] }
 0x2f8   : > { %2537 = vmatprep.subr.bf16.mxu1 %v1376_v56  ;;  %v1468_v56 = vunpack.c.l.s8.bf16 %v672_v11  ;;  %v1432_v28 = vunpack.c.h.s8.bf16 %v652_v43 }
 0x2f9   : > { %v2268_v50 = vpop.f32.mrf.mxu0  ;;  %2513 = vmatmul.mubr.bf16.vlgmr.msra.gmra.mxu0 %v3663_v62 }
 0x2fa   : > { %v3981_v46 = vadd.f32 %v2268_v50, %v3957_v31  ;;  %2563 = vmatpush1.bf16.msra.mxu0 %v1407_v41  ;;  %2594 = vmatprep.mubr.bf16.mxu0 %v3679_v26  ;;  %v1367_v31 = vunpack.c.h.s8.bf16 %v619_v37  ;;  %v1360_v26 = vunpack.c.h.s8.bf16 %v616_v49  ;;  %v1435_v41 = vunpack.c.l.s8.bf16 %v655_v15  ;;  %v651_v50 = vld [vmem:[%s3366_s8 + $0xbd0] sm:$0xff] }
 0x2fb   : > { %2538 = vmatpush2.bf16.msra.mxu1 %v1375_v63  ;;  %v2270_v54 = vpop.f32.mrf.mxu0  ;;  %2564 = vmatprep.subr.bf16.mxu0 %v1404_v3 }
 0x2fc   : > { %2539 = vmatprep.subr.bf16.mxu1 %v1372_v55  ;;  %v3986_v40 = vadd.f32 %v2270_v54, %v3962_v30  ;;  %v1363_v30 = vunpack.c.l.s8.bf16 %v619_v37  ;;  %v1467_v55 = vunpack.c.l.s8.bf16 %v671_v16  ;;  %v1460_v37 = vunpack.c.l.s8.bf16 %v668_v36 }
 0x2fd   : > { %v2272_v62 = vpop.f32.mrf.mxu0 }
 0x2fe   : > { %2565 = vmatpush1.bf16.msra.mxu0 %v1403_v51  ;;  %v664_v62 = vld [vmem:[%s3366_s8 + $0xc38] sm:$0xff] }
 0x2ff   : > { %2540 = vmatpush2.bf16.msra.mxu1 %v1371_v19  ;;  %v2273_v59 = vpop.f32.mrf.mxu0  ;;  %2566 = vmatprep.subr.bf16.mxu0 %v1400_v33  ;;  %v667_v19 = vld [vmem:[%s3366_s8 + $0xc50] sm:$0xff]  ;;  %v1428_v33 = vunpack.c.l.s8.bf16 %v652_v43 }
 0x300   : > { %2541 = vmatprep.subr.bf16.mxu1 %v1368_v39  ;;  %v1463_v54 = vunpack.c.h.s8.bf16 %v667_v19  ;;  %v647_v59 = vld [vmem:[%s3366_s8 + $0xbb0] sm:$0xff] }
 0x302   : > { %2567 = vmatpush1.bf16.msra.mxu0 %v1399_v38  ;;  %v1456_v38 = vunpack.c.h.s8.bf16 %v664_v62 }
 0x303   : > { %2542 = vmatpush2.bf16.msra.mxu1 %v1367_v31  ;;  %2568 = vmatprep.subr.bf16.mxu0 %v1396_v61  ;;  %v1459_v31 = vunpack.c.l.s8.bf16 %v667_v19  ;;  %v1423_v61 = vunpack.c.h.s8.bf16 %v647_v59 }
 0x304   : > { %2543 = vmatprep.subr.bf16.mxu1 %v1364_v60  ;;  %v663_v60 = vld [vmem:[%s3366_s8 + $0xc30] sm:$0xff] }
 0x305   : > { %v1455_v49 = vunpack.c.h.s8.bf16 %v663_v60  ;;  %v1451_v23 = vunpack.c.l.s8.bf16 %v663_v60  ;;  %v1476_v60 = vld [vmem:[#allocation2 + $0x8] sm:$0xff] }
 0x306   : > { %2569 = vmatpush1.bf16.msra.mxu0 %v1395_v24  ;;  %v644_v24 = vld [vmem:[%s3366_s8 + $0xb98] sm:$0xff] }
 0x307   : > { %2544 = vmatpush2.bf16.msra.mxu1 %v1363_v30  ;;  %2570 = vmatprep.subr.bf16.mxu0 %v1392_v57  ;;  %v1452_v30 = vunpack.c.l.s8.bf16 %v664_v62  ;;  %v1419_v57 = vunpack.c.l.s8.bf16 %v647_v59  ;;  %v1416_v44 = vunpack.c.h.s8.bf16 %v644_v24  ;;  %v1412_v10 = vunpack.c.l.s8.bf16 %v644_v24 }
 0x308   : > { %2545 = vmatprep.subr.bf16.mxu1 %v1360_v26  ;;  %v660_v26 = vld [vmem:[%s3366_s8 + $0xc18] sm:$0xff] }
 0x30a   : > { %2571 = vmatpush1.bf16.msra.mxu0 %v1391_v20  ;;  %v643_v20 = vld [vmem:[%s3366_s8 + $0xb90] sm:$0xff] }
 0x30b   : > { %2546 = vmatpush2.bf16.msra.mxu1 %v1359_v2  ;;  %2572 = vmatprep.subr.bf16.mxu0 %v1388_v25  ;;  %v1448_v2 = vunpack.c.h.s8.bf16 %v660_v26  ;;  %v1415_v25 = vunpack.c.h.s8.bf16 %v643_v20 }
 0x30c   : > { %2547 = vmatprep.subr.bf16.mxu1 %v1356_v0  ;;  %v659_v0 = vld [vmem:[%s3366_s8 + $0xc10] sm:$0xff] }
 0x30d   : > { %v1447_v47 = vunpack.c.h.s8.bf16 %v659_v0 }
 0x30e   : > { %2573 = vmatpush1.bf16.msra.mxu0 %v1387_v4  ;;  %v1411_v4 = vunpack.c.l.s8.bf16 %v643_v20 }
 0x30f   : > { %2548 = vmatpush2.bf16.msra.mxu1 %v1355_v58  ;;  %2574 = vmatprep.subr.bf16.mxu0 %v1384_v5  ;;  %v1444_v58 = vunpack.c.l.s8.bf16 %v660_v26 }
 0x310   : > { %2549 = vmatprep.subr.bf16.mxu1 %v1352_v22  ;;  %v1443_v22 = vunpack.c.l.s8.bf16 %v659_v0 }
 0x312   : > { %2575 = vmatpush1.bf16.msra.mxu0 %v1383_v7 }
 0x313   : > { %2550 = vmatpush2.bf16.msra.mxu1 %v1351_v34  ;;  %2576 = vmatprep.subr.bf16.mxu0 %v1380_v9 }
 0x314   : > { %2551 = vmatprep.subr.bf16.mxu1 %v1348_v8 }
 0x316   : > { %2577 = vmatpush1.bf16.msra.mxu0 %v1379_v18 }
 0x317   : > { %2552 = vmatpush2.bf16.msra.mxu1 %v1347_v32  ;;  %2578 = vmatprep.subr.bf16.mxu0 %v1440_v13 }
 0x318   : > { %2603 = vmatprep.subr.bf16.mxu1 %v1472_v48 }
 0x31a   : > { %v2309_v27 = vpop.f32.mrf.mxu1  ;;  %2554 = vmatmul.mubr.bf16.vlgmr.msra.gmra.mxu1 %v3723_v52  ;;  %2579 = vmatpush2.bf16.msra.mxu0 %v1439_v17 }
 0x31b   : > { %v4005_v63 = vadd.f32 %v2309_v27, %v3981_v46  ;;  %2604 = vmatpush1.bf16.msra.mxu1 %v1471_v29  ;;  %2580 = vmatprep.subr.bf16.mxu0 %v1436_v35  ;;  %v1431_v46 = vunpack.c.h.s8.bf16 %v651_v50 }
 0x31c   : > { %v2311_v3 = vpop.f32.mrf.mxu1  ;;  %2605 = vmatprep.subr.bf16.mxu1 %v1468_v56  ;;  %2635 = vmatprep.mubr.bf16.mxu1 %v3310_v12  ;;  %v1424_v12 = vunpack.c.h.s8.bf16 %v648_v42 }
 0x31d   : > { %v4010_v51 = vadd.f32 %v2311_v3, %v3986_v40  ;;  %v1427_v40 = vunpack.c.l.s8.bf16 %v651_v50 }
 0x31e   : > { %v2313_v52 = vpop.f32.mrf.mxu1  ;;  %2581 = vmatpush2.bf16.msra.mxu0 %v1435_v41 }
 0x31f   : > { %2606 = vmatpush1.bf16.msra.mxu1 %v1467_v55  ;;  %2582 = vmatprep.subr.bf16.mxu0 %v1432_v28 }
 0x320   : > { %v2314_v39 = vpop.f32.mrf.mxu1  ;;  %2607 = vmatprep.subr.bf16.mxu1 %v1464_v45 }
 0x322   : > { %2583 = vmatpush2.bf16.msra.mxu0 %v1431_v46 }
 0x323   : > { %2608 = vmatpush1.bf16.msra.mxu1 %v1463_v54  ;;  %2584 = vmatprep.subr.bf16.mxu0 %v1428_v33 }
 0x324   : > { %2609 = vmatprep.subr.bf16.mxu1 %v1460_v37 }
 0x326   : > { %2585 = vmatpush2.bf16.msra.mxu0 %v1427_v40  ;;  %v1475_v40 = vld [vmem:[#allocation2 + $0x18] sm:$0xff] }
 0x327   : > { %2610 = vmatpush1.bf16.msra.mxu1 %v1459_v31  ;;  %2586 = vmatprep.subr.bf16.mxu0 %v1424_v12 }
 0x328   : > { %2611 = vmatprep.subr.bf16.mxu1 %v1456_v38 }
 0x32a   : > { %2587 = vmatpush2.bf16.msra.mxu0 %v1423_v61 }
 0x32b   : > { %2612 = vmatpush1.bf16.msra.mxu1 %v1455_v49  ;;  %2588 = vmatprep.subr.bf16.mxu0 %v1420_v1 }
 0x32c   : > { %2613 = vmatprep.subr.bf16.mxu1 %v1452_v30 }
 0x32e   : > { %2589 = vmatpush2.bf16.msra.mxu0 %v1419_v57 }
 0x32f   : > { %2614 = vmatpush1.bf16.msra.mxu1 %v1451_v23  ;;  %2590 = vmatprep.subr.bf16.mxu0 %v1416_v44 }
 0x330   : > { %2615 = vmatprep.subr.bf16.mxu1 %v1448_v2 }
 0x332   : > { %2591 = vmatpush2.bf16.msra.mxu0 %v1415_v25 }
 0x333   : > { %2616 = vmatpush1.bf16.msra.mxu1 %v1447_v47  ;;  %2592 = vmatprep.subr.bf16.mxu0 %v1412_v10 }
 0x334   : > { %2617 = vmatprep.subr.bf16.mxu1 %v1444_v58 }
 0x336   : > { %2593 = vmatpush2.bf16.msra.mxu0 %v1411_v4 }
 0x337   : > { %2618 = vmatpush1.bf16.msra.mxu1 %v1443_v22 }
 0x339   : > { %v2350_v5 = vpop.f32.mrf.mxu0  ;;  %2595 = vmatmul.mubr.bf16.vlgmr.msra.gmra.mxu0 %v3727_v53 }
 0x33a   : > { %2636 = vmatmul.mubr.bf16.vlgmr.msra.gmra.mxu1 %v3264_v6  ;;  %v2351_v21 = vadd.f32 %v2350_v5, %v4005_v63 }
 0x33b   : > { %v2352_v34 = vpop.f32.mrf.mxu0 }
 0x33c   : > { %v2353_v7 = vadd.f32 %v2352_v34, %v4010_v51 }
 0x33d   : > { %v2354_v8 = vpop.f32.mrf.mxu0 }
 0x33f   : > { %v2355_v9 = vpop.f32.mrf.mxu0 }
 0x35a   : > { %v2391_v14 = vpop.f32.mrf.mxu1 }
 0x35b   : > { %v2392_v11 = vadd.f32 %v2391_v14, %v2351_v21 }
 0x35c   : > { %v2393_v32 = vpop.f32.mrf.mxu1 }
 0x35d   : > { %v2394_v18 = vadd.f32 %v2393_v32, %v2353_v7 }
 0x35e   : > { %v2395_v13 = vpop.f32.mrf.mxu1 }
 0x360   : > { %v2396_v48 = vpop.f32.mrf.mxu1 }
 0x379   : > { %v2432_v15 = vpop.f32.mrf.mxu0 }
 0x37a   : > { %v2433_v16 = vadd.f32 %v2432_v15, %v2392_v11 }
 0x37b   : > { %v2434_v17 = vpop.f32.mrf.mxu0 }
 0x37c   : > { %v2435_v29 = vadd.f32 %v2434_v17, %v2394_v18 }
 0x37d   : > { %v2436_v53 = vpop.f32.mrf.mxu0 }
 0x37f   : > { %v2437_v35 = vpop.f32.mrf.mxu0 }
 0x39a   : > { %v2473_v56 = vpop.f32.mrf.mxu1 }
 0x39b   : > { %v2474_v43 = vadd.f32 %v2473_v56, %v2433_v16 }
 0x39c   : > { %v2475_v36 = vpop.f32.mrf.mxu1 }
 0x39d   : > { %v2476_v27 = vadd.f32 %v2475_v36, %v2435_v29 }
 0x39e   : > { %v2477_v63 = vpop.f32.mrf.mxu1 }
 0x3a0   : > { %v2478_v41 = vpop.f32.mrf.mxu1 }
 0x3b9   : > { %v2514_v55 = vpop.f32.mrf.mxu0 }
 0x3ba   : > { %v2515_v46 = vadd.f32 %v2514_v55, %v2474_v43 }
 0x3bb   : > { %v2516_v3 = vpop.f32.mrf.mxu0 }
 0x3bc   : > { %v2517_v54 = vadd.f32 %v2516_v3, %v2476_v27 }
 0x3bd   : > { %v2518_v28 = vpop.f32.mrf.mxu0 }
 0x3bf   : > { %v2519_v45 = vpop.f32.mrf.mxu0 }
 0x3da   : > { %v2555_v50 = vpop.f32.mrf.mxu1 }
 0x3db   : > { %v2556_v39 = vadd.f32 %v2555_v50, %v2515_v46 }
 0x3dc   : > { %v2557_v19 = vpop.f32.mrf.mxu1 }
 0x3dd   : > { %v2558_v42 = vadd.f32 %v2557_v19, %v2517_v54 }
 0x3de   : > { %v2559_v51 = vpop.f32.mrf.mxu1 }
 0x3e0   : > { %v2560_v52 = vpop.f32.mrf.mxu1 }
 0x3f9   : > { %v2596_v33 = vpop.f32.mrf.mxu0 }
 0x3fa   : > { %v2637_v37 = vpop.f32.mrf.mxu1  ;;  %v2597_v62 = vadd.f32 %v2596_v33, %v2556_v39 }
 0x3fb   : > { %v2598_v31 = vpop.f32.mrf.mxu0 }
 0x3fc   : > { %v2639_v12 = vpop.f32.mrf.mxu1  ;;  %v2638_v38 = vadd.f32 %v2637_v37, %v2597_v62  ;;  %v2599_v59 = vadd.f32 %v2598_v31, %v2558_v42 }
 0x3fd   : > { %v2600_v61 = vpop.f32.mrf.mxu0 }
 0x3fe   : > { %v2641_v49 = vpop.f32.mrf.mxu1  ;;  %v2646_v1 = vadd.f32 %v2638_v38, %v1475_v40  ;;  %v2640_v30 = vadd.f32 %v2639_v12, %v2599_v59  ;;  %2655 = sbr.rel (%p3147_p6) target bundleno = 1295 (0x50f), region = 52 }
 0x3ff   : > { %v2601_v24 = vpop.f32.mrf.mxu0 }
 0x400   : > { %v2642_v26 = vpop.f32.mrf.mxu1  ;;  %2650 = vst [vmem:[#allocation2 + $0x18] sm:$0xff] %v2646_v1  ;;  %v2647_v57 = vadd.f32 %v2640_v30, %v1476_v60 }
 0x402   : > { %2651 = vst [vmem:[#allocation2 + $0x8] sm:$0xff] %v2647_v57 }
 0x403   : > { %v3265_v23 = vld [vmem:[%s4141_s4 + $0x78] sm:$0xff]   ;;  %v3269_v0 = vld [vmem:[%s4141_s4 + $0x70] sm:$0xff]   ;;  %v3273_v58 = vld [vmem:[%s4141_s4 + $0x68] sm:$0xff]   ;;  %v2662_v32 = vlaneseq }
 0x404   : > { %v3266_v44 = vld [vmem:[%s4141_s4 + $0xf8] sm:$0xff]   ;;  %3185 = vmatprep.subr.bf16.mxu0 %v3265_v23  ;;  %v3270_v25 = vld [vmem:[%s4141_s4 + $0xf0] sm:$0xff]   ;;  %v3274_v4 = vld [vmem:[%s4141_s4 + $0xe8] sm:$0xff]  }
 0x405   : > { %v3267_v2 = vld [vmem:[%s4141_s4 + $0x38] sm:$0xff]   ;;  %3207 = vmatprep.subr.bf16.mxu1 %v3266_v44  ;;  %v3271_v47 = vld [vmem:[%s4141_s4 + $0x30] sm:$0xff]   ;;  %v3275_v22 = vld [vmem:[%s4141_s4 + $0x28] sm:$0xff]   ;;  %v2663_v16 = vshrl.u32 %v2662_v32, 7 }
 0x406   : > { %v3268_v20 = vld [vmem:[%s4141_s4 + $0xb8] sm:$0xff]   ;;  %3186 = vmatpush3.bf16.msra.mxu0 %v3267_v2  ;;  %v3272_v10 = vld [vmem:[%s4141_s4 + $0xb0] sm:$0xff]   ;;  %v3276_v5 = vld [vmem:[%s4141_s4 + $0xa8] sm:$0xff]  }
 0x407   : > { %3208 = vmatpush3.bf16.msra.mxu1 %v3268_v20  ;;  %3187 = vmatprep.subr.bf16.mxu0 %v3269_v0  ;;  %v3277_v6 = vld [vmem:[%s4141_s4 + $0x60] sm:$0xff]   ;;  %v3281_v8 = vld [vmem:[%s4141_s4 + $0x58] sm:$0xff]   ;;  %v3285_v18 = vld [vmem:[%s4141_s4 + $0x50] sm:$0xff]   ;;  %v2668_v56 = vsub.s32 1, %v2663_v16  ;;  %v2676_v36 = vsub.s32 3, %v2663_v16  ;;  %v2664_v63 = vsub.s32 0, %v2663_v16 }
 0x408   : > { %3209 = vmatprep.subr.bf16.mxu1 %v3270_v25  ;;  %v3278_v21 = vld [vmem:[%s4141_s4 + $0xe0] sm:$0xff]   ;;  %v3282_v9 = vld [vmem:[%s4141_s4 + $0xd8] sm:$0xff]   ;;  %v3286_v13 = vld [vmem:[%s4141_s4 + $0xd0] sm:$0xff]   ;;  %v2672_v55 = vsub.s32 2, %v2663_v16 }
 0x409   : > { %v3279_v34 = vld [vmem:[%s4141_s4 + $0x20] sm:$0xff]   ;;  %v3283_v14 = vld [vmem:[%s4141_s4 + $0x18] sm:$0xff]   ;;  %v3287_v48 = vld [vmem:[%s4141_s4 + $0x10] sm:$0xff]  }
 0x40a   : > { %3188 = vmatpush3.bf16.msra.mxu0 %v3271_v47  ;;  %v3280_v7 = vld [vmem:[%s4141_s4 + $0xa0] sm:$0xff]   ;;  %v3284_v11 = vld [vmem:[%s4141_s4 + $0x98] sm:$0xff]   ;;  %v3288_v15 = vld [vmem:[%s4141_s4 + $0x90] sm:$0xff]  }
 0x40b   : > { %3210 = vmatpush3.bf16.msra.mxu1 %v3272_v10  ;;  %3189 = vmatprep.subr.bf16.mxu0 %v3273_v58  ;;  %v3289_v17 = vld [vmem:[%s4141_s4 + $0x48] sm:$0xff]   ;;  %v3293_v43 = vld [vmem:[%s4141_s4 + $0x40] sm:$0xff]   ;;  %v2656_v39 = vld [vmem:[#allocation2 + $0x10] sm:$0xff] }
 0x40c   : > { %3211 = vmatprep.subr.bf16.mxu1 %v3274_v4  ;;  %v3290_v29 = vld [vmem:[%s4141_s4 + $0xc8] sm:$0xff]   ;;  %v3294_v27 = vld [vmem:[%s4141_s4 + $0xc0] sm:$0xff]   ;;  %v2658_v33 = vld [vmem:[#allocation2 + $0x18] sm:$0xff] }
 0x40d   : > { %v3291_v53 = vld [vmem:[%s4141_s4 + $0x8] sm:$0xff]   ;;  %v3295_v41 = vld [vmem:[%s4141_s4] sm:$0xff]  }
 0x40e   : > { %3190 = vmatpush3.bf16.msra.mxu0 %v3275_v22  ;;  %v3292_v35 = vld [vmem:[%s4141_s4 + $0x88] sm:$0xff]   ;;  %v3296_v3 = vld [vmem:[%s4141_s4 + $0x80] sm:$0xff]  }
 0x40f   : > { %3212 = vmatpush3.bf16.msra.mxu1 %v3276_v5  ;;  %3191 = vmatprep.subr.bf16.mxu0 %v3277_v6  ;;  %v2657_v28 = vld [vmem:[#allocation2] sm:$0xff]  ;;  %v2659_v52 = vld [vmem:[#allocation2 + $0x8] sm:$0xff] }
 0x410   : > { %3213 = vmatprep.subr.bf16.mxu1 %v3278_v21  ;;  %v2660_v45 = vld [vmem:[%s4139_s2] sm:$0xf] }
 0x411   : > { %v2686_v50 = vld [vmem:[%s4140_s3] sm:$0xf]  ;;  %v2669_v19 = vrot.slane %v2660_v45, %v2668_v56  ;;  %v2677_v46 = vrot.slane %v2660_v45, %v2676_v36  ;;  %v2665_v37 = vrot.slane %v2660_v45, %v2664_v63  ;;  %v2673_v62 = vrot.slane %v2660_v45, %v2672_v55 }
 0x412   : > { %3192 = vmatpush3.bf16.msra.mxu0 %v3279_v34  ;;  %v2695_v51 = vrot.slane %v2686_v50, %v2668_v56  ;;  %v2703_v54 = vrot.slane %v2686_v50, %v2676_v36  ;;  %v2691_v42 = vrot.slane %v2686_v50, %v2664_v63  ;;  %v2699_v40 = vrot.slane %v2686_v50, %v2672_v55  ;;  %v3148_v22 = vld [vmem:[%s4142_s5] ss:$0 sm:$0xff] }
 0x413   : > { %3214 = vmatpush3.bf16.msra.mxu1 %v3280_v7  ;;  %3193 = vmatprep.subr.bf16.mxu0 %v3281_v8  ;;  %v2683_v31 = vmul.f32 %v2669_v19, %v2657_v28  ;;  %v2685_v12 = vmul.f32 %v2677_v46, %v2659_v52  ;;  %v2682_v38 = vmul.f32 %v2665_v37, %v2656_v39 }
 0x414   : > { %3215 = vmatprep.subr.bf16.mxu1 %v3282_v9  ;;  %v2684_v59 = vmul.f32 %v2673_v62, %v2658_v33 }
 0x415   : > { %v2709_v60 = vadd.f32 %v2695_v51, %v2683_v31  ;;  %v2711_v61 = vadd.f32 %v2703_v54, %v2685_v12  ;;  %v2708_v49 = vadd.f32 %v2691_v42, %v2682_v38 }
 0x416   : > { %3194 = vmatpush3.bf16.msra.mxu0 %v3283_v14  ;;  %v2710_v1 = vadd.f32 %v2699_v40, %v2684_v59 }
 0x417   : > { %3216 = vmatpush3.bf16.msra.mxu1 %v3284_v11  ;;  %3195 = vmatprep.subr.bf16.mxu0 %v3285_v18  ;;  %v2713_v30 = vmul.f32 0.2, %v2709_v60  ;;  %v2715_v24 = vmul.f32 0.2, %v2711_v61  ;;  %v2712_v26 = vmul.f32 0.2, %v2708_v49 }
 0x418   : > { %3217 = vmatprep.subr.bf16.mxu1 %v3286_v13  ;;  %v2714_v57 = vmul.f32 0.2, %v2710_v1 }
 0x419   : > { %v2717_v23 = vmax.f32 %v2709_v60, %v2713_v30  ;;  %v2719_v44 = vmax.f32 %v2711_v61, %v2715_v24  ;;  %v2716_v2 = vmax.f32 %v2708_v49, %v2712_v26 }
 0x41a   : > { %3196 = vmatpush3.bf16.msra.mxu0 %v3287_v48  ;;  %v2718_v20 = vmax.f32 %v2710_v1, %v2714_v57 }
 0x41b   : > { %3218 = vmatpush3.bf16.msra.mxu1 %v3288_v15  ;;  %3197 = vmatprep.subr.bf16.mxu0 %v3289_v17  ;;  %v2721_v0 = vpack.c.bf16 %v2717_v23, %v2717_v23  ;;  %v2723_v25 = vpack.c.bf16 %v2719_v44, %v2719_v44  ;;  %v2720_v47 = vpack.c.bf16 %v2716_v2, %v2716_v2 }
 0x41c   : > { %3219 = vmatprep.subr.bf16.mxu1 %v3290_v29  ;;  %v2722_v10 = vpack.c.bf16 %v2718_v20, %v2718_v20 }
 0x41d   : > { %3019 = vmatprep.mubr.bf16.mxu0 %v2721_v0  ;;  %3059 = vmatprep.mubr.bf16.mxu1 %v2723_v25 }
 0x41e   : > { %3198 = vmatpush3.bf16.msra.mxu0 %v3291_v53 }
 0x41f   : > { %3220 = vmatpush3.bf16.msra.mxu1 %v3292_v35  ;;  %3199 = vmatprep.subr.bf16.mxu0 %v3293_v43 }
 0x420   : > { %3221 = vmatprep.subr.bf16.mxu1 %v3294_v27 }
 0x422   : > { %3200 = vmatpush3.bf16.msra.mxu0 %v3295_v41 }
 0x423   : > { %3222 = vmatpush3.bf16.msra.mxu1 %v3296_v3 }
 0x425   : > { %3020 = vmatmul.mubr.bf16.vlgmr.msra.gmra.mxu0 %v2720_v47 }
 0x426   : > { %3060 = vmatmul.mubr.bf16.vlgmr.msra.gmra.mxu1 %v2722_v10 }
 0x4e5   : > { %v3201_v58 = vpop.f32.mrf.mxu0 }
 0x4e6   : > { %v3223_v4 = vpop.f32.mrf.mxu1 }
 0x4e7   : > { %v3202_v5 = vpop.f32.mrf.mxu0 }
 0x4e8   : > { %v3224_v6 = vpop.f32.mrf.mxu1  ;;  %v3203_v21 = vadd.f32 %v3202_v5, %v3201_v58 }
 0x4e9   : > { %v3204_v34 = vpop.f32.mrf.mxu0  ;;  %v3225_v9 = vadd.f32 %v3224_v6, %v3223_v4 }
 0x4ea   : > { %v3226_v7 = vpop.f32.mrf.mxu1  ;;  %v3022_v8 = vadd.f32 %v3203_v21, %v3148_v22 }
 0x4eb   : > { %v3205_v14 = vpop.f32.mrf.mxu0 }
 0x4ec   : > { %v3227_v11 = vpop.f32.mrf.mxu1  ;;  %v3062_v32 = vadd.f32 %v3225_v9, %v3022_v8 }
 0x4ee   : > { %v3181_v18 = vmul.f32 -1.442695, %v3062_v32 }
 0x4f0   : > { %3297 = vpow2.f32 %v3181_v18 }
 0x4fd   : > { %v3298_v13 = vpop.eup %3297 }
 0x4fe   : > { %v3070_v48 = vadd.f32 1.0, %v3298_v13 }
 0x500   : > { %3299 = vrcp.f32 %v3070_v48 }
 0x50d   : > { %v3300_v15 = vpop.eup %3299 }
 0x50e   : > { %3073 = vst [vmem:[%s4143_s6] sm:$0xff] %v3300_v15 }
 0x50f PF: > { %s16_s21 = sadd.s32 1, %s3307_s21  }
 0x510   : > { %p13_p7 = scmp.ge.s32.totalorder %s16_s21, 7  }
 0x512   :  { %15 = sbr.rel (!%p13_p7) target bundleno = 1 (0x1), region = 81 }

</bundles_post_ra>
